<compile_context>
chip_gen: v7x
topology: tpu7x:2x2x1
jax: 0.10.0
libtpu: 0.0.40
codegen_flags: <defaults>
</compile_context>

<pallas_src>
import functools
import math

import jax
import jax.numpy as jnp
import numpy as np
from jax import lax
from jax.experimental import pallas as pl
from jax.experimental.pallas import tpu as pltpu


def _round_up(x, m):
    return (x + m - 1) // m * m


def _time_embed_kernel(t_ref, w_ref, bins_ref, freq_ref, phase_ref, amp_ref,
                       o_ref, *, num_bins, max_period, group, use_pe):
    """One grid step: TR*group timestamps -> packed (TR, group*D) embeddings."""
    t = t_ref[...]                                   # (TR, G) f32, G timestamps per row
    t_mod = jnp.mod(t, max_period)                   # torch `%` (floored) semantics
    t_norm = t_mod / max_period                      # in [0, 1)
    # Bin index as an exact small integer held in f32 (trunc == floor for >= 0).
    idx = jnp.clip(jnp.floor(t_norm * num_bins), 0.0, float(num_bins - 1))   # (TR, G)

    w = w_ref[...]                                   # (Kp, D) f32 table (resident)
    bins = bins_ref[...]                             # (1, Kp) f32 = 0..Kp-1 (hoisted const)

    # Embedding gather: per packed slot, one-hot @ table on the MXU (exact in f32).
    emb_parts = []
    for g in range(group):                           # group is small & static (e.g. 4)
        onehot = (idx[:, g:g + 1] == bins).astype(jnp.float32)          # (TR, Kp)
        emb_parts.append(
            jnp.dot(onehot, w, preferred_element_type=jnp.float32,
                    precision=lax.Precision.HIGHEST))                    # (TR, D)
    emb = emb_parts[0] if group == 1 else jnp.concatenate(emb_parts, axis=1)  # (TR, G*D)

    if use_pe:
        freq = freq_ref[...]                         # (1, D) = 2*pi*freq_i (hoisted const)
        ang_parts = [t_norm[:, g:g + 1] * freq for g in range(group)]
        angle = (ang_parts[0] if group == 1
                 else jnp.concatenate(ang_parts, axis=1))                # (TR, G*D)
        # cos(x) == sin(x + pi/2): one EUP transcendental per output element.
        # amp folds position_scale and zeroes the odd-D tail column.
        emb = emb + jnp.sin(angle + phase_ref[...]) * amp_ref[...]       # (TR, G*D)

    o_ref[...] = emb                                 # full-width (packed) store


def make_learnable_time_embedding(weight, *, num_bins=1000, max_period=10000.0,
                                  position_scale=0.1, use_position_encoding=True,
                                  batch_tile=1024):
    """'Module init': pre-pads the table, precomputes PE constants, returns forward(t).

    batch_tile: max batch rows per grid step.  At 1024 the largest in-kernel
    intermediate (the (TB/G, Kp) one-hot) is ~1 MiB, comfortably inside the
    default VMEM budget even with double-buffered in/out tiles.
    """
    weight = jnp.asarray(weight, jnp.float32)
    assert weight.shape[0] == num_bins
    D = weight.shape[1]

    # Pad table rows to a lane multiple; extra zero rows are never selected.
    Kp = _round_up(num_bins, 128)
    w_pad = jnp.pad(weight, ((0, Kp - num_bins), (0, 0)))             # once, not per call
    bins_row = jnp.asarray(np.arange(Kp, dtype=np.float32)[None, :])  # (1, Kp)

    # PE constants (once).  freq shared by columns 2i and 2i+1.
    half = max(D // 2, 1)
    d = np.arange(D)
    freq_np = np.exp(-(d // 2) * (math.log(10000.0) / half))
    freq_row = jnp.asarray((2.0 * math.pi * freq_np)[None, :], jnp.float32)   # (1, D)
    phase_np = np.where(d % 2 == 1, math.pi / 2.0, 0.0)               # cos via sin(x+pi/2)
    amp_np = np.where(d < 2 * (D // 2), float(position_scale), 0.0)   # zero odd-D tail col

    # Lane-dense packing factor: G consecutive batch rows per 128-lane output row.
    G_packed = 128 // D if (0 < D < 128 and 128 % D == 0) else 1

    def build(G):
        phase_row = jnp.asarray(np.tile(phase_np, G)[None, :], jnp.float32)   # (1, G*D)
        amp_row = jnp.asarray(np.tile(amp_np, G)[None, :], jnp.float32)       # (1, G*D)
        kernel = functools.partial(
            _time_embed_kernel, num_bins=num_bins, max_period=float(max_period),
            group=G, use_pe=use_position_encoding)
        unit = 8 * G                                  # minimal batch granularity
        tile_cap = max(_round_up(int(batch_tile), unit), unit)

        @jax.jit
        def run(t):
            B = t.shape[0]
            Bp = _round_up(max(B, 1), unit)
            # Minimum number of <= tile_cap steps; spread rows evenly so padding
            # stays small.  >=2 steps when there is enough work lets v7x shard
            # the "parallel" batch axis over both TensorCores (no-op v5e/v6e).
            n_steps = pl.cdiv(Bp, tile_cap)
            if n_steps == 1 and Bp >= 2 * unit:
                n_steps = 2
            TB = _round_up(pl.cdiv(Bp, n_steps), unit)
            Bp = n_steps * TB
            TR = TB // G
            t_packed = jnp.pad(t, (0, Bp - B)).reshape(Bp // G, G)

            out_packed = pl.pallas_call(
                kernel,
                out_shape=jax.ShapeDtypeStruct((Bp // G, G * D), jnp.float32),
                grid=(n_steps,),
                in_specs=[
                    pl.BlockSpec((TR, G), lambda b: (b, 0)),            # packed timestamps
                    pl.BlockSpec((Kp, D), lambda b: (0, 0)),            # table (resident)
                    pl.BlockSpec((1, Kp), lambda b: (0, 0)),            # bin ids
                    pl.BlockSpec((1, D), lambda b: (0, 0)),             # 2*pi*freq
                    pl.BlockSpec((1, G * D), lambda b: (0, 0)),         # phase (packed)
                    pl.BlockSpec((1, G * D), lambda b: (0, 0)),         # amplitude (packed)
                ],
                out_specs=pl.BlockSpec((TR, G * D), lambda b: (b, 0)),
                compiler_params=pltpu.CompilerParams(
                    dimension_semantics=("parallel",)),
            )(t_packed, w_pad, bins_row, freq_row, phase_row, amp_row)
            return out_packed.reshape(Bp, D)[:B]

        return run

    # Preference order: lane-dense packed layout, then unpacked baseline.
    configs = [G_packed] + ([1] if G_packed != 1 else [])
    runners = [build(g) for g in configs]
    chosen = []   # cache of the first config that compiled & ran

    def forward(t):
        t = jnp.asarray(t, jnp.float32).reshape(-1)   # accepts (B,) or (B, 1)
        if chosen:
            return runners[chosen[0]](t)
        last_err = None
        for i, run in enumerate(runners):
            try:
                out = jax.block_until_ready(run(t))
                chosen.append(i)
                return out
            except Exception as e:    # e.g. packed layout rejected by this build
                last_err = e
        raise last_err

    return forward


def _reference(t, weight, num_bins, max_period, position_scale, dimension):
    """Pure-JAX reference mirroring the PyTorch forward."""
    t = jnp.asarray(t, jnp.float32)[:, None]
    t_mod = jnp.mod(t, max_period)
    idx = jnp.clip((t_mod / max_period * num_bins).astype(jnp.int32),
                   0, num_bins - 1)[:, 0]
    emb = weight[idx]
    B = t.shape[0]
    tn = (t_mod / max_period)[:, 0]
    pe = jnp.zeros((B, dimension), jnp.float32)
    half = dimension // 2
    for i in range(half):
        freq = math.exp(-(i * math.log(10000.0) / half))
        pe = pe.at[:, 2 * i].set(jnp.sin(tn * freq * 2 * math.pi))
        if 2 * i + 1 < dimension:
            pe = pe.at[:, 2 * i + 1].set(jnp.cos(tn * freq * 2 * math.pi))
    return emb + position_scale * pe


if __name__ == "__main__":
    dimension = 32
    num_bins = 1000
    max_period = 10000.0
    position_scale = 0.1
    batch = 8

    key = jax.random.PRNGKey(0)
    k_w, k_t = jax.random.split(key)
    # nn.init.normal_(weight, mean=0.0, std=0.02)
    weight = 0.02 * jax.random.normal(k_w, (num_bins, dimension), jnp.float32)
    # timestamps spanning more than one period to exercise the modulo path
    t = jax.random.uniform(k_t, (batch,), jnp.float32, 0.0, 25000.0)

    forward = make_learnable_time_embedding(
        weight, num_bins=num_bins, max_period=max_period,
        position_scale=position_scale)
    out = jax.block_until_ready(forward(t))

    ref = _reference(t, weight, num_bins, max_period, position_scale, dimension)
    assert out.shape == (batch, dimension)
    assert out.dtype == jnp.float32
    max_err = float(jnp.max(jnp.abs(out - ref)))
    assert jnp.allclose(out, ref, atol=1e-5, rtol=1e-5), f"max abs err {max_err}"

    # TODO(synk): the module's Python-side `self.cache` dict / cache_size_limit is
    # host state (unused in forward) and has no kernel equivalent.
    print("KERNEL_OK")
</pallas_src>

<mosaic_0001>
module attributes {stable_mosaic.version = 11 : i64} {
  func.func @_time_embed_kernel(%arg0: i32, %arg1: memref<8x4xf32, #tpu.memory_space<vmem>>, %arg2: memref<1024x32xf32, #tpu.memory_space<vmem>>, %arg3: memref<1x1024xf32, #tpu.memory_space<vmem>>, %arg4: memref<1x32xf32, #tpu.memory_space<vmem>>, %arg5: memref<1x128xf32, #tpu.memory_space<vmem>>, %arg6: memref<1x128xf32, #tpu.memory_space<vmem>>, %arg7: memref<8x128xf32, #tpu.memory_space<vmem>>) attributes {dimension_semantics = [#tpu.dimension_semantics<parallel>], iteration_bounds = array<i64: 1>, scalar_prefetch = 0 : i64, scratch_operands = 0 : i64, tpu.core_type = #tpu.core_type<tc>, window_params = [{transform_indices = @transform_0, window_bounds = array<i64: 8, 4>}, {pipeline_mode = #tpu.pipeline_mode<synchronous>, transform_indices = @transform_1, window_bounds = array<i64: 1024, 32>}, {pipeline_mode = #tpu.pipeline_mode<synchronous>, transform_indices = @transform_2, window_bounds = array<i64: 1, 1024>}, {pipeline_mode = #tpu.pipeline_mode<synchronous>, transform_indices = @transform_3, window_bounds = array<i64: 1, 32>}, {pipeline_mode = #tpu.pipeline_mode<synchronous>, transform_indices = @transform_4, window_bounds = array<i64: 1, 128>}, {pipeline_mode = #tpu.pipeline_mode<synchronous>, transform_indices = @transform_5, window_bounds = array<i64: 1, 128>}, {transform_indices = @transform_6, window_bounds = array<i64: 8, 128>}]} {
    %c0 = arith.constant 0 : index
    %c0_0 = arith.constant 0 : index
    %0 = vector.load %arg1[%c0, %c0_0] : memref<8x4xf32, #tpu.memory_space<vmem>>, vector<8x4xf32>
    %cst = arith.constant 1.000000e+04 : f32
    %1 = vector.broadcast %cst : f32 to vector<8x4xf32>
    %2 = arith.remf %0, %1 : vector<8x4xf32>
    %cst_1 = arith.constant 0.000000e+00 : f32
    %3 = vector.broadcast %cst_1 : f32 to vector<8x4xf32>
    %4 = arith.cmpf one, %2, %3 : vector<8x4xf32>
    %cst_2 = arith.constant 0.000000e+00 : f32
    %5 = vector.broadcast %cst_2 : f32 to vector<8x4xf32>
    %6 = arith.cmpf olt, %2, %5 : vector<8x4xf32>
    %cst_3 = arith.constant 0.000000e+00 : f32
    %7 = arith.cmpf olt, %cst, %cst_3 : f32
    %8 = vector.broadcast %7 : i1 to vector<8x4xi1>
    %9 = vector.broadcast %8 : vector<8x4xi1> to vector<8x4xi1>
    %10 = arith.xori %6, %9 : vector<8x4xi1>
    %11 = arith.andi %10, %4 : vector<8x4xi1>
    %12 = vector.broadcast %cst : f32 to vector<8x4xf32>
    %13 = arith.addf %2, %12 : vector<8x4xf32>
    %14 = arith.select %11, %13, %2 : vector<8x4xi1>, vector<8x4xf32>
    %cst_4 = arith.constant 1.000000e+04 : f32
    %15 = vector.broadcast %cst_4 : f32 to vector<8x4xf32>
    %16 = arith.divf %14, %15 : vector<8x4xf32>
    %cst_5 = arith.constant 1.000000e+03 : f32
    %17 = vector.broadcast %cst_5 : f32 to vector<8x4xf32>
    %18 = arith.mulf %16, %17 : vector<8x4xf32>
    %19 = math.floor %18 : vector<8x4xf32>
    %cst_6 = arith.constant 0.000000e+00 : f32
    %cst_7 = arith.constant 9.990000e+02 : f32
    %20 = vector.broadcast %cst_6 : f32 to vector<8x4xf32>
    %21 = arith.maximumf %20, %19 : vector<8x4xf32>
    %22 = vector.broadcast %cst_7 : f32 to vector<8x4xf32>
    %23 = arith.minimumf %22, %21 : vector<8x4xf32>
    %c0_8 = arith.constant 0 : index
    %c0_9 = arith.constant 0 : index
    %24 = vector.load %arg2[%c0_8, %c0_9] : memref<1024x32xf32, #tpu.memory_space<vmem>>, vector<1024x32xf32>
    %c0_10 = arith.constant 0 : index
    %c0_11 = arith.constant 0 : index
    %25 = vector.load %arg3[%c0_10, %c0_11] : memref<1x1024xf32, #tpu.memory_space<vmem>>, vector<1x1024xf32>
    %26 = vector.extract_strided_slice %23 {offsets = [0, 0], sizes = [8, 1], strides = [1, 1]} : vector<8x4xf32> to vector<8x1xf32>
    %27 = vector.broadcast %26 : vector<8x1xf32> to vector<8x1024xf32>
    %28 = vector.broadcast %25 : vector<1x1024xf32> to vector<8x1024xf32>
    %29 = arith.cmpf oeq, %27, %28 : vector<8x1024xf32>
    %30 = arith.extui %29 : vector<8x1024xi1> to vector<8x1024xi32>
    %31 = arith.sitofp %30 : vector<8x1024xi32> to vector<8x1024xf32>
    %cst_12 = arith.constant dense<0.000000e+00> : vector<8x32xf32>
    %32 = tpu.matmul %31, %24, %cst_12 {dimension_numbers = #tpu.dot_dimension_numbers<[1], [0], [0], [1], [0, 0, 1, 1], [], []>, precision = #tpu.contract_precision<fp32>} : vector<8x1024xf32>, vector<1024x32xf32>, vector<8x32xf32> -> vector<8x32xf32>
    %33 = vector.extract_strided_slice %23 {offsets = [0, 1], sizes = [8, 1], strides = [1, 1]} : vector<8x4xf32> to vector<8x1xf32>
    %34 = vector.broadcast %33 : vector<8x1xf32> to vector<8x1024xf32>
    %35 = vector.broadcast %25 : vector<1x1024xf32> to vector<8x1024xf32>
    %36 = arith.cmpf oeq, %34, %35 : vector<8x1024xf32>
    %37 = arith.extui %36 : vector<8x1024xi1> to vector<8x1024xi32>
    %38 = arith.sitofp %37 : vector<8x1024xi32> to vector<8x1024xf32>
    %cst_13 = arith.constant dense<0.000000e+00> : vector<8x32xf32>
    %39 = tpu.matmul %38, %24, %cst_13 {dimension_numbers = #tpu.dot_dimension_numbers<[1], [0], [0], [1], [0, 0, 1, 1], [], []>, precision = #tpu.contract_precision<fp32>} : vector<8x1024xf32>, vector<1024x32xf32>, vector<8x32xf32> -> vector<8x32xf32>
    %40 = vector.extract_strided_slice %23 {offsets = [0, 2], sizes = [8, 1], strides = [1, 1]} : vector<8x4xf32> to vector<8x1xf32>
    %41 = vector.broadcast %40 : vector<8x1xf32> to vector<8x1024xf32>
    %42 = vector.broadcast %25 : vector<1x1024xf32> to vector<8x1024xf32>
    %43 = arith.cmpf oeq, %41, %42 : vector<8x1024xf32>
    %44 = arith.extui %43 : vector<8x1024xi1> to vector<8x1024xi32>
    %45 = arith.sitofp %44 : vector<8x1024xi32> to vector<8x1024xf32>
    %cst_14 = arith.constant dense<0.000000e+00> : vector<8x32xf32>
    %46 = tpu.matmul %45, %24, %cst_14 {dimension_numbers = #tpu.dot_dimension_numbers<[1], [0], [0], [1], [0, 0, 1, 1], [], []>, precision = #tpu.contract_precision<fp32>} : vector<8x1024xf32>, vector<1024x32xf32>, vector<8x32xf32> -> vector<8x32xf32>
    %47 = vector.extract_strided_slice %23 {offsets = [0, 3], sizes = [8, 1], strides = [1, 1]} : vector<8x4xf32> to vector<8x1xf32>
    %48 = vector.broadcast %47 : vector<8x1xf32> to vector<8x1024xf32>
    %49 = vector.broadcast %25 : vector<1x1024xf32> to vector<8x1024xf32>
    %50 = arith.cmpf oeq, %48, %49 : vector<8x1024xf32>
    %51 = arith.extui %50 : vector<8x1024xi1> to vector<8x1024xi32>
    %52 = arith.sitofp %51 : vector<8x1024xi32> to vector<8x1024xf32>
    %cst_15 = arith.constant dense<0.000000e+00> : vector<8x32xf32>
    %53 = tpu.matmul %52, %24, %cst_15 {dimension_numbers = #tpu.dot_dimension_numbers<[1], [0], [0], [1], [0, 0, 1, 1], [], []>, precision = #tpu.contract_precision<fp32>} : vector<8x1024xf32>, vector<1024x32xf32>, vector<8x32xf32> -> vector<8x32xf32>
    %54 = tpu.concatenate %32, %39, %46, %53 in 1 : vector<8x32xf32>, vector<8x32xf32>, vector<8x32xf32>, vector<8x32xf32> -> vector<8x128xf32>
    %c0_16 = arith.constant 0 : index
    %c0_17 = arith.constant 0 : index
    %55 = vector.load %arg4[%c0_16, %c0_17] : memref<1x32xf32, #tpu.memory_space<vmem>>, vector<1x32xf32>
    %56 = vector.extract_strided_slice %16 {offsets = [0, 0], sizes = [8, 1], strides = [1, 1]} : vector<8x4xf32> to vector<8x1xf32>
    %57 = vector.broadcast %56 : vector<8x1xf32> to vector<8x32xf32>
    %58 = vector.broadcast %55 : vector<1x32xf32> to vector<8x32xf32>
    %59 = arith.mulf %57, %58 : vector<8x32xf32>
    %60 = vector.extract_strided_slice %16 {offsets = [0, 1], sizes = [8, 1], strides = [1, 1]} : vector<8x4xf32> to vector<8x1xf32>
    %61 = vector.broadcast %60 : vector<8x1xf32> to vector<8x32xf32>
    %62 = vector.broadcast %55 : vector<1x32xf32> to vector<8x32xf32>
    %63 = arith.mulf %61, %62 : vector<8x32xf32>
    %64 = vector.extract_strided_slice %16 {offsets = [0, 2], sizes = [8, 1], strides = [1, 1]} : vector<8x4xf32> to vector<8x1xf32>
    %65 = vector.broadcast %64 : vector<8x1xf32> to vector<8x32xf32>
    %66 = vector.broadcast %55 : vector<1x32xf32> to vector<8x32xf32>
    %67 = arith.mulf %65, %66 : vector<8x32xf32>
    %68 = vector.extract_strided_slice %16 {offsets = [0, 3], sizes = [8, 1], strides = [1, 1]} : vector<8x4xf32> to vector<8x1xf32>
    %69 = vector.broadcast %68 : vector<8x1xf32> to vector<8x32xf32>
    %70 = vector.broadcast %55 : vector<1x32xf32> to vector<8x32xf32>
    %71 = arith.mulf %69, %70 : vector<8x32xf32>
    %72 = tpu.concatenate %59, %63, %67, %71 in 1 : vector<8x32xf32>, vector<8x32xf32>, vector<8x32xf32>, vector<8x32xf32> -> vector<8x128xf32>
    %c0_18 = arith.constant 0 : index
    %c0_19 = arith.constant 0 : index
    %73 = vector.load %arg5[%c0_18, %c0_19] : memref<1x128xf32, #tpu.memory_space<vmem>>, vector<1x128xf32>
    %74 = vector.broadcast %73 : vector<1x128xf32> to vector<8x128xf32>
    %75 = arith.addf %72, %74 : vector<8x128xf32>
    %76 = math.sin %75 : vector<8x128xf32>
    %c0_20 = arith.constant 0 : index
    %c0_21 = arith.constant 0 : index
    %77 = vector.load %arg6[%c0_20, %c0_21] : memref<1x128xf32, #tpu.memory_space<vmem>>, vector<1x128xf32>
    %78 = vector.broadcast %77 : vector<1x128xf32> to vector<8x128xf32>
    %79 = arith.mulf %76, %78 : vector<8x128xf32>
    %80 = arith.addf %54, %79 : vector<8x128xf32>
    %c0_22 = arith.constant 0 : index
    %c0_23 = arith.constant 0 : index
    %81 = vector.load %arg7[%c0_22, %c0_23] : memref<8x128xf32, #tpu.memory_space<vmem>>, vector<8x128xf32>
    tpu.vector_store %arg7[%c0_22, %c0_23], %80 {strides = array<i32>} : memref<8x128xf32, #tpu.memory_space<vmem>>, vector<8x128xf32>,
    return
  }
  func.func @transform_0(%arg0: i32) -> (i32, i32) {
    %c0_i32 = arith.constant 0 : i32
    %c0_i32_0 = arith.constant 0 : i32
    return %arg0, %c0_i32 : i32, i32
  }
  func.func @transform_1(%arg0: i32) -> (i32, i32) {
    %c0_i32 = arith.constant 0 : i32
    %c0_i32_0 = arith.constant 0 : i32
    %c0_i32_1 = arith.constant 0 : i32
    return %c0_i32, %c0_i32_0 : i32, i32
  }
  func.func @transform_2(%arg0: i32) -> (i32, i32) {
    %c0_i32 = arith.constant 0 : i32
    %c0_i32_0 = arith.constant 0 : i32
    %c0_i32_1 = arith.constant 0 : i32
    return %c0_i32, %c0_i32_0 : i32, i32
  }
  func.func @transform_3(%arg0: i32) -> (i32, i32) {
    %c0_i32 = arith.constant 0 : i32
    %c0_i32_0 = arith.constant 0 : i32
    %c0_i32_1 = arith.constant 0 : i32
    return %c0_i32, %c0_i32_0 : i32, i32
  }
  func.func @transform_4(%arg0: i32) -> (i32, i32) {
    %c0_i32 = arith.constant 0 : i32
    %c0_i32_0 = arith.constant 0 : i32
    %c0_i32_1 = arith.constant 0 : i32
    return %c0_i32, %c0_i32_0 : i32, i32
  }
  func.func @transform_5(%arg0: i32) -> (i32, i32) {
    %c0_i32 = arith.constant 0 : i32
    %c0_i32_0 = arith.constant 0 : i32
    %c0_i32_1 = arith.constant 0 : i32
    return %c0_i32, %c0_i32_0 : i32, i32
  }
  func.func @transform_6(%arg0: i32) -> (i32, i32) {
    %c0_i32 = arith.constant 0 : i32
    %c0_i32_0 = arith.constant 0 : i32
    return %arg0, %c0_i32 : i32, i32
  }
}

module attributes {stable_mosaic.version = 11 : i64} {
  func.func @_time_embed_kernel(%arg0: i32, %arg1: memref<8x1xf32, #tpu.memory_space<vmem>>, %arg2: memref<1024x32xf32, #tpu.memory_space<vmem>>, %arg3: memref<1x1024xf32, #tpu.memory_space<vmem>>, %arg4: memref<1x32xf32, #tpu.memory_space<vmem>>, %arg5: memref<1x32xf32, #tpu.memory_space<vmem>>, %arg6: memref<1x32xf32, #tpu.memory_space<vmem>>, %arg7: memref<8x32xf32, #tpu.memory_space<vmem>>) attributes {dimension_semantics = [#tpu.dimension_semantics<parallel>], iteration_bounds = array<i64: 1>, scalar_prefetch = 0 : i64, scratch_operands = 0 : i64, tpu.core_type = #tpu.core_type<tc>, window_params = [{transform_indices = @transform_0, window_bounds = array<i64: 8, 1>}, {pipeline_mode = #tpu.pipeline_mode<synchronous>, transform_indices = @transform_1, window_bounds = array<i64: 1024, 32>}, {pipeline_mode = #tpu.pipeline_mode<synchronous>, transform_indices = @transform_2, window_bounds = array<i64: 1, 1024>}, {pipeline_mode = #tpu.pipeline_mode<synchronous>, transform_indices = @transform_3, window_bounds = array<i64: 1, 32>}, {pipeline_mode = #tpu.pipeline_mode<synchronous>, transform_indices = @transform_4, window_bounds = array<i64: 1, 32>}, {pipeline_mode = #tpu.pipeline_mode<synchronous>, transform_indices = @transform_5, window_bounds = array<i64: 1, 32>}, {transform_indices = @transform_6, window_bounds = array<i64: 8, 32>}]} {
    %c0 = arith.constant 0 : index
    %c0_0 = arith.constant 0 : index
    %0 = vector.load %arg1[%c0, %c0_0] : memref<8x1xf32, #tpu.memory_space<vmem>>, vector<8x1xf32>
    %cst = arith.constant 1.000000e+04 : f32
    %1 = vector.broadcast %cst : f32 to vector<8x1xf32>
    %2 = arith.remf %0, %1 : vector<8x1xf32>
    %cst_1 = arith.constant 0.000000e+00 : f32
    %3 = vector.broadcast %cst_1 : f32 to vector<8x1xf32>
    %4 = arith.cmpf one, %2, %3 : vector<8x1xf32>
    %cst_2 = arith.constant 0.000000e+00 : f32
    %5 = vector.broadcast %cst_2 : f32 to vector<8x1xf32>
    %6 = arith.cmpf olt, %2, %5 : vector<8x1xf32>
    %cst_3 = arith.constant 0.000000e+00 : f32
    %7 = arith.cmpf olt, %cst, %cst_3 : f32
    %8 = vector.broadcast %7 : i1 to vector<8x1xi1>
    %9 = vector.broadcast %8 : vector<8x1xi1> to vector<8x1xi1>
    %10 = arith.xori %6, %9 : vector<8x1xi1>
    %11 = arith.andi %10, %4 : vector<8x1xi1>
    %12 = vector.broadcast %cst : f32 to vector<8x1xf32>
    %13 = arith.addf %2, %12 : vector<8x1xf32>
    %14 = arith.select %11, %13, %2 : vector<8x1xi1>, vector<8x1xf32>
    %cst_4 = arith.constant 1.000000e+04 : f32
    %15 = vector.broadcast %cst_4 : f32 to vector<8x1xf32>
    %16 = arith.divf %14, %15 : vector<8x1xf32>
    %cst_5 = arith.constant 1.000000e+03 : f32
    %17 = vector.broadcast %cst_5 : f32 to vector<8x1xf32>
    %18 = arith.mulf %16, %17 : vector<8x1xf32>
    %19 = math.floor %18 : vector<8x1xf32>
    %cst_6 = arith.constant 0.000000e+00 : f32
    %cst_7 = arith.constant 9.990000e+02 : f32
    %20 = vector.broadcast %cst_6 : f32 to vector<8x1xf32>
    %21 = arith.maximumf %20, %19 : vector<8x1xf32>
    %22 = vector.broadcast %cst_7 : f32 to vector<8x1xf32>
    %23 = arith.minimumf %22, %21 : vector<8x1xf32>
    %c0_8 = arith.constant 0 : index
    %c0_9 = arith.constant 0 : index
    %24 = vector.load %arg2[%c0_8, %c0_9] : memref<1024x32xf32, #tpu.memory_space<vmem>>, vector<1024x32xf32>
    %c0_10 = arith.constant 0 : index
    %c0_11 = arith.constant 0 : index
    %25 = vector.load %arg3[%c0_10, %c0_11] : memref<1x1024xf32, #tpu.memory_space<vmem>>, vector<1x1024xf32>
    %26 = vector.broadcast %23 : vector<8x1xf32> to vector<8x1024xf32>
    %27 = vector.broadcast %25 : vector<1x1024xf32> to vector<8x1024xf32>
    %28 = arith.cmpf oeq, %26, %27 : vector<8x1024xf32>
    %29 = arith.extui %28 : vector<8x1024xi1> to vector<8x1024xi32>
    %30 = arith.sitofp %29 : vector<8x1024xi32> to vector<8x1024xf32>
    %cst_12 = arith.constant dense<0.000000e+00> : vector<8x32xf32>
    %31 = tpu.matmul %30, %24, %cst_12 {dimension_numbers = #tpu.dot_dimension_numbers<[1], [0], [0], [1], [0, 0, 1, 1], [], []>, precision = #tpu.contract_precision<fp32>} : vector<8x1024xf32>, vector<1024x32xf32>, vector<8x32xf32> -> vector<8x32xf32>
    %c0_13 = arith.constant 0 : index
    %c0_14 = arith.constant 0 : index
    %32 = vector.load %arg4[%c0_13, %c0_14] : memref<1x32xf32, #tpu.memory_space<vmem>>, vector<1x32xf32>
    %33 = vector.broadcast %16 : vector<8x1xf32> to vector<8x32xf32>
    %34 = vector.broadcast %32 : vector<1x32xf32> to vector<8x32xf32>
    %35 = arith.mulf %33, %34 : vector<8x32xf32>
    %c0_15 = arith.constant 0 : index
    %c0_16 = arith.constant 0 : index
    %36 = vector.load %arg5[%c0_15, %c0_16] : memref<1x32xf32, #tpu.memory_space<vmem>>, vector<1x32xf32>
    %37 = vector.broadcast %36 : vector<1x32xf32> to vector<8x32xf32>
    %38 = arith.addf %35, %37 : vector<8x32xf32>
    %39 = math.sin %38 : vector<8x32xf32>
    %c0_17 = arith.constant 0 : index
    %c0_18 = arith.constant 0 : index
    %40 = vector.load %arg6[%c0_17, %c0_18] : memref<1x32xf32, #tpu.memory_space<vmem>>, vector<1x32xf32>
    %41 = vector.broadcast %40 : vector<1x32xf32> to vector<8x32xf32>
    %42 = arith.mulf %39, %41 : vector<8x32xf32>
    %43 = arith.addf %31, %42 : vector<8x32xf32>
    %c0_19 = arith.constant 0 : index
    %c0_20 = arith.constant 0 : index
    %44 = vector.load %arg7[%c0_19, %c0_20] : memref<8x32xf32, #tpu.memory_space<vmem>>, vector<8x32xf32>
    tpu.vector_store %arg7[%c0_19, %c0_20], %43 {strides = array<i32>} : memref<8x32xf32, #tpu.memory_space<vmem>>, vector<8x32xf32>,
    return
  }
  func.func @transform_0(%arg0: i32) -> (i32, i32) {
    %c0_i32 = arith.constant 0 : i32
    %c0_i32_0 = arith.constant 0 : i32
    return %arg0, %c0_i32 : i32, i32
  }
  func.func @transform_1(%arg0: i32) -> (i32, i32) {
    %c0_i32 = arith.constant 0 : i32
    %c0_i32_0 = arith.constant 0 : i32
    %c0_i32_1 = arith.constant 0 : i32
    return %c0_i32, %c0_i32_0 : i32, i32
  }
  func.func @transform_2(%arg0: i32) -> (i32, i32) {
    %c0_i32 = arith.constant 0 : i32
    %c0_i32_0 = arith.constant 0 : i32
    %c0_i32_1 = arith.constant 0 : i32
    return %c0_i32, %c0_i32_0 : i32, i32
  }
  func.func @transform_3(%arg0: i32) -> (i32, i32) {
    %c0_i32 = arith.constant 0 : i32
    %c0_i32_0 = arith.constant 0 : i32
    %c0_i32_1 = arith.constant 0 : i32
    return %c0_i32, %c0_i32_0 : i32, i32
  }
  func.func @transform_4(%arg0: i32) -> (i32, i32) {
    %c0_i32 = arith.constant 0 : i32
    %c0_i32_0 = arith.constant 0 : i32
    %c0_i32_1 = arith.constant 0 : i32
    return %c0_i32, %c0_i32_0 : i32, i32
  }
  func.func @transform_5(%arg0: i32) -> (i32, i32) {
    %c0_i32 = arith.constant 0 : i32
    %c0_i32_0 = arith.constant 0 : i32
    %c0_i32_1 = arith.constant 0 : i32
    return %c0_i32, %c0_i32_0 : i32, i32
  }
  func.func @transform_6(%arg0: i32) -> (i32, i32) {
    %c0_i32 = arith.constant 0 : i32
    %c0_i32_0 = arith.constant 0 : i32
    return %arg0, %c0_i32 : i32, i32
  }
}

</mosaic_0001>

<bundles_post_ra>
// kernel: run.1
= control target key start
LH: loop header
LB: loop body
LE: loop exit
PB: predicated region body
PF: predicated region fallthrough
CT: control target
= control target key end

     0   :  { %11 = vsyncpa [#allocation3], 0  ;;  %s20950_s21 = smov [#allocation2]   ;;  %s25885_s0 = inlined_call_operand.vmem [shape: f32[8,4], index: 0, kind: input, shape index: {}]   ;;  %s25886_s1 = inlined_call_operand.hbm [shape: f32[1024,32], index: 1, kind: input, shape index: {}]   ;;  %s25887_s2 = inlined_call_operand.vmem [shape: f32[1,1024], index: 2, kind: input, shape index: {}]   ;;  %s25888_s3 = inlined_call_operand.vmem [shape: f32[1,32], index: 3, kind: input, shape index: {}]   ;;  %s25889_s4 = inlined_call_operand.vmem [shape: f32[1,128], index: 4, kind: input, shape index: {}]   ;;  %s25890_s5 = inlined_call_operand.vmem [shape: f32[1,128], index: 5, kind: input, shape index: {}]   ;;  %s25891_s6 = inlined_call_operand.vmem [shape: f32[8,128], index: 6, kind: output, shape index: {}]  }
   0x1   :  { %s19_s22 = sshll.u32 %s20950_s21, 4  ;;  %s20926_s25 = scalar_lea.hbm %s25886_s1, 16384  ;;  %s20_s22 = int_to_ptr.vmem [resolvable:$true] %s19_s22 }
   0x2   :  { %p20927_p0 = scmp.ne.s32.totalorder %s25886_s1, %s20926_s25  ;;  %p20930_p1 = scmp.lt.u32.totalorder %s20926_s25, %s25886_s1 }
   0x4   :  { %p20932_p2 = pnand %p20930_p1, %p20927_p0 }
   0x6   :  { %20935 = shalt.err (!%p20932_p2)
}
   0x7   :  { %s20936_s30 = scalar_lea.vmem %s20_s22, 16384  ;;  %p20941_p4 = scmp.lt.s32.totalorder %s20_s22, %s20_s22 }
   0x8   :  { %p20937_p3 = scmp.ne.s32.totalorder %s20_s22, %s20936_s30  ;;  %p20942_p5 = scmp.lt.s32.totalorder %s20936_s30, %s20936_s30 }
   0xa   :  { %p20943_p6 = por %p20942_p5, %p20941_p4 }
   0xc   :  { %p20944_p7 = pnand %p20943_p6, %p20937_p3 }
   0xe   :  { %20947 = shalt.err (!%p20944_p7)
}
   0xf   :  { %s20951_s7 = smov 128   ;;  %s20952_s8 = smov 8  }
  0x10   :  { %25 = dma.hbm_to_vmem [thread:$0]  %s25886_s1, 16384, %s20_s22, [#allocation3], %s20951_s7, %s20951_s7, %s20952_s8  }
  0x11   :  { %20948 = dma.done.wait [#allocation3], 16384  }
  0x12   :  { %20949 = vsyncadd [#allocation3], 4294950912  ;;  %v25892_v0 = vmov 0   ;;  %v21019_v1 = vld [vmem:[%s25885_s0] sm:$0xff]  ;;  %v76_v2 = vld [vmem:[#allocation2 + $0x80] sm:$0xff]  ;;  %s20959_s14 = smov 64  }
  0x13   :  { %20912 = vset.pattern.permute.xlu0 %v25892_v0  ;;  %v77_v3 = vld [vmem:[#allocation2 + $0x88] sm:$0xff]  ;;  %v38_v4 = vand.u32 2147483647, %v21019_v1  ;;  %v308_v5 = vand.u32 4294901760, %v76_v2  ;;  %v60_v7 = vld [vmem:[#allocation2] sm:$0xff]  ;;  %v47_v8 = vand.u32 2147483648, %v21019_v1 }
  0x14   :  { %v311_v6 = vand.u32 4294901760, %v77_v3  ;;  %v61_v9 = vld [vmem:[#allocation2 + $0x8] sm:$0xff]  ;;  %v260_v10 = vand.u32 4294901760, %v60_v7  ;;  %v78_v11 = vld [vmem:[#allocation2 + $0x90] sm:$0xff]  ;;  %v79_v12 = vld [vmem:[#allocation2 + $0x98] sm:$0xff]  ;;  %s20960_s15 = smov 32  }
  0x15   :  { %v40_v13 = vmul.f32 0.0001, %v38_v4  ;;  %v21025_v15 = vsub.f32 %v76_v2, %v308_v5  ;;  %v62_v17 = vld [vmem:[#allocation2 + $0x10] sm:$0xff]  ;;  %v263_v18 = vand.u32 4294901760, %v61_v9  ;;  %v314_v20 = vand.u32 4294901760, %v78_v11  ;;  %v63_v25 = vld [vmem:[#allocation2 + $0x18] sm:$0xff] }
  0x16   :  { %v21023_v14 = vpack.c.bf16 %v311_v6, %v308_v5  ;;  %v21027_v16 = vsub.f32 %v77_v3, %v311_v6  ;;  %v21029_v19 = vsub.f32 %v60_v7, %v260_v10  ;;  %v317_v21 = vand.u32 4294901760, %v79_v12  ;;  %v80_v47 = vld [vmem:[#allocation2 + $0xa0] sm:$0xff]  ;;  %v81_v51 = vld [vmem:[#allocation2 + $0xa8] sm:$0xff]  ;;  %v86_v0 = vld [vmem:[#allocation2 + $0xd0] sm:$0xff] }
  0x17   :  { %v41_v22 = vfloor.f32 %v40_v13  ;;  %v25912_v23 = vand.u32 4294901760, %v21025_v15  ;;  %v266_v26 = vand.u32 4294901760, %v62_v17  ;;  %v21034_v27 = vpack.c.bf16 %v263_v18, %v260_v10  ;;  %v64_v56 = vld [vmem:[#allocation2 + $0x20] sm:$0xff]  ;;  %v65_v6 = vld [vmem:[#allocation2 + $0x28] sm:$0xff] }
  0x18   :  { %26679 = vst [vmem:[#allocation5_spill] sm:$0xff] %v21023_v14  ;;  %v25910_v24 = vand.u32 4294901760, %v21027_v16  ;;  %17819 = vmatprep.subr.bf16.mxu0 %v21023_v14  ;;  %v25909_v28 = vand.u32 4294901760, %v21029_v19  ;;  %v21037_v29 = vsub.f32 %v61_v9, %v263_v18  ;;  %v21039_v30 = vpack.c.bf16 %v317_v21, %v314_v20 }
  0x19   :  { %26680 = vst [vmem:[#allocation6_spill] sm:$0xff] %v21034_v27  ;;  %v42_v31 = vmul.f32 10000.0, %v41_v22  ;;  %v487_v32 = vsub.f32 %v21025_v15, %v25912_v23  ;;  %v21047_v34 = vsub.f32 %v78_v11, %v314_v20  ;;  %v21053_v37 = vsub.f32 %v79_v12, %v317_v21  ;;  %17821 = vmatpush3.bf16.msra.mxu0 %v21034_v27  ;;  %v83_v12 = vld [vmem:[#allocation2 + $0xb8] sm:$0xff] }
  0x1a   :  { %26681 = vst [vmem:[#allocation7_spill] sm:$0xff] %v21039_v30  ;;  %v494_v33 = vsub.f32 %v21027_v16, %v25910_v24  ;;  %v375_v35 = vsub.f32 %v21029_v19, %v25909_v28  ;;  %v25908_v36 = vand.u32 4294901760, %v21037_v29  ;;  %v269_v38 = vand.u32 4294901760, %v63_v25  ;;  %17823 = vmatprep.subr.bf16.mxu0 %v21039_v30  ;;  %v72_v28 = vld [vmem:[#allocation2 + $0x60] sm:$0xff] }
  0x1b   :  { %v43_v39 = vsub.f32 %v38_v4, %v42_v31  ;;  %v488_v40 = vand.u32 4294901760, %v487_v32  ;;  %v25906_v42 = vand.u32 4294901760, %v21047_v34  ;;  %v25903_v45 = vand.u32 4294901760, %v21053_v37 }
  0x1c   :  { %v495_v41 = vand.u32 4294901760, %v494_v33  ;;  %v376_v43 = vand.u32 4294901760, %v375_v35  ;;  %v382_v44 = vsub.f32 %v21037_v29, %v25908_v36  ;;  %v21062_v46 = vpack.c.bf16 %v269_v38, %v266_v26 }
  0x1d   :  { %vm44_vm0 = vcmp.eq.f32.partialorder %v43_v39, 10000.0  ;;  %v501_v49 = vsub.f32 %v21047_v34, %v25906_v42  ;;  %v21069_v50 = vsub.f32 %v62_v17, %v266_v26  ;;  %v508_v54 = vsub.f32 %v21053_v37, %v25903_v45 }
  0x1e   :  { %26682 = vst [vmem:[#allocation8_spill] sm:$0xff] %v21062_v46  ;;  %v21064_v48 = vpack.c.bf16 %v495_v41, %v488_v40  ;;  %v45_v52 = vsel %vm44_vm0, 0.0, %v43_v39  ;;  %v383_v53 = vand.u32 4294901760, %v382_v44  ;;  %v21074_v55 = vsub.f32 %v63_v25, %v269_v38  ;;  %17825 = vmatpush3.bf16.msra.mxu0 %v21062_v46  ;;  %v66_v40 = vld [vmem:[#allocation2 + $0x30] sm:$0xff] }
  0x1f   :  { %v46_v57 = vand.u32 2147483647, %v45_v52  ;;  %v502_v58 = vand.u32 4294901760, %v501_v49  ;;  %v25902_v59 = vand.u32 4294901760, %v21069_v50  ;;  %v320_v60 = vand.u32 4294901760, %v80_v47  ;;  %v67_v49 = vld [vmem:[#allocation2 + $0x38] sm:$0xff] }
  0x20   :  { %26683 = vst [vmem:[#allocation9_spill] sm:$0xff] %v21064_v48  ;;  %17851 = vmatprep.subr.bf16.mxu1 %v21064_v48  ;;  %v21079_v61 = vpack.c.bf16 %v383_v53, %v376_v43  ;;  %v509_v62 = vand.u32 4294901760, %v508_v54  ;;  %v25901_v63 = vand.u32 4294901760, %v21074_v55  ;;  %v323_v2 = vand.u32 4294901760, %v81_v51 }
  0x21   :  { %v48_v3 = vor.u32 %v47_v8, %v46_v57  ;;  %v389_v4 = vsub.f32 %v21069_v50, %v25902_v59  ;;  %v21087_v5 = vsub.f32 %v80_v47, %v320_v60  ;;  %v272_v7 = vand.u32 4294901760, %v64_v56  ;;  %v82_v8 = vld [vmem:[#allocation2 + $0xb0] sm:$0xff]  ;;  %v88_v59 = vld [vmem:[#allocation2 + $0xe0] sm:$0xff] }
  0x22   :  { %26684 = vst [vmem:[#allocation10_spill] sm:$0xff] %v21079_v61  ;;  %17853 = vmatpush3.bf16.msra.mxu1 %v21079_v61  ;;  %v21090_v9 = vpack.c.bf16 %v509_v62, %v502_v58  ;;  %v396_v10 = vsub.f32 %v21074_v55, %v25901_v63  ;;  %v21095_v11 = vpack.c.bf16 %v323_v2, %v320_v60  ;;  %v275_v22 = vand.u32 4294901760, %v65_v6  ;;  %v71_v63 = vld [vmem:[#allocation2 + $0x58] sm:$0xff] }
  0x23   :  { %v21097_v1 = vsub.f32 %v81_v51, %v323_v2  ;;  %vm49_vm1 = vcmp.ne.f32.partialorder %v48_v3, 0.0  ;;  %vm50_vm2 = vcmp.lt.f32.partialorder %v48_v3, 0.0  ;;  %v52_v13 = vadd.f32 10000.0, %v48_v3 }
  0x24   :  { %26685 = vst [vmem:[#allocation11_spill] sm:$0xff] %v21090_v9  ;;  %26686 = vst [vmem:[#allocation12_spill] sm:$0xff] %v21095_v11  ;;  %v390_v17 = vand.u32 4294901760, %v389_v4  ;;  %17855 = vmatprep.subr.bf16.mxu1 %v21090_v9  ;;  %v397_v18 = vand.u32 4294901760, %v396_v10  ;;  %v25900_v20 = vand.u32 4294901760, %v21087_v5  ;;  %17827 = vmatprep.subr.bf16.mxu0 %v21095_v11  ;;  %v21103_v26 = vsub.f32 %v64_v56, %v272_v7  ;;  %v75_v9 = vld [vmem:[#allocation2 + $0x78] sm:$0xff] }
  0x25   :  { %vm51_vm3 = vmand %vm50_vm2, %vm49_vm1  ;;  %v25898_v21 = vand.u32 4294901760, %v21097_v1  ;;  %v326_v31 = vand.u32 4294901760, %v82_v8  ;;  %v329_v32 = vand.u32 4294901760, %v83_v12  ;;  %v21115_v41 = vpack.c.bf16 %v275_v22, %v272_v7 }
  0x26   :  { %v53_v25 = vsel %vm51_vm3, %v52_v13, %v48_v3  ;;  %v21107_v35 = vpack.c.bf16 %v397_v18, %v390_v17  ;;  %v515_v38 = vsub.f32 %v21087_v5, %v25900_v20  ;;  %v25897_v43 = vand.u32 4294901760, %v21103_v26  ;;  %v85_v13 = vld [vmem:[#allocation2 + $0xc8] sm:$0xff] }
  0x27   :  { %v21105_v33 = vmul.f32 0.0001, %v53_v25  ;;  %v522_v39 = vsub.f32 %v21097_v1, %v25898_v21  ;;  %26689 = vst [vmem:[#allocation15_spill] sm:$0xff] %v21115_v41  ;;  %v21118_v44 = vsub.f32 %v65_v6, %v275_v22  ;;  %v21120_v47 = vpack.c.bf16 %v329_v32, %v326_v31  ;;  %17829 = vmatpush3.bf16.msra.mxu0 %v21115_v41  ;;  %v84_v6 = vld [vmem:[#allocation2 + $0xc0] sm:$0xff] }
  0x28   :  { %26688 = vst [vmem:[#allocation14_spill] sm:$0xff] %v21107_v35  ;;  %17857 = vmatpush3.bf16.msra.mxu1 %v21107_v35  ;;  %v516_v52 = vand.u32 4294901760, %v515_v38  ;;  %v21124_v54 = vsub.f32 %v82_v8, %v326_v31  ;;  %v403_v56 = vsub.f32 %v21103_v26, %v25897_v43  ;;  %v21130_v58 = vsub.f32 %v83_v12, %v329_v32 }
  0x29   :  { %26687 = vst [vmem:[#allocation13_spill] sm:$0xff] %v21105_v33  ;;  %26690 = vst [vmem:[#allocation16_spill] sm:$0xff] %v21120_v47  ;;  %v56_v51 = vmul.f32 1000.0, %v21105_v33  ;;  %v523_v53 = vand.u32 4294901760, %v522_v39  ;;  %v25896_v57 = vand.u32 4294901760, %v21118_v44  ;;  %v278_v60 = vand.u32 4294901760, %v66_v40  ;;  %17831 = vmatprep.subr.bf16.mxu0 %v21120_v47 }
  0x2a   :  { %v25895_v3 = vand.u32 4294901760, %v21124_v54  ;;  %v281_v4 = vand.u32 4294901760, %v67_v49  ;;  %v404_v7 = vand.u32 4294901760, %v403_v56  ;;  %v25893_v8 = vand.u32 4294901760, %v21130_v58 }
  0x2b   :  { %v57_v62 = vfloor.f32 %v56_v51  ;;  %v21133_v2 = vpack.c.bf16 %v523_v53, %v516_v52  ;;  %v410_v10 = vsub.f32 %v21118_v44, %v25896_v57  ;;  %v21141_v12 = vsub.f32 %v66_v40, %v278_v60  ;;  %v68_v40 = vld [vmem:[#allocation2 + $0x40] sm:$0xff] }
  0x2c   :  { %v529_v18 = vsub.f32 %v21124_v54, %v25895_v3  ;;  %v21147_v22 = vpack.c.bf16 %v281_v4, %v278_v60  ;;  %v21149_v25 = vsub.f32 %v67_v49, %v281_v4  ;;  %v536_v32 = vsub.f32 %v21130_v58, %v25893_v8 }
  0x2d   :  { %26691 = vst [vmem:[#allocation17_spill] sm:$0xff] %v21133_v2  ;;  %v58_v17 = vmax.f32 %v57_v62, 0.0  ;;  %17859 = vmatprep.subr.bf16.mxu1 %v21133_v2  ;;  %v411_v31 = vand.u32 4294901760, %v410_v10  ;;  %v25894_v38 = vand.u32 4294901760, %v21141_v12  ;;  %v332_v39 = vand.u32 4294901760, %v84_v6  ;;  %v69_v62 = vld [vmem:[#allocation2 + $0x48] sm:$0xff] }
  0x2e   :  { %26692 = vst [vmem:[#allocation18_spill] sm:$0xff] %v21147_v22  ;;  %v530_v52 = vand.u32 4294901760, %v529_v18  ;;  %v25899_v53 = vand.u32 4294901760, %v21149_v25  ;;  %v335_v56 = vand.u32 4294901760, %v85_v13  ;;  %17833 = vmatpush3.bf16.msra.mxu0 %v21147_v22  ;;  %v537_v60 = vand.u32 4294901760, %v536_v32 }
  0x2f   :  { %v21155_v51 = vmin.f32 %v58_v17, 999.0  ;;  %v21159_v49 = vpack.c.bf16 %v411_v31, %v404_v7  ;;  %v417_v4 = vsub.f32 %v21141_v12, %v25894_v38  ;;  %v21164_v10 = vsub.f32 %v84_v6, %v332_v39  ;;  %v87_v31 = vld [vmem:[#allocation2 + $0xd8] sm:$0xff] }
  0x30   :  { %v424_v17 = vsub.f32 %v21149_v25, %v25899_v53  ;;  %v21170_v18 = vpack.c.bf16 %v335_v56, %v332_v39  ;;  %v21172_v8 = vsub.f32 %v85_v13, %v335_v56  ;;  %v284_v7 = vand.u32 4294901760, %v68_v40 }
  0x31   :  { %26693 = vst [vmem:[#allocation19_spill] sm:$0xff] %v21155_v51  ;;  %26694 = vst [vmem:[#allocation20_spill] sm:$0xff] %v21159_v49  ;;  %191 = vperm.xlu0 %20912, %v21155_v51   ;;  %17861 = vmatpush3.bf16.msra.mxu1 %v21159_v49  ;;  %v21175_v32 = vpack.c.bf16 %v537_v60, %v530_v52  ;;  %v418_v38 = vand.u32 4294901760, %v417_v4  ;;  %v25904_v6 = vand.u32 4294901760, %v21164_v10  ;;  %v287_v3 = vand.u32 4294901760, %v69_v62  ;;  %v70_v60 = vld [vmem:[#allocation2 + $0x50] sm:$0xff] }
  0x32   :  { %26695 = vst [vmem:[#allocation21_spill] sm:$0xff] %v21170_v18  ;;  %v425_v57 = vand.u32 4294901760, %v424_v17  ;;  %v25905_v43 = vand.u32 4294901760, %v21172_v8  ;;  %v21179_v21 = vsub.f32 %v68_v40, %v284_v7  ;;  %v338_v53 = vand.u32 4294901760, %v86_v0  ;;  %17835 = vmatprep.subr.bf16.mxu0 %v21170_v18 }
  0x33   :  { %26696 = vst [vmem:[#allocation22_spill] sm:$0xff] %v21175_v32  ;;  %17863 = vmatprep.subr.bf16.mxu1 %v21175_v32  ;;  %v543_v13 = vsub.f32 %v21164_v10, %v25904_v6  ;;  %v21186_v39 = vpack.c.bf16 %v287_v3, %v284_v7  ;;  %v21188_v52 = vsub.f32 %v69_v62, %v287_v3  ;;  %v341_v56 = vand.u32 4294901760, %v87_v31 }
  0x34   :  { %v21190_v4 = vpack.c.bf16 %v425_v57, %v418_v38  ;;  %v550_v40 = vsub.f32 %v21172_v8, %v25905_v43  ;;  %v25907_v17 = vand.u32 4294901760, %v21179_v21  ;;  %v21196_v20 = vsub.f32 %v86_v0, %v338_v53 }
  0x35   :  { %26697 = vst [vmem:[#allocation23_spill] sm:$0xff] %v21186_v39  ;;  %v544_v45 = vand.u32 4294901760, %v543_v13  ;;  %v25911_v7 = vand.u32 4294901760, %v21188_v52  ;;  %v21199_v6 = vpack.c.bf16 %v341_v56, %v338_v53  ;;  %v21201_v3 = vsub.f32 %v87_v31, %v341_v56  ;;  %17837 = vmatpush3.bf16.msra.mxu0 %v21186_v39  ;;  %v89_v56 = vld [vmem:[#allocation2 + $0xe8] sm:$0xff] }
  0x36   :  { %26698 = vst [vmem:[#allocation24_spill] sm:$0xff] %v21190_v4  ;;  %17865 = vmatpush3.bf16.msra.mxu1 %v21190_v4  ;;  %v551_v57 = vand.u32 4294901760, %v550_v40  ;;  %v431_v38 = vsub.f32 %v21179_v21, %v25907_v17  ;;  %v25917_v0 = vand.u32 4294901760, %v21196_v20  ;;  %v290_v62 = vand.u32 4294901760, %v70_v60 }
  0x37   :  { %26699 = vst [vmem:[#allocation25_spill] sm:$0xff] %v21199_v6  ;;  %v438_v13 = vsub.f32 %v21188_v52, %v25911_v7  ;;  %v25922_v53 = vand.u32 4294901760, %v21201_v3  ;;  %v293_v31 = vand.u32 4294901760, %v71_v63  ;;  %v344_v43 = vand.u32 4294901760, %v88_v59  ;;  %17839 = vmatprep.subr.bf16.mxu0 %v21199_v6 }
  0x38   :  { %v21214_v42 = vpack.c.bf16 %v551_v57, %v544_v45  ;;  %v432_v40 = vand.u32 4294901760, %v431_v38  ;;  %v557_v17 = vsub.f32 %v21196_v20, %v25917_v0  ;;  %v21219_v36 = vsub.f32 %v70_v60, %v290_v62  ;;  %v73_v60 = vld [vmem:[#allocation2 + $0x68] sm:$0xff] }
  0x39   :  { %v439_v24 = vand.u32 4294901760, %v438_v13  ;;  %v564_v7 = vsub.f32 %v21201_v3, %v25922_v53  ;;  %v21224_v23 = vpack.c.bf16 %v293_v31, %v290_v62  ;;  %v21226_v33 = vsub.f32 %v71_v63, %v293_v31  ;;  %v90_v53 = vld [vmem:[#allocation2 + $0xf0] sm:$0xff] }
  0x3a   :  { %26700 = vst [vmem:[#allocation26_spill] sm:$0xff] %v21214_v42  ;;  %17867 = vmatprep.subr.bf16.mxu1 %v21214_v42  ;;  %v558_v45 = vand.u32 4294901760, %v557_v17  ;;  %v25927_v57 = vand.u32 4294901760, %v21219_v36  ;;  %v347_v38 = vand.u32 4294901760, %v89_v56  ;;  %v21230_v4 = vsub.f32 %v88_v59, %v344_v43  ;;  %v91_v42 = vld [vmem:[#allocation2 + $0xf8] sm:$0xff] }
  0x3b   :  { %26701 = vst [vmem:[#allocation27_spill] sm:$0xff] %v21224_v23  ;;  %v21232_v0 = vpack.c.bf16 %v439_v24, %v432_v40  ;;  %v565_v13 = vand.u32 4294901760, %v564_v7  ;;  %v25928_v32 = vand.u32 4294901760, %v21226_v33  ;;  %v296_v49 = vand.u32 4294901760, %v72_v28  ;;  %17841 = vmatpush3.bf16.msra.mxu0 %v21224_v23 }
  0x3c   :  { %v445_v63 = vsub.f32 %v21219_v36, %v25927_v57  ;;  %v21239_v17 = vpack.c.bf16 %v347_v38, %v344_v43  ;;  %v25929_v62 = vand.u32 4294901760, %v21230_v4  ;;  %v21242_v59 = vsub.f32 %v89_v56, %v347_v38  ;;  %v74_v57 = vld [vmem:[#allocation2 + $0x70] sm:$0xff] }
  0x3d   :  { %26702 = vst [vmem:[#allocation28_spill] sm:$0xff] %v21232_v0  ;;  %17869 = vmatpush3.bf16.msra.mxu1 %v21232_v0  ;;  %v21245_v24 = vpack.c.bf16 %v565_v13, %v558_v45  ;;  %v452_v7 = vsub.f32 %v21226_v33, %v25928_v32  ;;  %v299_v31 = vand.u32 4294901760, %v73_v60  ;;  %v21250_v40 = vsub.f32 %v72_v28, %v296_v49 }
  0x3e   :  { %26703 = vst [vmem:[#allocation29_spill] sm:$0xff] %v21239_v17  ;;  %v446_v2 = vand.u32 4294901760, %v445_v63  ;;  %v571_v43 = vsub.f32 %v21230_v4, %v25929_v62  ;;  %v25940_v56 = vand.u32 4294901760, %v21242_v59  ;;  %v350_v38 = vand.u32 4294901760, %v90_v53  ;;  %17843 = vmatprep.subr.bf16.mxu0 %v21239_v17 }
  0x3f   :  { %26704 = vst [vmem:[#allocation30_spill] sm:$0xff] %v21245_v24  ;;  %17871 = vmatprep.subr.bf16.mxu1 %v21245_v24  ;;  %v453_v45 = vand.u32 4294901760, %v452_v7  ;;  %v21258_v13 = vpack.c.bf16 %v299_v31, %v296_v49  ;;  %v25941_v28 = vand.u32 4294901760, %v21250_v40  ;;  %v21261_v32 = vsub.f32 %v73_v60, %v299_v31 }
  0x40   :  { %v572_v63 = vand.u32 4294901760, %v571_v43  ;;  %v578_v62 = vsub.f32 %v21242_v59, %v25940_v56  ;;  %v353_v0 = vand.u32 4294901760, %v91_v42  ;;  %v21266_v35 = vsub.f32 %v90_v53, %v350_v38 }
  0x41   :  { %26705 = vst [vmem:[#allocation31_spill] sm:$0xff] %v21258_v13  ;;  %v21268_v61 = vpack.c.bf16 %v453_v45, %v446_v2  ;;  %v459_v49 = vsub.f32 %v21250_v40, %v25941_v28  ;;  %v25946_v7 = vand.u32 4294901760, %v21261_v32  ;;  %v302_v24 = vand.u32 4294901760, %v74_v57  ;;  %17845 = vmatpush3.bf16.msra.mxu0 %v21258_v13 }
  0x42   :  { %v579_v60 = vand.u32 4294901760, %v578_v62  ;;  %v21275_v31 = vpack.c.bf16 %v353_v0, %v350_v38  ;;  %v25947_v43 = vand.u32 4294901760, %v21266_v35  ;;  %v21278_v56 = vsub.f32 %v91_v42, %v353_v0 }
  0x43   :  { %26706 = vst [vmem:[#allocation32_spill] sm:$0xff] %v21268_v61  ;;  %17873 = vmatpush3.bf16.msra.mxu1 %v21268_v61  ;;  %v460_v2 = vand.u32 4294901760, %v459_v49  ;;  %v466_v53 = vsub.f32 %v21261_v32, %v25946_v7  ;;  %v305_v45 = vand.u32 4294901760, %v75_v9  ;;  %v21284_v28 = vsub.f32 %v74_v57, %v302_v24 }
  0x44   :  { %26707 = vst [vmem:[#allocation33_spill] sm:$0xff] %v21275_v31  ;;  %v21286_v48 = vpack.c.bf16 %v579_v60, %v572_v63  ;;  %v585_v62 = vsub.f32 %v21266_v35, %v25947_v43  ;;  %v25949_v38 = vand.u32 4294901760, %v21278_v56  ;;  %v195_v42 = vlaneseq  ;;  %17847 = vmatprep.subr.bf16.mxu0 %v21275_v31 }
  0x45   :  { %v467_v0 = vand.u32 4294901760, %v466_v53  ;;  %v21293_v49 = vpack.c.bf16 %v305_v45, %v302_v24  ;;  %v25948_v61 = vand.u32 4294901760, %v21284_v28  ;;  %v21296_v7 = vsub.f32 %v75_v9, %v305_v45 }
  0x46   :  { %26708 = vst [vmem:[#allocation34_spill] sm:$0xff] %v21286_v48  ;;  %17875 = vmatprep.subr.bf16.mxu1 %v21286_v48  ;;  %v586_v57 = vand.u32 4294901760, %v585_v62  ;;  %v592_v63 = vsub.f32 %v21278_v56, %v25949_v38  ;;  %v196_v9 = vshrl.u32 %v195_v42, 7  ;;  %v21311_v45 = vpack.c.bf16 %v21027_v16, %v21025_v15 }
  0x47   :  { %26709 = vst [vmem:[#allocation35_spill] sm:$0xff] %v21293_v49  ;;  %v21302_v60 = vpack.c.bf16 %v467_v0, %v460_v2  ;;  %v473_v43 = vsub.f32 %v21284_v28, %v25948_v61  ;;  %v479_v24 = vand.u32 4294901760, %v21296_v7  ;;  %17849 = vmatpush3.bf16.msra.mxu0 %v21293_v49  ;;  %v21317_v0 = vpack.c.bf16 %v21037_v29, %v21029_v19 }
  0x48   :  { %v593_v53 = vand.u32 4294901760, %v592_v63  ;;  %26711 = vst [vmem:[#allocation37_spill] sm:$0xff] %v21311_v45  ;;  %v21321_v61 = vpack.c.bf16 %v21053_v37, %v21047_v34  ;;  %17883 = vmatprep.subr.bf16.mxu0 %v21311_v45  ;;  %v21328_v42 = vpack.c.bf16 %v21074_v55, %v21069_v50  ;;  %v21340_v48 = vpack.c.bf16 %v21130_v58, %v21124_v54 }
  0x49   :  { %26710 = vst [vmem:[#allocation36_spill] sm:$0xff] %v21302_v60  ;;  %17877 = vmatpush3.bf16.msra.mxu1 %v21302_v60  ;;  %v474_v62 = vand.u32 4294901760, %v473_v43  ;;  %v480_v2 = vsub.f32 %v21296_v7, %v479_v24  ;;  %26712 = vst [vmem:[#allocation38_spill] sm:$0xff] %v21317_v0  ;;  %v21332_v43 = vpack.c.bf16 %v21097_v1, %v21087_v5  ;;  %v209_v49 = vsub.s32 3, %v196_v9 }
  0x4a   :  { %26713 = vst [vmem:[#allocation39_spill] sm:$0xff] %v21321_v61  ;;  %v21323_v38 = vpack.c.bf16 %v593_v53, %v586_v57  ;;  %26715 = vst [vmem:[#allocation41_spill] sm:$0xff] %v21328_v42  ;;  %v21336_v60 = vpack.c.bf16 %v21118_v44, %v21103_v26  ;;  %v188_v57 = vld [vmem:[%s25887_s2] sm:$0xff]  ;;  %v21348_v53 = vpack.c.bf16 %v21149_v25, %v21141_v12  ;;  %v205_v31 = vsub.s32 2, %v196_v9 }
  0x4b   :  { %v481_v63 = vand.u32 4294901760, %v480_v2  ;;  %26716 = vst [vmem:[#allocation42_spill] sm:$0xff] %v21332_v43  ;;  %26718 = vst [vmem:[#allocation44_spill] sm:$0xff] %v21340_v48  ;;  %v21352_v2 = vpack.c.bf16 %v21172_v8, %v21164_v10  ;;  %v21356_v45 = vpack.c.bf16 %v21188_v52, %v21179_v21  ;;  %v21360_v51 = vpack.c.bf16 %v21201_v3, %v21196_v20 }
  0x4c   :  { %26714 = vst [vmem:[#allocation40_spill] sm:$0xff] %v21323_v38  ;;  %26717 = vst [vmem:[#allocation43_spill] sm:$0xff] %v21336_v60  ;;  %17879 = vmatprep.subr.bf16.mxu1 %v21323_v38  ;;  %v217_v13 = vsub.s32 5, %v196_v9  ;;  %v21366_v17 = vpack.c.bf16 %v21226_v33, %v21219_v36  ;;  %v225_v23 = vsub.s32 7, %v196_v9  ;;  %v21369_v48 = vrot.slane %v188_v57, %v209_v49 }
  0x4d   :  { %26719 = vst [vmem:[#allocation45_spill] sm:$0xff] %v21348_v53  ;;  %26720 = vst [vmem:[#allocation46_spill] sm:$0xff] %v21352_v2  ;;  %v21362_v38 = vpack.c.bf16 %v481_v63, %v474_v62  ;;  %v213_v53 = vsub.s32 4, %v196_v9  ;;  %v221_v2 = vsub.s32 6, %v196_v9  ;;  %v21388_v49 = vpack.c.bf16 %v21261_v32, %v21250_v40 }
  0x4e   :  { %26721 = vst [vmem:[#allocation47_spill] sm:$0xff] %v21356_v45  ;;  %26722 = vst [vmem:[#allocation48_spill] sm:$0xff] %v21360_v51  ;;  %v21371_v45 = vrot.slane %v188_v57, %v205_v31  ;;  %v21373_v6 = vrot.slane %v188_v57, %v217_v13  ;;  %v21378_v63 = vrot.slane %v188_v57, %v225_v23  ;;  %v26735_v23 = vand.u32 4294901760, %v21025_v15 }
  0x4f   :  { %26723 = vst [vmem:[#allocation49_spill] sm:$0xff] %v21362_v38  ;;  %26724 = vst [vmem:[#allocation50_spill] sm:$0xff] %v21366_v17  ;;  %17881 = vmatpush3.bf16.msra.mxu1 %v21362_v38  ;;  %v21376_v62 = vrot.slane %v188_v57, %v213_v53  ;;  %v21380_v51 = vrot.slane %v188_v57, %v221_v2  ;;  %v21384_v17 = vpack.c.bf16 %v21242_v59, %v21230_v4 }
  0x50   :  { %26725 = vst [vmem:[#allocation51_spill] sm:$0xff] %v21369_v48  ;;  %26726 = vst [vmem:[#allocation52_spill] sm:$0xff] %v21371_v45  ;;  %17915 = vmatprep.subr.bf16.mxu1 %v21023_v14  ;;  %v21392_v13 = vpack.c.bf16 %v21278_v56, %v21266_v35  ;;  %v21396_v31 = vpack.c.bf16 %v21296_v7, %v21284_v28  ;;  %v26736_v53 = vand.u32 4294901760, %v21027_v16  ;;  %v26738_v38 = vand.u32 4294901760, %v21029_v19 }
  0x51   :  { %26727 = vst [vmem:[#allocation53_spill] sm:$0xff] %v21373_v6  ;;  %26728 = vst [vmem:[#allocation54_spill] sm:$0xff] %v21376_v62  ;;  %v26741_v62 = vand.u32 4294901760, %v21047_v34  ;;  %v26742_v6 = vand.u32 4294901760, %v21053_v37  ;;  %v26744_v7 = vand.u32 4294901760, %v21069_v50  ;;  %v26745_v15 = vand.u32 4294901760, %v21074_v55 }
  0x52   :  { %26729 = vst [vmem:[#allocation55_spill] sm:$0xff] %v21378_v63  ;;  %26730 = vst [vmem:[#allocation56_spill] sm:$0xff] %v21380_v51  ;;  %v21402_v2 = vpack.c.bf16 %v26736_v53, %v26735_v23  ;;  %v26739_v51 = vand.u32 4294901760, %v21037_v29  ;;  %v26747_v16 = vand.u32 4294901760, %v21087_v5  ;;  %v26748_v19 = vand.u32 4294901760, %v21097_v1 }
  0x53   :  { %26731 = vst [vmem:[#allocation57_spill] sm:$0xff] %v21384_v17  ;;  %26732 = vst [vmem:[#allocation58_spill] sm:$0xff] %v21388_v49  ;;  %v21414_v45 = vpack.c.bf16 %v26742_v6, %v26741_v62  ;;  %v21420_v48 = vpack.c.bf16 %v26745_v15, %v26744_v7  ;;  %v26750_v29 = vand.u32 4294901760, %v21103_v26  ;;  %v26751_v34 = vand.u32 4294901760, %v21118_v44 }
  0x54   :  { %26733 = vst [vmem:[#allocation59_spill] sm:$0xff] %v21392_v13  ;;  %26734 = vst [vmem:[#allocation60_spill] sm:$0xff] %v21396_v31  ;;  %v21408_v63 = vpack.c.bf16 %v26739_v51, %v26738_v38  ;;  %v21426_v23 = vpack.c.bf16 %v26748_v19, %v26747_v16  ;;  %v26753_v37 = vand.u32 4294901760, %v21124_v54  ;;  %v26754_v50 = vand.u32 4294901760, %v21130_v58 }
  0x55   :  { %26737 = vst [vmem:[#allocation61_spill] sm:$0xff] %v21402_v2  ;;  %26743 = vst [vmem:[#allocation63_spill] sm:$0xff] %v21414_v45  ;;  %v21432_v51 = vpack.c.bf16 %v26751_v34, %v26750_v29  ;;  %v26756_v55 = vand.u32 4294901760, %v21141_v12  ;;  %v26757_v5 = vand.u32 4294901760, %v21149_v25  ;;  %v26759_v1 = vand.u32 4294901760, %v21164_v10 }
  0x56   :  { %26740 = vst [vmem:[#allocation62_spill] sm:$0xff] %v21408_v63  ;;  %26746 = vst [vmem:[#allocation64_spill] sm:$0xff] %v21420_v48  ;;  %v21438_v6 = vpack.c.bf16 %v26754_v50, %v26753_v37  ;;  %v26760_v26 = vand.u32 4294901760, %v21172_v8  ;;  %v26762_v44 = vand.u32 4294901760, %v21179_v21  ;;  %v26763_v54 = vand.u32 4294901760, %v21188_v52 }
  0x57   :  { %26749 = vst [vmem:[#allocation65_spill] sm:$0xff] %v21426_v23  ;;  %26752 = vst [vmem:[#allocation66_spill] sm:$0xff] %v21432_v51  ;;  %v21444_v38 = vpack.c.bf16 %v26757_v5, %v26756_v55  ;;  %v26765_v58 = vand.u32 4294901760, %v21196_v20  ;;  %v26766_v12 = vand.u32 4294901760, %v21201_v3  ;;  %v26768_v25 = vand.u32 4294901760, %v21219_v36 }
  0x58   :  { %26755 = vst [vmem:[#allocation67_spill] sm:$0xff] %v21438_v6  ;;  %v21450_v62 = vpack.c.bf16 %v26760_v26, %v26759_v1  ;;  %v21456_v53 = vpack.c.bf16 %v26763_v54, %v26762_v44  ;;  %v26769_v10 = vand.u32 4294901760, %v21226_v33  ;;  %v26771_v8 = vand.u32 4294901760, %v21230_v4  ;;  %v26784_v54 = vld [vmem:[#allocation25_spill] sm:$0xff] }
  0x59   :  { %26758 = vst [vmem:[#allocation68_spill] sm:$0xff] %v21444_v38  ;;  %v21462_v7 = vpack.c.bf16 %v26766_v12, %v26765_v58  ;;  %v26772_v21 = vand.u32 4294901760, %v21242_v59  ;;  %v26774_v52 = vand.u32 4294901760, %v21250_v40  ;;  %v26775_v20 = vand.u32 4294901760, %v21261_v32  ;;  %v26785_v58 = vld [vmem:[#allocation44_spill] sm:$0xff]  ;;  %v26786_v12 = vld [vmem:[#allocation27_spill] sm:$0xff] }
  0x5a   :  { %26761 = vst [vmem:[#allocation69_spill] sm:$0xff] %v21450_v62  ;;  %26764 = vst [vmem:[#allocation70_spill] sm:$0xff] %v21456_v53  ;;  %v21468_v15 = vpack.c.bf16 %v26769_v10, %v26768_v25  ;;  %v26777_v3 = vand.u32 4294901760, %v21266_v35  ;;  %v26778_v36 = vand.u32 4294901760, %v21278_v56  ;;  %v26780_v33 = vand.u32 4294901760, %v21284_v28  ;;  %v21539_v25 = vld [vmem:[#allocation2 + $0x1f0] sm:$0xff] }
  0x5b   :  { %26767 = vst [vmem:[#allocation71_spill] sm:$0xff] %v21462_v7  ;;  %v21474_v16 = vpack.c.bf16 %v26772_v21, %v26771_v8  ;;  %v21480_v19 = vpack.c.bf16 %v26775_v20, %v26774_v52  ;;  %v201_v4 = vsub.s32 1, %v196_v9  ;;  %v197_v59 = vsub.s32 0, %v196_v9  ;;  %26787 = vst [vmem:[#allocation79_spill] sm:$0xff] %v21539_v25  ;;  %v21541_v10 = vld [vmem:[#allocation2 + $0x1f8] sm:$0xff]  ;;  %v26789_v8 = vld [vmem:[#allocation45_spill] sm:$0xff] }
  0x5c   :  { %26770 = vst [vmem:[#allocation72_spill] sm:$0xff] %v21468_v15  ;;  %v21486_v29 = vpack.c.bf16 %v26778_v36, %v26777_v3  ;;  %v21490_v34 = vpack.c.bf16 %v479_v24, %v26780_v33  ;;  %v25986_v35 = vmov 0.0   ;;  %v25988_v56 = vmov 1.0   ;;  %26788 = vst [vmem:[#allocation80_spill] sm:$0xff] %v21541_v10  ;;  %v26790_v21 = vld [vmem:[#allocation29_spill] sm:$0xff]  ;;  %v26791_v52 = vld [vmem:[#allocation46_spill] sm:$0xff] }
  0x5d   :  { %26773 = vst [vmem:[#allocation73_spill] sm:$0xff] %v21474_v16  ;;  %26776 = vst [vmem:[#allocation74_spill] sm:$0xff] %v21480_v19  ;;  %v21492_v37 = vrot.slane %v188_v57, %v201_v4  ;;  %v21494_v50 = vrot.slane %v188_v57, %v197_v59  ;;  %v21546_v20 = vld [vmem:[#allocation2 + $0x180] sm:$0xff]  ;;  %v21548_v3 = vld [vmem:[#allocation2 + $0x188] sm:$0xff] }
  0x5e   :  { %26779 = vst [vmem:[#allocation75_spill] sm:$0xff] %v21486_v29  ;;  %26781 = vst [vmem:[#allocation76_spill] sm:$0xff] %v21490_v34  ;;  %v21550_v36 = vld [vmem:[#allocation2 + $0x100] sm:$0xff]  ;;  %v21552_v33 = vld [vmem:[#allocation2 + $0x108] sm:$0xff]  ;;  %v26802_v59 = vand.u32 4294901760, %v21546_v20 }
  0x5f   :  { %26782 = vst [vmem:[#allocation77_spill] sm:$0xff] %v21492_v37  ;;  %26783 = vst [vmem:[#allocation78_spill] sm:$0xff] %v21494_v50 }
  0x60   :  { %v21586_v4 = vsub.f32 %v21546_v20, %v26802_v59 }
  0x62   :  { %26803 = vst [vmem:[#allocation83_spill] sm:$0xff] %v21586_v4 }
  0xb0   :  { %v21496_v40 = vpop.permute.xlu0 %191 }
  0xb1   :  { %vm236_vm4 = vcmp.eq.f32.partialorder %v21496_v40, %v21492_v37  ;;  %vm235_vm5 = vcmp.eq.f32.partialorder %v21496_v40, %v21494_v50  ;;  %v22279_v50 = vld [vmem:[#allocation2 + $0x270] sm:$0xff] }
  0xb2   :  { %v14324_v32 = vsel %vm236_vm4, 1.0, %v25986_v35  ;;  %14331 = vmatprep.mubr.msk.f32.mxu1 %vm236_vm4, %v25988_v56  ;;  %v14323_v28 = vsel %vm235_vm5, 1.0, %v25986_v35  ;;  %v21593_v35 = vld [vmem:[#allocation2 + $0x190] sm:$0xff] }
  0xb3   :  { %v356_v24 = vsub.f32 %v14324_v32, %v14324_v32  ;;  %v21514_v9 = vsub.f32 %v14323_v28, %v14323_v28  ;;  %14332 = vmatmul.mubr.msk.f32.vlgmr.msra.gmra.mrb[0].mxu1 %vm235_vm5, %v25988_v56  ;;  %v21556_v32 = vld [vmem:[#allocation2 + $0x170] sm:$0xff]  ;;  %v21558_v28 = vld [vmem:[#allocation2 + $0x178] sm:$0xff]  ;;  %v26804_v56 = vand.u32 4294901760, %v21548_v3 }
  0xb4   :  { %17917 = vmatpush3.bf16.msra.mxu1 %v21034_v27  ;;  %26792 = vst [vmem:[#allocation81_spill] sm:$0xff] %v21556_v32  ;;  %26793 = vst [vmem:[#allocation82_spill] sm:$0xff] %v21558_v28 }
  0xb5   :  { %17919 = vmatprep.subr.bf16.mxu1 %v21039_v30  ;;  %v357_v57 = vand.u32 4294901760, %v356_v24  ;;  %v363_v55 = vand.u32 4294901760, %v21514_v9 }
  0xb7   :  { %840 = vmatprep.mubr.f32.mxu1 %v357_v57  ;;  %v358_v5 = vsub.f32 %v356_v24, %v357_v57  ;;  %v364_v1 = vsub.f32 %v21514_v9, %v363_v55  ;;  %v26795_v57 = vld [vmem:[#allocation47_spill] sm:$0xff] }
  0xb8   :  { %17921 = vmatpush3.bf16.msra.mxu1 %v21062_v46 }
  0xb9   :  { %17923 = vmatprep.subr.bf16.mxu1 %v21095_v11  ;;  %v359_v26 = vand.u32 4294901760, %v358_v5  ;;  %v365_v44 = vand.u32 4294901760, %v364_v1  ;;  %v26796_v5 = vld [vmem:[#allocation33_spill] sm:$0xff] }
  0xbb   :  { %360 = vmatprep.mubr.f32.mxu0 %v359_v26  ;;  %v26800_v26 = vld [vmem:[#allocation35_spill] sm:$0xff] }
  0xbc   :  { %17925 = vmatpush3.bf16.msra.mxu1 %v21115_v41  ;;  %366 = vmatmul.mubr.f32.vlgmr.msra.gmra.mrb[0].mxu0 %v365_v44  ;;  %v26797_v44 = vld [vmem:[#allocation48_spill] sm:$0xff] }
  0xbd   :  { %17885 = vmatpush3.bf16.msra.mxu0 %v21317_v0  ;;  %733 = vmatprep.mubr.f32.mxu0 %v356_v24  ;;  %v26794_v24 = vld [vmem:[#allocation31_spill] sm:$0xff]  ;;  %v26812_v0 = vmov 1.0  }
  0xbe   :  { %17927 = vmatprep.subr.bf16.mxu1 %v21120_v47  ;;  %17887 = vmatprep.subr.bf16.mxu0 %v21321_v61 }
  0xc0   :  { %17929 = vmatpush3.bf16.msra.mxu1 %v21147_v22 }
  0xc1   :  { %17889 = vmatpush3.bf16.msra.mxu0 %v21328_v42  ;;  %17931 = vmatprep.subr.bf16.mxu1 %v21170_v18  ;;  %v26811_v42 = vand.u32 4294901760, %v21558_v28 }
  0xc2   :  { %17891 = vmatprep.subr.bf16.mxu0 %v21332_v43  ;;  %v26810_v43 = vand.u32 4294901760, %v21556_v32 }
  0xc3   :  { %v21616_v61 = vsub.f32 %v21558_v28, %v26811_v42  ;;  %v21629_v42 = vld [vmem:[#allocation2 + $0x118] sm:$0xff] }
  0xc4   :  { %17933 = vmatpush3.bf16.msra.mxu1 %v21186_v39 }
  0xc5   :  { %17893 = vmatpush3.bf16.msra.mxu0 %v21336_v60  ;;  %17935 = vmatprep.subr.bf16.mxu1 %v26784_v54  ;;  %v26808_v60 = vand.u32 4294901760, %v21552_v33 }
  0xc6   :  { %17895 = vmatprep.subr.bf16.mxu0 %v26785_v58 }
  0xc7   :  { %v21606_v59 = vsub.f32 %v21552_v33, %v26808_v60  ;;  %v21659_v60 = vld [vmem:[#allocation2 + $0x1a0] sm:$0xff] }
  0xc8   :  { %17937 = vmatpush3.bf16.msra.mxu1 %v26786_v12  ;;  %v26829_v37 = vand.u32 4294901760, %v21659_v60 }
  0xc9   :  { %17897 = vmatpush3.bf16.msra.mxu0 %v26789_v8  ;;  %17939 = vmatprep.subr.bf16.mxu1 %v26790_v21  ;;  %v26799_v8 = vand.u32 4294901760, %v21541_v10  ;;  %26809 = vst [vmem:[#allocation86_spill] sm:$0xff] %v21606_v59 }
  0xca   :  { %17899 = vmatprep.subr.bf16.mxu0 %v26791_v52  ;;  %v26798_v52 = vand.u32 4294901760, %v21539_v25 }
  0xcb   :  { %v21578_v1 = vsub.f32 %v21541_v10, %v26799_v8  ;;  %v21595_v8 = vld [vmem:[#allocation2 + $0x198] sm:$0xff] }
  0xcc   :  { %17941 = vmatpush3.bf16.msra.mxu1 %v26794_v24 }
  0xcd   :  { %17901 = vmatpush3.bf16.msra.mxu0 %v26795_v57  ;;  %17943 = vmatprep.subr.bf16.mxu1 %v26796_v5  ;;  %v21573_v57 = vsub.f32 %v21539_v25, %v26798_v52  ;;  %v21591_v52 = vsub.f32 %v21548_v3, %v26804_v56  ;;  %v21611_v56 = vsub.f32 %v21556_v32, %v26810_v43  ;;  %v26815_v32 = vand.u32 4294901760, %v21593_v35 }
  0xce   :  { %17903 = vmatprep.subr.bf16.mxu0 %v26797_v44  ;;  %v26801_v44 = vld [vmem:[#allocation50_spill] sm:$0xff] }
  0xcf   :  { %26805 = vst [vmem:[#allocation84_spill] sm:$0xff] %v21591_v52 }
  0xd0   :  { %17945 = vmatpush3.bf16.msra.mxu1 %v26800_v26 }
  0xd1   :  { %17905 = vmatpush3.bf16.msra.mxu0 %v26801_v44  ;;  %17979 = vmatprep.subr.bf16.mxu1 %v21023_v14  ;;  %v26806_v44 = vand.u32 4294901760, %v21550_v36  ;;  %v21627_v14 = vld [vmem:[#allocation2 + $0x110] sm:$0xff] }
  0xd2   :  { %17907 = vmatprep.subr.bf16.mxu0 %v21384_v17  ;;  %v26012_v17 = vand.u32 4294901760, %v21573_v57 }
  0xd3   :  { %v21601_v58 = vsub.f32 %v21550_v36, %v26806_v44  ;;  %844 = vmatmul.mubr.f32.vlgmr.msra.gmra.mrb[2].mxu1 %v363_v55  ;;  %v26819_v55 = vand.u32 4294901760, %v21611_v56 }
  0xd4   :  { %17981 = vmatpush3.bf16.msra.mxu1 %v21034_v27  ;;  %14335 = vmatprep.mubr.msk.f32.mxu1 %vm236_vm4, %v26812_v0  ;;  %v26813_v27 = vand.u32 4294901760, %v21578_v1 }
  0xd5   :  { %26807 = vst [vmem:[#allocation85_spill] sm:$0xff] %v21601_v58  ;;  %17909 = vmatpush3.bf16.msra.mxu0 %v21388_v49  ;;  %17983 = vmatprep.subr.bf16.mxu1 %v21039_v30  ;;  %v26019_v30 = vand.u32 4294901760, %v21616_v61  ;;  %v21661_v49 = vld [vmem:[#allocation2 + $0x1a8] sm:$0xff]  ;;  %v26823_v10 = vand.u32 4294901760, %v21601_v58 }
  0xd6   :  { %v21639_v28 = vpack.c.bf16 %v26813_v27, %v26012_v17  ;;  %17911 = vmatprep.subr.bf16.mxu0 %v21392_v13  ;;  %v21652_v27 = vsub.f32 %v21593_v35, %v26815_v32  ;;  %v26817_v17 = vand.u32 4294901760, %v21595_v8  ;;  %v21671_v32 = vld [vmem:[#allocation2 + $0x120] sm:$0xff] }
  0xd7   :  { %v21667_v44 = vpack.c.bf16 %v26019_v30, %v26819_v55  ;;  %v1237_v55 = vsub.f32 %v21601_v58, %v26823_v10  ;;  %v26824_v30 = vand.u32 4294901760, %v21606_v59  ;;  %v21712_v10 = vld [vmem:[#allocation2 + $0x1b0] sm:$0xff] }
  0xd8   :  { %26814 = vst [vmem:[#allocation87_spill] sm:$0xff] %v21639_v28  ;;  %17985 = vmatpush3.bf16.msra.mxu1 %v21062_v46  ;;  %26816 = vst [vmem:[#allocation88_spill] sm:$0xff] %v21652_v27  ;;  %v21657_v43 = vsub.f32 %v21595_v8, %v26817_v17  ;;  %v26821_v17 = vand.u32 4294901760, %v21586_v4  ;;  %v26822_v46 = vand.u32 4294901760, %v21591_v52 }
  0xd9   :  { %26820 = vst [vmem:[#allocation90_spill] sm:$0xff] %v21667_v44  ;;  %17913 = vmatpush3.bf16.msra.mxu0 %v21396_v31  ;;  %17987 = vmatprep.subr.bf16.mxu1 %v21095_v11  ;;  %v1244_v31 = vsub.f32 %v21606_v59, %v26824_v30  ;;  %v26825_v11 = vand.u32 4294901760, %v21627_v14  ;;  %v26827_v44 = vand.u32 4294901760, %v21629_v42  ;;  %v1238_v30 = vand.u32 4294901760, %v1237_v55 }
  0xda   :  { %26818 = vst [vmem:[#allocation89_spill] sm:$0xff] %v21657_v43  ;;  %17947 = vmatprep.subr.bf16.mxu0 %v21402_v2  ;;  %v1349_v13 = vsub.f32 %v21586_v4, %v26821_v17  ;;  %v1356_v28 = vsub.f32 %v21591_v52, %v26822_v46  ;;  %v21721_v59 = vsub.f32 %v21659_v60, %v26829_v37  ;;  %v26834_v55 = vand.u32 4294901760, %v21657_v43 }
  0xdb   :  { %v21689_v2 = vsub.f32 %v21627_v14, %v26825_v11  ;;  %v21694_v17 = vsub.f32 %v21629_v42, %v26827_v44  ;;  %v21708_v44 = vld [vmem:[#allocation2 + $0x128] sm:$0xff]  ;;  %v1245_v46 = vand.u32 4294901760, %v1244_v31  ;;  %v21714_v11 = vld [vmem:[#allocation2 + $0x1b8] sm:$0xff]  ;;  %v26833_v31 = vand.u32 4294901760, %v21652_v27 }
  0xdc   :  { %736 = vmatmul.mubr.f32.vlgmr.msra.gmra.mrb[2].mxu0 %v21514_v9  ;;  %17989 = vmatpush3.bf16.msra.mxu1 %v21115_v41  ;;  %v1350_v9 = vand.u32 4294901760, %v1349_v13  ;;  %v1357_v52 = vand.u32 4294901760, %v1356_v28  ;;  %26830 = vst [vmem:[#allocation93_spill] sm:$0xff] %v21721_v59  ;;  %v1370_v41 = vsub.f32 %v21657_v43, %v26834_v55  ;;  %v26835_v37 = vand.u32 4294901760, %v21671_v32 }
  0xdd   :  { %26826 = vst [vmem:[#allocation91_spill] sm:$0xff] %v21689_v2  ;;  %26828 = vst [vmem:[#allocation92_spill] sm:$0xff] %v21694_v17  ;;  %17949 = vmatpush3.bf16.msra.mxu0 %v21408_v63  ;;  %14333 = vmatprep.mubr.msk.f32.mxu0 %vm236_vm4, %v26812_v0  ;;  %v1363_v28 = vsub.f32 %v21652_v27, %v26833_v31  ;;  %v21748_v55 = vpack.c.bf16 %v1245_v46, %v1238_v30  ;;  %v26839_v63 = vand.u32 4294901760, %v21689_v2  ;;  %v21758_v27 = vld [vmem:[#allocation2 + $0x130] sm:$0xff] }
  0xde   :  { %17991 = vmatprep.subr.bf16.mxu1 %v21120_v47  ;;  %17951 = vmatprep.subr.bf16.mxu0 %v21414_v45  ;;  %v26831_v47 = vand.u32 4294901760, %v21661_v49  ;;  %v21739_v45 = vsub.f32 %v21671_v32, %v26835_v37  ;;  %v21746_v31 = vpack.c.bf16 %v1357_v52, %v1350_v9  ;;  %v26840_v37 = vand.u32 4294901760, %v21694_v17  ;;  %v21762_v52 = vld [vmem:[#allocation2 + $0x1c0] sm:$0xff] }
  0xdf   :  { %26838 = vst [vmem:[#allocation97_spill] sm:$0xff] %v21748_v55  ;;  %v1251_v43 = vsub.f32 %v21689_v2, %v26839_v63  ;;  %v1364_v46 = vand.u32 4294901760, %v1363_v28  ;;  %v1371_v30 = vand.u32 4294901760, %v1370_v41  ;;  %v26841_v9 = vand.u32 4294901760, %v21708_v44 }
  0xe0   :  { %v21726_v13 = vsub.f32 %v21661_v49, %v26831_v47  ;;  %17993 = vmatpush3.bf16.msra.mxu1 %v21147_v22  ;;  %26836 = vst [vmem:[#allocation95_spill] sm:$0xff] %v21739_v45  ;;  %26837 = vst [vmem:[#allocation96_spill] sm:$0xff] %v21746_v31  ;;  %v21760_v22 = vld [vmem:[#allocation2 + $0x138] sm:$0xff]  ;;  %v26843_v47 = vand.u32 4294901760, %v21546_v20  ;;  %v26846_v28 = vand.u32 4294901760, %v21712_v10  ;;  %v26848_v63 = vand.u32 4294901760, %v21714_v11 }
  0xe1   :  { %17953 = vmatpush3.bf16.msra.mxu0 %v21420_v48  ;;  %17995 = vmatprep.subr.bf16.mxu1 %v21170_v18  ;;  %v1258_v48 = vsub.f32 %v21694_v17, %v26840_v37  ;;  %v21769_v37 = vsub.f32 %v21708_v44, %v26841_v9  ;;  %v26844_v18 = vand.u32 4294901760, %v21548_v3  ;;  %v26851_v20 = vand.u32 4294901760, %v21552_v33 }
  0xe2   :  { %26832 = vst [vmem:[#allocation94_spill] sm:$0xff] %v21726_v13  ;;  %17955 = vmatprep.subr.bf16.mxu0 %v21426_v23  ;;  %v21782_v41 = vsub.f32 %v21712_v10, %v26846_v28  ;;  %v21787_v9 = vsub.f32 %v21714_v11, %v26848_v63  ;;  %v26853_v63 = vand.u32 4294901760, %v21721_v59  ;;  %v26856_v3 = vand.u32 4294901760, %v21595_v8 }
  0xe3   :  { %26842 = vst [vmem:[#allocation98_spill] sm:$0xff] %v21769_v37  ;;  %v21777_v23 = vpack.c.bf16 %v26844_v18, %v26843_v47  ;;  %v21798_v47 = vld [vmem:[#allocation2 + $0x1c8] sm:$0xff]  ;;  %v1259_v17 = vand.u32 4294901760, %v1258_v48  ;;  %v26859_v48 = vand.u32 4294901760, %v21739_v45 }
  0xe4   :  { %17997 = vmatpush3.bf16.msra.mxu1 %v21186_v39  ;;  %26847 = vst [vmem:[#allocation100_spill] sm:$0xff] %v21782_v41  ;;  %26849 = vst [vmem:[#allocation101_spill] sm:$0xff] %v21787_v9  ;;  %v1252_v39 = vand.u32 4294901760, %v1251_v43  ;;  %v21816_v43 = vpack.c.bf16 %v1371_v30, %v1364_v46  ;;  %v26865_v46 = vand.u32 4294901760, %v21762_v52 }
  0xe5   :  { %17957 = vmatpush3.bf16.msra.mxu0 %v21432_v51  ;;  %17999 = vmatprep.subr.bf16.mxu1 %v26784_v54  ;;  %26845 = vst [vmem:[#allocation99_spill] sm:$0xff] %v21777_v23  ;;  %v26850_v51 = vand.u32 4294901760, %v21550_v36  ;;  %v26854_v36 = vand.u32 4294901760, %v21726_v13 }
  0xe6   :  { %17959 = vmatprep.subr.bf16.mxu0 %v21438_v6  ;;  %v1377_v6 = vsub.f32 %v21721_v59, %v26853_v63  ;;  %26858 = vst [vmem:[#allocation104_spill] sm:$0xff] %v21816_v43  ;;  %v21821_v63 = vsub.f32 %v21739_v45, %v26859_v48  ;;  %v26861_v48 = vand.u32 4294901760, %v21758_v27  ;;  %v21851_v30 = vsub.f32 %v21762_v52, %v26865_v46 }
  0xe7   :  { %v21794_v54 = vpack.c.bf16 %v26851_v20, %v26850_v51  ;;  %v1384_v33 = vsub.f32 %v21726_v13, %v26854_v36  ;;  %v21807_v51 = vld [vmem:[#allocation2 + $0x140] sm:$0xff]  ;;  %v26855_v20 = vand.u32 4294901760, %v21593_v35  ;;  %v21824_v36 = vld [vmem:[#allocation2 + $0x148] sm:$0xff]  ;;  %v26860_v35 = vld [vmem:[#allocation51_spill] sm:$0xff]  ;;  %v26869_v59 = vand.u32 4294901760, %v21769_v37 }
  0xe8   :  { %18001 = vmatpush3.bf16.msra.mxu1 %v26786_v12  ;;  %vm238_vm6 = vcmp.eq.f32.partialorder %v21496_v40, %v26860_v35  ;;  %v21841_v28 = vsub.f32 %v21758_v27, %v26861_v48  ;;  %26866 = vst [vmem:[#allocation107_spill] sm:$0xff] %v21851_v30  ;;  %v21854_v12 = vpack.c.bf16 %v1259_v17, %v1252_v39  ;;  %v26868_v48 = vmov 0.0   ;;  %v21867_v17 = vld [vmem:[#allocation2 + $0x150] sm:$0xff] }
  0xe9   :  { %26852 = vst [vmem:[#allocation102_spill] sm:$0xff] %v21794_v54  ;;  %v21814_v18 = vpack.c.bf16 %v26856_v3, %v26855_v20  ;;  %17961 = vmatpush3.bf16.msra.mxu0 %v21444_v38  ;;  %18003 = vmatprep.subr.bf16.mxu1 %v26790_v21  ;;  %v21833_v3 = vld [vmem:[#allocation2 + $0x1d0] sm:$0xff]  ;;  %v21835_v20 = vld [vmem:[#allocation2 + $0x1d8] sm:$0xff]  ;;  %v26863_v38 = vand.u32 4294901760, %v21760_v22  ;;  %v1385_v45 = vand.u32 4294901760, %v1384_v33  ;;  %v1272_v46 = vsub.f32 %v21769_v37, %v26869_v59 }
  0xea   :  { %17963 = vmatprep.subr.bf16.mxu0 %v21450_v62  ;;  %26862 = vst [vmem:[#allocation105_spill] sm:$0xff] %v21841_v28  ;;  %26867 = vst [vmem:[#allocation108_spill] sm:$0xff] %v21854_v12  ;;  %v1378_v62 = vand.u32 4294901760, %v1377_v6  ;;  %v21869_v6 = vld [vmem:[#allocation2 + $0x158] sm:$0xff]  ;;  %v1266_v33 = vand.u32 4294901760, %v21821_v63  ;;  %v26870_v13 = vand.u32 4294901760, %v21782_v41 }
  0xeb   :  { %26857 = vst [vmem:[#allocation103_spill] sm:$0xff] %v21814_v18  ;;  %v21846_v21 = vsub.f32 %v21760_v22, %v26863_v38  ;;  %v14326_v38 = vsel %vm238_vm6, 1.0, %v26868_v48  ;;  %v26871_v59 = vand.u32 4294901760, %v21787_v9  ;;  %v26872_v39 = vand.u32 4294901760, %v21798_v47 }
  0xec   :  { %18005 = vmatpush3.bf16.msra.mxu1 %v26794_v24  ;;  %v21877_v8 = vsub.f32 %v21782_v41, %v26870_v13  ;;  %v26874_v13 = vand.u32 4294901760, %v21807_v51  ;;  %v21902_v37 = vsub.f32 %v14326_v38, %v14326_v38  ;;  %v26878_v58 = vand.u32 4294901760, %v21833_v3 }
  0xed   :  { %26864 = vst [vmem:[#allocation106_spill] sm:$0xff] %v21846_v21  ;;  %17965 = vmatpush3.bf16.msra.mxu0 %v21456_v53  ;;  %18007 = vmatprep.subr.bf16.mxu1 %v26796_v5  ;;  %v21882_v2 = vsub.f32 %v21787_v9, %v26871_v59  ;;  %v21887_v24 = vsub.f32 %v21798_v47, %v26872_v39  ;;  %v21898_v59 = vld [vmem:[#allocation2 + $0x1e0] sm:$0xff]  ;;  %v21900_v9 = vld [vmem:[#allocation2 + $0x1e8] sm:$0xff]  ;;  %v26875_v39 = vand.u32 4294901760, %v21824_v36  ;;  %v26880_v38 = vand.u32 4294901760, %v21835_v20 }
  0xee   :  { %17967 = vmatprep.subr.bf16.mxu0 %v21462_v7  ;;  %v21896_v41 = vsub.f32 %v21807_v51, %v26874_v13  ;;  %v21912_v53 = vpack.c.bf16 %v1385_v45, %v1378_v62  ;;  %v1273_v13 = vand.u32 4294901760, %v1272_v46  ;;  %v21917_v4 = vsub.f32 %v21833_v3, %v26878_v58  ;;  %v21930_v5 = vld [vmem:[#allocation2 + $0x160] sm:$0xff]  ;;  %v21932_v58 = vld [vmem:[#allocation2 + $0x168] sm:$0xff] }
  0xef   :  { %26873 = vst [vmem:[#allocation109_spill] sm:$0xff] %v21887_v24  ;;  %v21907_v7 = vsub.f32 %v21824_v36, %v26875_v39  ;;  %v21922_v25 = vsub.f32 %v21835_v20, %v26880_v38  ;;  %v1392_v39 = vand.u32 4294901760, %v21877_v8  ;;  %v26882_v38 = vand.u32 4294901760, %v21841_v28 }
  0xf0   :  { %18009 = vmatpush3.bf16.msra.mxu1 %v26800_v26  ;;  %26877 = vst [vmem:[#allocation111_spill] sm:$0xff] %v21912_v53  ;;  %26879 = vst [vmem:[#allocation112_spill] sm:$0xff] %v21917_v4  ;;  %v26884_v45 = vand.u32 4294901760, %v21851_v30  ;;  %v26888_v35 = vand.u32 4294901760, %v21898_v59 }
  0xf1   :  { %26876 = vst [vmem:[#allocation110_spill] sm:$0xff] %v21907_v7  ;;  %26881 = vst [vmem:[#allocation113_spill] sm:$0xff] %v21922_v25  ;;  %17969 = vmatpush3.bf16.msra.mxu0 %v21468_v15  ;;  %18043 = vmatprep.subr.bf16.mxu1 %v21746_v31  ;;  %v1279_v63 = vsub.f32 %v21841_v28, %v26882_v38  ;;  %v26883_v31 = vand.u32 4294901760, %v21846_v21  ;;  %v26885_v38 = vand.u32 4294901760, %v21867_v17  ;;  %v26890_v15 = vand.u32 4294901760, %v21900_v9 }
  0xf2   :  { %17971 = vmatprep.subr.bf16.mxu0 %v21474_v16  ;;  %v1405_v62 = vsub.f32 %v21851_v30, %v26884_v45  ;;  %v21979_v16 = vsub.f32 %v21898_v59, %v26888_v35 }
  0xf3   :  { %v1286_v8 = vsub.f32 %v21846_v21, %v26883_v31  ;;  %14336 = vmatmul.mubr.msk.f32.vlgmr.msra.gmra.mrb[4].mxu1 %vm235_vm5, %v26812_v0  ;;  %v21954_v26 = vsub.f32 %v21867_v17, %v26885_v38  ;;  %v26886_v31 = vand.u32 4294901760, %v21869_v6  ;;  %v21984_v46 = vsub.f32 %v21900_v9, %v26890_v15 }
  0xf4   :  { %18045 = vmatpush3.bf16.msra.mxu1 %v21748_v55  ;;  %14337 = vmatprep.mubr.msk.f32.mxu1 %vm238_vm6, %v26812_v0  ;;  %v26887_v55 = vand.u32 4294901760, %v21887_v24  ;;  %26889 = vst [vmem:[#allocation114_spill] sm:$0xff] %v21979_v16  ;;  %v21987_v38 = vpack.c.bf16 %v1273_v13, %v1266_v33  ;;  %v26895_v21 = vand.u32 4294901760, %v21907_v7  ;;  %v26896_v33 = vand.u32 4294901760, %v21917_v4 }
  0xf5   :  { %v21959_v45 = vsub.f32 %v21869_v6, %v26886_v31  ;;  %17973 = vmatpush3.bf16.msra.mxu0 %v21480_v19  ;;  %18047 = vmatprep.subr.bf16.mxu1 %v21816_v43  ;;  %v1399_v31 = vand.u32 4294901760, %v21882_v2  ;;  %26891 = vst [vmem:[#allocation115_spill] sm:$0xff] %v21984_v46  ;;  %v1280_v43 = vand.u32 4294901760, %v1279_v63  ;;  %v1287_v2 = vand.u32 4294901760, %v1286_v8 }
  0xf6   :  { %v1412_v30 = vsub.f32 %v21887_v24, %v26887_v55  ;;  %17975 = vmatprep.subr.bf16.mxu0 %v21486_v29  ;;  %26892 = vst [vmem:[#allocation116_spill] sm:$0xff] %v21987_v38  ;;  %v26893_v19 = vand.u32 4294901760, %v21896_v41  ;;  %v26894_v24 = vand.u32 4294901760, %v21902_v37  ;;  %v1300_v28 = vsub.f32 %v21907_v7, %v26895_v21 }
  0xf7   :  { %v1419_v63 = vsub.f32 %v21917_v4, %v26896_v33  ;;  %v26899_v21 = vand.u32 4294901760, %v21932_v58  ;;  %v1406_v29 = vand.u32 4294901760, %v1405_v62  ;;  %v22030_v7 = vpack.c.bf16 %v1287_v2, %v1280_v43 }
  0xf8   :  { %v1293_v55 = vsub.f32 %v21896_v41, %v26893_v19  ;;  %v1220_v35 = vsub.f32 %v21902_v37, %v26894_v24  ;;  %18049 = vmatpush3.bf16.msra.mxu1 %v21854_v12  ;;  %v26897_v19 = vand.u32 4294901760, %v21922_v25  ;;  %v26898_v24 = vand.u32 4294901760, %v21930_v5 }
  0xf9   :  { %v22015_v15 = vsub.f32 %v21932_v58, %v26899_v21  ;;  %17977 = vmatpush3.bf16.msra.mxu0 %v21490_v34  ;;  %18051 = vmatprep.subr.bf16.mxu1 %v21912_v53  ;;  %v1413_v33 = vand.u32 4294901760, %v1412_v30  ;;  %v22028_v21 = vpack.c.bf16 %v1399_v31, %v1392_v39  ;;  %26904 = vst [vmem:[#allocation119_spill] sm:$0xff] %v22030_v7  ;;  %v1301_v62 = vand.u32 4294901760, %v1300_v28 }
  0xfa   :  { %v1426_v13 = vsub.f32 %v21922_v25, %v26897_v19  ;;  %v22010_v8 = vsub.f32 %v21930_v5, %v26898_v24  ;;  %v26900_v25 = vand.u32 4294901760, %v21627_v14  ;;  %v26901_v24 = vand.u32 4294901760, %v21629_v42  ;;  %18011 = vmatprep.subr.bf16.mxu0 %v21777_v23 }
  0xfb   :  { %26903 = vst [vmem:[#allocation118_spill] sm:$0xff] %v22028_v21  ;;  %v1294_v34 = vand.u32 4294901760, %v1293_v55  ;;  %v1221_v53 = vand.u32 4294901760, %v1220_v35  ;;  %v26905_v30 = vand.u32 4294901760, %v21954_v26  ;;  %v26906_v19 = vand.u32 4294901760, %v21959_v45 }
  0xfc   :  { %v22025_v4 = vpack.c.bf16 %v26901_v24, %v26900_v25  ;;  %14334 = vmatmul.mubr.msk.f32.vlgmr.msra.gmra.mrb[4].mxu0 %vm235_vm5, %v26812_v0  ;;  %18053 = vmatpush3.bf16.msra.mxu1 %v21987_v38  ;;  %v1420_v25 = vand.u32 4294901760, %v1419_v63  ;;  %v1427_v42 = vand.u32 4294901760, %v1426_v13  ;;  %v26130_v43 = vand.u32 4294901760, %v22010_v8  ;;  %v22294_v38 = vld [vmem:[#allocation2 + $0x288] sm:$0xff] }
  0xfd   :  { %v1307_v12 = vsub.f32 %v21954_v26, %v26905_v30  ;;  %v1314_v14 = vsub.f32 %v21959_v45, %v26906_v19  ;;  %v26129_v28 = vand.u32 4294901760, %v22015_v15  ;;  %18013 = vmatpush3.bf16.msra.mxu0 %v21794_v54  ;;  %1222 = vmatprep.mubr.f32.mxu0 %v1221_v53  ;;  %v22046_v39 = vpack.c.bf16 %v1413_v33, %v1406_v29 }
  0xfe   :  { %26902 = vst [vmem:[#allocation117_spill] sm:$0xff] %v22025_v4  ;;  %v26908_v31 = vand.u32 4294901760, %v21979_v16  ;;  %v26909_v55 = vand.u32 4294901760, %v21984_v46  ;;  %v26910_v63 = vand.u32 4294901760, %v21659_v60  ;;  %v26911_v13 = vand.u32 4294901760, %v21661_v49  ;;  %18055 = vmatprep.subr.bf16.mxu1 %v22028_v21  ;;  %18015 = vmatprep.subr.bf16.mxu0 %v21814_v18  ;;  %v26999_v21 = vld [vmem:[#allocation53_spill] sm:$0xff] }
  0xff   :  { %26907 = vst [vmem:[#allocation120_spill] sm:$0xff] %v22046_v39  ;;  %v26913_v53 = vand.u32 4294901760, %v21671_v32  ;;  %v26914_v29 = vand.u32 4294901760, %v21708_v44  ;;  %v1308_v24 = vand.u32 4294901760, %v1307_v12  ;;  %v1315_v30 = vand.u32 4294901760, %v1314_v14 }
 0x100   :  { %v1433_v2 = vsub.f32 %v21979_v16, %v26908_v31  ;;  %v1440_v35 = vsub.f32 %v21984_v46, %v26909_v55  ;;  %v22058_v19 = vpack.c.bf16 %v26911_v13, %v26910_v63  ;;  %18057 = vmatpush3.bf16.msra.mxu1 %v22030_v7  ;;  %v22069_v31 = vpack.c.bf16 %v1301_v62, %v1294_v34 }
 0x101   :  { %v22066_v33 = vpack.c.bf16 %v26914_v29, %v26913_v53  ;;  %v22071_v60 = vpack.c.bf16 %v1427_v42, %v1420_v25  ;;  %v1321_v49 = vsub.f32 %v22010_v8, %v26130_v43  ;;  %v1328_v32 = vsub.f32 %v22015_v15, %v26129_v28  ;;  %18017 = vmatpush3.bf16.msra.mxu0 %v22025_v4  ;;  %v26981_v43 = vld [vmem:[#allocation100_spill] sm:$0xff] }
 0x102   :  { %26912 = vst [vmem:[#allocation121_spill] sm:$0xff] %v22058_v19  ;;  %26916 = vst [vmem:[#allocation123_spill] sm:$0xff] %v22069_v31  ;;  %18059 = vmatprep.subr.bf16.mxu1 %v22046_v39  ;;  %v1434_v12 = vand.u32 4294901760, %v1433_v2  ;;  %v1441_v44 = vand.u32 4294901760, %v1440_v35  ;;  %v26918_v14 = vand.u32 4294901760, %v21573_v57  ;;  %v26919_v62 = vand.u32 4294901760, %v21578_v1  ;;  %18019 = vmatprep.subr.bf16.mxu0 %v22058_v19 }
 0x103   :  { %26915 = vst [vmem:[#allocation122_spill] sm:$0xff] %v22066_v33  ;;  %26917 = vst [vmem:[#allocation124_spill] sm:$0xff] %v22071_v60  ;;  %v26920_v42 = vand.u32 4294901760, %v21712_v10  ;;  %v26921_v55 = vand.u32 4294901760, %v21714_v11  ;;  %v22094_v13 = vpack.c.bf16 %v1315_v30, %v1308_v24  ;;  %v1322_v2 = vand.u32 4294901760, %v1321_v49  ;;  %v26997_v39 = vld [vmem:[#allocation113_spill] sm:$0xff] }
 0x104   :  { %v1447_v34 = vsub.f32 %v21573_v57, %v26918_v14  ;;  %v1454_v25 = vsub.f32 %v21578_v1, %v26919_v62  ;;  %18061 = vmatpush3.bf16.msra.mxu1 %v22069_v31  ;;  %v1329_v35 = vand.u32 4294901760, %v1328_v32  ;;  %v26924_v53 = vand.u32 4294901760, %v21611_v56  ;;  %v26996_v31 = vld [vmem:[#allocation112_spill] sm:$0xff] }
 0x105   :  { %v22091_v63 = vpack.c.bf16 %v26921_v55, %v26920_v42  ;;  %26923 = vst [vmem:[#allocation126_spill] sm:$0xff] %v22094_v13  ;;  %v26925_v14 = vand.u32 4294901760, %v21616_v61  ;;  %v26926_v11 = vand.u32 4294901760, %v21758_v27  ;;  %v26927_v62 = vand.u32 4294901760, %v21760_v22  ;;  %18021 = vmatpush3.bf16.msra.mxu0 %v22066_v33  ;;  %18063 = vmatprep.subr.bf16.mxu1 %v22071_v60  ;;  %v22266_v60 = vld [vmem:[#allocation2 + $0x2f0] sm:$0xff] }
 0x106   :  { %v1335_v29 = vsub.f32 %v21611_v56, %v26924_v53  ;;  %v22111_v24 = vpack.c.bf16 %v1441_v44, %v1434_v12  ;;  %v1448_v30 = vand.u32 4294901760, %v1447_v34  ;;  %v1455_v49 = vand.u32 4294901760, %v1454_v25 }
 0x107   :  { %26922 = vst [vmem:[#allocation125_spill] sm:$0xff] %v22091_v63  ;;  %v1342_v10 = vsub.f32 %v21616_v61, %v26925_v14  ;;  %v22107_v42 = vpack.c.bf16 %v26927_v62, %v26926_v11  ;;  %v26930_v32 = vand.u32 4294901760, %v21762_v52  ;;  %v26931_v55 = vand.u32 4294901760, %v21798_v47  ;;  %18023 = vmatprep.subr.bf16.mxu0 %v22091_v63  ;;  %v26934_v11 = vld [vmem:[#allocation52_spill] sm:$0xff] }
 0x108   :  { %26929 = vst [vmem:[#allocation128_spill] sm:$0xff] %v22111_v24  ;;  %18065 = vmatpush3.bf16.msra.mxu1 %v22094_v13  ;;  %v22121_v22 = vpack.c.bf16 %v1329_v35, %v1322_v2  ;;  %v1336_v27 = vand.u32 4294901760, %v1335_v29  ;;  %vm237_vm7 = vcmp.eq.f32.partialorder %v21496_v40, %v26934_v11  ;;  %v26935_v12 = vand.u32 4294901760, %v21807_v51  ;;  %v22281_v11 = vld [vmem:[#allocation2 + $0x278] sm:$0xff] }
 0x109   :  { %26928 = vst [vmem:[#allocation127_spill] sm:$0xff] %v22107_v42  ;;  %v22117_v53 = vpack.c.bf16 %v26931_v55, %v26930_v32  ;;  %v1343_v14 = vand.u32 4294901760, %v1342_v10  ;;  %v26936_v44 = vand.u32 4294901760, %v21824_v36  ;;  %18025 = vmatpush3.bf16.msra.mxu0 %v22107_v42  ;;  %18067 = vmatprep.subr.bf16.mxu1 %v22111_v24  ;;  %v22133_v47 = vpack.c.bf16 %v1455_v49, %v1448_v30  ;;  %v26954_v32 = vld [vmem:[#allocation80_spill] sm:$0xff]  ;;  %v22258_v24 = vld [vmem:[#allocation2 + $0x268] sm:$0xff] }
 0x10a   :  { %26933 = vst [vmem:[#allocation130_spill] sm:$0xff] %v22121_v22  ;;  %v26939_v34 = vand.u32 4294901760, %v21833_v3  ;;  %v26940_v25 = vand.u32 4294901760, %v21835_v20  ;;  %v14325_v51 = vsel %vm237_vm7, 1.0, %v26868_v48  ;;  %v26943_v35 = vand.u32 4294901760, %v21867_v17 }
 0x10b   :  { %26932 = vst [vmem:[#allocation129_spill] sm:$0xff] %v22117_v53  ;;  %v22129_v52 = vpack.c.bf16 %v26936_v44, %v26935_v12  ;;  %26938 = vst [vmem:[#allocation132_spill] sm:$0xff] %v22133_v47  ;;  %18027 = vmatprep.subr.bf16.mxu0 %v22117_v53  ;;  %v22147_v36 = vpack.c.bf16 %v1343_v14, %v1336_v27  ;;  %v26944_v29 = vand.u32 4294901760, %v21869_v6  ;;  %v26946_v20 = vand.u32 4294901760, %v21898_v59  ;;  %v26952_v59 = vld [vmem:[#allocation79_spill] sm:$0xff]  ;;  %v26960_v44 = vld [vmem:[#allocation82_spill] sm:$0xff] }
 0x10c   :  { %v22139_v2 = vpack.c.bf16 %v26940_v25, %v26939_v34  ;;  %18069 = vmatpush3.bf16.msra.mxu1 %v22121_v22  ;;  %v26947_v10 = vand.u32 4294901760, %v21900_v9  ;;  %v22164_v30 = vsub.f32 %v14325_v51, %v14325_v51  ;;  %v26949_v17 = vand.u32 4294901760, %v21930_v5 }
 0x10d   :  { %26937 = vst [vmem:[#allocation131_spill] sm:$0xff] %v22129_v52  ;;  %26942 = vst [vmem:[#allocation134_spill] sm:$0xff] %v22147_v36  ;;  %v22153_v3 = vpack.c.bf16 %v26944_v29, %v26943_v35  ;;  %18029 = vmatpush3.bf16.msra.mxu0 %v22129_v52  ;;  %18071 = vmatprep.subr.bf16.mxu1 %v22133_v47  ;;  %v26950_v6 = vand.u32 4294901760, %v21932_v58  ;;  %v26953_v9 = vand.u32 4294901760, %v26952_v59  ;;  %v26955_v55 = vand.u32 4294901760, %v26954_v32  ;;  %v26958_v58 = vld [vmem:[#allocation81_spill] sm:$0xff] }
 0x10e   :  { %26941 = vst [vmem:[#allocation133_spill] sm:$0xff] %v22139_v2  ;;  %v22161_v62 = vpack.c.bf16 %v26947_v10, %v26946_v20  ;;  %18031 = vmatprep.subr.bf16.mxu0 %v22139_v2  ;;  %v26131_v14 = vand.u32 4294901760, %v22164_v30  ;;  %v26957_v5 = vand.u32 4294901760, %v21902_v37  ;;  %v26959_v12 = vand.u32 4294901760, %v26958_v58  ;;  %v26963_v35 = vld [vmem:[#allocation83_spill] sm:$0xff]  ;;  %v26964_v29 = vld [vmem:[#allocation84_spill] sm:$0xff] }
 0x10f   :  { %26945 = vst [vmem:[#allocation135_spill] sm:$0xff] %v22153_v3  ;;  %v22171_v49 = vpack.c.bf16 %v26950_v6, %v26949_v17  ;;  %v22179_v27 = vpack.c.bf16 %v26955_v55, %v26953_v9  ;;  %v26961_v34 = vand.u32 4294901760, %v26960_v44  ;;  %v22204_v20 = vpack.c.bf16 %v26964_v29, %v26963_v35  ;;  %v26966_v10 = vld [vmem:[#allocation85_spill] sm:$0xff]  ;;  %v26967_v17 = vld [vmem:[#allocation86_spill] sm:$0xff]  ;;  %v26969_v9 = vld [vmem:[#allocation88_spill] sm:$0xff] }
 0x110   :  { %26948 = vst [vmem:[#allocation136_spill] sm:$0xff] %v22161_v62  ;;  %18073 = vmatpush3.bf16.msra.mxu1 %v22147_v36  ;;  %v1226_v51 = vsub.f32 %v22164_v30, %v26131_v14  ;;  %v22211_v6 = vpack.c.bf16 %v26967_v17, %v26966_v10  ;;  %v26970_v32 = vld [vmem:[#allocation89_spill] sm:$0xff]  ;;  %v26973_v58 = vld [vmem:[#allocation92_spill] sm:$0xff]  ;;  %v26987_v36 = vld [vmem:[#allocation107_spill] sm:$0xff]  ;;  %v22273_v7 = vpack.c.bf16 %v26997_v39, %v26996_v31 }
 0x111   :  { %26951 = vst [vmem:[#allocation137_spill] sm:$0xff] %v22171_v49  ;;  %18033 = vmatpush3.bf16.msra.mxu0 %v22153_v3  ;;  %18107 = vmatprep.subr.bf16.mxu1 %v21777_v23  ;;  %26956 = vst [vmem:[#allocation79_spill] sm:$0xff] %v22179_v27  ;;  %v22194_v25 = vpack.c.bf16 %v26961_v34, %v26959_v12  ;;  %v22216_v55 = vpack.c.bf16 %v26970_v32, %v26969_v9  ;;  %v26975_v44 = vld [vmem:[#allocation93_spill] sm:$0xff]  ;;  %v26976_v34 = vld [vmem:[#allocation94_spill] sm:$0xff] }
 0x112   :  { %18035 = vmatprep.subr.bf16.mxu0 %v22161_v62  ;;  %26965 = vst [vmem:[#allocation81_spill] sm:$0xff] %v22204_v20  ;;  %26968 = vst [vmem:[#allocation82_spill] sm:$0xff] %v22211_v6  ;;  %v1227_v59 = vand.u32 4294901760, %v1226_v51  ;;  %v22229_v51 = vpack.c.bf16 %v26976_v34, %v26975_v44  ;;  %v26982_v14 = vld [vmem:[#allocation101_spill] sm:$0xff]  ;;  %vm240_vm8 = vcmp.eq.f32.partialorder %v21496_v40, %v26999_v21 }
 0x113   :  { %14338 = vmatmul.mubr.msk.f32.vlgmr.msra.gmra.mrb[6].mxu1 %vm237_vm7, %v26812_v0  ;;  %26962 = vst [vmem:[#allocation80_spill] sm:$0xff] %v22194_v25  ;;  %26971 = vst [vmem:[#allocation83_spill] sm:$0xff] %v22216_v55  ;;  %v26988_v47 = vld [vmem:[#allocation109_spill] sm:$0xff] }
 0x114   :  { %18109 = vmatpush3.bf16.msra.mxu1 %v21794_v54  ;;  %1702 = vmatprep.mubr.f32.mxu1 %v26957_v5  ;;  %v26972_v5 = vld [vmem:[#allocation91_spill] sm:$0xff]  ;;  %26977 = vst [vmem:[#allocation85_spill] sm:$0xff] %v22229_v51  ;;  %v22253_v22 = vpack.c.bf16 %v26988_v47, %v26987_v36  ;;  %26991 = vst [vmem:[#allocation93_spill] sm:$0xff] %v22258_v24 }
 0x115   :  { %18037 = vmatpush3.bf16.msra.mxu0 %v22171_v49  ;;  %18111 = vmatprep.subr.bf16.mxu1 %v21814_v18  ;;  %v22223_v12 = vpack.c.bf16 %v26973_v58, %v26972_v5  ;;  %26998 = vst [vmem:[#allocation100_spill] sm:$0xff] %v22273_v7  ;;  %27000 = vst [vmem:[#allocation101_spill] sm:$0xff] %v22279_v50 }
 0x116   :  { %18039 = vmatprep.subr.bf16.mxu0 %v22179_v27  ;;  %26989 = vst [vmem:[#allocation91_spill] sm:$0xff] %v22253_v22 }
 0x117   :  { %26974 = vst [vmem:[#allocation84_spill] sm:$0xff] %v22223_v12 }
 0x118   :  { %18113 = vmatpush3.bf16.msra.mxu1 %v22025_v4 }
 0x119   :  { %18041 = vmatpush3.bf16.msra.mxu0 %v22194_v25  ;;  %18115 = vmatprep.subr.bf16.mxu1 %v22058_v19 }
 0x11a   :  { %18075 = vmatprep.subr.bf16.mxu0 %v22204_v20 }
 0x11c   :  { %1228 = vmatmul.mubr.f32.vlgmr.msra.gmra.mrb[6].mxu0 %v1227_v59  ;;  %18117 = vmatpush3.bf16.msra.mxu1 %v22066_v33  ;;  %v26978_v59 = vld [vmem:[#allocation95_spill] sm:$0xff] }
 0x11d   :  { %18077 = vmatpush3.bf16.msra.mxu0 %v22211_v6  ;;  %1595 = vmatprep.mubr.f32.mxu0 %v21902_v37  ;;  %v26979_v37 = vld [vmem:[#allocation98_spill] sm:$0xff]  ;;  %v22241_v6 = vpack.c.bf16 %v26982_v14, %v26981_v43  ;;  %26994 = vst [vmem:[#allocation95_spill] sm:$0xff] %v22266_v60 }
 0x11e   :  { %18119 = vmatprep.subr.bf16.mxu1 %v22091_v63  ;;  %18079 = vmatprep.subr.bf16.mxu0 %v22216_v55  ;;  %v22236_v28 = vpack.c.bf16 %v26979_v37, %v26978_v59  ;;  %v26984_v55 = vld [vmem:[#allocation105_spill] sm:$0xff] }
 0x11f   :  { %26983 = vst [vmem:[#allocation88_spill] sm:$0xff] %v22241_v6  ;;  %27001 = vst [vmem:[#allocation105_spill] sm:$0xff] %v22281_v11 }
 0x120   :  { %18121 = vmatpush3.bf16.msra.mxu1 %v22107_v42  ;;  %26980 = vst [vmem:[#allocation86_spill] sm:$0xff] %v22236_v28 }
 0x121   :  { %18081 = vmatpush3.bf16.msra.mxu0 %v22223_v12  ;;  %18123 = vmatprep.subr.bf16.mxu1 %v22117_v53  ;;  %v26985_v12 = vld [vmem:[#allocation106_spill] sm:$0xff] }
 0x122   :  { %18083 = vmatprep.subr.bf16.mxu0 %v22229_v51  ;;  %v22248_v20 = vpack.c.bf16 %v26985_v12, %v26984_v55  ;;  %v22256_v51 = vld [vmem:[#allocation2 + $0x260] sm:$0xff] }
 0x123   :  { %26990 = vst [vmem:[#allocation92_spill] sm:$0xff] %v22256_v51 }
 0x124   :  { %18125 = vmatpush3.bf16.msra.mxu1 %v22129_v52  ;;  %26986 = vst [vmem:[#allocation89_spill] sm:$0xff] %v22248_v20  ;;  %v22309_v52 = vld [vmem:[#allocation2 + $0x200] sm:$0xff] }
 0x125   :  { %18085 = vmatpush3.bf16.msra.mxu0 %v22236_v28  ;;  %18127 = vmatprep.subr.bf16.mxu1 %v22139_v2  ;;  %v26992_v28 = vld [vmem:[#allocation110_spill] sm:$0xff]  ;;  %v27008_v2 = vand.u32 4294901760, %v22266_v60 }
 0x126   :  { %18087 = vmatprep.subr.bf16.mxu0 %v22241_v6  ;;  %v22264_v13 = vpack.c.bf16 %v26992_v28, %v21896_v41  ;;  %v22268_v6 = vld [vmem:[#allocation2 + $0x2f8] sm:$0xff] }
 0x127   :  { %26995 = vst [vmem:[#allocation98_spill] sm:$0xff] %v22268_v6  ;;  %v22329_v21 = vsub.f32 %v22266_v60, %v27008_v2  ;;  %v22347_v2 = vpack.c.bf16 %v21578_v1, %v21573_v57 }
 0x128   :  { %18129 = vmatpush3.bf16.msra.mxu1 %v22153_v3  ;;  %26993 = vst [vmem:[#allocation94_spill] sm:$0xff] %v22264_v13  ;;  %v14328_v3 = vsel %vm240_vm8, 1.0, %v26868_v48 }
 0x129   :  { %18089 = vmatpush3.bf16.msra.mxu0 %v22248_v20  ;;  %18131 = vmatprep.subr.bf16.mxu1 %v22161_v62  ;;  %v22284_v62 = vld [vmem:[#allocation2 + $0x280] sm:$0xff]  ;;  %v22292_v20 = vpack.c.bf16 %v21959_v45, %v21954_v26  ;;  %27012 = vst [vmem:[#allocation113_spill] sm:$0xff] %v22347_v2 }
 0x12a   :  { %18091 = vmatprep.subr.bf16.mxu0 %v22253_v22  ;;  %v27007_v22 = vld [vmem:[#allocation19_spill] sm:$0xff] }
 0x12b   :  { %27002 = vst [vmem:[#allocation106_spill] sm:$0xff] %v22292_v20 }
 0x12c   :  { %18133 = vmatpush3.bf16.msra.mxu1 %v22171_v49  ;;  %v22299_v49 = vpack.c.bf16 %v21984_v46, %v21979_v16  ;;  %v27005_v16 = vand.u32 4294901760, %v22258_v24 }
 0x12d   :  { %18093 = vmatpush3.bf16.msra.mxu0 %v22264_v13  ;;  %18135 = vmatprep.subr.bf16.mxu1 %v22179_v27  ;;  %v26194_v27 = vmov 1   ;;  %v22324_v13 = vld [vmem:[#allocation2 + $0x208] sm:$0xff] }
 0x12e   :  { %18095 = vmatprep.subr.bf16.mxu0 %v22273_v7  ;;  %27003 = vst [vmem:[#allocation107_spill] sm:$0xff] %v22299_v49  ;;  %20913 = vset.pattern.permute.xlu0 %v26194_v27  ;;  %v27004_v7 = vand.u32 4294901760, %v22256_v51  ;;  %v22319_v48 = vsub.f32 %v22258_v24, %v27005_v16  ;;  %v22340_v16 = vpack.c.bf16 %v22015_v15, %v22010_v8  ;;  %v22398_v24 = vld [vmem:[#allocation2 + $0x210] sm:$0xff] }
 0x12f   :  { %3708 = vperm.xlu0 %20913, %v27007_v22   ;;  %v22342_v27 = vsub.f32 %v14328_v3, %v14328_v3  ;;  %v27015_v3 = vand.u32 4294901760, %v22164_v30  ;;  %v22390_v22 = vpack.c.bf16 %v21616_v61, %v21611_v56  ;;  %v27028_v61 = vand.u32 4294901760, %v22309_v52 }
 0x130   :  { %v22314_v46 = vsub.f32 %v22256_v51, %v27004_v7  ;;  %27006 = vst [vmem:[#allocation109_spill] sm:$0xff] %v22319_v48  ;;  %18137 = vmatpush3.bf16.msra.mxu1 %v22194_v25  ;;  %v27009_v7 = vand.u32 4294901760, %v22268_v6  ;;  %27010 = vst [vmem:[#allocation110_spill] sm:$0xff] %v22340_v16  ;;  %v22400_v25 = vld [vmem:[#allocation2 + $0x218] sm:$0xff] }
 0x131   :  { %18097 = vmatpush3.bf16.msra.mxu0 %v22292_v20  ;;  %18171 = vmatprep.subr.bf16.mxu1 %v21777_v23  ;;  %27011 = vst [vmem:[#allocation112_spill] sm:$0xff] %v22342_v27  ;;  %v27014_v23 = vand.u32 4294901760, %v22281_v11  ;;  %27021 = vst [vmem:[#allocation140_spill] sm:$0xff] %v22390_v22  ;;  %v22413_v56 = vsub.f32 %v22309_v52, %v27028_v61  ;;  %v27039_v61 = vand.u32 4294901760, %v26967_v17 }
 0x132   :  { %v22334_v51 = vsub.f32 %v22268_v6, %v27009_v7  ;;  %18099 = vmatprep.subr.bf16.mxu0 %v22299_v49  ;;  %v27013_v7 = vand.u32 4294901760, %v22279_v50  ;;  %v27016_v49 = vand.u32 4294901760, %v22284_v62  ;;  %v27025_v1 = vand.u32 4294901760, %v22314_v46 }
 0x133   :  { %v22358_v6 = vsub.f32 %v22281_v11, %v27014_v23  ;;  %1706 = vmatmul.mubr.f32.vlgmr.msra.gmra.mrb[8].mxu1 %v27015_v3  ;;  %v27019_v3 = vand.u32 4294901760, %v22294_v38  ;;  %27029 = vst [vmem:[#allocation143_spill] sm:$0xff] %v22413_v56 }
 0x134   :  { %v22353_v20 = vsub.f32 %v22279_v50, %v27013_v7  ;;  %v22365_v57 = vsub.f32 %v22284_v62, %v27016_v49  ;;  %18173 = vmatpush3.bf16.msra.mxu1 %v21794_v54  ;;  %14341 = vmatprep.mubr.msk.f32.mxu1 %vm238_vm6, %v26812_v0  ;;  %v22380_v49 = vld [vmem:[#allocation2 + $0x290] sm:$0xff]  ;;  %v22382_v50 = vld [vmem:[#allocation2 + $0x298] sm:$0xff]  ;;  %v27022_v54 = vand.u32 4294901760, %v26963_v35  ;;  %v27031_v7 = vand.u32 4294901760, %v22334_v51  ;;  %v22433_v35 = vld [vmem:[#allocation2 + $0x2a8] sm:$0xff] }
 0x135   :  { %v22378_v11 = vsub.f32 %v22294_v38, %v27019_v3  ;;  %18101 = vmatpush3.bf16.msra.mxu0 %v22340_v16  ;;  %18175 = vmatprep.subr.bf16.mxu1 %v21814_v18  ;;  %v27023_v3 = vand.u32 4294901760, %v26964_v29  ;;  %v27026_v16 = vand.u32 4294901760, %v22319_v48  ;;  %v27042_v29 = vand.u32 4294901760, %v26970_v32 }
 0x136   :  { %27017 = vst [vmem:[#allocation138_spill] sm:$0xff] %v22365_v57  ;;  %18103 = vmatprep.subr.bf16.mxu0 %v22347_v2 }
 0x137   :  { %27020 = vst [vmem:[#allocation139_spill] sm:$0xff] %v22378_v11  ;;  %v22396_v60 = vpack.c.bf16 %v27023_v3, %v27022_v54  ;;  %v22407_v18 = vpack.c.bf16 %v27026_v16, %v27025_v1  ;;  %v22415_v54 = vld [vmem:[#allocation2 + $0x2a0] sm:$0xff]  ;;  %v27030_v3 = vand.u32 4294901760, %v22329_v21  ;;  %v27033_v1 = vand.u32 4294901760, %v22324_v13 }
 0x138   :  { %18177 = vmatpush3.bf16.msra.mxu1 %v22025_v4  ;;  %v27035_v16 = vand.u32 4294901760, %v22353_v20 }
 0x139   :  { %27024 = vst [vmem:[#allocation141_spill] sm:$0xff] %v22396_v60  ;;  %27027 = vst [vmem:[#allocation142_spill] sm:$0xff] %v22407_v18  ;;  %v22423_v48 = vpack.c.bf16 %v27031_v7, %v27030_v3  ;;  %v22429_v2 = vsub.f32 %v22324_v13, %v27033_v1  ;;  %18105 = vmatpush3.bf16.msra.mxu0 %v22390_v22  ;;  %18179 = vmatprep.subr.bf16.mxu1 %v22058_v19  ;;  %v27038_v18 = vand.u32 4294901760, %v26966_v10 }
 0x13a   :  { %18139 = vmatprep.subr.bf16.mxu0 %v22396_v60  ;;  %v27041_v3 = vand.u32 4294901760, %v26969_v9  ;;  %v27044_v10 = vand.u32 4294901760, %v22342_v27  ;;  %v27046_v9 = vand.u32 4294901760, %v22380_v49  ;;  %v27051_v7 = vand.u32 4294901760, %v22398_v24 }
 0x13b   :  { %27032 = vst [vmem:[#allocation144_spill] sm:$0xff] %v22423_v48  ;;  %27034 = vst [vmem:[#allocation145_spill] sm:$0xff] %v22429_v2  ;;  %v27036_v48 = vand.u32 4294901760, %v22358_v6  ;;  %v22451_v4 = vpack.c.bf16 %v27039_v61, %v27038_v18  ;;  %v27045_v18 = vand.u32 4294901760, %v22365_v57  ;;  %v27059_v60 = vand.u32 4294901760, %v26976_v34 }
 0x13c   :  { %v22466_v17 = vsub.f32 %v22342_v27, %v27044_v10  ;;  %v22475_v32 = vsub.f32 %v22380_v49, %v27046_v9  ;;  %1598 = vmatmul.mubr.f32.vlgmr.msra.gmra.mrb[8].mxu0 %v22164_v30  ;;  %18181 = vmatpush3.bf16.msra.mxu1 %v22066_v33  ;;  %v27050_v10 = vand.u32 4294901760, %v22378_v11  ;;  %v27053_v9 = vand.u32 4294901760, %v22400_v25 }
 0x13d   :  { %v22443_v1 = vpack.c.bf16 %v27036_v48, %v27035_v16  ;;  %27040 = vst [vmem:[#allocation147_spill] sm:$0xff] %v22451_v4  ;;  %v22459_v48 = vpack.c.bf16 %v27042_v29, %v27041_v3  ;;  %v2211_v61 = vsub.f32 %v22365_v57, %v27045_v18  ;;  %v27048_v29 = vand.u32 4294901760, %v22382_v50  ;;  %18141 = vmatpush3.bf16.msra.mxu0 %v22451_v4 }
 0x13e   :  { %27047 = vst [vmem:[#allocation149_spill] sm:$0xff] %v22475_v32  ;;  %v2218_v18 = vsub.f32 %v22378_v11, %v27050_v10  ;;  %v22490_v16 = vsub.f32 %v22398_v24, %v27051_v7  ;;  %v22495_v22 = vsub.f32 %v22400_v25, %v27053_v9  ;;  %14339 = vmatprep.mubr.msk.f32.mxu0 %vm238_vm6, %v26812_v0  ;;  %v27055_v30 = vand.u32 4294901760, %v26972_v5 }
 0x13f   :  { %27037 = vst [vmem:[#allocation146_spill] sm:$0xff] %v22443_v1  ;;  %27043 = vst [vmem:[#allocation148_spill] sm:$0xff] %v22459_v48  ;;  %v22480_v3 = vsub.f32 %v22382_v50, %v27048_v29  ;;  %v27056_v29 = vand.u32 4294901760, %v26973_v58  ;;  %v27058_v7 = vand.u32 4294901760, %v26975_v44  ;;  %v27061_v9 = vand.u32 4294901760, %v22415_v54  ;;  %18183 = vmatprep.subr.bf16.mxu1 %v22091_v63  ;;  %18143 = vmatprep.subr.bf16.mxu0 %v22459_v48 }
 0x140   :  { %27052 = vst [vmem:[#allocation151_spill] sm:$0xff] %v22490_v16  ;;  %27054 = vst [vmem:[#allocation152_spill] sm:$0xff] %v22495_v22  ;;  %v27063_v5 = vand.u32 4294901760, %v26978_v59  ;;  %v27064_v58 = vand.u32 4294901760, %v26979_v37  ;;  %v27066_v44 = vand.u32 4294901760, %v26981_v43  ;;  %v27071_v48 = vand.u32 4294901760, %v22413_v56  ;;  %18185 = vmatpush3.bf16.msra.mxu1 %v22107_v42 }
 0x141   :  { %27049 = vst [vmem:[#allocation150_spill] sm:$0xff] %v22480_v3  ;;  %v22506_v10 = vpack.c.bf16 %v27056_v29, %v27055_v30  ;;  %v22512_v33 = vpack.c.bf16 %v27059_v60, %v27058_v7  ;;  %v22517_v4 = vsub.f32 %v22415_v54, %v27061_v9  ;;  %v27067_v60 = vand.u32 4294901760, %v26982_v14  ;;  %v22538_v9 = vld [vmem:[#allocation2 + $0x220] sm:$0xff]  ;;  %18187 = vmatprep.subr.bf16.mxu1 %v22117_v53 }
 0x142   :  { %v22525_v30 = vpack.c.bf16 %v27064_v58, %v27063_v5  ;;  %v27069_v29 = vand.u32 4294901760, %v22433_v35  ;;  %v2099_v59 = vsub.f32 %v22413_v56, %v27071_v48  ;;  %v27072_v37 = vand.u32 4294901760, %v22429_v2  ;;  %v22548_v58 = vld [vmem:[#allocation2 + $0x228] sm:$0xff] }
 0x143   :  { %27057 = vst [vmem:[#allocation153_spill] sm:$0xff] %v22506_v10  ;;  %27060 = vst [vmem:[#allocation154_spill] sm:$0xff] %v22512_v33  ;;  %v22531_v34 = vpack.c.bf16 %v27067_v60, %v27066_v44  ;;  %v2212_v44 = vand.u32 4294901760, %v2211_v61  ;;  %v2219_v60 = vand.u32 4294901760, %v2218_v18  ;;  %18145 = vmatpush3.bf16.msra.mxu0 %v22506_v10  ;;  %v27073_v48 = vand.u32 4294901760, %v26984_v55  ;;  %v27094_v18 = vld [vmem:[#allocation133_spill] sm:$0xff] }
 0x144   :  { %27062 = vst [vmem:[#allocation155_spill] sm:$0xff] %v22517_v4  ;;  %27065 = vst [vmem:[#allocation156_spill] sm:$0xff] %v22525_v30  ;;  %v22536_v7 = vsub.f32 %v22433_v35, %v27069_v29  ;;  %v2106_v5 = vsub.f32 %v22429_v2, %v27072_v37  ;;  %v27074_v37 = vand.u32 4294901760, %v26985_v12  ;;  %v27076_v14 = vand.u32 4294901760, %v26987_v36  ;;  %18147 = vmatprep.subr.bf16.mxu0 %v22512_v33  ;;  %v27095_v33 = vld [vmem:[#allocation114_spill] sm:$0xff] }
 0x145   :  { %27068 = vst [vmem:[#allocation157_spill] sm:$0xff] %v22531_v34  ;;  %v27077_v42 = vand.u32 4294901760, %v26988_v47  ;;  %v27079_v29 = vand.u32 4294901760, %v21896_v41  ;;  %v27080_v55 = vand.u32 4294901760, %v26992_v28  ;;  %v27082_v12 = vand.u32 4294901760, %v26996_v31  ;;  %v27090_v47 = vld [vmem:[#allocation131_spill] sm:$0xff] }
 0x146   :  { %27070 = vst [vmem:[#allocation158_spill] sm:$0xff] %v22536_v7  ;;  %v22559_v43 = vpack.c.bf16 %v27074_v37, %v27073_v48  ;;  %v27083_v36 = vand.u32 4294901760, %v26997_v39  ;;  %v27085_v37 = vand.u32 4294901760, %v21954_v26  ;;  %v27086_v41 = vand.u32 4294901760, %v21959_v45  ;;  %18189 = vmatpush3.bf16.msra.mxu1 %v27090_v47 }
 0x147   :  { %v22565_v61 = vpack.c.bf16 %v27077_v42, %v27076_v14  ;;  %v22574_v10 = vpack.c.bf16 %v27080_v55, %v27079_v29  ;;  %v22584_v14 = vld [vmem:[#allocation2 + $0x2b0] sm:$0xff]  ;;  %v2100_v28 = vand.u32 4294901760, %v2099_v59  ;;  %v27088_v29 = vand.u32 4294901760, %v22475_v32  ;;  %v22611_v42 = vld [vmem:[#allocation2 + $0x238] sm:$0xff]  ;;  %18149 = vmatpush3.bf16.msra.mxu0 %v22525_v30  ;;  %18191 = vmatprep.subr.bf16.mxu1 %v27094_v18  ;;  %v22643_v18 = vld [vmem:[#allocation2 + $0x2c8] sm:$0xff] }
 0x148   :  { %27075 = vst [vmem:[#allocation159_spill] sm:$0xff] %v22559_v43  ;;  %v22580_v48 = vpack.c.bf16 %v27083_v36, %v27082_v12  ;;  %v22590_v63 = vpack.c.bf16 %v27086_v41, %v27085_v37  ;;  %v27089_v39 = vand.u32 4294901760, %v22480_v3  ;;  %v22598_v12 = vld [vmem:[#allocation2 + $0x2b8] sm:$0xff]  ;;  %v22600_v36 = vld [vmem:[#allocation2 + $0x230] sm:$0xff]  ;;  %v22603_v26 = vpack.c.bf16 %v2219_v60, %v2212_v44  ;;  %18151 = vmatprep.subr.bf16.mxu0 %v22531_v34 }
 0x149   :  { %27078 = vst [vmem:[#allocation160_spill] sm:$0xff] %v22565_v61  ;;  %27081 = vst [vmem:[#allocation161_spill] sm:$0xff] %v22574_v10  ;;  %v2225_v31 = vsub.f32 %v22475_v32, %v27088_v29  ;;  %v2107_v45 = vand.u32 4294901760, %v2106_v5  ;;  %v27092_v37 = vand.u32 4294901760, %v22490_v16  ;;  %v27093_v41 = vand.u32 4294901760, %v22495_v22  ;;  %v27097_v60 = vld [vmem:[#allocation115_spill] sm:$0xff] }
 0x14a   :  { %27084 = vst [vmem:[#allocation162_spill] sm:$0xff] %v22580_v48  ;;  %27087 = vst [vmem:[#allocation163_spill] sm:$0xff] %v22590_v63  ;;  %v2232_v55 = vsub.f32 %v22480_v3, %v27089_v39  ;;  %v22613_v39 = vld [vmem:[#allocation2 + $0x2c0] sm:$0xff]  ;;  %v27096_v44 = vand.u32 4294901760, %v27095_v33  ;;  %v27098_v5 = vand.u32 4294901760, %v27097_v60  ;;  %v27103_v30 = vand.u32 4294901760, %v22536_v7 }
 0x14b   :  { %27091 = vst [vmem:[#allocation164_spill] sm:$0xff] %v22603_v26  ;;  %v2113_v59 = vsub.f32 %v22490_v16, %v27092_v37  ;;  %v2120_v29 = vsub.f32 %v22495_v22, %v27093_v41  ;;  %v27100_v37 = vand.u32 4294901760, %v22517_v4  ;;  %v27101_v41 = vand.u32 4294901760, %v22538_v9  ;;  %v22656_v16 = vld [vmem:[#allocation2 + $0x240] sm:$0xff]  ;;  %18153 = vmatpush3.bf16.msra.mxu0 %v22559_v43 }
 0x14c   :  { %v22621_v47 = vpack.c.bf16 %v27098_v5, %v27096_v44  ;;  %v2246_v33 = vsub.f32 %v22536_v7, %v27103_v30  ;;  %v27104_v44 = vand.u32 4294901760, %v22548_v58  ;;  %v2233_v1 = vand.u32 4294901760, %v2232_v55  ;;  %18155 = vmatprep.subr.bf16.mxu0 %v22565_v61 }
 0x14d   :  { %v2239_v53 = vsub.f32 %v22517_v4, %v27100_v37  ;;  %v22629_v19 = vsub.f32 %v22538_v9, %v27101_v41  ;;  %v2226_v41 = vand.u32 4294901760, %v2225_v31  ;;  %v27106_v4 = vld [vmem:[#allocation135_spill] sm:$0xff]  ;;  %v27107_v30 = vand.u32 4294901760, %v22284_v62  ;;  %v27111_v31 = vld [vmem:[#allocation136_spill] sm:$0xff] }
 0x14e   :  { %27099 = vst [vmem:[#allocation114_spill] sm:$0xff] %v22621_v47  ;;  %v22639_v60 = vsub.f32 %v22548_v58, %v27104_v44  ;;  %18193 = vmatpush3.bf16.msra.mxu1 %v27106_v4  ;;  %v27108_v7 = vand.u32 4294901760, %v22294_v38  ;;  %v22654_v22 = vpack.c.bf16 %v2107_v45, %v2100_v28  ;;  %v2114_v5 = vand.u32 4294901760, %v2113_v59  ;;  %v22669_v28 = vld [vmem:[#allocation2 + $0x2d0] sm:$0xff]  ;;  %v22671_v45 = vld [vmem:[#allocation2 + $0x2d8] sm:$0xff] }
 0x14f   :  { %27102 = vst [vmem:[#allocation115_spill] sm:$0xff] %v22629_v19  ;;  %v2121_v37 = vand.u32 4294901760, %v2120_v29  ;;  %18195 = vmatprep.subr.bf16.mxu1 %v27111_v31  ;;  %v2240_v55 = vand.u32 4294901760, %v2239_v53  ;;  %v27112_v23 = vand.u32 4294901760, %v22584_v14  ;;  %v2247_v59 = vand.u32 4294901760, %v2246_v33  ;;  %18157 = vmatpush3.bf16.msra.mxu0 %v22574_v10 }
 0x150   :  { %27105 = vst [vmem:[#allocation165_spill] sm:$0xff] %v22639_v60  ;;  %v22652_v44 = vpack.c.bf16 %v27108_v7, %v27107_v30  ;;  %27110 = vst [vmem:[#allocation167_spill] sm:$0xff] %v22654_v22  ;;  %v22667_v7 = vld [vmem:[#allocation2 + $0x248] sm:$0xff]  ;;  %v27114_v29 = vand.u32 4294901760, %v22598_v12  ;;  %v27118_v34 = vand.u32 4294901760, %v22010_v8  ;;  %v27119_v43 = vand.u32 4294901760, %v22015_v15  ;;  %18159 = vmatprep.subr.bf16.mxu0 %v22580_v48 }
 0x151   :  { %v22664_v62 = vsub.f32 %v22584_v14, %v27112_v23  ;;  %v27116_v23 = vand.u32 4294901760, %v22600_v36  ;;  %v22691_v61 = vpack.c.bf16 %v2233_v1, %v2226_v41  ;;  %v27122_v33 = vand.u32 4294901760, %v22611_v42  ;;  %v22710_v41 = vld [vmem:[#allocation2 + $0x258] sm:$0xff]  ;;  %v22735_v15 = vld [vmem:[#allocation2 + $0x2e8] sm:$0xff] }
 0x152   :  { %27109 = vst [vmem:[#allocation166_spill] sm:$0xff] %v22652_v44  ;;  %v22678_v30 = vsub.f32 %v22598_v12, %v27114_v29  ;;  %v22689_v31 = vpack.c.bf16 %v27119_v43, %v27118_v34  ;;  %v27124_v29 = vand.u32 4294901760, %v22613_v39  ;;  %v22708_v43 = vld [vmem:[#allocation2 + $0x250] sm:$0xff]  ;;  %v27130_v34 = vand.u32 4294901760, %v22643_v18 }
 0x153   :  { %27113 = vst [vmem:[#allocation168_spill] sm:$0xff] %v22664_v62  ;;  %v22683_v38 = vsub.f32 %v22600_v36, %v27116_v23  ;;  %27121 = vst [vmem:[#allocation172_spill] sm:$0xff] %v22691_v61  ;;  %v22696_v53 = vsub.f32 %v22611_v42, %v27122_v33  ;;  %v27126_v23 = vld [vmem:[#allocation137_spill] sm:$0xff]  ;;  %v27127_v33 = vld [vmem:[#allocation79_spill] sm:$0xff]  ;;  %v22726_v3 = vpack.c.bf16 %v2247_v59, %v2240_v55  ;;  %v27133_v10 = vand.u32 4294901760, %v22639_v60 }
 0x154   :  { %27115 = vst [vmem:[#allocation169_spill] sm:$0xff] %v22678_v30  ;;  %27120 = vst [vmem:[#allocation171_spill] sm:$0xff] %v22689_v31  ;;  %v22701_v4 = vsub.f32 %v22613_v39, %v27124_v29  ;;  %18197 = vmatpush3.bf16.msra.mxu1 %v27126_v23  ;;  %v22714_v29 = vpack.c.bf16 %v2121_v37, %v2114_v5  ;;  %v27129_v23 = vand.u32 4294901760, %v22629_v19  ;;  %v27134_v59 = vld [vmem:[#allocation80_spill] sm:$0xff]  ;;  %v27141_v48 = vand.u32 4294901760, %v22671_v45 }
 0x155   :  { %27117 = vst [vmem:[#allocation170_spill] sm:$0xff] %v22683_v38  ;;  %27123 = vst [vmem:[#allocation173_spill] sm:$0xff] %v22696_v53  ;;  %18199 = vmatprep.subr.bf16.mxu1 %v27127_v33  ;;  %v22723_v1 = vsub.f32 %v22643_v18, %v27130_v34  ;;  %v2134_v5 = vsub.f32 %v22639_v60, %v27133_v10  ;;  %v27135_v10 = vand.u32 4294901760, %v22656_v16  ;;  %v27137_v33 = vand.u32 4294901760, %v22667_v7 }
 0x156   :  { %27125 = vst [vmem:[#allocation174_spill] sm:$0xff] %v22701_v4  ;;  %27128 = vst [vmem:[#allocation175_spill] sm:$0xff] %v22714_v29  ;;  %v2127_v8 = vsub.f32 %v22629_v19, %v27129_v23  ;;  %v22733_v23 = vld [vmem:[#allocation2 + $0x2e0] sm:$0xff]  ;;  %v27139_v19 = vand.u32 4294901760, %v22669_v28  ;;  %v22760_v55 = vsub.f32 %v22671_v45, %v27141_v48  ;;  %18161 = vmatpush3.bf16.msra.mxu0 %v22590_v63  ;;  %v27143_v2 = vand.u32 4294901760, %v22664_v62 }
 0x157   :  { %27131 = vst [vmem:[#allocation176_spill] sm:$0xff] %v22723_v1  ;;  %27132 = vst [vmem:[#allocation177_spill] sm:$0xff] %v22726_v3  ;;  %v22745_v37 = vsub.f32 %v22656_v16, %v27135_v10  ;;  %v22750_v60 = vsub.f32 %v22667_v7, %v27137_v33  ;;  %18163 = vmatprep.subr.bf16.mxu0 %v22621_v47  ;;  %v27144_v48 = vand.u32 4294901760, %v22678_v30  ;;  %v27147_v32 = vand.u32 4294901760, %v22696_v53 }
 0x158   :  { %18201 = vmatpush3.bf16.msra.mxu1 %v27134_v59  ;;  %v22755_v34 = vsub.f32 %v22669_v28, %v27139_v19  ;;  %27142 = vst [vmem:[#allocation181_spill] sm:$0xff] %v22760_v55  ;;  %v2128_v10 = vand.u32 4294901760, %v2127_v8  ;;  %v2135_v19 = vand.u32 4294901760, %v2134_v5  ;;  %v2253_v56 = vsub.f32 %v22664_v62, %v27143_v2 }
 0x159   :  { %27136 = vst [vmem:[#allocation178_spill] sm:$0xff] %v22745_v37  ;;  %27138 = vst [vmem:[#allocation179_spill] sm:$0xff] %v22750_v60  ;;  %18235 = vmatprep.subr.bf16.mxu1 %v22603_v26  ;;  %v2260_v63 = vsub.f32 %v22678_v30, %v27144_v48  ;;  %v27145_v26 = vand.u32 4294901760, %v22683_v38  ;;  %v2148_v5 = vsub.f32 %v22696_v53, %v27147_v32  ;;  %v27148_v59 = vand.u32 4294901760, %v22701_v4 }
 0x15a   :  { %27140 = vst [vmem:[#allocation180_spill] sm:$0xff] %v22755_v34  ;;  %v27149_v47 = vand.u32 4294901760, %v22708_v43  ;;  %18165 = vmatpush3.bf16.msra.mxu0 %v22689_v31  ;;  %v27153_v53 = vand.u32 4294901760, %v22733_v23  ;;  %v27154_v32 = vand.u32 4294901760, %v22735_v15  ;;  %v22828_v62 = vpack.c.bf16 %v2135_v19, %v2128_v10 }
 0x15b   :  { %v2141_v8 = vsub.f32 %v22683_v38, %v27145_v26  ;;  %14342 = vmatmul.mubr.msk.f32.vlgmr.msra.gmra.mrb[10].mxu1 %vm237_vm7, %v26812_v0  ;;  %v2267_v2 = vsub.f32 %v22701_v4, %v27148_v59  ;;  %v27150_v26 = vand.u32 4294901760, %v22710_v41  ;;  %v27156_v4 = vand.u32 4294901760, %v22324_v13 }
 0x15c   :  { %v22790_v48 = vsub.f32 %v22708_v43, %v27149_v47  ;;  %18237 = vmatpush3.bf16.msra.mxu1 %v22654_v22  ;;  %14343 = vmatprep.mubr.msk.f32.mxu1 %vm240_vm8, %v26812_v0  ;;  %v22814_v30 = vsub.f32 %v22733_v23, %v27153_v53  ;;  %v22819_v59 = vsub.f32 %v22735_v15, %v27154_v32  ;;  %v27155_v47 = vand.u32 4294901760, %v22309_v52 }
 0x15d   :  { %v22795_v38 = vsub.f32 %v22710_v41, %v27150_v26  ;;  %18239 = vmatprep.subr.bf16.mxu1 %v22691_v61  ;;  %v27152_v26 = vand.u32 4294901760, %v22723_v1  ;;  %v27158_v61 = vld [vmem:[#allocation87_spill] sm:$0xff]  ;;  %27159 = vst [vmem:[#allocation183_spill] sm:$0xff] %v22828_v62  ;;  %v2142_v11 = vand.u32 4294901760, %v2141_v8  ;;  %v2149_v53 = vand.u32 4294901760, %v2148_v5  ;;  %v27164_v8 = vld [vmem:[#allocation90_spill] sm:$0xff] }
 0x15e   :  { %v22825_v31 = vpack.c.bf16 %v27156_v4, %v27155_v47  ;;  %18167 = vmatprep.subr.bf16.mxu0 %v27158_v61  ;;  %v27160_v52 = vand.u32 4294901760, %v22745_v37  ;;  %v27161_v4 = vand.u32 4294901760, %v22750_v60  ;;  %v27162_v10 = vand.u32 4294901760, %v22755_v34  ;;  %v27269_v33 = vld [vmem:[#allocation176_spill] sm:$0xff] }
 0x15f   :  { %v2274_v22 = vsub.f32 %v22723_v1, %v27152_v26  ;;  %v2254_v26 = vand.u32 4294901760, %v2253_v56  ;;  %v2261_v1 = vand.u32 4294901760, %v2260_v63  ;;  %v27163_v56 = vand.u32 4294901760, %v22760_v55  ;;  %18169 = vmatpush3.bf16.msra.mxu0 %v27164_v8 }
 0x160   :  { %27157 = vst [vmem:[#allocation182_spill] sm:$0xff] %v22825_v31  ;;  %18241 = vmatpush3.bf16.msra.mxu1 %v22714_v29  ;;  %v2155_v13 = vsub.f32 %v22745_v37, %v27160_v52  ;;  %v2162_v32 = vsub.f32 %v22750_v60, %v27161_v4  ;;  %v2281_v63 = vsub.f32 %v22755_v34, %v27162_v10  ;;  %v2268_v5 = vand.u32 4294901760, %v2267_v2 }
 0x161   :  { %v2288_v19 = vsub.f32 %v22760_v55, %v27163_v56  ;;  %18243 = vmatprep.subr.bf16.mxu1 %v22726_v3  ;;  %v2275_v47 = vand.u32 4294901760, %v2274_v22  ;;  %v26314_v27 = vand.u32 4294901760, %v22819_v59  ;;  %v27165_v4 = vand.u32 4294901760, %v22380_v49  ;;  %18203 = vmatprep.subr.bf16.mxu0 %v22652_v44 }
 0x162   :  { %v27166_v57 = vand.u32 4294901760, %v22382_v50  ;;  %v2083_v10 = vand.u32 4294901760, %v22466_v17  ;;  %v22857_v56 = vpack.c.bf16 %v2261_v1, %v2254_v26  ;;  %v27169_v3 = vand.u32 4294901760, %v22398_v24  ;;  %14340 = vmatmul.mubr.msk.f32.vlgmr.msra.gmra.mrb[10].mxu0 %vm237_vm7, %v26812_v0 }
 0x163   :  { %v27170_v22 = vand.u32 4294901760, %v22400_v25  ;;  %v22865_v52 = vpack.c.bf16 %v2149_v53, %v2142_v11  ;;  %v27173_v49 = vand.u32 4294901760, %v22790_v48  ;;  %v2156_v24 = vand.u32 4294901760, %v2155_v13  ;;  %18205 = vmatpush3.bf16.msra.mxu0 %v22825_v31 }
 0x164   :  { %v22853_v29 = vpack.c.bf16 %v27166_v57, %v27165_v4  ;;  %27168 = vst [vmem:[#allocation185_spill] sm:$0xff] %v22857_v56  ;;  %v27174_v57 = vand.u32 4294901760, %v22795_v38  ;;  %18245 = vmatpush3.bf16.msra.mxu1 %v22828_v62  ;;  %v2163_v25 = vand.u32 4294901760, %v2162_v32  ;;  %v2282_v17 = vand.u32 4294901760, %v2281_v63  ;;  %2084 = vmatprep.mubr.f32.mxu0 %v2083_v10 }
 0x165   :  { %v22863_v2 = vpack.c.bf16 %v27170_v22, %v27169_v3  ;;  %27172 = vst [vmem:[#allocation187_spill] sm:$0xff] %v22865_v52  ;;  %v2169_v50 = vsub.f32 %v22790_v48, %v27173_v49  ;;  %v2289_v11 = vand.u32 4294901760, %v2288_v19  ;;  %v22879_v3 = vpack.c.bf16 %v2275_v47, %v2268_v5  ;;  %18247 = vmatprep.subr.bf16.mxu1 %v22857_v56 }
 0x166   :  { %27167 = vst [vmem:[#allocation184_spill] sm:$0xff] %v22853_v29  ;;  %v2176_v4 = vsub.f32 %v22795_v38, %v27174_v57  ;;  %v27176_v1 = vand.u32 4294901760, %v22814_v30  ;;  %v2302_v53 = vsub.f32 %v22819_v59, %v26314_v27  ;;  %v27177_v22 = vand.u32 4294901760, %v22415_v54  ;;  %18207 = vmatprep.subr.bf16.mxu0 %v22853_v29  ;;  %v23054_v27 = vld [vmem:[#allocation2 + $0x3c8] sm:$0xff] }
 0x167   :  { %27171 = vst [vmem:[#allocation186_spill] sm:$0xff] %v22863_v2  ;;  %27175 = vst [vmem:[#allocation188_spill] sm:$0xff] %v22879_v3  ;;  %v27178_v13 = vand.u32 4294901760, %v22433_v35  ;;  %v27180_v63 = vand.u32 4294901760, %v22538_v9  ;;  %v27181_v19 = vand.u32 4294901760, %v22548_v58  ;;  %v2170_v47 = vand.u32 4294901760, %v2169_v50  ;;  %18209 = vmatpush3.bf16.msra.mxu0 %v22863_v2 }
 0x168   :  { %v2295_v26 = vsub.f32 %v22814_v30, %v27176_v1  ;;  %v2177_v10 = vand.u32 4294901760, %v2176_v4  ;;  %18249 = vmatpush3.bf16.msra.mxu1 %v22865_v52  ;;  %v22902_v49 = vpack.c.bf16 %v2163_v25, %v2156_v24  ;;  %v22904_v54 = vpack.c.bf16 %v2289_v11, %v2282_v17  ;;  %v27186_v1 = vld [vmem:[#allocation109_spill] sm:$0xff] }
 0x169   :  { %v22891_v32 = vpack.c.bf16 %v27178_v13, %v27177_v22  ;;  %v22899_v5 = vpack.c.bf16 %v27181_v19, %v27180_v63  ;;  %v27185_v35 = vand.u32 4294901760, %v22314_v46  ;;  %v27187_v22 = vand.u32 4294901760, %v27186_v1  ;;  %18251 = vmatprep.subr.bf16.mxu1 %v22879_v3 }
 0x16a   :  { %27183 = vst [vmem:[#allocation191_spill] sm:$0xff] %v22902_v49  ;;  %27184 = vst [vmem:[#allocation192_spill] sm:$0xff] %v22904_v54  ;;  %v2296_v58 = vand.u32 4294901760, %v2295_v26  ;;  %v2303_v50 = vand.u32 4294901760, %v2302_v53  ;;  %v27188_v4 = vand.u32 4294901760, %v22329_v21  ;;  %v27189_v25 = vand.u32 4294901760, %v22334_v51 }
 0x16b   :  { %27179 = vst [vmem:[#allocation189_spill] sm:$0xff] %v22891_v32  ;;  %27182 = vst [vmem:[#allocation190_spill] sm:$0xff] %v22899_v5  ;;  %v2183_v57 = vsub.f32 %v22314_v46, %v27185_v35  ;;  %v2190_v9 = vsub.f32 %v27186_v1, %v27187_v22  ;;  %v27190_v11 = vand.u32 4294901760, %v22584_v14  ;;  %v27191_v13 = vand.u32 4294901760, %v22598_v12  ;;  %18211 = vmatprep.subr.bf16.mxu0 %v22891_v32 }
 0x16c   :  { %v2309_v24 = vsub.f32 %v22329_v21, %v27188_v4  ;;  %v2316_v17 = vsub.f32 %v22334_v51, %v27189_v25  ;;  %v22927_v19 = vpack.c.bf16 %v2177_v10, %v2170_v47  ;;  %18253 = vmatpush3.bf16.msra.mxu1 %v22902_v49  ;;  %v27194_v35 = vand.u32 4294901760, %v22353_v20  ;;  %18213 = vmatpush3.bf16.msra.mxu0 %v22899_v5  ;;  %v27259_v49 = vld [vmem:[#allocation168_spill] sm:$0xff] }
 0x16d   :  { %v22924_v63 = vpack.c.bf16 %v27191_v13, %v27190_v11  ;;  %v2184_v26 = vand.u32 4294901760, %v2183_v57  ;;  %v2191_v53 = vand.u32 4294901760, %v2190_v9  ;;  %v27195_v4 = vand.u32 4294901760, %v22358_v6  ;;  %18255 = vmatprep.subr.bf16.mxu1 %v22904_v54 }
 0x16e   :  { %27193 = vst [vmem:[#allocation193_spill] sm:$0xff] %v22927_v19  ;;  %v2197_v22 = vsub.f32 %v22353_v20, %v27194_v35  ;;  %v27196_v12 = vand.u32 4294901760, %v22600_v36  ;;  %v27197_v25 = vand.u32 4294901760, %v22611_v42  ;;  %v22944_v47 = vpack.c.bf16 %v2303_v50, %v2296_v58 }
 0x16f   :  { %27192 = vst [vmem:[#allocation109_spill] sm:$0xff] %v22924_v63  ;;  %v2204_v14 = vsub.f32 %v22358_v6, %v27195_v4  ;;  %v2310_v10 = vand.u32 4294901760, %v2309_v24  ;;  %v2317_v57 = vand.u32 4294901760, %v2316_v17  ;;  %v27200_v9 = vand.u32 4294901760, %v22613_v39  ;;  %18215 = vmatprep.subr.bf16.mxu0 %v22924_v63 }
 0x170   :  { %v22940_v11 = vpack.c.bf16 %v27197_v25, %v27196_v12  ;;  %27199 = vst [vmem:[#allocation195_spill] sm:$0xff] %v22944_v47  ;;  %v27201_v13 = vand.u32 4294901760, %v22643_v18  ;;  %18257 = vmatpush3.bf16.msra.mxu1 %v22927_v19  ;;  %v22954_v42 = vpack.c.bf16 %v2191_v53, %v2184_v26  ;;  %v2198_v36 = vand.u32 4294901760, %v2197_v22  ;;  %v27204_v12 = vld [vmem:[#allocation54_spill] sm:$0xff]  ;;  %v23070_v19 = vld [vmem:[#allocation2 + $0x340] sm:$0xff] }
 0x171   :  { %v2205_v4 = vand.u32 4294901760, %v2204_v14  ;;  %vm239_vm9 = vcmp.eq.f32.partialorder %v21496_v40, %v27204_v12  ;;  %v27205_v58 = vand.u32 4294901760, %v22656_v16  ;;  %v27206_v50 = vand.u32 4294901760, %v22667_v7  ;;  %18259 = vmatprep.subr.bf16.mxu1 %v22944_v47  ;;  %v27266_v47 = vld [vmem:[#allocation173_spill] sm:$0xff] }
 0x172   :  { %27198 = vst [vmem:[#allocation194_spill] sm:$0xff] %v22940_v11  ;;  %v22950_v35 = vpack.c.bf16 %v27201_v13, %v27200_v9  ;;  %27203 = vst [vmem:[#allocation197_spill] sm:$0xff] %v22954_v42  ;;  %18217 = vmatpush3.bf16.msra.mxu0 %v22940_v11  ;;  %v22966_v18 = vpack.c.bf16 %v2317_v57, %v2310_v10  ;;  %v27209_v24 = vand.u32 4294901760, %v22669_v28  ;;  %v27210_v17 = vand.u32 4294901760, %v22671_v45  ;;  %v27222_v9 = vld [vmem:[#allocation93_spill] sm:$0xff] }
 0x173   :  { %v22962_v39 = vpack.c.bf16 %v27206_v50, %v27205_v58  ;;  %v27212_v53 = vmov 0.0   ;;  %v22980_v7 = vpack.c.bf16 %v2205_v4, %v2198_v36  ;;  %v27214_v22 = vand.u32 4294901760, %v22708_v43  ;;  %v27220_v43 = vld [vmem:[#allocation92_spill] sm:$0xff]  ;;  %v27227_v4 = vld [vmem:[#allocation98_spill] sm:$0xff] }
 0x174   :  { %27202 = vst [vmem:[#allocation196_spill] sm:$0xff] %v22950_v35  ;;  %27208 = vst [vmem:[#allocation199_spill] sm:$0xff] %v22966_v18  ;;  %v22972_v26 = vpack.c.bf16 %v27210_v17, %v27209_v24  ;;  %18219 = vmatprep.subr.bf16.mxu0 %v22950_v35  ;;  %v14327_v16 = vsel %vm239_vm9, 1.0, %v27212_v53  ;;  %18261 = vmatpush3.bf16.msra.mxu1 %v22954_v42  ;;  %v27215_v14 = vand.u32 4294901760, %v22710_v41  ;;  %v27217_v45 = vand.u32 4294901760, %v22733_v23  ;;  %v27225_v23 = vld [vmem:[#allocation95_spill] sm:$0xff] }
 0x175   :  { %27207 = vst [vmem:[#allocation198_spill] sm:$0xff] %v22962_v39  ;;  %27213 = vst [vmem:[#allocation201_spill] sm:$0xff] %v22980_v7  ;;  %18263 = vmatprep.subr.bf16.mxu1 %v22966_v18  ;;  %v27218_v25 = vand.u32 4294901760, %v22735_v15  ;;  %v22997_v57 = vsub.f32 %v14327_v16, %v14327_v16  ;;  %v27221_v41 = vand.u32 4294901760, %v27220_v43  ;;  %v27223_v13 = vand.u32 4294901760, %v27222_v9  ;;  %v27230_v17 = vld [vmem:[#allocation112_spill] sm:$0xff] }
 0x176   :  { %27211 = vst [vmem:[#allocation200_spill] sm:$0xff] %v22972_v26  ;;  %v22986_v28 = vpack.c.bf16 %v27215_v14, %v27214_v22  ;;  %18221 = vmatpush3.bf16.msra.mxu0 %v22962_v39  ;;  %v27226_v15 = vand.u32 4294901760, %v27225_v23  ;;  %v27228_v58 = vand.u32 4294901760, %v27227_v4  ;;  %v27231_v16 = vand.u32 4294901760, %v27230_v17  ;;  %v27232_v22 = vld [vmem:[#allocation101_spill] sm:$0xff]  ;;  %v27237_v9 = vld [vmem:[#allocation138_spill] sm:$0xff] }
 0x177   :  { %v22994_v10 = vpack.c.bf16 %v27218_v25, %v27217_v45  ;;  %18223 = vmatprep.subr.bf16.mxu0 %v22972_v26  ;;  %v23004_v36 = vpack.c.bf16 %v27223_v13, %v27221_v41  ;;  %v26315_v24 = vand.u32 4294901760, %v22997_v57  ;;  %v27233_v14 = vand.u32 4294901760, %v27232_v22  ;;  %v27234_v45 = vld [vmem:[#allocation105_spill] sm:$0xff]  ;;  %v27238_v13 = vld [vmem:[#allocation139_spill] sm:$0xff]  ;;  %27247 = vst [vmem:[#allocation138_spill] sm:$0xff] %v23054_v27 }
 0x178   :  { %27216 = vst [vmem:[#allocation202_spill] sm:$0xff] %v22986_v28  ;;  %18265 = vmatpush3.bf16.msra.mxu1 %v22980_v7  ;;  %v23012_v50 = vpack.c.bf16 %v27228_v58, %v27226_v15  ;;  %v27235_v25 = vand.u32 4294901760, %v27234_v45  ;;  %v23037_v23 = vpack.c.bf16 %v27238_v13, %v27237_v9  ;;  %v27240_v15 = vld [vmem:[#allocation143_spill] sm:$0xff]  ;;  %v27241_v4 = vld [vmem:[#allocation145_spill] sm:$0xff]  ;;  %v27249_v7 = vld [vmem:[#allocation152_spill] sm:$0xff]  ;;  %v27264_v62 = vand.u32 4294901760, %v23054_v27 }
 0x179   :  { %27219 = vst [vmem:[#allocation203_spill] sm:$0xff] %v22994_v10  ;;  %27224 = vst [vmem:[#allocation92_spill] sm:$0xff] %v23004_v36  ;;  %18299 = vmatprep.subr.bf16.mxu1 %v22652_v44  ;;  %v2088_v41 = vsub.f32 %v22997_v57, %v26315_v24  ;;  %v23044_v58 = vpack.c.bf16 %v27241_v4, %v27240_v15  ;;  %v27243_v22 = vld [vmem:[#allocation149_spill] sm:$0xff]  ;;  %v27248_v24 = vld [vmem:[#allocation151_spill] sm:$0xff] }
 0x17a   :  { %18225 = vmatpush3.bf16.msra.mxu0 %v22986_v28  ;;  %27229 = vst [vmem:[#allocation93_spill] sm:$0xff] %v23012_v50  ;;  %v23027_v43 = vpack.c.bf16 %v27235_v25, %v27233_v14  ;;  %27239 = vst [vmem:[#allocation98_spill] sm:$0xff] %v23037_v23  ;;  %v27244_v14 = vld [vmem:[#allocation150_spill] sm:$0xff]  ;;  %v23052_v25 = vld [vmem:[#allocation2 + $0x3c0] sm:$0xff]  ;;  %v23096_v8 = vsub.f32 %v23054_v27, %v27264_v62  ;;  %v27271_v62 = vand.u32 4294901760, %v23070_v19 }
 0x17b   :  { %18227 = vmatprep.subr.bf16.mxu0 %v22994_v10  ;;  %14344 = vmatmul.mubr.msk.f32.vlgmr.msra.gmra.mrb[12].mxu1 %vm239_vm9, %v26812_v0  ;;  %27242 = vst [vmem:[#allocation112_spill] sm:$0xff] %v23044_v58  ;;  %v23049_v45 = vpack.c.bf16 %v27244_v14, %v27243_v22  ;;  %27246 = vst [vmem:[#allocation105_spill] sm:$0xff] %v23052_v25  ;;  %v27260_v42 = vld [vmem:[#allocation169_spill] sm:$0xff]  ;;  %v27262_v56 = vand.u32 4294901760, %v23052_v25 }
 0x17c   :  { %18301 = vmatpush3.bf16.msra.mxu1 %v22825_v31  ;;  %2564 = vmatprep.mubr.f32.mxu1 %v27231_v16  ;;  %27236 = vst [vmem:[#allocation95_spill] sm:$0xff] %v23027_v43  ;;  %v2089_v16 = vand.u32 4294901760, %v2088_v41  ;;  %v23060_v41 = vpack.c.bf16 %v27249_v7, %v27248_v24  ;;  %27254 = vst [vmem:[#allocation145_spill] sm:$0xff] %v23070_v19  ;;  %v23084_v3 = vpack.c.bf16 %v27260_v42, %v27259_v49 }
 0x17d   :  { %18303 = vmatprep.subr.bf16.mxu1 %v22853_v29  ;;  %27245 = vst [vmem:[#allocation101_spill] sm:$0xff] %v23049_v45  ;;  %v23113_v27 = vsub.f32 %v23070_v19, %v27271_v62  ;;  %v23137_v19 = vld [vmem:[#allocation2 + $0x3f8] sm:$0xff] }
 0x17e   :  { %18229 = vmatpush3.bf16.msra.mxu0 %v23004_v36  ;;  %27250 = vst [vmem:[#allocation139_spill] sm:$0xff] %v23060_v41  ;;  %27261 = vst [vmem:[#allocation151_spill] sm:$0xff] %v23084_v3 }
 0x17f   :  { %18231 = vmatprep.subr.bf16.mxu0 %v23012_v50  ;;  %27279 = vst [vmem:[#allocation204_spill] sm:$0xff] %v23137_v19 }
 0x180   :  { %18305 = vmatpush3.bf16.msra.mxu1 %v22863_v2 }
 0x181   :  { %18307 = vmatprep.subr.bf16.mxu1 %v22891_v32 }
 0x182   :  { %18233 = vmatpush3.bf16.msra.mxu0 %v23027_v43 }
 0x183   :  { %18267 = vmatprep.subr.bf16.mxu0 %v23037_v23  ;;  %v27251_v23 = vld [vmem:[#allocation155_spill] sm:$0xff] }
 0x184   :  { %18309 = vmatpush3.bf16.msra.mxu1 %v22899_v5 }
 0x185   :  { %2090 = vmatmul.mubr.f32.vlgmr.msra.gmra.mrb[12].mxu0 %v2089_v16  ;;  %18311 = vmatprep.subr.bf16.mxu1 %v22924_v63  ;;  %v27252_v16 = vld [vmem:[#allocation158_spill] sm:$0xff] }
 0x186   :  { %18269 = vmatpush3.bf16.msra.mxu0 %v23044_v58  ;;  %2457 = vmatprep.mubr.f32.mxu0 %v27230_v17  ;;  %v23066_v18 = vpack.c.bf16 %v27252_v16, %v27251_v23  ;;  %v23072_v58 = vld [vmem:[#allocation2 + $0x348] sm:$0xff]  ;;  %v27256_v17 = vld [vmem:[#allocation115_spill] sm:$0xff]  ;;  %v14525_v52 = vpop.f32.mrb[0].mxu1 }
 0x187   :  { %18271 = vmatprep.subr.bf16.mxu0 %v23049_v45  ;;  %27255 = vst [vmem:[#allocation149_spill] sm:$0xff] %v23072_v58  ;;  %v27257_v45 = vld [vmem:[#allocation165_spill] sm:$0xff] }
 0x188   :  { %27253 = vst [vmem:[#allocation143_spill] sm:$0xff] %v23066_v18  ;;  %18313 = vmatpush3.bf16.msra.mxu1 %v22940_v11  ;;  %v23079_v54 = vpack.c.bf16 %v27257_v45, %v27256_v17  ;;  %v23128_v11 = vld [vmem:[#allocation2 + $0x368] sm:$0xff] }
 0x189   :  { %18315 = vmatprep.subr.bf16.mxu1 %v22950_v35  ;;  %v14526_v35 = vpop.f32.mrb[1].mxu1  ;;  %27276 = vst [vmem:[#allocation169_spill] sm:$0xff] %v23128_v11 }
 0x18a   :  { %18273 = vmatpush3.bf16.msra.mxu0 %v23060_v41  ;;  %27258 = vst [vmem:[#allocation150_spill] sm:$0xff] %v23079_v54  ;;  %v23091_v41 = vsub.f32 %v23052_v25, %v27262_v56  ;;  %v27268_v56 = vld [vmem:[#allocation174_spill] sm:$0xff]  ;;  %v14527_v62 = vadd.f32 %v14526_v35, %v14525_v52  ;;  %v23179_v35 = vpack.c.bf16 %v22819_v59, %v22814_v30 }
 0x18b   :  { %18275 = vmatprep.subr.bf16.mxu0 %v23066_v18  ;;  %v27265_v18 = vld [vmem:[#allocation170_spill] sm:$0xff]  ;;  %v23108_v25 = vpack.c.bf16 %v27269_v33, %v27268_v56  ;;  %v23126_v56 = vld [vmem:[#allocation2 + $0x360] sm:$0xff]  ;;  %v23143_v33 = vpack.c.bf16 %v22760_v55, %v22755_v34  ;;  %v23160_v34 = vld [vmem:[#allocation2 + $0x370] sm:$0xff] }
 0x18c   :  { %27263 = vst [vmem:[#allocation152_spill] sm:$0xff] %v23091_v41  ;;  %18317 = vmatpush3.bf16.msra.mxu1 %v22962_v39  ;;  %v23103_v61 = vpack.c.bf16 %v27266_v47, %v27265_v18  ;;  %v23122_v39 = vld [vmem:[#allocation2 + $0x3e8] sm:$0xff]  ;;  %27275 = vst [vmem:[#allocation168_spill] sm:$0xff] %v23126_v56 }
 0x18d   :  { %18319 = vmatprep.subr.bf16.mxu1 %v22972_v26  ;;  %27270 = vst [vmem:[#allocation158_spill] sm:$0xff] %v23108_v25  ;;  %v23120_v26 = vld [vmem:[#allocation2 + $0x3e0] sm:$0xff]  ;;  %27274 = vst [vmem:[#allocation165_spill] sm:$0xff] %v23122_v39 }
 0x18e   :  { %18277 = vmatpush3.bf16.msra.mxu0 %v23079_v54  ;;  %27267 = vst [vmem:[#allocation155_spill] sm:$0xff] %v23103_v61  ;;  %v27272_v54 = vand.u32 4294901760, %v23072_v58  ;;  %27273 = vst [vmem:[#allocation115_spill] sm:$0xff] %v23120_v26  ;;  %v27288_v52 = vand.u32 4294901760, %v23120_v26 }
 0x18f   :  { %18279 = vmatprep.subr.bf16.mxu0 %v23084_v3  ;;  %v26378_v3 = vand.u32 4294901760, %v23091_v41  ;;  %27280 = vst [vmem:[#allocation205_spill] sm:$0xff] %v23143_v33  ;;  %27283 = vst [vmem:[#allocation207_spill] sm:$0xff] %v23160_v34  ;;  %v23162_v41 = vld [vmem:[#allocation2 + $0x378] sm:$0xff] }
 0x190   :  { %v23118_v12 = vsub.f32 %v23072_v58, %v27272_v54  ;;  %18321 = vmatpush3.bf16.msra.mxu1 %v22986_v28  ;;  %v23133_v54 = vpack.c.bf16 %v22750_v60, %v22745_v37  ;;  %v23135_v58 = vld [vmem:[#allocation2 + $0x3f0] sm:$0xff]  ;;  %v27281_v28 = vand.u32 4294901760, %v23096_v8  ;;  %27284 = vst [vmem:[#allocation208_spill] sm:$0xff] %v23162_v41  ;;  %27287 = vst [vmem:[#allocation211_spill] sm:$0xff] %v23179_v35  ;;  %v27289_v37 = vand.u32 4294901760, %v23122_v39 }
 0x191   :  { %27278 = vst [vmem:[#allocation173_spill] sm:$0xff] %v23135_v58  ;;  %18323 = vmatprep.subr.bf16.mxu1 %v22994_v10  ;;  %v23184_v55 = vsub.f32 %v23120_v26, %v27288_v52  ;;  %v14490_v26 = vpop.f32.mrb[0].mxu0 }
 0x192   :  { %27277 = vst [vmem:[#allocation170_spill] sm:$0xff] %v23133_v54  ;;  %18281 = vmatpush3.bf16.msra.mxu0 %v23103_v61  ;;  %v23151_v60 = vpack.c.bf16 %v27281_v28, %v26378_v3  ;;  %v26382_v61 = vand.u32 4294901760, %v23113_v27  ;;  %v26381_v10 = vand.u32 4294901760, %v23118_v12  ;;  %v23167_v28 = vpack.c.bf16 %v22795_v38, %v22790_v48 }
 0x193   :  { %18283 = vmatprep.subr.bf16.mxu0 %v23108_v25  ;;  %v23189_v25 = vsub.f32 %v23122_v39, %v27289_v37  ;;  %v27292_v37 = vand.u32 4294901760, %v23135_v58 }
 0x194   :  { %27282 = vst [vmem:[#allocation206_spill] sm:$0xff] %v23151_v60  ;;  %18325 = vmatpush3.bf16.msra.mxu1 %v23004_v36  ;;  %27285 = vst [vmem:[#allocation209_spill] sm:$0xff] %v23167_v28  ;;  %v23173_v3 = vpack.c.bf16 %v26381_v10, %v26382_v61  ;;  %v27290_v10 = vand.u32 4294901760, %v23126_v56  ;;  %v23225_v60 = vld [vmem:[#allocation2 + $0x380] sm:$0xff] }
 0x195   :  { %18327 = vmatprep.subr.bf16.mxu1 %v23012_v50  ;;  %v23207_v39 = vsub.f32 %v23135_v58, %v27292_v37  ;;  %v23223_v37 = vpack.c.bf16 %v22334_v51, %v22329_v21  ;;  %v27299_v21 = vand.u32 4294901760, %v23162_v41  ;;  %v27301_v58 = vand.u32 4294901760, %v22997_v57 }
 0x196   :  { %27286 = vst [vmem:[#allocation210_spill] sm:$0xff] %v23173_v3  ;;  %18285 = vmatpush3.bf16.msra.mxu0 %v23133_v54  ;;  %v23195_v61 = vsub.f32 %v23126_v56, %v27290_v10  ;;  %v27291_v54 = vand.u32 4294901760, %v23128_v11  ;;  %v14491_v56 = vpop.f32.mrb[1].mxu0 }
 0x197   :  { %18287 = vmatprep.subr.bf16.mxu0 %v23143_v33  ;;  %v27293_v33 = vand.u32 4294901760, %v23137_v19  ;;  %v14492_v52 = vadd.f32 %v14491_v56, %v14490_v26  ;;  %27296 = vst [vmem:[#allocation214_spill] sm:$0xff] %v23223_v37  ;;  %v27297_v26 = vand.u32 4294901760, %v23160_v34  ;;  %v23242_v51 = vsub.f32 %v23162_v41, %v27299_v21 }
 0x198   :  { %v23200_v3 = vsub.f32 %v23128_v11, %v27291_v54  ;;  %18329 = vmatpush3.bf16.msra.mxu1 %v23027_v43  ;;  %v23217_v54 = vpack.c.bf16 %v27186_v1, %v22314_v46  ;;  %v27302_v1 = vand.u32 4294901760, %v23184_v55  ;;  %v23265_v46 = vld [vmem:[#allocation2 + $0x308] sm:$0xff]  ;;  %v27314_v41 = vand.u32 4294901760, %v27237_v9 }
 0x199   :  { %v23212_v10 = vsub.f32 %v23137_v19, %v27293_v33  ;;  %18363 = vmatprep.subr.bf16.mxu1 %v22652_v44  ;;  %v23227_v33 = vld [vmem:[#allocation2 + $0x388] sm:$0xff]  ;;  %v23237_v56 = vsub.f32 %v23160_v34, %v27297_v26  ;;  %27300 = vst [vmem:[#allocation216_spill] sm:$0xff] %v23242_v51  ;;  %v27306_v19 = vld [vmem:[#allocation55_spill] sm:$0xff]  ;;  %v27317_v9 = vand.u32 4294901760, %v23225_v60 }
 0x19a   :  { %27295 = vst [vmem:[#allocation213_spill] sm:$0xff] %v23217_v54  ;;  %18289 = vmatpush3.bf16.msra.mxu0 %v23167_v28  ;;  %v23244_v28 = vadd.f32 %v14527_v62, %v14492_v52  ;;  %v23263_v52 = vld [vmem:[#allocation2 + $0x300] sm:$0xff]  ;;  %vm242_vm10 = vcmp.eq.f32.partialorder %v21496_v40, %v27306_v19  ;;  %v27311_v62 = vand.u32 4294901760, %v23207_v39 }
 0x19b   :  { %27294 = vst [vmem:[#allocation212_spill] sm:$0xff] %v23212_v10  ;;  %18291 = vmatprep.subr.bf16.mxu0 %v23179_v35  ;;  %27298 = vst [vmem:[#allocation215_spill] sm:$0xff] %v23237_v56  ;;  %2568 = vmatmul.mubr.f32.vlgmr.msra.gmra.mrb[14].mxu1 %v27301_v58  ;;  %v27303_v35 = vand.u32 4294901760, %v23189_v25  ;;  %v23279_v58 = vpack.c.bf16 %v22358_v6, %v22353_v20  ;;  %v27312_v44 = vand.u32 4294901760, %v23212_v10  ;;  %v27322_v6 = vand.u32 4294901760, %v27240_v15 }
 0x19c   :  { %18365 = vmatpush3.bf16.msra.mxu1 %v22825_v31  ;;  %14347 = vmatprep.mubr.msk.f32.mxu1 %vm240_vm8, %v26812_v0  ;;  %v27328_v15 = vand.u32 4294901760, %v23263_v52  ;;  %v27390_v10 = vand.u32 4294901760, %v22819_v59 }
 0x19d   :  { %v23254_v26 = vpack.c.bf16 %v27303_v35, %v27302_v1  ;;  %v27307_v35 = vand.u32 4294901760, %v23195_v61  ;;  %v27308_v1 = vand.u32 4294901760, %v23200_v3  ;;  %18367 = vmatprep.subr.bf16.mxu1 %v22853_v29  ;;  %27310 = vst [vmem:[#allocation219_spill] sm:$0xff] %v23279_v58  ;;  %v26412_v29 = vand.u32 4294901760, %v23242_v51 }
 0x19e   :  { %18293 = vmatpush3.bf16.msra.mxu0 %v23217_v54  ;;  %v26413_v54 = vand.u32 4294901760, %v23237_v56 }
 0x19f   :  { %27304 = vst [vmem:[#allocation217_spill] sm:$0xff] %v23254_v26  ;;  %v23273_v31 = vpack.c.bf16 %v27308_v1, %v27307_v35  ;;  %v23285_v26 = vpack.c.bf16 %v27312_v44, %v27311_v62  ;;  %18295 = vmatprep.subr.bf16.mxu0 %v23223_v37  ;;  %v27315_v35 = vand.u32 4294901760, %v27238_v13  ;;  %v14330_v44 = vsel %vm242_vm10, 1.0, %v27212_v53 }
 0x1a0   :  { %18369 = vmatpush3.bf16.msra.mxu1 %v22863_v2  ;;  %v23306_v13 = vsub.f32 %v23225_v60, %v27317_v9  ;;  %v27323_v9 = vand.u32 4294901760, %v27241_v4  ;;  %v27326_v37 = vand.u32 4294901760, %v27244_v14  ;;  %v23345_v4 = vsub.f32 %v23263_v52, %v27328_v15  ;;  %v23372_v14 = vld [vmem:[#allocation2 + $0x3a0] sm:$0xff] }
 0x1a1   :  { %27309 = vst [vmem:[#allocation218_spill] sm:$0xff] %v23273_v31  ;;  %27313 = vst [vmem:[#allocation220_spill] sm:$0xff] %v23285_v26  ;;  %v23292_v1 = vpack.c.bf16 %v27315_v35, %v27314_v41  ;;  %v27319_v41 = vand.u32 4294901760, %v23227_v33  ;;  %v23317_v35 = vpack.c.bf16 %v26412_v29, %v26413_v54  ;;  %18371 = vmatprep.subr.bf16.mxu1 %v22891_v32  ;;  %v23336_v54 = vld [vmem:[#allocation2 + $0x390] sm:$0xff]  ;;  %v27367_v31 = vld [vmem:[#allocation180_spill] sm:$0xff] }
 0x1a2   :  { %27318 = vst [vmem:[#allocation222_spill] sm:$0xff] %v23306_v13  ;;  %18297 = vmatpush3.bf16.msra.mxu0 %v23279_v58  ;;  %v23325_v20 = vpack.c.bf16 %v27323_v9, %v27322_v6  ;;  %v23334_v29 = vsub.f32 %v14330_v44, %v14330_v44  ;;  %v23338_v58 = vld [vmem:[#allocation2 + $0x398] sm:$0xff]  ;;  %v23340_v32 = vld [vmem:[#allocation2 + $0x310] sm:$0xff]  ;;  %27329 = vst [vmem:[#allocation227_spill] sm:$0xff] %v23345_v4  ;;  %v27330_v6 = vand.u32 4294901760, %v23265_v46  ;;  %v27332_v9 = vand.u32 4294901760, %v27248_v24 }
 0x1a3   :  { %27316 = vst [vmem:[#allocation221_spill] sm:$0xff] %v23292_v1  ;;  %v23311_v62 = vsub.f32 %v23227_v33, %v27319_v41  ;;  %27321 = vst [vmem:[#allocation224_spill] sm:$0xff] %v23317_v35  ;;  %18331 = vmatprep.subr.bf16.mxu0 %v23292_v1  ;;  %v27325_v41 = vand.u32 4294901760, %v27243_v22  ;;  %v23356_v44 = vld [vmem:[#allocation2 + $0x318] sm:$0xff]  ;;  %v27335_v24 = vand.u32 4294901760, %v27251_v23  ;;  %v27342_v1 = vand.u32 4294901760, %v27260_v42 }
 0x1a4   :  { %27324 = vst [vmem:[#allocation225_spill] sm:$0xff] %v23325_v20  ;;  %v23350_v22 = vsub.f32 %v23265_v46, %v27330_v6  ;;  %18373 = vmatpush3.bf16.msra.mxu1 %v22899_v5  ;;  %v27339_v6 = vand.u32 4294901760, %v27257_v45  ;;  %v27347_v42 = vld [vmem:[#allocation194_spill] sm:$0xff]  ;;  %v27351_v23 = vand.u32 4294901760, %v23336_v54  ;;  %v27364_v35 = vld [vmem:[#allocation179_spill] sm:$0xff] }
 0x1a5   :  { %27320 = vst [vmem:[#allocation223_spill] sm:$0xff] %v23311_v62  ;;  %v23332_v2 = vpack.c.bf16 %v27326_v37, %v27325_v41  ;;  %2460 = vmatmul.mubr.f32.vlgmr.msra.gmra.mrb[14].mxu0 %v22997_v57  ;;  %v27333_v41 = vand.u32 4294901760, %v27249_v7  ;;  %18375 = vmatprep.subr.bf16.mxu1 %v22924_v63  ;;  %v27336_v7 = vand.u32 4294901760, %v27252_v16  ;;  %v27341_v37 = vand.u32 4294901760, %v27259_v49  ;;  %v23396_v63 = vld [vmem:[#allocation2 + $0x320] sm:$0xff]  ;;  %v27357_v45 = vld [vmem:[#allocation174_spill] sm:$0xff] }
 0x1a6   :  { %27331 = vst [vmem:[#allocation228_spill] sm:$0xff] %v23350_v22  ;;  %18333 = vmatpush3.bf16.msra.mxu0 %v23325_v20  ;;  %14345 = vmatprep.mubr.msk.f32.mxu0 %vm240_vm8, %v26812_v0  ;;  %v23374_v20 = vld [vmem:[#allocation2 + $0x3a8] sm:$0xff]  ;;  %v27344_v16 = vand.u32 4294901760, %v27265_v18  ;;  %v27349_v18 = vand.u32 4294901760, %v23311_v62  ;;  %v23428_v49 = vsub.f32 %v23336_v54, %v27351_v23 }
 0x1a7   :  { %27327 = vst [vmem:[#allocation226_spill] sm:$0xff] %v23332_v2  ;;  %v23367_v57 = vpack.c.bf16 %v27333_v41, %v27332_v9  ;;  %18335 = vmatprep.subr.bf16.mxu0 %v23332_v2  ;;  %v23382_v9 = vpack.c.bf16 %v27336_v7, %v27335_v24  ;;  %v27338_v41 = vand.u32 4294901760, %v27256_v17  ;;  %v23394_v5 = vpack.c.bf16 %v27342_v1, %v27341_v37  ;;  %v27359_v2 = vld [vmem:[#allocation176_spill] sm:$0xff] }
 0x1a8   :  { %v27345_v24 = vand.u32 4294901760, %v27266_v47  ;;  %18377 = vmatpush3.bf16.msra.mxu1 %v27347_v42  ;;  %v27348_v1 = vand.u32 4294901760, %v23306_v13  ;;  %v23419_v47 = vsub.f32 %v23311_v62, %v27349_v18  ;;  %27352 = vst [vmem:[#allocation234_spill] sm:$0xff] %v23428_v49  ;;  %v27355_v18 = vand.u32 4294901760, %v23340_v32  ;;  %v27362_v42 = vld [vmem:[#allocation178_spill] sm:$0xff] }
 0x1a9   :  { %27334 = vst [vmem:[#allocation229_spill] sm:$0xff] %v23367_v57  ;;  %27337 = vst [vmem:[#allocation230_spill] sm:$0xff] %v23382_v9  ;;  %v23388_v15 = vpack.c.bf16 %v27339_v6, %v27338_v41  ;;  %v23408_v6 = vld [vmem:[#allocation2 + $0x328] sm:$0xff]  ;;  %v27363_v21 = vand.u32 4294901760, %v27362_v42  ;;  %v27368_v62 = vand.u32 4294901760, %v27367_v31  ;;  %v27375_v42 = vand.u32 4294901760, %v23345_v4 }
 0x1aa   :  { %27343 = vst [vmem:[#allocation232_spill] sm:$0xff] %v23394_v5  ;;  %v23403_v7 = vpack.c.bf16 %v27345_v24, %v27344_v16  ;;  %v23414_v37 = vsub.f32 %v23306_v13, %v27348_v1  ;;  %18337 = vmatpush3.bf16.msra.mxu0 %v23367_v57  ;;  %v27350_v24 = vld [vmem:[#allocation196_spill] sm:$0xff]  ;;  %v27353_v1 = vand.u32 4294901760, %v23338_v58  ;;  %v23438_v41 = vsub.f32 %v23340_v32, %v27355_v18  ;;  %v27369_v18 = vld [vmem:[#allocation181_spill] sm:$0xff] }
 0x1ab   :  { %27340 = vst [vmem:[#allocation231_spill] sm:$0xff] %v23388_v15  ;;  %18379 = vmatprep.subr.bf16.mxu1 %v27350_v24  ;;  %18339 = vmatprep.subr.bf16.mxu0 %v23382_v9  ;;  %v27358_v57 = vand.u32 4294901760, %v27357_v45  ;;  %v27360_v24 = vand.u32 4294901760, %v27359_v2  ;;  %v27370_v13 = vand.u32 4294901760, %v27369_v18  ;;  %v27372_v45 = vand.u32 4294901760, %v22790_v48  ;;  %v23480_v48 = vld [vmem:[#allocation2 + $0x3b8] sm:$0xff] }
 0x1ac   :  { %27346 = vst [vmem:[#allocation233_spill] sm:$0xff] %v23403_v7  ;;  %v23433_v17 = vsub.f32 %v23338_v58, %v27353_v1  ;;  %27356 = vst [vmem:[#allocation236_spill] sm:$0xff] %v23438_v41  ;;  %v27365_v1 = vand.u32 4294901760, %v27364_v35  ;;  %v27373_v2 = vand.u32 4294901760, %v22795_v38  ;;  %v2961_v35 = vsub.f32 %v23345_v4, %v27375_v42  ;;  %v23482_v38 = vld [vmem:[#allocation2 + $0x330] sm:$0xff]  ;;  %v23497_v16 = vld [vmem:[#allocation2 + $0x338] sm:$0xff] }
 0x1ad   :  { %v23446_v23 = vpack.c.bf16 %v27360_v24, %v27358_v57  ;;  %v23458_v34 = vpack.c.bf16 %v27370_v13, %v27368_v62  ;;  %v27377_v24 = vand.u32 4294901760, %v23356_v44  ;;  %v23478_v62 = vld [vmem:[#allocation2 + $0x3b0] sm:$0xff]  ;;  %v3074_v18 = vand.u32 4294901760, %v23414_v37  ;;  %v27384_v9 = vld [vmem:[#allocation200_spill] sm:$0xff]  ;;  %v14595_v4 = vpop.f32.mrb[2].mxu1 }
 0x1ae   :  { %27354 = vst [vmem:[#allocation235_spill] sm:$0xff] %v23433_v17  ;;  %v23452_v26 = vpack.c.bf16 %v27365_v1, %v27363_v21  ;;  %v23465_v57 = vpack.c.bf16 %v27373_v2, %v27372_v45  ;;  %v27376_v21 = vand.u32 4294901760, %v23350_v22  ;;  %v27379_v1 = vld [vmem:[#allocation198_spill] sm:$0xff]  ;;  %v3081_v45 = vand.u32 4294901760, %v23419_v47  ;;  %18341 = vmatpush3.bf16.msra.mxu0 %v23388_v15  ;;  %v23543_v37 = vld [vmem:[#allocation2 + $0x3d0] sm:$0xff]  ;;  %v23545_v47 = vld [vmem:[#allocation2 + $0x3d8] sm:$0xff] }
 0x1af   :  { %27361 = vst [vmem:[#allocation174_spill] sm:$0xff] %v23446_v23  ;;  %27371 = vst [vmem:[#allocation178_spill] sm:$0xff] %v23458_v34  ;;  %v23476_v13 = vsub.f32 %v23356_v44, %v27377_v24  ;;  %18381 = vmatpush3.bf16.msra.mxu1 %v27379_v1  ;;  %v27380_v2 = vand.u32 4294901760, %v23372_v14  ;;  %18343 = vmatprep.subr.bf16.mxu0 %v23394_v5  ;;  %v14596_v1 = vpop.f32.mrb[3].mxu1  ;;  %v2962_v11 = vand.u32 4294901760, %v2961_v35  ;;  %v27388_v5 = vld [vmem:[#allocation202_spill] sm:$0xff] }
 0x1b0   :  { %27366 = vst [vmem:[#allocation176_spill] sm:$0xff] %v23452_v26  ;;  %27374 = vst [vmem:[#allocation179_spill] sm:$0xff] %v23465_v57  ;;  %v2968_v31 = vsub.f32 %v23350_v22, %v27376_v21  ;;  %v27382_v21 = vand.u32 4294901760, %v23374_v20  ;;  %18383 = vmatprep.subr.bf16.mxu1 %v27384_v9  ;;  %v23520_v56 = vadd.f32 %v14596_v1, %v14595_v4  ;;  %v27392_v35 = vld [vmem:[#allocation203_spill] sm:$0xff]  ;;  %v27394_v1 = vand.u32 4294901760, %v23433_v17 }
 0x1b1   :  { %27378 = vst [vmem:[#allocation180_spill] sm:$0xff] %v23476_v13  ;;  %v23490_v42 = vsub.f32 %v23372_v14, %v27380_v2  ;;  %v27385_v2 = vand.u32 4294901760, %v23396_v63  ;;  %v27395_v59 = vand.u32 4294901760, %v23438_v41  ;;  %v27402_v51 = vand.u32 4294901760, %v23476_v13 }
 0x1b2   :  { %v23495_v24 = vsub.f32 %v23374_v20, %v27382_v21  ;;  %v27387_v21 = vand.u32 4294901760, %v23408_v6  ;;  %v2969_v53 = vand.u32 4294901760, %v2968_v31  ;;  %18345 = vmatpush3.bf16.msra.mxu0 %v23403_v7  ;;  %v27393_v31 = vand.u32 4294901760, %v23428_v49 }
 0x1b3   :  { %27381 = vst [vmem:[#allocation181_spill] sm:$0xff] %v23490_v42  ;;  %v23507_v22 = vsub.f32 %v23396_v63, %v27385_v2  ;;  %18385 = vmatpush3.bf16.msra.mxu1 %v27388_v5  ;;  %18347 = vmatprep.subr.bf16.mxu0 %v23446_v23  ;;  %v2982_v5 = vsub.f32 %v23476_v13, %v27402_v51  ;;  %v23585_v51 = vld [vmem:[#allocation2 + $0x350] sm:$0xff]  ;;  %v23587_v13 = vld [vmem:[#allocation2 + $0x358] sm:$0xff] }
 0x1b4   :  { %27383 = vst [vmem:[#allocation237_spill] sm:$0xff] %v23495_v24  ;;  %v23513_v15 = vsub.f32 %v23408_v6, %v27387_v21  ;;  %v27389_v21 = vand.u32 4294901760, %v22814_v30  ;;  %18387 = vmatprep.subr.bf16.mxu1 %v27392_v35  ;;  %v3087_v4 = vsub.f32 %v23428_v49, %v27393_v31  ;;  %v3094_v30 = vsub.f32 %v23433_v17, %v27394_v1 }
 0x1b5   :  { %27386 = vst [vmem:[#allocation238_spill] sm:$0xff] %v23507_v22  ;;  %v27396_v31 = vand.u32 4294901760, %v23478_v62  ;;  %v27397_v1 = vand.u32 4294901760, %v23480_v48  ;;  %v23564_v35 = vpack.c.bf16 %v3081_v45, %v3074_v18  ;;  %v23566_v23 = vpack.c.bf16 %v2969_v53, %v2962_v11 }
 0x1b6   :  { %v23527_v9 = vpack.c.bf16 %v27390_v10, %v27389_v21  ;;  %v2975_v10 = vsub.f32 %v23438_v41, %v27395_v59  ;;  %v27398_v59 = vand.u32 4294901760, %v23482_v38  ;;  %v27406_v18 = vand.u32 4294901760, %v23495_v24  ;;  %18349 = vmatpush3.bf16.msra.mxu0 %v23452_v26 }
 0x1b7   :  { %v23552_v2 = vsub.f32 %v23478_v62, %v27396_v31  ;;  %v23557_v7 = vsub.f32 %v23480_v48, %v27397_v1  ;;  %27400 = vst [vmem:[#allocation241_spill] sm:$0xff] %v23564_v35  ;;  %27401 = vst [vmem:[#allocation242_spill] sm:$0xff] %v23566_v23  ;;  %v27403_v31 = vand.u32 4294901760, %v23497_v16  ;;  %18389 = vmatpush3.bf16.msra.mxu1 %v23004_v36  ;;  %v27405_v1 = vand.u32 4294901760, %v23490_v42 }
 0x1b8   :  { %27391 = vst [vmem:[#allocation239_spill] sm:$0xff] %v23527_v9  ;;  %v23562_v21 = vsub.f32 %v23482_v38, %v27398_v59  ;;  %v3108_v11 = vsub.f32 %v23495_v24, %v27406_v18  ;;  %18391 = vmatprep.subr.bf16.mxu1 %v23012_v50  ;;  %v3095_v36 = vand.u32 4294901760, %v3094_v30  ;;  %v2976_v17 = vand.u32 4294901760, %v2975_v10  ;;  %18351 = vmatprep.subr.bf16.mxu0 %v23458_v34  ;;  %v14560_v50 = vpop.f32.mrb[2].mxu0 }
 0x1b9   :  { %v23574_v41 = vsub.f32 %v23497_v16, %v27403_v31  ;;  %v3101_v59 = vsub.f32 %v23490_v42, %v27405_v1  ;;  %v3088_v31 = vand.u32 4294901760, %v3087_v4  ;;  %v27407_v1 = vand.u32 4294901760, %v23507_v22 }
 0x1ba   :  { %27399 = vst [vmem:[#allocation240_spill] sm:$0xff] %v23562_v21  ;;  %v27408_v18 = vand.u32 4294901760, %v23513_v15  ;;  %v2983_v4 = vand.u32 4294901760, %v2982_v5  ;;  %v3109_v49 = vand.u32 4294901760, %v3108_v11  ;;  %v27410_v26 = vand.u32 4294901760, %v23545_v47  ;;  %18353 = vmatpush3.bf16.msra.mxu0 %v23465_v57  ;;  %v27422_v57 = vld [vmem:[#allocation142_spill] sm:$0xff] }
 0x1bb   :  { %27404 = vst [vmem:[#allocation243_spill] sm:$0xff] %v23574_v41  ;;  %v2989_v42 = vsub.f32 %v23507_v22, %v27407_v1  ;;  %v14561_v22 = vpop.f32.mrb[3].mxu0  ;;  %18393 = vmatpush3.bf16.msra.mxu1 %v23027_v43  ;;  %v3102_v34 = vand.u32 4294901760, %v3101_v59  ;;  %v23617_v1 = vpack.c.bf16 %v3095_v36, %v3088_v31  ;;  %v27412_v59 = vand.u32 4294901760, %v23334_v29  ;;  %18355 = vmatprep.subr.bf16.mxu0 %v23527_v9  ;;  %v27416_v31 = vld [vmem:[#allocation54_spill] sm:$0xff] }
 0x1bc   :  { %v2996_v45 = vsub.f32 %v23513_v15, %v27408_v18  ;;  %v27409_v18 = vand.u32 4294901760, %v23543_v37  ;;  %v23613_v5 = vsub.f32 %v23545_v47, %v27410_v26  ;;  %v14562_v30 = vadd.f32 %v14561_v22, %v14560_v50  ;;  %18427 = vmatprep.subr.bf16.mxu1 %v23564_v35 }
 0x1bd   :  { %27411 = vst [vmem:[#allocation244_spill] sm:$0xff] %v23617_v1  ;;  %v2990_v10 = vand.u32 4294901760, %v2989_v42  ;;  %v2944_v11 = vsub.f32 %v23334_v29, %v27412_v59  ;;  %v27413_v24 = vand.u32 4294901760, %v23552_v2  ;;  %v27414_v50 = vand.u32 4294901760, %v23557_v7 }
 0x1be   :  { %v23608_v53 = vsub.f32 %v23543_v37, %v27409_v18  ;;  %v2997_v18 = vand.u32 4294901760, %v2996_v45  ;;  %v27415_v35 = vand.u32 4294901760, %v23562_v21  ;;  %v738_v42 = vadd.f32 %v14562_v30, %v23244_v28  ;;  %14348 = vmatmul.mubr.msk.f32.vlgmr.msra.gmra.mrb[16].mxu1 %vm239_vm9, %v26812_v0  ;;  %18357 = vmatpush3.bf16.msra.mxu0 %v27422_v57 }
 0x1bf   :  { %v3115_v26 = vsub.f32 %v23552_v2, %v27413_v24  ;;  %v3122_v22 = vsub.f32 %v23557_v7, %v27414_v50  ;;  %v27417_v45 = vand.u32 4294901760, %v23574_v41  ;;  %v27418_v24 = vand.u32 4294901760, %v23585_v51  ;;  %18429 = vmatpush3.bf16.msra.mxu1 %v23566_v23  ;;  %14349 = vmatprep.mubr.msk.f32.mxu1 %vm242_vm10, %v26812_v0 }
 0x1c0   :  { %v3003_v36 = vsub.f32 %v23562_v21, %v27415_v35  ;;  %v27419_v50 = vand.u32 4294901760, %v23587_v13  ;;  %v23655_v28 = vpack.c.bf16 %v2983_v4, %v2976_v17  ;;  %v23657_v30 = vpack.c.bf16 %v3109_v49, %v3102_v34  ;;  %18431 = vmatprep.subr.bf16.mxu1 %v23617_v1 }
 0x1c1   :  { %v3010_v59 = vsub.f32 %v23574_v41, %v27417_v45  ;;  %v23643_v9 = vsub.f32 %v23585_v51, %v27418_v24  ;;  %v27425_v41 = vand.u32 4294901760, %v23096_v8  ;;  %v23670_v17 = vadd.f32 %v23520_v56, %v738_v42  ;;  %v27428_v24 = vld [vmem:[#allocation144_spill] sm:$0xff] }
 0x1c2   :  { %v23648_v35 = vsub.f32 %v23587_v13, %v27419_v50  ;;  %27420 = vst [vmem:[#allocation54_spill] sm:$0xff] %v23655_v28  ;;  %27421 = vst [vmem:[#allocation245_spill] sm:$0xff] %v23657_v30  ;;  %v27423_v50 = vld [vmem:[#allocation152_spill] sm:$0xff]  ;;  %v27426_v34 = vand.u32 4294901760, %v23225_v60  ;;  %v27427_v49 = vand.u32 4294901760, %v23227_v33  ;;  %18359 = vmatprep.subr.bf16.mxu0 %v27428_v24  ;;  %v23679_v45 = vpack.c.bf16 %v2997_v18, %v2990_v10 }
 0x1c3   :  { %v27424_v43 = vand.u32 4294901760, %v27423_v50  ;;  %v3136_v19 = vsub.f32 %v23096_v8, %v27425_v41  ;;  %v3116_v1 = vand.u32 4294901760, %v3115_v26  ;;  %v3123_v57 = vand.u32 4294901760, %v3122_v22  ;;  %18433 = vmatpush3.bf16.msra.mxu1 %v23655_v28 }
 0x1c4   :  { %v23676_v4 = vpack.c.bf16 %v27427_v49, %v27426_v34  ;;  %27429 = vst [vmem:[#allocation246_spill] sm:$0xff] %v23679_v45  ;;  %v27430_v60 = vand.u32 4294901760, %v23113_v27  ;;  %v27431_v56 = vand.u32 4294901760, %v23118_v12  ;;  %v27432_v10 = vand.u32 4294901760, %v23608_v53  ;;  %v27436_v49 = vld [vmem:[#allocation146_spill] sm:$0xff]  ;;  %18435 = vmatprep.subr.bf16.mxu1 %v23657_v30 }
 0x1c5   :  { %v3129_v23 = vsub.f32 %v27423_v50, %v27424_v43  ;;  %v3004_v43 = vand.u32 4294901760, %v3003_v36  ;;  %v3011_v50 = vand.u32 4294901760, %v3010_v59  ;;  %v27433_v26 = vand.u32 4294901760, %v23613_v5  ;;  %18361 = vmatpush3.bf16.msra.mxu0 %v27436_v49 }
 0x1c6   :  { %v3017_v33 = vsub.f32 %v23113_v27, %v27430_v60  ;;  %v3024_v42 = vsub.f32 %v23118_v12, %v27431_v56  ;;  %v3143_v18 = vsub.f32 %v23608_v53, %v27432_v10  ;;  %v27434_v36 = vand.u32 4294901760, %v23263_v52  ;;  %18395 = vmatprep.subr.bf16.mxu0 %v23676_v4 }
 0x1c7   :  { %v3150_v22 = vsub.f32 %v23613_v5, %v27433_v26  ;;  %v27435_v59 = vand.u32 4294901760, %v23265_v46  ;;  %v3130_v60 = vand.u32 4294901760, %v3129_v23  ;;  %v3137_v56 = vand.u32 4294901760, %v3136_v19  ;;  %18437 = vmatpush3.bf16.msra.mxu1 %v23679_v45 }
 0x1c8   :  { %v27437_v41 = vand.u32 4294901760, %v23336_v54  ;;  %v27438_v10 = vand.u32 4294901760, %v23338_v58  ;;  %v2945_v26 = vand.u32 4294901760, %v2944_v11  ;;  %v23711_v52 = vpack.c.bf16 %v3123_v57, %v3116_v1  ;;  %14346 = vmatmul.mubr.msk.f32.vlgmr.msra.gmra.mrb[16].mxu0 %vm239_vm9, %v26812_v0 }
 0x1c9   :  { %v23700_v34 = vpack.c.bf16 %v27435_v59, %v27434_v36  ;;  %v27440_v46 = vand.u32 4294901760, %v23340_v32  ;;  %v27441_v36 = vand.u32 4294901760, %v23356_v44  ;;  %v23719_v30 = vpack.c.bf16 %v3011_v50, %v3004_v43 }
 0x1ca   :  { %v23708_v21 = vpack.c.bf16 %v27438_v10, %v27437_v41  ;;  %27439 = vst [vmem:[#allocation247_spill] sm:$0xff] %v23711_v52  ;;  %v27444_v19 = vand.u32 4294901760, %v23643_v9  ;;  %v27445_v58 = vand.u32 4294901760, %v23648_v35  ;;  %v3018_v32 = vand.u32 4294901760, %v3017_v33  ;;  %2946 = vmatprep.mubr.f32.mxu0 %v2945_v26  ;;  %18439 = vmatprep.subr.bf16.mxu1 %v23711_v52  ;;  %v27537_v52 = vld [vmem:[#allocation152_spill] sm:$0xff] }
 0x1cb   :  { %v23717_v59 = vpack.c.bf16 %v27441_v36, %v27440_v46  ;;  %27443 = vst [vmem:[#allocation249_spill] sm:$0xff] %v23719_v30  ;;  %v3025_v44 = vand.u32 4294901760, %v3024_v42  ;;  %v3144_v57 = vand.u32 4294901760, %v3143_v18  ;;  %v3151_v1 = vand.u32 4294901760, %v3150_v22  ;;  %18397 = vmatpush3.bf16.msra.mxu0 %v23700_v34  ;;  %18441 = vmatpush3.bf16.msra.mxu1 %v23719_v30 }
 0x1cc   :  { %v3031_v54 = vsub.f32 %v23643_v9, %v27444_v19  ;;  %v3038_v23 = vsub.f32 %v23648_v35, %v27445_v58  ;;  %v23733_v11 = vpack.c.bf16 %v3137_v56, %v3130_v60  ;;  %v27447_v50 = vand.u32 4294901760, %v23184_v55  ;;  %18399 = vmatprep.subr.bf16.mxu0 %v23708_v21 }
 0x1cd   :  { %27442 = vst [vmem:[#allocation248_spill] sm:$0xff] %v23717_v59  ;;  %v27448_v41 = vand.u32 4294901760, %v23189_v25  ;;  %v27449_v46 = vand.u32 4294901760, %v23372_v14  ;;  %v27450_v33 = vand.u32 4294901760, %v23374_v20  ;;  %v27452_v18 = vand.u32 4294901760, %v23396_v63 }
 0x1ce   :  { %27446 = vst [vmem:[#allocation250_spill] sm:$0xff] %v23733_v11  ;;  %v3157_v43 = vsub.f32 %v23184_v55, %v27447_v50  ;;  %v27453_v22 = vand.u32 4294901760, %v23408_v6  ;;  %v3032_v56 = vand.u32 4294901760, %v3031_v54  ;;  %v3039_v26 = vand.u32 4294901760, %v3038_v23  ;;  %18443 = vmatprep.subr.bf16.mxu1 %v23733_v11 }
 0x1cf   :  { %v3164_v10 = vsub.f32 %v23189_v25, %v27448_v41  ;;  %v23745_v42 = vpack.c.bf16 %v27450_v33, %v27449_v46  ;;  %v23756_v36 = vpack.c.bf16 %v3025_v44, %v3018_v32  ;;  %v23758_v14 = vpack.c.bf16 %v3151_v1, %v3144_v57  ;;  %18401 = vmatpush3.bf16.msra.mxu0 %v23717_v59  ;;  %v27460_v44 = vld [vmem:[#allocation212_spill] sm:$0xff] }
 0x1d0   :  { %v23753_v60 = vpack.c.bf16 %v27453_v22, %v27452_v18  ;;  %v27457_v20 = vand.u32 4294901760, %v23195_v61  ;;  %v27458_v58 = vand.u32 4294901760, %v23200_v3  ;;  %v3158_v6 = vand.u32 4294901760, %v3157_v43  ;;  %v27466_v18 = vld [vmem:[#allocation215_spill] sm:$0xff] }
 0x1d1   :  { %27451 = vst [vmem:[#allocation251_spill] sm:$0xff] %v23745_v42  ;;  %27455 = vst [vmem:[#allocation253_spill] sm:$0xff] %v23756_v36  ;;  %v3165_v54 = vand.u32 4294901760, %v3164_v10  ;;  %v27459_v23 = vand.u32 4294901760, %v23207_v39  ;;  %v27461_v57 = vand.u32 4294901760, %v27460_v44  ;;  %v27462_v50 = vand.u32 4294901760, %v23478_v62  ;;  %18403 = vmatprep.subr.bf16.mxu0 %v23745_v42  ;;  %18445 = vmatpush3.bf16.msra.mxu1 %v23756_v36 }
 0x1d2   :  { %27454 = vst [vmem:[#allocation252_spill] sm:$0xff] %v23753_v60  ;;  %27456 = vst [vmem:[#allocation254_spill] sm:$0xff] %v23758_v14  ;;  %v3045_v19 = vsub.f32 %v23195_v61, %v27457_v20  ;;  %v3052_v63 = vsub.f32 %v23200_v3, %v27458_v58  ;;  %v27463_v41 = vand.u32 4294901760, %v23480_v48  ;;  %v23781_v33 = vpack.c.bf16 %v3039_v26, %v3032_v56  ;;  %v27468_v58 = vld [vmem:[#allocation216_spill] sm:$0xff] }
 0x1d3   :  { %v3171_v32 = vsub.f32 %v23207_v39, %v27459_v23  ;;  %v3178_v1 = vsub.f32 %v27460_v44, %v27461_v57  ;;  %v27467_v22 = vand.u32 4294901760, %v27466_v18  ;;  %v27469_v23 = vand.u32 4294901760, %v27468_v58  ;;  %18405 = vmatpush3.bf16.msra.mxu0 %v23753_v60  ;;  %18447 = vmatprep.subr.bf16.mxu1 %v23758_v14 }
 0x1d4   :  { %v23778_v46 = vpack.c.bf16 %v27463_v41, %v27462_v50  ;;  %27465 = vst [vmem:[#allocation255_spill] sm:$0xff] %v23781_v33  ;;  %v3046_v43 = vand.u32 4294901760, %v3045_v19  ;;  %v3053_v10 = vand.u32 4294901760, %v3052_v63  ;;  %v27470_v48 = vand.u32 4294901760, %v23482_v38  ;;  %v27474_v63 = vld [vmem:[#allocation105_spill] sm:$0xff]  ;;  %v27479_v38 = vld [vmem:[#allocation56_spill] sm:$0xff] }
 0x1d5   :  { %v3059_v20 = vsub.f32 %v27466_v18, %v27467_v22  ;;  %v3066_v62 = vsub.f32 %v27468_v58, %v27469_v23  ;;  %v27471_v57 = vand.u32 4294901760, %v23497_v16  ;;  %v23798_v56 = vpack.c.bf16 %v3165_v54, %v3158_v6  ;;  %v27476_v22 = vld [vmem:[#allocation138_spill] sm:$0xff]  ;;  %v14665_v23 = vpop.f32.mrb[4].mxu1  ;;  %18449 = vmatpush3.bf16.msra.mxu1 %v23781_v33 }
 0x1d6   :  { %27464 = vst [vmem:[#allocation212_spill] sm:$0xff] %v23778_v46  ;;  %v3172_v26 = vand.u32 4294901760, %v3171_v32  ;;  %v3179_v19 = vand.u32 4294901760, %v3178_v1  ;;  %v27475_v41 = vand.u32 4294901760, %v27474_v63  ;;  %v27477_v36 = vand.u32 4294901760, %v27476_v22  ;;  %18407 = vmatprep.subr.bf16.mxu0 %v23778_v46  ;;  %v14666_v16 = vpop.f32.mrb[5].mxu1 }
 0x1d7   :  { %v23794_v50 = vpack.c.bf16 %v27471_v57, %v27470_v48  ;;  %27473 = vst [vmem:[#allocation216_spill] sm:$0xff] %v23798_v56  ;;  %vm241_vm11 = vcmp.eq.f32.partialorder %v21496_v40, %v27479_v38  ;;  %v14667_v48 = vadd.f32 %v14666_v16, %v14665_v23  ;;  %v23810_v6 = vpack.c.bf16 %v3053_v10, %v3046_v43  ;;  %v27481_v1 = vld [vmem:[#allocation145_spill] sm:$0xff]  ;;  %v27600_v40 = vld [vmem:[#allocation15_spill] sm:$0xff] }
 0x1d8   :  { %v23804_v11 = vpack.c.bf16 %v27477_v36, %v27475_v41  ;;  %v3060_v54 = vand.u32 4294901760, %v3059_v20  ;;  %v3067_v32 = vand.u32 4294901760, %v3066_v62  ;;  %v27482_v57 = vand.u32 4294901760, %v27481_v1  ;;  %v27483_v63 = vld [vmem:[#allocation149_spill] sm:$0xff]  ;;  %18451 = vmatprep.subr.bf16.mxu1 %v23798_v56 }
 0x1d9   :  { %27472 = vst [vmem:[#allocation215_spill] sm:$0xff] %v23794_v50  ;;  %27480 = vst [vmem:[#allocation138_spill] sm:$0xff] %v23810_v6  ;;  %v27484_v22 = vand.u32 4294901760, %v27483_v63  ;;  %18409 = vmatpush3.bf16.msra.mxu0 %v23794_v50  ;;  %v23820_v41 = vpack.c.bf16 %v3179_v19, %v3172_v26  ;;  %v27487_v23 = vand.u32 4294901760, %v23543_v37  ;;  %v27488_v16 = vand.u32 4294901760, %v23545_v47  ;;  %18453 = vmatpush3.bf16.msra.mxu1 %v23810_v6  ;;  %v27495_v47 = vld [vmem:[#allocation115_spill] sm:$0xff] }
 0x1da   :  { %27478 = vst [vmem:[#allocation105_spill] sm:$0xff] %v23804_v11  ;;  %18411 = vmatprep.subr.bf16.mxu0 %v23804_v11  ;;  %v27490_v10 = vmov 0.0   ;;  %v23834_v62 = vpack.c.bf16 %v3067_v32, %v3060_v54  ;;  %v27492_v26 = vand.u32 4294901760, %v23585_v51  ;;  %v27493_v19 = vand.u32 4294901760, %v23587_v13  ;;  %v14630_v32 = vpop.f32.mrb[4].mxu0  ;;  %v27500_v13 = vld [vmem:[#allocation168_spill] sm:$0xff] }
 0x1db   :  { %v23816_v36 = vpack.c.bf16 %v27484_v22, %v27482_v57  ;;  %27486 = vst [vmem:[#allocation149_spill] sm:$0xff] %v23820_v41  ;;  %v23826_v43 = vpack.c.bf16 %v27488_v16, %v27487_v23  ;;  %v14329_v20 = vsel %vm241_vm11, 1.0, %v27490_v10  ;;  %18455 = vmatprep.subr.bf16.mxu1 %v23820_v41  ;;  %v27496_v1 = vand.u32 4294901760, %v27495_v47  ;;  %v27497_v57 = vld [vmem:[#allocation165_spill] sm:$0xff]  ;;  %v14631_v51 = vpop.f32.mrb[5].mxu0  ;;  %v27526_v6 = vld [vmem:[#allocation180_spill] sm:$0xff] }
 0x1dc   :  { %27491 = vst [vmem:[#allocation257_spill] sm:$0xff] %v23834_v62  ;;  %v23840_v37 = vpack.c.bf16 %v27493_v19, %v27492_v26  ;;  %v27498_v63 = vand.u32 4294901760, %v27497_v57  ;;  %v23851_v54 = vsub.f32 %v14329_v20, %v14329_v20  ;;  %v27501_v23 = vand.u32 4294901760, %v27500_v13  ;;  %v27502_v16 = vld [vmem:[#allocation169_spill] sm:$0xff]  ;;  %v27507_v57 = vld [vmem:[#allocation204_spill] sm:$0xff] }
 0x1dd   :  { %27485 = vst [vmem:[#allocation145_spill] sm:$0xff] %v23816_v36  ;;  %27489 = vst [vmem:[#allocation256_spill] sm:$0xff] %v23826_v43  ;;  %18413 = vmatpush3.bf16.msra.mxu0 %v23816_v36  ;;  %18457 = vmatpush3.bf16.msra.mxu1 %v23834_v62  ;;  %v27503_v26 = vand.u32 4294901760, %v27502_v16  ;;  %v14632_v41 = vadd.f32 %v14631_v51, %v14630_v32  ;;  %v27505_v47 = vld [vmem:[#allocation173_spill] sm:$0xff]  ;;  %v27508_v20 = vand.u32 4294901760, %v27507_v57  ;;  %v27510_v32 = vand.u32 4294901760, %v23334_v29 }
 0x1de   :  { %27494 = vst [vmem:[#allocation258_spill] sm:$0xff] %v23840_v37  ;;  %v23848_v22 = vpack.c.bf16 %v27498_v63, %v27496_v1  ;;  %18415 = vmatprep.subr.bf16.mxu0 %v23826_v43  ;;  %18491 = vmatprep.subr.bf16.mxu1 %v23676_v4  ;;  %v27506_v1 = vand.u32 4294901760, %v27505_v47  ;;  %v26511_v62 = vand.u32 4294901760, %v23851_v54  ;;  %v27511_v51 = vld [vmem:[#allocation207_spill] sm:$0xff]  ;;  %v27513_v16 = vld [vmem:[#allocation208_spill] sm:$0xff] }
 0x1df   :  { %v23858_v19 = vpack.c.bf16 %v27503_v26, %v27501_v23  ;;  %v1014_v13 = vadd.f32 %v14632_v41, %v23670_v17  ;;  %v27512_v23 = vand.u32 4294901760, %v27511_v51  ;;  %v27514_v26 = vand.u32 4294901760, %v27513_v16  ;;  %v27517_v57 = vld [vmem:[#allocation223_spill] sm:$0xff]  ;;  %v27520_v51 = vld [vmem:[#allocation228_spill] sm:$0xff] }
 0x1e0   :  { %27499 = vst [vmem:[#allocation115_spill] sm:$0xff] %v23848_v22  ;;  %v23866_v63 = vpack.c.bf16 %v27508_v20, %v27506_v1  ;;  %14350 = vmatmul.mubr.msk.f32.vlgmr.msra.gmra.mrb[18].mxu1 %vm241_vm11, %v26812_v0  ;;  %v2950_v41 = vsub.f32 %v23851_v54, %v26511_v62  ;;  %v27516_v1 = vld [vmem:[#allocation222_spill] sm:$0xff]  ;;  %v27523_v16 = vld [vmem:[#allocation235_spill] sm:$0xff]  ;;  %v27525_v62 = vld [vmem:[#allocation236_spill] sm:$0xff] }
 0x1e1   :  { %27504 = vst [vmem:[#allocation165_spill] sm:$0xff] %v23858_v19  ;;  %18417 = vmatpush3.bf16.msra.mxu0 %v23840_v37  ;;  %18493 = vmatpush3.bf16.msra.mxu1 %v23700_v34  ;;  %v23882_v47 = vpack.c.bf16 %v27514_v26, %v27512_v23  ;;  %v1118_v17 = vadd.f32 %v14667_v48, %v1014_v13  ;;  %v27522_v13 = vld [vmem:[#allocation234_spill] sm:$0xff] }
 0x1e2   :  { %27509 = vst [vmem:[#allocation168_spill] sm:$0xff] %v23866_v63  ;;  %18419 = vmatprep.subr.bf16.mxu0 %v23848_v22  ;;  %3426 = vmatprep.mubr.f32.mxu1 %v27510_v32  ;;  %v23892_v20 = vpack.c.bf16 %v27517_v57, %v27516_v1  ;;  %v27519_v32 = vld [vmem:[#allocation227_spill] sm:$0xff]  ;;  %v2951_v48 = vand.u32 4294901760, %v2950_v41  ;;  %v23904_v26 = vpack.c.bf16 %v27523_v16, %v27522_v13  ;;  %v27528_v41 = vld [vmem:[#allocation181_spill] sm:$0xff] }
 0x1e3   :  { %27515 = vst [vmem:[#allocation169_spill] sm:$0xff] %v23882_v47  ;;  %18495 = vmatprep.subr.bf16.mxu1 %v23708_v21  ;;  %v23899_v23 = vpack.c.bf16 %v27520_v51, %v27519_v32  ;;  %v23911_v56 = vpack.c.bf16 %v27526_v6, %v27525_v62 }
 0x1e4   :  { %27518 = vst [vmem:[#allocation173_spill] sm:$0xff] %v23892_v20  ;;  %27524 = vst [vmem:[#allocation207_spill] sm:$0xff] %v23904_v26 }
 0x1e5   :  { %18421 = vmatpush3.bf16.msra.mxu0 %v23858_v19  ;;  %18497 = vmatpush3.bf16.msra.mxu1 %v23717_v59  ;;  %27521 = vst [vmem:[#allocation204_spill] sm:$0xff] %v23899_v23  ;;  %27527 = vst [vmem:[#allocation208_spill] sm:$0xff] %v23911_v56 }
 0x1e6   :  { %18423 = vmatprep.subr.bf16.mxu0 %v23866_v63  ;;  %18499 = vmatprep.subr.bf16.mxu1 %v23745_v42  ;;  %v14735_v30 = vpop.f32.mrb[6].mxu1 }
 0x1e7   :  { %v14736_v45 = vpop.f32.mrb[7].mxu1 }
 0x1e8   :  { %v14737_v49 = vadd.f32 %v14736_v45, %v14735_v30 }
 0x1e9   :  { %18425 = vmatpush3.bf16.msra.mxu0 %v23882_v47  ;;  %18501 = vmatpush3.bf16.msra.mxu1 %v23753_v60 }
 0x1ea   :  { %18459 = vmatprep.subr.bf16.mxu0 %v23892_v20  ;;  %18503 = vmatprep.subr.bf16.mxu1 %v23778_v46  ;;  %v27529_v20 = vld [vmem:[#allocation237_spill] sm:$0xff] }
 0x1eb   :  { %v23917_v33 = vpack.c.bf16 %v27529_v20, %v27528_v41 }
 0x1ec   :  { %2952 = vmatmul.mubr.f32.vlgmr.msra.gmra.mrb[18].mxu0 %v2951_v48  ;;  %v27531_v48 = vld [vmem:[#allocation238_spill] sm:$0xff] }
 0x1ed   :  { %18461 = vmatpush3.bf16.msra.mxu0 %v23899_v23  ;;  %3319 = vmatprep.mubr.f32.mxu0 %v23334_v29  ;;  %27530 = vst [vmem:[#allocation222_spill] sm:$0xff] %v23917_v33  ;;  %v23924_v29 = vpack.c.bf16 %v23513_v15, %v27531_v48  ;;  %v23929_v23 = vpack.c.bf16 %v23557_v7, %v23552_v2 }
 0x1ee   :  { %18463 = vmatprep.subr.bf16.mxu0 %v23904_v26  ;;  %18505 = vmatpush3.bf16.msra.mxu1 %v23794_v50  ;;  %v27534_v26 = vld [vmem:[#allocation240_spill] sm:$0xff] }
 0x1ef   :  { %18507 = vmatprep.subr.bf16.mxu1 %v23804_v11  ;;  %27532 = vst [vmem:[#allocation223_spill] sm:$0xff] %v23924_v29  ;;  %27533 = vst [vmem:[#allocation227_spill] sm:$0xff] %v23929_v23 }
 0x1f1   :  { %18465 = vmatpush3.bf16.msra.mxu0 %v23911_v56  ;;  %v27535_v56 = vld [vmem:[#allocation243_spill] sm:$0xff] }
 0x1f2   :  { %18467 = vmatprep.subr.bf16.mxu0 %v23917_v33  ;;  %18509 = vmatpush3.bf16.msra.mxu1 %v23816_v36  ;;  %v23936_v14 = vpack.c.bf16 %v27535_v56, %v27534_v26  ;;  %v23941_v33 = vpack.c.bf16 %v23096_v8, %v27537_v52  ;;  %v23960_v8 = vpack.c.bf16 %v23648_v35, %v23643_v9 }
 0x1f3   :  { %18511 = vmatprep.subr.bf16.mxu1 %v23826_v43  ;;  %v23972_v52 = vpack.c.bf16 %v23200_v3, %v23195_v61  ;;  %v23990_v61 = vpack.c.bf16 %v27468_v58, %v27466_v18  ;;  %v27552_v18 = vand.u32 4294901760, %v27520_v51  ;;  %v27558_v51 = vand.u32 4294901760, %v27526_v6 }
 0x1f4   :  { %27536 = vst [vmem:[#allocation228_spill] sm:$0xff] %v23936_v14  ;;  %27538 = vst [vmem:[#allocation234_spill] sm:$0xff] %v23941_v33  ;;  %v27563_v6 = vand.u32 4294901760, %v27531_v48  ;;  %v27569_v48 = vand.u32 4294901760, %v27534_v26  ;;  %v27573_v26 = vld [vmem:[#allocation206_spill] sm:$0xff] }
 0x1f5   :  { %18469 = vmatpush3.bf16.msra.mxu0 %v23924_v29  ;;  %v23948_v29 = vpack.c.bf16 %v23118_v12, %v23113_v27  ;;  %27541 = vst [vmem:[#allocation180_spill] sm:$0xff] %v23960_v8  ;;  %v23965_v27 = vpack.c.bf16 %v23189_v25, %v23184_v55  ;;  %v14700_v12 = vpop.f32.mrb[6].mxu0  ;;  %27543 = vst [vmem:[#allocation237_spill] sm:$0xff] %v23972_v52  ;;  %v27545_v25 = vand.u32 4294901760, %v23851_v54 }
 0x1f6   :  { %18471 = vmatprep.subr.bf16.mxu0 %v23929_v23  ;;  %18513 = vmatpush3.bf16.msra.mxu1 %v23840_v37  ;;  %v23953_v23 = vpack.c.bf16 %v23613_v5, %v23608_v53  ;;  %v14701_v30 = vpop.f32.mrb[7].mxu0  ;;  %27547 = vst [vmem:[#allocation240_spill] sm:$0xff] %v23990_v61 }
 0x1f7   :  { %18515 = vmatprep.subr.bf16.mxu1 %v23848_v22  ;;  %27539 = vst [vmem:[#allocation235_spill] sm:$0xff] %v23948_v29  ;;  %27542 = vst [vmem:[#allocation181_spill] sm:$0xff] %v23965_v27  ;;  %v14702_v45 = vadd.f32 %v14701_v30, %v14700_v12  ;;  %v27546_v12 = vld [vmem:[#allocation55_spill] sm:$0xff]  ;;  %v27551_v30 = vand.u32 4294901760, %v27519_v32  ;;  %v27557_v32 = vand.u32 4294901760, %v27525_v62  ;;  %v27564_v62 = vand.u32 4294901760, %v23513_v15 }
 0x1f8   :  { %27540 = vst [vmem:[#allocation236_spill] sm:$0xff] %v23953_v23  ;;  %v27570_v15 = vand.u32 4294901760, %v27535_v56  ;;  %v27574_v56 = vand.u32 4294901760, %v23608_v53 }
 0x1f9   :  { %18473 = vmatpush3.bf16.msra.mxu0 %v23936_v14  ;;  %v1230_v55 = vadd.f32 %v14702_v45, %v1118_v17  ;;  %v24006_v58 = vpack.c.bf16 %v27552_v18, %v27551_v30  ;;  %v27572_v18 = vld [vmem:[#allocation77_spill] sm:$0xff] }
 0x1fa   :  { %18475 = vmatprep.subr.bf16.mxu0 %v23941_v33  ;;  %18517 = vmatpush3.bf16.msra.mxu1 %v23858_v19 }
 0x1fb   :  { %18519 = vmatprep.subr.bf16.mxu1 %v23866_v63  ;;  %v1462_v3 = vadd.f32 %v14737_v49, %v1230_v55  ;;  %27553 = vst [vmem:[#allocation152_spill] sm:$0xff] %v24006_v58  ;;  %v27554_v49 = vand.u32 4294901760, %v27522_v13  ;;  %v24026_v13 = vpack.c.bf16 %v27558_v51, %v27557_v32  ;;  %v24043_v55 = vpack.c.bf16 %v27564_v62, %v27563_v6  ;;  %v27577_v51 = vld [vmem:[#allocation210_spill] sm:$0xff] }
 0x1fd   :  { %18477 = vmatpush3.bf16.msra.mxu0 %v23948_v29  ;;  %27559 = vst [vmem:[#allocation259_spill] sm:$0xff] %v24026_v13  ;;  %27565 = vst [vmem:[#allocation261_spill] sm:$0xff] %v24043_v55 }
 0x1fe   :  { %18479 = vmatprep.subr.bf16.mxu0 %v23953_v23  ;;  %18521 = vmatpush3.bf16.msra.mxu1 %v23882_v47  ;;  %v23977_v23 = vpack.c.bf16 %v27460_v44, %v23207_v39  ;;  %v27548_v39 = vand.u32 4294901760, %v27516_v1  ;;  %v27549_v44 = vand.u32 4294901760, %v27517_v57  ;;  %v27555_v1 = vand.u32 4294901760, %v27523_v16 }
 0x1ff   :  { %18555 = vmatprep.subr.bf16.mxu1 %v23676_v4  ;;  %v27561_v16 = vand.u32 4294901760, %v27529_v20  ;;  %v27567_v20 = vand.u32 4294901760, %v23557_v7 }
 0x200   :  { %27544 = vst [vmem:[#allocation238_spill] sm:$0xff] %v23977_v23  ;;  %v23997_v17 = vpack.c.bf16 %v27549_v44, %v27548_v39  ;;  %v24013_v57 = vpack.c.bf16 %v27555_v1, %v27554_v49  ;;  %v24059_v39 = vpack.c.bf16 %v27570_v15, %v27569_v48  ;;  %v24061_v44 = vpop.permute.xlu0 %3708  ;;  %v27575_v49 = vand.u32 4294901760, %v23613_v5  ;;  %v27582_v48 = vld [vmem:[#allocation217_spill] sm:$0xff]  ;;  %v27583_v15 = vld [vmem:[#allocation10_spill] sm:$0xff] }
 0x201   :  { %18481 = vmatpush3.bf16.msra.mxu0 %v23960_v8  ;;  %3430 = vmatmul.mubr.f32.vlgmr.msra.gmra.mrb[20].mxu1 %v27545_v25  ;;  %vm3712_vm12 = vcmp.eq.f32.partialorder %v24061_v44, %v27572_v18  ;;  %v20957_v18 = vmov 2   ;;  %vm3715_vm1 = vcmp.eq.f32.partialorder %v24061_v44, %v27416_v31  ;;  %vm3718_vm2 = vcmp.eq.f32.partialorder %v24061_v44, %v27546_v12 }
 0x202   :  { %18483 = vmatprep.subr.bf16.mxu0 %v23965_v27  ;;  %18557 = vmatpush3.bf16.msra.mxu1 %v23700_v34  ;;  %27550 = vst [vmem:[#allocation243_spill] sm:$0xff] %v23997_v17  ;;  %27556 = vst [vmem:[#allocation55_spill] sm:$0xff] %v24013_v57  ;;  %v24074_v1 = vpack.c.bf16 %v27575_v49, %v27574_v56  ;;  %v14356_v32 = vsel %vm3712_vm12, 1.0, %v27490_v10  ;;  %v27586_v49 = vld [vmem:[#allocation220_spill] sm:$0xff]  ;;  %vm3717_vm3 = vcmp.eq.f32.partialorder %v24061_v44, %v27479_v38 }
 0x203   :  { %14353 = vmatprep.mubr.msk.f32.mxu1 %vm242_vm10, %v26812_v0  ;;  %18559 = vmatprep.subr.bf16.mxu1 %v23708_v21  ;;  %27571 = vst [vmem:[#allocation263_spill] sm:$0xff] %v24059_v39  ;;  %v24090_v5 = vsub.f32 %v14356_v32, %v14356_v32  ;;  %v27587_v32 = vld [vmem:[#allocation14_spill] sm:$0xff] }
 0x204   :  { %27576 = vst [vmem:[#allocation264_spill] sm:$0xff] %v24074_v1  ;;  %20914 = vset.pattern.permute.xlu1 %v20957_v18  ;;  %20917 = vset.pattern.permute.xlu0 %v20957_v18  ;;  %v27699_v18 = vld [vmem:[#allocation110_spill] sm:$0xff] }
 0x205   :  { %18485 = vmatpush3.bf16.msra.mxu0 %v23972_v52 }
 0x206   :  { %18487 = vmatprep.subr.bf16.mxu0 %v23977_v23  ;;  %18561 = vmatpush3.bf16.msra.mxu1 %v23717_v59  ;;  %v14805_v30 = vpop.f32.mrb[8].mxu1 }
 0x207   :  { %18563 = vmatprep.subr.bf16.mxu1 %v23745_v42  ;;  %v14806_v7 = vpop.f32.mrb[9].mxu1 }
 0x209   :  { %18489 = vmatpush3.bf16.msra.mxu0 %v23990_v61 }
 0x20a   :  { %18523 = vmatprep.subr.bf16.mxu0 %v23997_v17  ;;  %18565 = vmatpush3.bf16.msra.mxu1 %v23753_v60 }
 0x20b   :  { %18567 = vmatprep.subr.bf16.mxu1 %v23778_v46 }
 0x20c   :  { %3322 = vmatmul.mubr.f32.vlgmr.msra.gmra.mrb[20].mxu0 %v23851_v54  ;;  %v27560_v54 = vand.u32 4294901760, %v27528_v41  ;;  %v27566_v41 = vand.u32 4294901760, %v23552_v2  ;;  %v14807_v2 = vadd.f32 %v14806_v7, %v14805_v30  ;;  %v27584_v30 = vld [vmem:[#allocation218_spill] sm:$0xff]  ;;  %v27585_v7 = vld [vmem:[#allocation11_spill] sm:$0xff] }
 0x20d   :  { %18525 = vmatpush3.bf16.msra.mxu0 %v24006_v58  ;;  %14351 = vmatprep.mubr.msk.f32.mxu0 %vm242_vm10, %v26812_v0  ;;  %v27697_v58 = vld [vmem:[#allocation106_spill] sm:$0xff] }
 0x20e   :  { %18527 = vmatprep.subr.bf16.mxu0 %v24013_v57  ;;  %v24034_v45 = vpack.c.bf16 %v27561_v16, %v27560_v54  ;;  %18569 = vmatpush3.bf16.msra.mxu1 %v23794_v50  ;;  %v24050_v25 = vpack.c.bf16 %v27567_v20, %v27566_v41  ;;  %v27578_v54 = vand.u32 4294901760, %v23643_v9  ;;  %v27579_v16 = vand.u32 4294901760, %v23648_v35  ;;  %v27581_v20 = vld [vmem:[#allocation9_spill] sm:$0xff] }
 0x20f   :  { %18571 = vmatprep.subr.bf16.mxu1 %v23804_v11  ;;  %v14770_v6 = vpop.f32.mrb[8].mxu0  ;;  %v3833_v9 = vand.u32 4294901760, %v24090_v5 }
 0x210   :  { %27562 = vst [vmem:[#allocation260_spill] sm:$0xff] %v24034_v45  ;;  %27568 = vst [vmem:[#allocation262_spill] sm:$0xff] %v24050_v25  ;;  %v24087_v53 = vpack.c.bf16 %v27579_v16, %v27578_v54  ;;  %v14771_v62 = vpop.f32.mrb[9].mxu0  ;;  %v27588_v54 = vld [vmem:[#allocation224_spill] sm:$0xff]  ;;  %v27589_v16 = vld [vmem:[#allocation17_spill] sm:$0xff] }
 0x211   :  { %18529 = vmatpush3.bf16.msra.mxu0 %v24026_v13  ;;  %v14772_v41 = vadd.f32 %v14771_v62, %v14770_v6  ;;  %v27590_v6 = vld [vmem:[#allocation5_spill] sm:$0xff] }
 0x212   :  { %18531 = vmatprep.subr.bf16.mxu0 %v24034_v45  ;;  %18573 = vmatpush3.bf16.msra.mxu1 %v23816_v36  ;;  %27580 = vst [vmem:[#allocation265_spill] sm:$0xff] %v24087_v53 }
 0x213   :  { %18575 = vmatprep.subr.bf16.mxu1 %v23826_v43  ;;  %v1600_v35 = vadd.f32 %v14772_v41, %v1462_v3  ;;  %v3834_v3 = vsub.f32 %v24090_v5, %v3833_v9  ;;  %v27591_v41 = vld [vmem:[#allocation20_spill] sm:$0xff] }
 0x215   :  { %18533 = vmatpush3.bf16.msra.mxu0 %v24043_v55  ;;  %v1708_v56 = vadd.f32 %v14807_v2, %v1600_v35  ;;  %v3835_v62 = vand.u32 4294901760, %v3834_v3  ;;  %v27592_v2 = vld [vmem:[#allocation6_spill] sm:$0xff]  ;;  %v27598_v3 = vld [vmem:[#allocation12_spill] sm:$0xff]  ;;  %v27614_v55 = vld [vmem:[#allocation29_spill] sm:$0xff] }
 0x216   :  { %18535 = vmatprep.subr.bf16.mxu0 %v24050_v25  ;;  %18577 = vmatpush3.bf16.msra.mxu1 %v23840_v37  ;;  %v27593_v35 = vld [vmem:[#allocation22_spill] sm:$0xff]  ;;  %v27613_v25 = vld [vmem:[#allocation27_spill] sm:$0xff] }
 0x217   :  { %18579 = vmatprep.subr.bf16.mxu1 %v23848_v22 }
 0x219   :  { %18537 = vmatpush3.bf16.msra.mxu0 %v24059_v39 }
 0x21a   :  { %18539 = vmatprep.subr.bf16.mxu0 %v27573_v26  ;;  %18581 = vmatpush3.bf16.msra.mxu1 %v23858_v19 }
 0x21b   :  { %18583 = vmatprep.subr.bf16.mxu1 %v23866_v63 }
 0x21d   :  { %18541 = vmatpush3.bf16.msra.mxu0 %v27577_v51 }
 0x21e   :  { %18543 = vmatprep.subr.bf16.mxu0 %v24074_v1  ;;  %18585 = vmatpush3.bf16.msra.mxu1 %v23882_v47  ;;  %v27609_v1 = vld [vmem:[#allocation23_spill] sm:$0xff] }
 0x21f   :  { %18619 = vmatprep.subr.bf16.mxu1 %v27581_v20  ;;  %v27605_v20 = vld [vmem:[#allocation18_spill] sm:$0xff] }
 0x221   :  { %18545 = vmatpush3.bf16.msra.mxu0 %v24087_v53  ;;  %14354 = vmatmul.mubr.msk.f32.vlgmr.msra.gmra.mrb[22].mxu1 %vm241_vm11, %v26812_v0  ;;  %v27607_v53 = vld [vmem:[#allocation21_spill] sm:$0xff] }
 0x222   :  { %18547 = vmatprep.subr.bf16.mxu0 %v27582_v48  ;;  %18621 = vmatpush3.bf16.msra.mxu1 %v27583_v15  ;;  %v27602_v15 = vld [vmem:[#allocation16_spill] sm:$0xff] }
 0x223   :  { %14363 = vmatprep.mubr.msk.f32.mxu1 %vm3712_vm12, %v26812_v0  ;;  %18623 = vmatprep.subr.bf16.mxu1 %v27585_v7  ;;  %v27599_v7 = vld [vmem:[#allocation28_spill] sm:$0xff] }
 0x225   :  { %18549 = vmatpush3.bf16.msra.mxu0 %v27584_v30 }
 0x226   :  { %18551 = vmatprep.subr.bf16.mxu0 %v27586_v49  ;;  %18625 = vmatpush3.bf16.msra.mxu1 %v27587_v32  ;;  %v27594_v49 = vld [vmem:[#allocation7_spill] sm:$0xff]  ;;  %v27597_v32 = vld [vmem:[#allocation26_spill] sm:$0xff] }
 0x227   :  { %18627 = vmatprep.subr.bf16.mxu1 %v27589_v16  ;;  %v27596_v16 = vld [vmem:[#allocation8_spill] sm:$0xff] }
 0x229   :  { %18553 = vmatpush3.bf16.msra.mxu0 %v27588_v54  ;;  %v27595_v54 = vld [vmem:[#allocation24_spill] sm:$0xff] }
 0x22a   :  { %18587 = vmatprep.subr.bf16.mxu0 %v27590_v6  ;;  %18629 = vmatpush3.bf16.msra.mxu1 %v27591_v41  ;;  %v27601_v41 = vld [vmem:[#allocation30_spill] sm:$0xff] }
 0x22b   :  { %18631 = vmatprep.subr.bf16.mxu1 %v27593_v35 }
 0x22c   :  { %14352 = vmatmul.mubr.msk.f32.vlgmr.msra.gmra.mrb[22].mxu0 %vm241_vm11, %v26812_v0 }
 0x22d   :  { %18589 = vmatpush3.bf16.msra.mxu0 %v27592_v2  ;;  %3836 = vmatprep.mubr.f32.mxu0 %v3835_v62  ;;  %v27603_v62 = vld [vmem:[#allocation32_spill] sm:$0xff] }
 0x22e   :  { %18591 = vmatprep.subr.bf16.mxu0 %v27594_v49  ;;  %18633 = vmatpush3.bf16.msra.mxu1 %v27595_v54  ;;  %v14875_v30 = vpop.f32.mrb[10].mxu1  ;;  %v27604_v54 = vld [vmem:[#allocation78_spill] sm:$0xff] }
 0x22f   :  { %18635 = vmatprep.subr.bf16.mxu1 %v27597_v32  ;;  %v14876_v35 = vpop.f32.mrb[11].mxu1  ;;  %vm3711_vm13 = vcmp.eq.f32.partialorder %v24061_v44, %v27604_v54  ;;  %v27606_v32 = vld [vmem:[#allocation34_spill] sm:$0xff]  ;;  %v27675_v54 = vld [vmem:[#allocation131_spill] sm:$0xff] }
 0x230   :  { %v14877_v48 = vadd.f32 %v14876_v35, %v14875_v30  ;;  %v27610_v30 = vld [vmem:[#allocation40_spill] sm:$0xff]  ;;  %v27611_v35 = vld [vmem:[#allocation25_spill] sm:$0xff] }
 0x231   :  { %18593 = vmatpush3.bf16.msra.mxu0 %v27596_v16 }
 0x232   :  { %18595 = vmatprep.subr.bf16.mxu0 %v27598_v3  ;;  %18637 = vmatpush3.bf16.msra.mxu1 %v27599_v7  ;;  %v27608_v7 = vld [vmem:[#allocation36_spill] sm:$0xff] }
 0x233   :  { %18639 = vmatprep.subr.bf16.mxu1 %v27601_v41  ;;  %v14355_v41 = vsel %vm3711_vm13, 1.0, %v27490_v10 }
 0x235   :  { %18597 = vmatpush3.bf16.msra.mxu0 %v27600_v40  ;;  %v14840_v51 = vpop.f32.mrb[10].mxu0 }
 0x236   :  { %18599 = vmatprep.subr.bf16.mxu0 %v27602_v15  ;;  %18641 = vmatpush3.bf16.msra.mxu1 %v27603_v62  ;;  %v24144_v62 = vsub.f32 %v14355_v41, %v14355_v41  ;;  %v14841_v26 = vpop.f32.mrb[11].mxu0  ;;  %v27615_v41 = vld [vmem:[#allocation31_spill] sm:$0xff] }
 0x237   :  { %18643 = vmatprep.subr.bf16.mxu1 %v27606_v32  ;;  %v27612_v32 = vld [vmem:[#allocation49_spill] sm:$0xff]  ;;  %v14842_v39 = vadd.f32 %v14841_v26, %v14840_v51 }
 0x238   :  { %v27616_v51 = vld [vmem:[#allocation33_spill] sm:$0xff] }
 0x239   :  { %18601 = vmatpush3.bf16.msra.mxu0 %v27605_v20  ;;  %v1876_v45 = vadd.f32 %v14842_v39, %v1708_v56  ;;  %v27617_v39 = vld [vmem:[#allocation35_spill] sm:$0xff] }
 0x23a   :  { %18603 = vmatprep.subr.bf16.mxu0 %v27607_v53  ;;  %18645 = vmatpush3.bf16.msra.mxu1 %v27608_v7  ;;  %v3839_v7 = vand.u32 4294901760, %v24144_v62 }
 0x23b   :  { %18647 = vmatprep.subr.bf16.mxu1 %v27610_v30  ;;  %v1980_v26 = vadd.f32 %v14877_v48, %v1876_v45  ;;  %v27618_v30 = vld [vmem:[#allocation37_spill] sm:$0xff]  ;;  %v27620_v45 = vld [vmem:[#allocation39_spill] sm:$0xff] }
 0x23c   :  { %v27621_v48 = vld [vmem:[#allocation41_spill] sm:$0xff] }
 0x23d   :  { %18605 = vmatpush3.bf16.msra.mxu0 %v27609_v1 }
 0x23e   :  { %18607 = vmatprep.subr.bf16.mxu0 %v27611_v35  ;;  %18649 = vmatpush3.bf16.msra.mxu1 %v27612_v32  ;;  %v3840_v32 = vsub.f32 %v24144_v62, %v3839_v7 }
 0x23f   :  { %18683 = vmatprep.subr.bf16.mxu1 %v27590_v6 }
 0x240   :  { %v3841_v56 = vand.u32 4294901760, %v3840_v32  ;;  %v27622_v32 = vld [vmem:[#allocation42_spill] sm:$0xff] }
 0x241   :  { %18609 = vmatpush3.bf16.msra.mxu0 %v27613_v25  ;;  %14364 = vmatmul.mubr.msk.f32.vlgmr.msra.gmra.mrb[24].mxu1 %vm3711_vm13, %v26812_v0 }
 0x242   :  { %18611 = vmatprep.subr.bf16.mxu0 %v27614_v55  ;;  %18685 = vmatpush3.bf16.msra.mxu1 %v27592_v2 }
 0x243   :  { %4316 = vmatprep.mubr.f32.mxu1 %v3833_v9  ;;  %18687 = vmatprep.subr.bf16.mxu1 %v27594_v49  ;;  %v27619_v9 = vld [vmem:[#allocation38_spill] sm:$0xff] }
 0x245   :  { %18613 = vmatpush3.bf16.msra.mxu0 %v27615_v41 }
 0x246   :  { %18615 = vmatprep.subr.bf16.mxu0 %v27616_v51  ;;  %18689 = vmatpush3.bf16.msra.mxu1 %v27596_v16 }
 0x247   :  { %18691 = vmatprep.subr.bf16.mxu1 %v27598_v3 }
 0x249   :  { %18617 = vmatpush3.bf16.msra.mxu0 %v27617_v39 }
 0x24a   :  { %18651 = vmatprep.subr.bf16.mxu0 %v27618_v30  ;;  %18693 = vmatpush3.bf16.msra.mxu1 %v27600_v40 }
 0x24b   :  { %18695 = vmatprep.subr.bf16.mxu1 %v27602_v15 }
 0x24c   :  { %3842 = vmatmul.mubr.f32.vlgmr.msra.gmra.mrb[24].mxu0 %v3841_v56  ;;  %v27623_v56 = vld [vmem:[#allocation43_spill] sm:$0xff] }
 0x24d   :  { %18653 = vmatpush3.bf16.msra.mxu0 %v27619_v9  ;;  %4209 = vmatprep.mubr.f32.mxu0 %v24090_v5  ;;  %v27624_v5 = vld [vmem:[#allocation44_spill] sm:$0xff] }
 0x24e   :  { %18655 = vmatprep.subr.bf16.mxu0 %v27620_v45  ;;  %18697 = vmatpush3.bf16.msra.mxu1 %v27605_v20  ;;  %v14945_v9 = vpop.f32.mrb[12].mxu1  ;;  %v27625_v45 = vld [vmem:[#allocation45_spill] sm:$0xff] }
 0x24f   :  { %18699 = vmatprep.subr.bf16.mxu1 %v27607_v53  ;;  %v14946_v30 = vpop.f32.mrb[13].mxu1 }
 0x250   :  { %v14947_v13 = vadd.f32 %v14946_v30, %v14945_v9  ;;  %v27629_v9 = vld [vmem:[#allocation50_spill] sm:$0xff] }
 0x251   :  { %18657 = vmatpush3.bf16.msra.mxu0 %v27621_v48  ;;  %v27626_v48 = vld [vmem:[#allocation46_spill] sm:$0xff] }
 0x252   :  { %18659 = vmatprep.subr.bf16.mxu0 %v27622_v32  ;;  %18701 = vmatpush3.bf16.msra.mxu1 %v27609_v1  ;;  %v27627_v32 = vld [vmem:[#allocation47_spill] sm:$0xff] }
 0x253   :  { %18703 = vmatprep.subr.bf16.mxu1 %v27611_v35 }
 0x255   :  { %18661 = vmatpush3.bf16.msra.mxu0 %v27623_v56  ;;  %v27628_v56 = vld [vmem:[#allocation48_spill] sm:$0xff] }
 0x256   :  { %18663 = vmatprep.subr.bf16.mxu0 %v27624_v5  ;;  %18705 = vmatpush3.bf16.msra.mxu1 %v27613_v25 }
 0x257   :  { %18707 = vmatprep.subr.bf16.mxu1 %v27614_v55 }
 0x258   :  { %v14910_v57 = vpop.f32.mrb[12].mxu0 }
 0x259   :  { %18665 = vmatpush3.bf16.msra.mxu0 %v27625_v45  ;;  %v14911_v5 = vpop.f32.mrb[13].mxu0  ;;  %v27630_v45 = vld [vmem:[#allocation57_spill] sm:$0xff] }
 0x25a   :  { %18667 = vmatprep.subr.bf16.mxu0 %v27626_v48  ;;  %18709 = vmatpush3.bf16.msra.mxu1 %v27615_v41  ;;  %v14912_v30 = vadd.f32 %v14911_v5, %v14910_v57  ;;  %v27632_v5 = vld [vmem:[#allocation59_spill] sm:$0xff] }
 0x25b   :  { %18711 = vmatprep.subr.bf16.mxu1 %v27616_v51 }
 0x25c   :  { %v2092_v48 = vadd.f32 %v14912_v30, %v1980_v26  ;;  %v27635_v26 = vld [vmem:[#allocation62_spill] sm:$0xff] }
 0x25d   :  { %18669 = vmatpush3.bf16.msra.mxu0 %v27627_v32  ;;  %v27639_v30 = vld [vmem:[#allocation66_spill] sm:$0xff]  ;;  %v27647_v32 = vld [vmem:[#allocation96_spill] sm:$0xff] }
 0x25e   :  { %18671 = vmatprep.subr.bf16.mxu0 %v27628_v56  ;;  %18713 = vmatpush3.bf16.msra.mxu1 %v27617_v39  ;;  %v27631_v56 = vld [vmem:[#allocation58_spill] sm:$0xff]  ;;  %v2324_v57 = vadd.f32 %v14947_v13, %v2092_v48  ;;  %v27636_v13 = vld [vmem:[#allocation63_spill] sm:$0xff]  ;;  %v27637_v48 = vld [vmem:[#allocation64_spill] sm:$0xff] }
 0x25f   :  { %18747 = vmatprep.subr.bf16.mxu1 %v27590_v6 }
 0x261   :  { %18673 = vmatpush3.bf16.msra.mxu0 %v27629_v9  ;;  %4320 = vmatmul.mubr.f32.vlgmr.msra.gmra.mrb[26].mxu1 %v3839_v7  ;;  %v27633_v9 = vld [vmem:[#allocation60_spill] sm:$0xff]  ;;  %v27634_v7 = vld [vmem:[#allocation61_spill] sm:$0xff] }
 0x262   :  { %18675 = vmatprep.subr.bf16.mxu0 %v27630_v45  ;;  %18749 = vmatpush3.bf16.msra.mxu1 %v27592_v2  ;;  %v27646_v45 = vld [vmem:[#allocation72_spill] sm:$0xff] }
 0x263   :  { %14367 = vmatprep.mubr.msk.f32.mxu1 %vm3712_vm12, %v26812_v0  ;;  %18751 = vmatprep.subr.bf16.mxu1 %v27594_v49  ;;  %v27680_v49 = vld [vmem:[#allocation136_spill] sm:$0xff] }
 0x265   :  { %18677 = vmatpush3.bf16.msra.mxu0 %v27631_v56 }
 0x266   :  { %18679 = vmatprep.subr.bf16.mxu0 %v27632_v5  ;;  %18753 = vmatpush3.bf16.msra.mxu1 %v27596_v16  ;;  %v27679_v16 = vld [vmem:[#allocation135_spill] sm:$0xff] }
 0x267   :  { %18755 = vmatprep.subr.bf16.mxu1 %v27598_v3 }
 0x269   :  { %18681 = vmatpush3.bf16.msra.mxu0 %v27633_v9 }
 0x26a   :  { %18715 = vmatprep.subr.bf16.mxu0 %v27634_v7  ;;  %18757 = vmatpush3.bf16.msra.mxu1 %v27600_v40  ;;  %v27640_v7 = vld [vmem:[#allocation67_spill] sm:$0xff] }
 0x26b   :  { %18759 = vmatprep.subr.bf16.mxu1 %v27602_v15 }
 0x26c   :  { %4212 = vmatmul.mubr.f32.vlgmr.msra.gmra.mrb[26].mxu0 %v24144_v62  ;;  %v27638_v62 = vld [vmem:[#allocation65_spill] sm:$0xff] }
 0x26d   :  { %18717 = vmatpush3.bf16.msra.mxu0 %v27635_v26  ;;  %14365 = vmatprep.mubr.msk.f32.mxu0 %vm3712_vm12, %v26812_v0 }
 0x26e   :  { %18719 = vmatprep.subr.bf16.mxu0 %v27636_v13  ;;  %18761 = vmatpush3.bf16.msra.mxu1 %v27605_v20  ;;  %v15015_v26 = vpop.f32.mrb[14].mxu1  ;;  %v27641_v13 = vld [vmem:[#allocation68_spill] sm:$0xff]  ;;  %v27673_v20 = vld [vmem:[#allocation129_spill] sm:$0xff] }
 0x26f   :  { %18763 = vmatprep.subr.bf16.mxu1 %v27607_v53  ;;  %v15016_v9 = vpop.f32.mrb[15].mxu1  ;;  %v27671_v53 = vld [vmem:[#allocation127_spill] sm:$0xff] }
 0x270   :  { %v15017_v5 = vadd.f32 %v15016_v9, %v15015_v26  ;;  %v27645_v9 = vld [vmem:[#allocation71_spill] sm:$0xff] }
 0x271   :  { %18721 = vmatpush3.bf16.msra.mxu0 %v27637_v48  ;;  %v27642_v48 = vld [vmem:[#allocation51_spill] sm:$0xff] }
 0x272   :  { %18723 = vmatprep.subr.bf16.mxu0 %v27638_v62  ;;  %18765 = vmatpush3.bf16.msra.mxu1 %v27609_v1  ;;  %vm3714_vm14 = vcmp.eq.f32.partialorder %v24061_v44, %v27642_v48  ;;  %v27643_v62 = vld [vmem:[#allocation69_spill] sm:$0xff]  ;;  %v27669_v1 = vld [vmem:[#allocation126_spill] sm:$0xff] }
 0x273   :  { %18767 = vmatprep.subr.bf16.mxu1 %v27611_v35 }
 0x275   :  { %18725 = vmatpush3.bf16.msra.mxu0 %v27639_v30  ;;  %v27644_v30 = vld [vmem:[#allocation70_spill] sm:$0xff] }
 0x276   :  { %18727 = vmatprep.subr.bf16.mxu0 %v27640_v7  ;;  %18769 = vmatpush3.bf16.msra.mxu1 %v27613_v25  ;;  %v14358_v7 = vsel %vm3714_vm14, 1.0, %v27490_v10 }
 0x277   :  { %18771 = vmatprep.subr.bf16.mxu1 %v27614_v55 }
 0x278   :  { %v14980_v26 = vpop.f32.mrb[14].mxu0 }
 0x279   :  { %18729 = vmatpush3.bf16.msra.mxu0 %v27641_v13  ;;  %v24232_v13 = vsub.f32 %v14358_v7, %v14358_v7  ;;  %v14981_v56 = vpop.f32.mrb[15].mxu0  ;;  %v27649_v7 = vld [vmem:[#allocation97_spill] sm:$0xff] }
 0x27a   :  { %18731 = vmatprep.subr.bf16.mxu0 %v27643_v62  ;;  %18773 = vmatpush3.bf16.msra.mxu1 %v27615_v41  ;;  %v14982_v62 = vadd.f32 %v14981_v56, %v14980_v26  ;;  %v27648_v41 = vld [vmem:[#allocation73_spill] sm:$0xff]  ;;  %v27650_v56 = vld [vmem:[#allocation74_spill] sm:$0xff]  ;;  %v27651_v26 = vld [vmem:[#allocation104_spill] sm:$0xff] }
 0x27b   :  { %18775 = vmatprep.subr.bf16.mxu1 %v27616_v51  ;;  %v27666_v51 = vld [vmem:[#allocation122_spill] sm:$0xff] }
 0x27c   :  { %v2462_v55 = vadd.f32 %v14982_v62, %v2324_v57  ;;  %v27652_v57 = vld [vmem:[#allocation75_spill] sm:$0xff] }
 0x27d   :  { %18733 = vmatpush3.bf16.msra.mxu0 %v27644_v30  ;;  %v27655_v30 = vld [vmem:[#allocation111_spill] sm:$0xff] }
 0x27e   :  { %18735 = vmatprep.subr.bf16.mxu0 %v27645_v9  ;;  %18777 = vmatpush3.bf16.msra.mxu1 %v27617_v39  ;;  %v4695_v9 = vand.u32 4294901760, %v24232_v13 }
 0x27f   :  { %18811 = vmatprep.subr.bf16.mxu1 %v27647_v32  ;;  %v27653_v32 = vld [vmem:[#allocation108_spill] sm:$0xff] }
 0x280   :  { %v4696_v62 = vsub.f32 %v24232_v13, %v4695_v9 }
 0x281   :  { %18737 = vmatpush3.bf16.msra.mxu0 %v27646_v45  ;;  %14368 = vmatmul.mubr.msk.f32.vlgmr.msra.gmra.mrb[28].mxu1 %vm3711_vm13, %v26812_v0  ;;  %v27654_v45 = vld [vmem:[#allocation76_spill] sm:$0xff] }
 0x282   :  { %18739 = vmatprep.subr.bf16.mxu0 %v27648_v41  ;;  %18813 = vmatpush3.bf16.msra.mxu1 %v27649_v7  ;;  %v2570_v41 = vadd.f32 %v15017_v5, %v2462_v55  ;;  %v27656_v7 = vld [vmem:[#allocation99_spill] sm:$0xff]  ;;  %v4697_v39 = vand.u32 4294901760, %v4696_v62  ;;  %v27658_v55 = vld [vmem:[#allocation102_spill] sm:$0xff]  ;;  %v27664_v62 = vld [vmem:[#allocation121_spill] sm:$0xff] }
 0x283   :  { %14369 = vmatprep.mubr.msk.f32.mxu1 %vm3714_vm14, %v26812_v0  ;;  %18815 = vmatprep.subr.bf16.mxu1 %v27651_v26  ;;  %v27657_v26 = vld [vmem:[#allocation116_spill] sm:$0xff]  ;;  %v27659_v5 = vld [vmem:[#allocation118_spill] sm:$0xff] }
 0x285   :  { %18741 = vmatpush3.bf16.msra.mxu0 %v27650_v56  ;;  %v27665_v56 = vld [vmem:[#allocation123_spill] sm:$0xff] }
 0x286   :  { %18743 = vmatprep.subr.bf16.mxu0 %v27652_v57  ;;  %18817 = vmatpush3.bf16.msra.mxu1 %v27653_v32  ;;  %v27660_v32 = vld [vmem:[#allocation103_spill] sm:$0xff]  ;;  %v27663_v57 = vld [vmem:[#allocation120_spill] sm:$0xff] }
 0x287   :  { %18819 = vmatprep.subr.bf16.mxu1 %v27655_v30  ;;  %v27662_v30 = vld [vmem:[#allocation117_spill] sm:$0xff] }
 0x289   :  { %18745 = vmatpush3.bf16.msra.mxu0 %v27654_v45  ;;  %v27661_v45 = vld [vmem:[#allocation119_spill] sm:$0xff] }
 0x28a   :  { %18779 = vmatprep.subr.bf16.mxu0 %v27656_v7  ;;  %18821 = vmatpush3.bf16.msra.mxu1 %v27657_v26  ;;  %v27667_v26 = vld [vmem:[#allocation124_spill] sm:$0xff] }
 0x28b   :  { %18823 = vmatprep.subr.bf16.mxu1 %v27659_v5 }
 0x28c   :  { %14366 = vmatmul.mubr.msk.f32.vlgmr.msra.gmra.mrb[28].mxu0 %vm3711_vm13, %v26812_v0 }
 0x28d   :  { %18781 = vmatpush3.bf16.msra.mxu0 %v27658_v55  ;;  %4698 = vmatprep.mubr.f32.mxu0 %v4697_v39  ;;  %v27668_v39 = vld [vmem:[#allocation125_spill] sm:$0xff] }
 0x28e   :  { %18783 = vmatprep.subr.bf16.mxu0 %v27660_v32  ;;  %18825 = vmatpush3.bf16.msra.mxu1 %v27661_v45  ;;  %v27670_v45 = vld [vmem:[#allocation52_spill] sm:$0xff] }
 0x28f   :  { %18827 = vmatprep.subr.bf16.mxu1 %v27663_v57  ;;  %vm3713_vm15 = vcmp.eq.f32.partialorder %v24061_v44, %v27670_v45  ;;  %v27672_v57 = vld [vmem:[#allocation128_spill] sm:$0xff] }
 0x291   :  { %18785 = vmatpush3.bf16.msra.mxu0 %v27662_v30  ;;  %v15085_v25 = vpop.f32.mrb[16].mxu1 }
 0x292   :  { %18787 = vmatprep.subr.bf16.mxu0 %v27664_v62  ;;  %18829 = vmatpush3.bf16.msra.mxu1 %v27665_v56  ;;  %v15086_v5 = vpop.f32.mrb[17].mxu1  ;;  %v27674_v56 = vld [vmem:[#allocation130_spill] sm:$0xff] }
 0x293   :  { %18831 = vmatprep.subr.bf16.mxu1 %v27667_v26  ;;  %v15087_v35 = vadd.f32 %v15086_v5, %v15085_v25  ;;  %v14357_v26 = vsel %vm3713_vm15, 1.0, %v27490_v10  ;;  %v27676_v25 = vld [vmem:[#allocation132_spill] sm:$0xff]  ;;  %v27677_v5 = vld [vmem:[#allocation133_spill] sm:$0xff] }
 0x295   :  { %18789 = vmatpush3.bf16.msra.mxu0 %v27666_v51 }
 0x296   :  { %18791 = vmatprep.subr.bf16.mxu0 %v27668_v39  ;;  %18833 = vmatpush3.bf16.msra.mxu1 %v27669_v1  ;;  %v24286_v1 = vsub.f32 %v14357_v26, %v14357_v26  ;;  %v27681_v26 = vld [vmem:[#allocation137_spill] sm:$0xff] }
 0x297   :  { %18835 = vmatprep.subr.bf16.mxu1 %v27672_v57  ;;  %v27678_v57 = vld [vmem:[#allocation134_spill] sm:$0xff] }
 0x299   :  { %18793 = vmatpush3.bf16.msra.mxu0 %v27671_v53 }
 0x29a   :  { %18795 = vmatprep.subr.bf16.mxu0 %v27673_v20  ;;  %18837 = vmatpush3.bf16.msra.mxu1 %v27674_v56  ;;  %v4701_v56 = vand.u32 4294901760, %v24286_v1 }
 0x29b   :  { %18839 = vmatprep.subr.bf16.mxu1 %v27676_v25  ;;  %v15050_v15 = vpop.f32.mrb[16].mxu0  ;;  %v27684_v25 = vld [vmem:[#allocation81_spill] sm:$0xff] }
 0x29c   :  { %v15051_v40 = vpop.f32.mrb[17].mxu0 }
 0x29d   :  { %18797 = vmatpush3.bf16.msra.mxu0 %v27675_v54  ;;  %v15052_v3 = vadd.f32 %v15051_v40, %v15050_v15  ;;  %v27682_v40 = vld [vmem:[#allocation79_spill] sm:$0xff] }
 0x29e   :  { %18799 = vmatprep.subr.bf16.mxu0 %v27677_v5  ;;  %18841 = vmatpush3.bf16.msra.mxu1 %v27678_v57  ;;  %v4702_v57 = vsub.f32 %v24286_v1, %v4701_v56 }
 0x29f   :  { %18875 = vmatprep.subr.bf16.mxu1 %v27656_v7  ;;  %v2738_v2 = vadd.f32 %v15052_v3, %v2570_v41  ;;  %v27683_v3 = vld [vmem:[#allocation80_spill] sm:$0xff] }
 0x2a0   :  { %v4703_v41 = vand.u32 4294901760, %v4702_v57  ;;  %v27688_v57 = vld [vmem:[#allocation85_spill] sm:$0xff] }
 0x2a1   :  { %18801 = vmatpush3.bf16.msra.mxu0 %v27679_v16  ;;  %14370 = vmatmul.mubr.msk.f32.vlgmr.msra.gmra.mrb[30].mxu1 %vm3713_vm15, %v26812_v0  ;;  %v2842_v15 = vadd.f32 %v15087_v35, %v2738_v2  ;;  %v27686_v2 = vld [vmem:[#allocation83_spill] sm:$0xff]  ;;  %v27687_v35 = vld [vmem:[#allocation84_spill] sm:$0xff] }
 0x2a2   :  { %18803 = vmatprep.subr.bf16.mxu0 %v27680_v49  ;;  %18877 = vmatpush3.bf16.msra.mxu1 %v27658_v55 }
 0x2a3   :  { %5178 = vmatprep.mubr.f32.mxu1 %v4695_v9  ;;  %18879 = vmatprep.subr.bf16.mxu1 %v27660_v32  ;;  %v27685_v9 = vld [vmem:[#allocation82_spill] sm:$0xff] }
 0x2a5   :  { %18805 = vmatpush3.bf16.msra.mxu0 %v27681_v26 }
 0x2a6   :  { %18807 = vmatprep.subr.bf16.mxu0 %v27682_v40  ;;  %18881 = vmatpush3.bf16.msra.mxu1 %v27662_v30 }
 0x2a7   :  { %18883 = vmatprep.subr.bf16.mxu1 %v27664_v62 }
 0x2a9   :  { %18809 = vmatpush3.bf16.msra.mxu0 %v27683_v3 }
 0x2aa   :  { %18843 = vmatprep.subr.bf16.mxu0 %v27684_v25  ;;  %18885 = vmatpush3.bf16.msra.mxu1 %v27666_v51 }
 0x2ab   :  { %18887 = vmatprep.subr.bf16.mxu1 %v27668_v39 }
 0x2ac   :  { %4704 = vmatmul.mubr.f32.vlgmr.msra.gmra.mrb[30].mxu0 %v4703_v41  ;;  %v27689_v41 = vld [vmem:[#allocation86_spill] sm:$0xff] }
 0x2ad   :  { %18845 = vmatpush3.bf16.msra.mxu0 %v27685_v9  ;;  %5071 = vmatprep.mubr.f32.mxu0 %v24232_v13  ;;  %v27690_v13 = vld [vmem:[#allocation88_spill] sm:$0xff] }
 0x2ae   :  { %18847 = vmatprep.subr.bf16.mxu0 %v27686_v2  ;;  %18889 = vmatpush3.bf16.msra.mxu1 %v27671_v53  ;;  %v27691_v2 = vld [vmem:[#allocation89_spill] sm:$0xff] }
 0x2af   :  { %18891 = vmatprep.subr.bf16.mxu1 %v27673_v20 }
 0x2b1   :  { %18849 = vmatpush3.bf16.msra.mxu0 %v27687_v35  ;;  %v27692_v35 = vld [vmem:[#allocation91_spill] sm:$0xff] }
 0x2b2   :  { %18851 = vmatprep.subr.bf16.mxu0 %v27688_v57  ;;  %18893 = vmatpush3.bf16.msra.mxu1 %v27675_v54  ;;  %v27693_v57 = vld [vmem:[#allocation94_spill] sm:$0xff] }
 0x2b3   :  { %18895 = vmatprep.subr.bf16.mxu1 %v27677_v5  ;;  %v15155_v9 = vpop.f32.mrb[18].mxu1 }
 0x2b4   :  { %v15156_v25 = vpop.f32.mrb[19].mxu1 }
 0x2b5   :  { %18853 = vmatpush3.bf16.msra.mxu0 %v27689_v41  ;;  %v15157_v6 = vadd.f32 %v15156_v25, %v15155_v9  ;;  %v27694_v41 = vld [vmem:[#allocation100_spill] sm:$0xff]  ;;  %v27695_v25 = vld [vmem:[#allocation19_spill] sm:$0xff] }
 0x2b6   :  { %18855 = vmatprep.subr.bf16.mxu0 %v27690_v13  ;;  %18897 = vmatpush3.bf16.msra.mxu1 %v27679_v16 }
 0x2b7   :  { %18899 = vmatprep.subr.bf16.mxu1 %v27680_v49  ;;  %7184 = vperm.xlu1 %20914, %v27695_v25  }
 0x2b9   :  { %18857 = vmatpush3.bf16.msra.mxu0 %v27691_v2  ;;  %v27696_v2 = vld [vmem:[#allocation13_spill] sm:$0xff] }
 0x2ba   :  { %18859 = vmatprep.subr.bf16.mxu0 %v27692_v35  ;;  %18901 = vmatpush3.bf16.msra.mxu1 %v27681_v26 }
 0x2bb   :  { %18903 = vmatprep.subr.bf16.mxu1 %v27682_v40  ;;  %14172 = vperm.xlu0 %20917, %v27696_v2  }
 0x2bd   :  { %18861 = vmatpush3.bf16.msra.mxu0 %v27693_v57  ;;  %v27698_v57 = vld [vmem:[#allocation107_spill] sm:$0xff] }
 0x2be   :  { %18863 = vmatprep.subr.bf16.mxu0 %v27694_v41  ;;  %18905 = vmatpush3.bf16.msra.mxu1 %v27683_v3  ;;  %v27715_v41 = vld [vmem:[#allocation164_spill] sm:$0xff] }
 0x2bf   :  { %v15120_v13 = vpop.f32.mrb[18].mxu0  ;;  %18939 = vmatprep.subr.bf16.mxu1 %v27656_v7 }
 0x2c0   :  { %v15121_v9 = vpop.f32.mrb[19].mxu0 }
 0x2c1   :  { %v15122_v35 = vadd.f32 %v15121_v9, %v15120_v13  ;;  %18865 = vmatpush3.bf16.msra.mxu0 %v27697_v58  ;;  %5182 = vmatmul.mubr.f32.vlgmr.msra.gmra.mrb[32].mxu1 %v4701_v56  ;;  %v27700_v9 = vld [vmem:[#allocation113_spill] sm:$0xff]  ;;  %v27701_v58 = vld [vmem:[#allocation140_spill] sm:$0xff] }
 0x2c2   :  { %18867 = vmatprep.subr.bf16.mxu0 %v27698_v57  ;;  %18941 = vmatpush3.bf16.msra.mxu1 %v27658_v55  ;;  %v27702_v56 = vld [vmem:[#allocation141_spill] sm:$0xff]  ;;  %v27714_v57 = vld [vmem:[#allocation163_spill] sm:$0xff] }
 0x2c3   :  { %v2954_v17 = vadd.f32 %v15122_v35, %v2842_v15  ;;  %14373 = vmatprep.mubr.msk.f32.mxu1 %vm3714_vm14, %v26812_v0  ;;  %18943 = vmatprep.subr.bf16.mxu1 %v27660_v32  ;;  %v27703_v15 = vld [vmem:[#allocation147_spill] sm:$0xff]  ;;  %v27707_v35 = vld [vmem:[#allocation156_spill] sm:$0xff] }
 0x2c5   :  { %18869 = vmatpush3.bf16.msra.mxu0 %v27699_v18  ;;  %v3186_v13 = vadd.f32 %v15157_v6, %v2954_v17  ;;  %v27704_v17 = vld [vmem:[#allocation148_spill] sm:$0xff]  ;;  %v27705_v6 = vld [vmem:[#allocation153_spill] sm:$0xff] }
 0x2c6   :  { %18871 = vmatprep.subr.bf16.mxu0 %v27700_v9  ;;  %18945 = vmatpush3.bf16.msra.mxu1 %v27662_v30  ;;  %v27747_v30 = vld [vmem:[#allocation203_spill] sm:$0xff] }
 0x2c7   :  { %18947 = vmatprep.subr.bf16.mxu1 %v27664_v62  ;;  %v27746_v62 = vld [vmem:[#allocation202_spill] sm:$0xff] }
 0x2c9   :  { %18873 = vmatpush3.bf16.msra.mxu0 %v27701_v58 }
 0x2ca   :  { %18907 = vmatprep.subr.bf16.mxu0 %v27702_v56  ;;  %18949 = vmatpush3.bf16.msra.mxu1 %v27666_v51  ;;  %v27708_v56 = vld [vmem:[#allocation157_spill] sm:$0xff] }
 0x2cb   :  { %18951 = vmatprep.subr.bf16.mxu1 %v27668_v39 }
 0x2cc   :  { %5074 = vmatmul.mubr.f32.vlgmr.msra.gmra.mrb[32].mxu0 %v24286_v1  ;;  %v27706_v1 = vld [vmem:[#allocation154_spill] sm:$0xff] }
 0x2cd   :  { %18909 = vmatpush3.bf16.msra.mxu0 %v27703_v15  ;;  %14371 = vmatprep.mubr.msk.f32.mxu0 %vm3714_vm14, %v26812_v0 }
 0x2ce   :  { %18911 = vmatprep.subr.bf16.mxu0 %v27704_v17  ;;  %18953 = vmatpush3.bf16.msra.mxu1 %v27671_v53  ;;  %v27709_v17 = vld [vmem:[#allocation159_spill] sm:$0xff]  ;;  %v27742_v53 = vld [vmem:[#allocation198_spill] sm:$0xff] }
 0x2cf   :  { %18955 = vmatprep.subr.bf16.mxu1 %v27673_v20  ;;  %v27740_v20 = vld [vmem:[#allocation196_spill] sm:$0xff] }
 0x2d1   :  { %18913 = vmatpush3.bf16.msra.mxu0 %v27705_v6  ;;  %v27710_v6 = vld [vmem:[#allocation53_spill] sm:$0xff] }
 0x2d2   :  { %18915 = vmatprep.subr.bf16.mxu0 %v27706_v1  ;;  %18957 = vmatpush3.bf16.msra.mxu1 %v27675_v54  ;;  %vm3716_vm0 = vcmp.eq.f32.partialorder %v24061_v44, %v27710_v6  ;;  %v27711_v1 = vld [vmem:[#allocation160_spill] sm:$0xff]  ;;  %v27737_v54 = vld [vmem:[#allocation193_spill] sm:$0xff]  ;;  %v27838_v44 = vld [vmem:[#allocation15_spill] sm:$0xff] }
 0x2d3   :  { %18959 = vmatprep.subr.bf16.mxu1 %v27677_v5 }
 0x2d4   :  { %v15225_v15 = vpop.f32.mrb[20].mxu1 }
 0x2d5   :  { %18917 = vmatpush3.bf16.msra.mxu0 %v27707_v35  ;;  %v15226_v58 = vpop.f32.mrb[21].mxu1  ;;  %v27712_v35 = vld [vmem:[#allocation161_spill] sm:$0xff] }
 0x2d6   :  { %18919 = vmatprep.subr.bf16.mxu0 %v27708_v56  ;;  %v15227_v9 = vadd.f32 %v15226_v58, %v15225_v15  ;;  %18961 = vmatpush3.bf16.msra.mxu1 %v27679_v16  ;;  %v14360_v56 = vsel %vm3716_vm0, 1.0, %v27490_v10  ;;  %v27713_v58 = vld [vmem:[#allocation162_spill] sm:$0xff] }
 0x2d7   :  { %18963 = vmatprep.subr.bf16.mxu1 %v27680_v49 }
 0x2d9   :  { %18921 = vmatpush3.bf16.msra.mxu0 %v27709_v17  ;;  %v24376_v17 = vsub.f32 %v14360_v56, %v14360_v56  ;;  %v27717_v56 = vld [vmem:[#allocation167_spill] sm:$0xff] }
 0x2da   :  { %18923 = vmatprep.subr.bf16.mxu0 %v27711_v1  ;;  %18965 = vmatpush3.bf16.msra.mxu1 %v27681_v26  ;;  %v27716_v26 = vld [vmem:[#allocation114_spill] sm:$0xff] }
 0x2db   :  { %18967 = vmatprep.subr.bf16.mxu1 %v27682_v40  ;;  %v27734_v40 = vld [vmem:[#allocation190_spill] sm:$0xff] }
 0x2dd   :  { %18925 = vmatpush3.bf16.msra.mxu0 %v27712_v35  ;;  %v27723_v35 = vld [vmem:[#allocation177_spill] sm:$0xff] }
 0x2de   :  { %18927 = vmatprep.subr.bf16.mxu0 %v27713_v58  ;;  %18969 = vmatpush3.bf16.msra.mxu1 %v27683_v3  ;;  %v5557_v58 = vand.u32 4294901760, %v24376_v17 }
 0x2df   :  { %v15190_v15 = vpop.f32.mrb[20].mxu0  ;;  %19003 = vmatprep.subr.bf16.mxu1 %v27715_v41  ;;  %v27721_v41 = vld [vmem:[#allocation175_spill] sm:$0xff] }
 0x2e0   :  { %v15191_v18 = vpop.f32.mrb[21].mxu0 }
 0x2e1   :  { %v15192_v1 = vadd.f32 %v15191_v18, %v15190_v15  ;;  %18929 = vmatpush3.bf16.msra.mxu0 %v27714_v57  ;;  %14374 = vmatmul.mubr.msk.f32.vlgmr.msra.gmra.mrb[34].mxu1 %vm3713_vm15, %v26812_v0  ;;  %v27718_v18 = vld [vmem:[#allocation171_spill] sm:$0xff]  ;;  %v27719_v15 = vld [vmem:[#allocation172_spill] sm:$0xff]  ;;  %v27722_v57 = vld [vmem:[#allocation90_spill] sm:$0xff] }
 0x2e2   :  { %18931 = vmatprep.subr.bf16.mxu0 %v27716_v26  ;;  %19005 = vmatpush3.bf16.msra.mxu1 %v27717_v56  ;;  %v27724_v56 = vld [vmem:[#allocation166_spill] sm:$0xff] }
 0x2e3   :  { %v3324_v49 = vadd.f32 %v15192_v1, %v3186_v13  ;;  %14375 = vmatprep.mubr.msk.f32.mxu1 %vm3716_vm0, %v26812_v0  ;;  %19007 = vmatprep.subr.bf16.mxu1 %v27719_v15  ;;  %v27720_v13 = vld [vmem:[#allocation87_spill] sm:$0xff]  ;;  %v5558_v1 = vsub.f32 %v24376_v17, %v5557_v58 }
 0x2e4   :  { %v27725_v15 = vld [vmem:[#allocation183_spill] sm:$0xff] }
 0x2e5   :  { %18933 = vmatpush3.bf16.msra.mxu0 %v27718_v18  ;;  %v3432_v26 = vadd.f32 %v15227_v9, %v3324_v49  ;;  %v5559_v3 = vand.u32 4294901760, %v5558_v1  ;;  %v27726_v49 = vld [vmem:[#allocation182_spill] sm:$0xff]  ;;  %v27727_v9 = vld [vmem:[#allocation185_spill] sm:$0xff]  ;;  %v27733_v18 = vld [vmem:[#allocation191_spill] sm:$0xff] }
 0x2e6   :  { %18935 = vmatprep.subr.bf16.mxu0 %v27720_v13  ;;  %19009 = vmatpush3.bf16.msra.mxu1 %v27721_v41  ;;  %v27728_v41 = vld [vmem:[#allocation184_spill] sm:$0xff]  ;;  %v27732_v1 = vld [vmem:[#allocation189_spill] sm:$0xff] }
 0x2e7   :  { %19011 = vmatprep.subr.bf16.mxu1 %v27723_v35  ;;  %v27730_v35 = vld [vmem:[#allocation186_spill] sm:$0xff]  ;;  %v27731_v13 = vld [vmem:[#allocation188_spill] sm:$0xff] }
 0x2e9   :  { %18937 = vmatpush3.bf16.msra.mxu0 %v27722_v57  ;;  %v27729_v57 = vld [vmem:[#allocation187_spill] sm:$0xff] }
 0x2ea   :  { %18971 = vmatprep.subr.bf16.mxu0 %v27724_v56  ;;  %19013 = vmatpush3.bf16.msra.mxu1 %v27725_v15  ;;  %v27735_v15 = vld [vmem:[#allocation192_spill] sm:$0xff] }
 0x2eb   :  { %19015 = vmatprep.subr.bf16.mxu1 %v27727_v9 }
 0x2ec   :  { %14372 = vmatmul.mubr.msk.f32.vlgmr.msra.gmra.mrb[34].mxu0 %vm3713_vm15, %v26812_v0 }
 0x2ed   :  { %18973 = vmatpush3.bf16.msra.mxu0 %v27726_v49  ;;  %5560 = vmatprep.mubr.f32.mxu0 %v5559_v3  ;;  %v27736_v3 = vld [vmem:[#allocation109_spill] sm:$0xff] }
 0x2ee   :  { %18975 = vmatprep.subr.bf16.mxu0 %v27728_v41  ;;  %19017 = vmatpush3.bf16.msra.mxu1 %v27729_v57  ;;  %v27738_v57 = vld [vmem:[#allocation194_spill] sm:$0xff] }
 0x2ef   :  { %19019 = vmatprep.subr.bf16.mxu1 %v27731_v13  ;;  %v27739_v13 = vld [vmem:[#allocation195_spill] sm:$0xff] }
 0x2f1   :  { %18977 = vmatpush3.bf16.msra.mxu0 %v27730_v35 }
 0x2f2   :  { %18979 = vmatprep.subr.bf16.mxu0 %v27732_v1  ;;  %19021 = vmatpush3.bf16.msra.mxu1 %v27733_v18  ;;  %v27741_v18 = vld [vmem:[#allocation197_spill] sm:$0xff] }
 0x2f3   :  { %19023 = vmatprep.subr.bf16.mxu1 %v27735_v15  ;;  %v14359_v15 = vsel %vm3715_vm1, 1.0, %v27490_v10 }
 0x2f4   :  { %v15295_v16 = vpop.f32.mrb[22].mxu1 }
 0x2f5   :  { %18981 = vmatpush3.bf16.msra.mxu0 %v27734_v40  ;;  %v15296_v9 = vpop.f32.mrb[23].mxu1 }
 0x2f6   :  { %18983 = vmatprep.subr.bf16.mxu0 %v27736_v3  ;;  %v15297_v5 = vadd.f32 %v15296_v9, %v15295_v16  ;;  %19025 = vmatpush3.bf16.msra.mxu1 %v27737_v54  ;;  %v27743_v16 = vld [vmem:[#allocation199_spill] sm:$0xff]  ;;  %v27744_v9 = vld [vmem:[#allocation200_spill] sm:$0xff]  ;;  %v24430_v54 = vsub.f32 %v14359_v15, %v14359_v15 }
 0x2f7   :  { %19027 = vmatprep.subr.bf16.mxu1 %v27739_v13  ;;  %v27745_v13 = vld [vmem:[#allocation201_spill] sm:$0xff] }
 0x2f9   :  { %18985 = vmatpush3.bf16.msra.mxu0 %v27738_v57 }
 0x2fa   :  { %18987 = vmatprep.subr.bf16.mxu0 %v27740_v20  ;;  %19029 = vmatpush3.bf16.msra.mxu1 %v27741_v18  ;;  %v5563_v18 = vand.u32 4294901760, %v24430_v54 }
 0x2fb   :  { %19031 = vmatprep.subr.bf16.mxu1 %v27743_v16  ;;  %v27752_v16 = vld [vmem:[#allocation98_spill] sm:$0xff] }
 0x2fd   :  { %18989 = vmatpush3.bf16.msra.mxu0 %v27742_v53 }
 0x2fe   :  { %18991 = vmatprep.subr.bf16.mxu0 %v27744_v9  ;;  %19033 = vmatpush3.bf16.msra.mxu1 %v27745_v13  ;;  %v5564_v13 = vsub.f32 %v24430_v54, %v5563_v18 }
 0x2ff   :  { %v15260_v45 = vpop.f32.mrb[22].mxu0  ;;  %19067 = vmatprep.subr.bf16.mxu1 %v27724_v56 }
 0x300   :  { %v15261_v39 = vpop.f32.mrb[23].mxu0 }
 0x301   :  { %v15262_v51 = vadd.f32 %v15261_v39, %v15260_v45  ;;  %18993 = vmatpush3.bf16.msra.mxu0 %v27746_v62  ;;  %14376 = vmatmul.mubr.msk.f32.vlgmr.msra.gmra.mrb[36].mxu1 %vm3715_vm1, %v26812_v0  ;;  %v27749_v45 = vld [vmem:[#allocation92_spill] sm:$0xff]  ;;  %v27750_v39 = vld [vmem:[#allocation93_spill] sm:$0xff] }
 0x302   :  { %18995 = vmatprep.subr.bf16.mxu0 %v27747_v30  ;;  %19069 = vmatpush3.bf16.msra.mxu1 %v27726_v49 }
 0x303   :  { %v3600_v32 = vadd.f32 %v15262_v51, %v3432_v26  ;;  %6040 = vmatprep.mubr.f32.mxu1 %v5557_v58  ;;  %19071 = vmatprep.subr.bf16.mxu1 %v27728_v41  ;;  %v27751_v51 = vld [vmem:[#allocation95_spill] sm:$0xff]  ;;  %v5565_v26 = vand.u32 4294901760, %v5564_v13 }
 0x304   :  { %v27755_v58 = vld [vmem:[#allocation139_spill] sm:$0xff] }
 0x305   :  { %v24442_v15 = vadd.f32 %v15297_v5, %v3600_v32  ;;  %18997 = vmatpush3.bf16.msra.mxu0 %v27749_v45  ;;  %v27753_v32 = vld [vmem:[#allocation112_spill] sm:$0xff]  ;;  %v27754_v5 = vld [vmem:[#allocation101_spill] sm:$0xff]  ;;  %v27756_v13 = vld [vmem:[#allocation143_spill] sm:$0xff] }
 0x306   :  { %18999 = vmatprep.subr.bf16.mxu0 %v27750_v39  ;;  %19073 = vmatpush3.bf16.msra.mxu1 %v27730_v35 }
 0x307   :  { %27748 = vst [vmem:[#allocation51_spill] sm:$0xff] %v24442_v15  ;;  %19075 = vmatprep.subr.bf16.mxu1 %v27732_v1 }
 0x309   :  { %19001 = vmatpush3.bf16.msra.mxu0 %v27751_v51 }
 0x30a   :  { %19035 = vmatprep.subr.bf16.mxu0 %v27752_v16  ;;  %19077 = vmatpush3.bf16.msra.mxu1 %v27734_v40 }
 0x30b   :  { %19079 = vmatprep.subr.bf16.mxu1 %v27736_v3 }
 0x30c   :  { %5566 = vmatmul.mubr.f32.vlgmr.msra.gmra.mrb[36].mxu0 %v5565_v26  ;;  %v27757_v26 = vld [vmem:[#allocation150_spill] sm:$0xff] }
 0x30d   :  { %19037 = vmatpush3.bf16.msra.mxu0 %v27753_v32  ;;  %5933 = vmatprep.mubr.f32.mxu0 %v24376_v17  ;;  %v27758_v17 = vld [vmem:[#allocation151_spill] sm:$0xff] }
 0x30e   :  { %19039 = vmatprep.subr.bf16.mxu0 %v27754_v5  ;;  %19081 = vmatpush3.bf16.msra.mxu1 %v27738_v57  ;;  %v27759_v5 = vld [vmem:[#allocation155_spill] sm:$0xff] }
 0x30f   :  { %19083 = vmatprep.subr.bf16.mxu1 %v27740_v20 }
 0x311   :  { %19041 = vmatpush3.bf16.msra.mxu0 %v27755_v58  ;;  %v27760_v58 = vld [vmem:[#allocation158_spill] sm:$0xff] }
 0x312   :  { %19043 = vmatprep.subr.bf16.mxu0 %v27756_v13  ;;  %19085 = vmatpush3.bf16.msra.mxu1 %v27742_v53  ;;  %v27761_v13 = vld [vmem:[#allocation170_spill] sm:$0xff] }
 0x313   :  { %19087 = vmatprep.subr.bf16.mxu1 %v27744_v9 }
 0x314   :  { %v15365_v15 = vpop.f32.mrb[24].mxu1 }
 0x315   :  { %19045 = vmatpush3.bf16.msra.mxu0 %v27757_v26  ;;  %v15366_v32 = vpop.f32.mrb[25].mxu1  ;;  %v27762_v26 = vld [vmem:[#allocation205_spill] sm:$0xff] }
 0x316   :  { %19047 = vmatprep.subr.bf16.mxu0 %v27758_v17  ;;  %v15367_v16 = vadd.f32 %v15366_v32, %v15365_v15  ;;  %19089 = vmatpush3.bf16.msra.mxu1 %v27746_v62  ;;  %v27763_v32 = vld [vmem:[#allocation209_spill] sm:$0xff] }
 0x317   :  { %19091 = vmatprep.subr.bf16.mxu1 %v27747_v30 }
 0x319   :  { %19049 = vmatpush3.bf16.msra.mxu0 %v27759_v5  ;;  %v27764_v5 = vld [vmem:[#allocation211_spill] sm:$0xff] }
 0x31a   :  { %19051 = vmatprep.subr.bf16.mxu0 %v27760_v58  ;;  %19093 = vmatpush3.bf16.msra.mxu1 %v27749_v45 }
 0x31b   :  { %19095 = vmatprep.subr.bf16.mxu1 %v27750_v39 }
 0x31d   :  { %19053 = vmatpush3.bf16.msra.mxu0 %v27761_v13  ;;  %v27780_v13 = vld [vmem:[#allocation241_spill] sm:$0xff] }
 0x31e   :  { %19055 = vmatprep.subr.bf16.mxu0 %v27762_v26  ;;  %19097 = vmatpush3.bf16.msra.mxu1 %v27751_v51  ;;  %v27765_v26 = vld [vmem:[#allocation213_spill] sm:$0xff] }
 0x31f   :  { %v15330_v55 = vpop.f32.mrb[24].mxu0  ;;  %19131 = vmatprep.subr.bf16.mxu1 %v27724_v56 }
 0x320   :  { %v15331_v17 = vpop.f32.mrb[25].mxu0 }
 0x321   :  { %v15332_v15 = vadd.f32 %v15331_v17, %v15330_v55  ;;  %19057 = vmatpush3.bf16.msra.mxu0 %v27763_v32  ;;  %6044 = vmatmul.mubr.f32.vlgmr.msra.gmra.mrb[38].mxu1 %v5563_v18  ;;  %v27766_v55 = vld [vmem:[#allocation214_spill] sm:$0xff]  ;;  %v27767_v17 = vld [vmem:[#allocation219_spill] sm:$0xff]  ;;  %v27768_v18 = vld [vmem:[#allocation221_spill] sm:$0xff] }
 0x322   :  { %19059 = vmatprep.subr.bf16.mxu0 %v27764_v5  ;;  %19133 = vmatpush3.bf16.msra.mxu1 %v27726_v49  ;;  %v27779_v32 = vld [vmem:[#allocation179_spill] sm:$0xff] }
 0x323   :  { %v4076_v58 = vadd.f32 %v15367_v16, %v15332_v15  ;;  %14379 = vmatprep.mubr.msk.f32.mxu1 %vm3716_vm0, %v26812_v0  ;;  %19135 = vmatprep.subr.bf16.mxu1 %v27728_v41  ;;  %v27769_v16 = vld [vmem:[#allocation225_spill] sm:$0xff]  ;;  %v27770_v15 = vld [vmem:[#allocation226_spill] sm:$0xff] }
 0x325   :  { %19061 = vmatpush3.bf16.msra.mxu0 %v27765_v26 }
 0x326   :  { %19063 = vmatprep.subr.bf16.mxu0 %v27766_v55  ;;  %19137 = vmatpush3.bf16.msra.mxu1 %v27730_v35  ;;  %v27774_v55 = vld [vmem:[#allocation232_spill] sm:$0xff] }
 0x327   :  { %19139 = vmatprep.subr.bf16.mxu1 %v27732_v1 }
 0x329   :  { %19065 = vmatpush3.bf16.msra.mxu0 %v27767_v17  ;;  %v27771_v17 = vld [vmem:[#allocation229_spill] sm:$0xff] }
 0x32a   :  { %19099 = vmatprep.subr.bf16.mxu0 %v27768_v18  ;;  %19141 = vmatpush3.bf16.msra.mxu1 %v27734_v40 }
 0x32b   :  { %19143 = vmatprep.subr.bf16.mxu1 %v27736_v3 }
 0x32c   :  { %5936 = vmatmul.mubr.f32.vlgmr.msra.gmra.mrb[38].mxu0 %v24430_v54  ;;  %v27772_v54 = vld [vmem:[#allocation230_spill] sm:$0xff] }
 0x32d   :  { %19101 = vmatpush3.bf16.msra.mxu0 %v27769_v16  ;;  %14377 = vmatprep.mubr.msk.f32.mxu0 %vm3716_vm0, %v26812_v0  ;;  %v27773_v16 = vld [vmem:[#allocation231_spill] sm:$0xff] }
 0x32e   :  { %19103 = vmatprep.subr.bf16.mxu0 %v27770_v15  ;;  %19145 = vmatpush3.bf16.msra.mxu1 %v27738_v57  ;;  %v27775_v15 = vld [vmem:[#allocation233_spill] sm:$0xff] }
 0x32f   :  { %19147 = vmatprep.subr.bf16.mxu1 %v27740_v20 }
 0x331   :  { %19105 = vmatpush3.bf16.msra.mxu0 %v27771_v17 }
 0x332   :  { %19107 = vmatprep.subr.bf16.mxu0 %v27772_v54  ;;  %19149 = vmatpush3.bf16.msra.mxu1 %v27742_v53  ;;  %v27776_v54 = vld [vmem:[#allocation174_spill] sm:$0xff] }
 0x333   :  { %19151 = vmatprep.subr.bf16.mxu1 %v27744_v9 }
 0x334   :  { %v15435_v18 = vpop.f32.mrb[26].mxu1 }
 0x335   :  { %19109 = vmatpush3.bf16.msra.mxu0 %v27773_v16  ;;  %v15436_v26 = vpop.f32.mrb[27].mxu1  ;;  %v27777_v16 = vld [vmem:[#allocation176_spill] sm:$0xff] }
 0x336   :  { %19111 = vmatprep.subr.bf16.mxu0 %v27774_v55  ;;  %v15437_v5 = vadd.f32 %v15436_v26, %v15435_v18  ;;  %19153 = vmatpush3.bf16.msra.mxu1 %v27746_v62  ;;  %v14362_v55 = vsel %vm3718_vm2, 1.0, %v27490_v10  ;;  %v27778_v26 = vld [vmem:[#allocation178_spill] sm:$0xff] }
 0x337   :  { %19155 = vmatprep.subr.bf16.mxu1 %v27747_v30 }
 0x339   :  { %19113 = vmatpush3.bf16.msra.mxu0 %v27775_v15  ;;  %v24520_v15 = vsub.f32 %v14362_v55, %v14362_v55  ;;  %v27782_v55 = vld [vmem:[#allocation242_spill] sm:$0xff] }
 0x33a   :  { %19115 = vmatprep.subr.bf16.mxu0 %v27776_v54  ;;  %19157 = vmatpush3.bf16.msra.mxu1 %v27749_v45  ;;  %v27781_v45 = vld [vmem:[#allocation239_spill] sm:$0xff] }
 0x33b   :  { %19159 = vmatprep.subr.bf16.mxu1 %v27750_v39 }
 0x33d   :  { %19117 = vmatpush3.bf16.msra.mxu0 %v27777_v16 }
 0x33e   :  { %19119 = vmatprep.subr.bf16.mxu0 %v27778_v26  ;;  %19161 = vmatpush3.bf16.msra.mxu1 %v27751_v51  ;;  %v6419_v26 = vand.u32 4294901760, %v24520_v15 }
 0x33f   :  { %v15400_v18 = vpop.f32.mrb[26].mxu0  ;;  %19195 = vmatprep.subr.bf16.mxu1 %v27780_v13  ;;  %v27786_v13 = vld [vmem:[#allocation245_spill] sm:$0xff] }
 0x340   :  { %v15401_v17 = vpop.f32.mrb[27].mxu0 }
 0x341   :  { %v15402_v54 = vadd.f32 %v15401_v17, %v15400_v18  ;;  %19121 = vmatpush3.bf16.msra.mxu0 %v27779_v32  ;;  %14380 = vmatmul.mubr.msk.f32.vlgmr.msra.gmra.mrb[40].mxu1 %vm3715_vm1, %v26812_v0  ;;  %v27783_v17 = vld [vmem:[#allocation142_spill] sm:$0xff]  ;;  %v27784_v18 = vld [vmem:[#allocation244_spill] sm:$0xff] }
 0x342   :  { %19123 = vmatprep.subr.bf16.mxu0 %v27781_v45  ;;  %19197 = vmatpush3.bf16.msra.mxu1 %v27782_v55 }
 0x343   :  { %v4214_v30 = vadd.f32 %v15402_v54, %v4076_v58  ;;  %14381 = vmatprep.mubr.msk.f32.mxu1 %vm3718_vm2, %v26812_v0  ;;  %19199 = vmatprep.subr.bf16.mxu1 %v27784_v18  ;;  %v6420_v58 = vsub.f32 %v24520_v15, %v6419_v26  ;;  %v27785_v54 = vld [vmem:[#allocation146_spill] sm:$0xff] }
 0x344   :  { %v27787_v18 = vld [vmem:[#allocation246_spill] sm:$0xff] }
 0x345   :  { %19125 = vmatpush3.bf16.msra.mxu0 %v27783_v17  ;;  %v4322_v45 = vadd.f32 %v15437_v5, %v4214_v30  ;;  %v6421_v55 = vand.u32 4294901760, %v6420_v58  ;;  %v27788_v30 = vld [vmem:[#allocation247_spill] sm:$0xff]  ;;  %v27789_v5 = vld [vmem:[#allocation249_spill] sm:$0xff] }
 0x346   :  { %19127 = vmatprep.subr.bf16.mxu0 %v27428_v24  ;;  %19201 = vmatpush3.bf16.msra.mxu1 %v23655_v28  ;;  %v27791_v58 = vld [vmem:[#allocation253_spill] sm:$0xff]  ;;  %v27793_v28 = vld [vmem:[#allocation255_spill] sm:$0xff] }
 0x347   :  { %19203 = vmatprep.subr.bf16.mxu1 %v27786_v13  ;;  %v27790_v13 = vld [vmem:[#allocation250_spill] sm:$0xff] }
 0x349   :  { %19129 = vmatpush3.bf16.msra.mxu0 %v27785_v54 }
 0x34a   :  { %19163 = vmatprep.subr.bf16.mxu0 %v23676_v4  ;;  %19205 = vmatpush3.bf16.msra.mxu1 %v27787_v18  ;;  %v27792_v18 = vld [vmem:[#allocation254_spill] sm:$0xff] }
 0x34b   :  { %19207 = vmatprep.subr.bf16.mxu1 %v27788_v30 }
 0x34c   :  { %14378 = vmatmul.mubr.msk.f32.vlgmr.msra.gmra.mrb[40].mxu0 %vm3715_vm1, %v26812_v0 }
 0x34d   :  { %19165 = vmatpush3.bf16.msra.mxu0 %v23700_v34  ;;  %6422 = vmatprep.mubr.f32.mxu0 %v6421_v55 }
 0x34e   :  { %19167 = vmatprep.subr.bf16.mxu0 %v23708_v21  ;;  %19209 = vmatpush3.bf16.msra.mxu1 %v27789_v5 }
 0x34f   :  { %19211 = vmatprep.subr.bf16.mxu1 %v27790_v13  ;;  %v27794_v13 = vld [vmem:[#allocation216_spill] sm:$0xff] }
 0x351   :  { %19169 = vmatpush3.bf16.msra.mxu0 %v23717_v59 }
 0x352   :  { %19171 = vmatprep.subr.bf16.mxu0 %v23745_v42  ;;  %19213 = vmatpush3.bf16.msra.mxu1 %v27791_v58  ;;  %v27795_v58 = vld [vmem:[#allocation138_spill] sm:$0xff] }
 0x353   :  { %19215 = vmatprep.subr.bf16.mxu1 %v27792_v18  ;;  %v14361_v18 = vsel %vm3717_vm3, 1.0, %v27490_v10 }
 0x354   :  { %v15505_v54 = vpop.f32.mrb[28].mxu1 }
 0x355   :  { %19173 = vmatpush3.bf16.msra.mxu0 %v23753_v60  ;;  %v15506_v55 = vpop.f32.mrb[29].mxu1 }
 0x356   :  { %19175 = vmatprep.subr.bf16.mxu0 %v23778_v46  ;;  %v15507_v30 = vadd.f32 %v15506_v55, %v15505_v54  ;;  %19217 = vmatpush3.bf16.msra.mxu1 %v27793_v28  ;;  %v27796_v54 = vld [vmem:[#allocation149_spill] sm:$0xff]  ;;  %v24574_v55 = vsub.f32 %v14361_v18, %v14361_v18 }
 0x357   :  { %19219 = vmatprep.subr.bf16.mxu1 %v27794_v13  ;;  %v27797_v13 = vld [vmem:[#allocation257_spill] sm:$0xff] }
 0x359   :  { %19177 = vmatpush3.bf16.msra.mxu0 %v23794_v50 }
 0x35a   :  { %19179 = vmatprep.subr.bf16.mxu0 %v23804_v11  ;;  %19221 = vmatpush3.bf16.msra.mxu1 %v27795_v58  ;;  %v6425_v58 = vand.u32 4294901760, %v24574_v55 }
 0x35b   :  { %19223 = vmatprep.subr.bf16.mxu1 %v27796_v54  ;;  %v27852_v54 = vld [vmem:[#allocation29_spill] sm:$0xff] }
 0x35c   :  { %v6426_v18 = vsub.f32 %v24574_v55, %v6425_v58 }
 0x35d   :  { %19181 = vmatpush3.bf16.msra.mxu0 %v23816_v36 }
 0x35e   :  { %19183 = vmatprep.subr.bf16.mxu0 %v23826_v43  ;;  %19225 = vmatpush3.bf16.msra.mxu1 %v27797_v13 }
 0x35f   :  { %v15470_v28 = vpop.f32.mrb[28].mxu0  ;;  %19259 = vmatprep.subr.bf16.mxu1 %v23676_v4 }
 0x360   :  { %v15471_v5 = vpop.f32.mrb[29].mxu0 }
 0x361   :  { %v15472_v24 = vadd.f32 %v15471_v5, %v15470_v28  ;;  %19185 = vmatpush3.bf16.msra.mxu0 %v23840_v37  ;;  %14382 = vmatmul.mubr.msk.f32.vlgmr.msra.gmra.mrb[42].mxu1 %vm3717_vm3, %v26812_v0  ;;  %v27802_v5 = vld [vmem:[#allocation222_spill] sm:$0xff] }
 0x362   :  { %19187 = vmatprep.subr.bf16.mxu0 %v23848_v22  ;;  %19261 = vmatpush3.bf16.msra.mxu1 %v23700_v34 }
 0x363   :  { %v4490_v17 = vadd.f32 %v15472_v24, %v4322_v45  ;;  %6902 = vmatprep.mubr.f32.mxu1 %v6419_v26  ;;  %19263 = vmatprep.subr.bf16.mxu1 %v23708_v21  ;;  %v6427_v24 = vand.u32 4294901760, %v6426_v18  ;;  %v27798_v45 = vld [vmem:[#allocation173_spill] sm:$0xff]  ;;  %v27799_v26 = vld [vmem:[#allocation204_spill] sm:$0xff]  ;;  %v27803_v18 = vld [vmem:[#allocation223_spill] sm:$0xff] }
 0x365   :  { %19189 = vmatpush3.bf16.msra.mxu0 %v23858_v19  ;;  %v4594_v28 = vadd.f32 %v15507_v30, %v4490_v17  ;;  %v27800_v17 = vld [vmem:[#allocation207_spill] sm:$0xff]  ;;  %v27801_v30 = vld [vmem:[#allocation208_spill] sm:$0xff] }
 0x366   :  { %19191 = vmatprep.subr.bf16.mxu0 %v23866_v63  ;;  %19265 = vmatpush3.bf16.msra.mxu1 %v23717_v59 }
 0x367   :  { %19267 = vmatprep.subr.bf16.mxu1 %v23745_v42 }
 0x369   :  { %19193 = vmatpush3.bf16.msra.mxu0 %v23882_v47 }
 0x36a   :  { %19227 = vmatprep.subr.bf16.mxu0 %v27798_v45  ;;  %19269 = vmatpush3.bf16.msra.mxu1 %v23753_v60 }
 0x36b   :  { %19271 = vmatprep.subr.bf16.mxu1 %v23778_v46 }
 0x36c   :  { %6428 = vmatmul.mubr.f32.vlgmr.msra.gmra.mrb[42].mxu0 %v6427_v24 }
 0x36d   :  { %19229 = vmatpush3.bf16.msra.mxu0 %v27799_v26  ;;  %6795 = vmatprep.mubr.f32.mxu0 %v24520_v15  ;;  %v27804_v15 = vld [vmem:[#allocation227_spill] sm:$0xff] }
 0x36e   :  { %19231 = vmatprep.subr.bf16.mxu0 %v27800_v17  ;;  %19273 = vmatpush3.bf16.msra.mxu1 %v23794_v50 }
 0x36f   :  { %19275 = vmatprep.subr.bf16.mxu1 %v23804_v11 }
 0x371   :  { %19233 = vmatpush3.bf16.msra.mxu0 %v27801_v30  ;;  %v27840_v30 = vld [vmem:[#allocation16_spill] sm:$0xff] }
 0x372   :  { %19235 = vmatprep.subr.bf16.mxu0 %v27802_v5  ;;  %19277 = vmatpush3.bf16.msra.mxu1 %v23816_v36 }
 0x373   :  { %19279 = vmatprep.subr.bf16.mxu1 %v23826_v43 }
 0x374   :  { %v15575_v24 = vpop.f32.mrb[30].mxu1 }
 0x375   :  { %19237 = vmatpush3.bf16.msra.mxu0 %v27803_v18  ;;  %v15576_v26 = vpop.f32.mrb[31].mxu1  ;;  %v27805_v18 = vld [vmem:[#allocation236_spill] sm:$0xff] }
 0x376   :  { %19239 = vmatprep.subr.bf16.mxu0 %v27804_v15  ;;  %v15577_v45 = vadd.f32 %v15576_v26, %v15575_v24  ;;  %19281 = vmatpush3.bf16.msra.mxu1 %v23840_v37 }
 0x377   :  { %19283 = vmatprep.subr.bf16.mxu1 %v23848_v22 }
 0x379   :  { %19241 = vmatpush3.bf16.msra.mxu0 %v23936_v14 }
 0x37a   :  { %19243 = vmatprep.subr.bf16.mxu0 %v23941_v33  ;;  %19285 = vmatpush3.bf16.msra.mxu1 %v23858_v19 }
 0x37b   :  { %19287 = vmatprep.subr.bf16.mxu1 %v23866_v63 }
 0x37d   :  { %19245 = vmatpush3.bf16.msra.mxu0 %v23948_v29 }
 0x37e   :  { %19247 = vmatprep.subr.bf16.mxu0 %v27805_v18  ;;  %19289 = vmatpush3.bf16.msra.mxu1 %v23882_v47  ;;  %v27820_v18 = vld [vmem:[#allocation217_spill] sm:$0xff] }
 0x37f   :  { %v15540_v5 = vpop.f32.mrb[30].mxu0  ;;  %19323 = vmatprep.subr.bf16.mxu1 %v23676_v4 }
 0x380   :  { %v15541_v15 = vpop.f32.mrb[31].mxu0 }
 0x381   :  { %v15542_v26 = vadd.f32 %v15541_v15, %v15540_v5  ;;  %19249 = vmatpush3.bf16.msra.mxu0 %v23960_v8  ;;  %6906 = vmatmul.mubr.f32.vlgmr.msra.gmra.mrb[44].mxu1 %v6425_v58  ;;  %v27806_v58 = vld [vmem:[#allocation243_spill] sm:$0xff]  ;;  %v27819_v8 = vld [vmem:[#allocation9_spill] sm:$0xff] }
 0x382   :  { %19251 = vmatprep.subr.bf16.mxu0 %v23965_v27  ;;  %19325 = vmatpush3.bf16.msra.mxu1 %v23700_v34  ;;  %v27809_v15 = vld [vmem:[#allocation259_spill] sm:$0xff]  ;;  %v27818_v27 = vld [vmem:[#allocation265_spill] sm:$0xff] }
 0x383   :  { %v4706_v24 = vadd.f32 %v15542_v26, %v4594_v28  ;;  %14385 = vmatprep.mubr.msk.f32.mxu1 %vm3718_vm2, %v26812_v0  ;;  %19327 = vmatprep.subr.bf16.mxu1 %v23708_v21  ;;  %v27807_v28 = vld [vmem:[#allocation152_spill] sm:$0xff]  ;;  %v27811_v26 = vld [vmem:[#allocation261_spill] sm:$0xff] }
 0x385   :  { %19253 = vmatpush3.bf16.msra.mxu0 %v23972_v52  ;;  %v4938_v5 = vadd.f32 %v15577_v45, %v4706_v24  ;;  %v27808_v45 = vld [vmem:[#allocation55_spill] sm:$0xff]  ;;  %v24647_v24 = vpop.permute.xlu1 %7184 }
 0x386   :  { %19255 = vmatprep.subr.bf16.mxu0 %v23977_v23  ;;  %19329 = vmatpush3.bf16.msra.mxu1 %v23717_v59  ;;  %v27814_v23 = vld [vmem:[#allocation263_spill] sm:$0xff]  ;;  %vm7190_vm6 = vcmp.eq.f32.partialorder %v24647_v24, %v27642_v48  ;;  %vm7192_vm8 = vcmp.eq.f32.partialorder %v24647_v24, %v27710_v6  ;;  %vm7191_vm9 = vcmp.eq.f32.partialorder %v24647_v24, %v27416_v31 }
 0x387   :  { %19331 = vmatprep.subr.bf16.mxu1 %v23745_v42  ;;  %vm7194_vm10 = vcmp.eq.f32.partialorder %v24647_v24, %v27546_v12  ;;  %vm7193_vm11 = vcmp.eq.f32.partialorder %v24647_v24, %v27479_v38  ;;  %v28085_v38 = vld [vmem:[#allocation27_spill] sm:$0xff] }
 0x389   :  { %19257 = vmatpush3.bf16.msra.mxu0 %v23990_v61 }
 0x38a   :  { %19291 = vmatprep.subr.bf16.mxu0 %v27806_v58  ;;  %19333 = vmatpush3.bf16.msra.mxu1 %v23753_v60  ;;  %v27812_v58 = vld [vmem:[#allocation262_spill] sm:$0xff] }
 0x38b   :  { %19335 = vmatprep.subr.bf16.mxu1 %v23778_v46 }
 0x38c   :  { %6798 = vmatmul.mubr.f32.vlgmr.msra.gmra.mrb[44].mxu0 %v24574_v55  ;;  %v27810_v55 = vld [vmem:[#allocation260_spill] sm:$0xff] }
 0x38d   :  { %19293 = vmatpush3.bf16.msra.mxu0 %v27807_v28  ;;  %14383 = vmatprep.mubr.msk.f32.mxu0 %vm3718_vm2, %v26812_v0 }
 0x38e   :  { %19295 = vmatprep.subr.bf16.mxu0 %v27808_v45  ;;  %19337 = vmatpush3.bf16.msra.mxu1 %v23794_v50 }
 0x38f   :  { %19339 = vmatprep.subr.bf16.mxu1 %v23804_v11 }
 0x391   :  { %19297 = vmatpush3.bf16.msra.mxu0 %v27809_v15  ;;  %v27813_v15 = vld [vmem:[#allocation77_spill] sm:$0xff] }
 0x392   :  { %19299 = vmatprep.subr.bf16.mxu0 %v27810_v55  ;;  %19341 = vmatpush3.bf16.msra.mxu1 %v23816_v36  ;;  %vm7188_vm4 = vcmp.eq.f32.partialorder %v24647_v24, %v27813_v15  ;;  %v27815_v55 = vld [vmem:[#allocation206_spill] sm:$0xff] }
 0x393   :  { %19343 = vmatprep.subr.bf16.mxu1 %v23826_v43  ;;  %v27851_v43 = vld [vmem:[#allocation27_spill] sm:$0xff] }
 0x394   :  { %v15645_v28 = vpop.f32.mrb[32].mxu1 }
 0x395   :  { %19301 = vmatpush3.bf16.msra.mxu0 %v27811_v26  ;;  %v15646_v45 = vpop.f32.mrb[33].mxu1  ;;  %v14388_v26 = vsel %vm7188_vm4, 1.0, %v27490_v10 }
 0x396   :  { %19303 = vmatprep.subr.bf16.mxu0 %v27812_v58  ;;  %v15647_v61 = vadd.f32 %v15646_v45, %v15645_v28  ;;  %19345 = vmatpush3.bf16.msra.mxu1 %v23840_v37  ;;  %v27816_v58 = vld [vmem:[#allocation210_spill] sm:$0xff]  ;;  %v27817_v28 = vld [vmem:[#allocation264_spill] sm:$0xff]  ;;  %v24664_v45 = vsub.f32 %v14388_v26, %v14388_v26 }
 0x397   :  { %19347 = vmatprep.subr.bf16.mxu1 %v23848_v22  ;;  %v27821_v26 = vld [vmem:[#allocation10_spill] sm:$0xff] }
 0x398   :  { %v7309_v29 = vand.u32 4294901760, %v24664_v45 }
 0x399   :  { %19305 = vmatpush3.bf16.msra.mxu0 %v27814_v23 }
 0x39a   :  { %19307 = vmatprep.subr.bf16.mxu0 %v27815_v55  ;;  %19349 = vmatpush3.bf16.msra.mxu1 %v23858_v19  ;;  %v27847_v19 = vld [vmem:[#allocation23_spill] sm:$0xff] }
 0x39b   :  { %19351 = vmatprep.subr.bf16.mxu1 %v23866_v63  ;;  %v27845_v63 = vld [vmem:[#allocation21_spill] sm:$0xff] }
 0x39d   :  { %19309 = vmatpush3.bf16.msra.mxu0 %v27816_v58 }
 0x39e   :  { %19311 = vmatprep.subr.bf16.mxu0 %v27817_v28  ;;  %19353 = vmatpush3.bf16.msra.mxu1 %v23882_v47  ;;  %v27827_v28 = vld [vmem:[#allocation17_spill] sm:$0xff]  ;;  %v27843_v47 = vld [vmem:[#allocation18_spill] sm:$0xff] }
 0x39f   :  { %v15610_v23 = vpop.f32.mrb[32].mxu0  ;;  %19387 = vmatprep.subr.bf16.mxu1 %v27819_v8  ;;  %v27824_v8 = vld [vmem:[#allocation220_spill] sm:$0xff] }
 0x3a0   :  { %v15611_v52 = vpop.f32.mrb[33].mxu0 }
 0x3a1   :  { %v15612_v55 = vadd.f32 %v15611_v52, %v15610_v23  ;;  %19313 = vmatpush3.bf16.msra.mxu0 %v27818_v27  ;;  %14386 = vmatmul.mubr.msk.f32.vlgmr.msra.gmra.mrb[46].mxu1 %vm3717_vm3, %v26812_v0  ;;  %v27822_v23 = vld [vmem:[#allocation218_spill] sm:$0xff]  ;;  %v27823_v52 = vld [vmem:[#allocation11_spill] sm:$0xff]  ;;  %v27826_v27 = vld [vmem:[#allocation224_spill] sm:$0xff] }
 0x3a2   :  { %19315 = vmatprep.subr.bf16.mxu0 %v27820_v18  ;;  %19389 = vmatpush3.bf16.msra.mxu1 %v27821_v26  ;;  %v27828_v26 = vld [vmem:[#allocation5_spill] sm:$0xff] }
 0x3a3   :  { %v5076_v58 = vadd.f32 %v15612_v55, %v4938_v5  ;;  %14395 = vmatprep.mubr.msk.f32.mxu1 %vm7188_vm4, %v26812_v0  ;;  %19391 = vmatprep.subr.bf16.mxu1 %v27823_v52  ;;  %v7310_v5 = vsub.f32 %v24664_v45, %v7309_v29  ;;  %v27825_v55 = vld [vmem:[#allocation14_spill] sm:$0xff]  ;;  %v27829_v52 = vld [vmem:[#allocation20_spill] sm:$0xff] }
 0x3a5   :  { %19317 = vmatpush3.bf16.msra.mxu0 %v27822_v23  ;;  %v5184_v18 = vadd.f32 %v15647_v61, %v5076_v58  ;;  %v7311_v33 = vand.u32 4294901760, %v7310_v5  ;;  %v27830_v61 = vld [vmem:[#allocation6_spill] sm:$0xff]  ;;  %v27836_v5 = vld [vmem:[#allocation12_spill] sm:$0xff] }
 0x3a6   :  { %19319 = vmatprep.subr.bf16.mxu0 %v27824_v8  ;;  %19393 = vmatpush3.bf16.msra.mxu1 %v27825_v55  ;;  %v27831_v58 = vld [vmem:[#allocation22_spill] sm:$0xff]  ;;  %v27832_v8 = vld [vmem:[#allocation7_spill] sm:$0xff]  ;;  %v27837_v23 = vld [vmem:[#allocation28_spill] sm:$0xff] }
 0x3a7   :  { %19395 = vmatprep.subr.bf16.mxu1 %v27827_v28  ;;  %v27834_v28 = vld [vmem:[#allocation8_spill] sm:$0xff]  ;;  %v27835_v55 = vld [vmem:[#allocation26_spill] sm:$0xff] }
 0x3a9   :  { %19321 = vmatpush3.bf16.msra.mxu0 %v27826_v27  ;;  %v27833_v27 = vld [vmem:[#allocation24_spill] sm:$0xff] }
 0x3aa   :  { %19355 = vmatprep.subr.bf16.mxu0 %v27828_v26  ;;  %19397 = vmatpush3.bf16.msra.mxu1 %v27829_v52  ;;  %v27839_v52 = vld [vmem:[#allocation30_spill] sm:$0xff] }
 0x3ab   :  { %19399 = vmatprep.subr.bf16.mxu1 %v27831_v58 }
 0x3ac   :  { %14384 = vmatmul.mubr.msk.f32.vlgmr.msra.gmra.mrb[46].mxu0 %vm3717_vm3, %v26812_v0 }
 0x3ad   :  { %19357 = vmatpush3.bf16.msra.mxu0 %v27830_v61  ;;  %7312 = vmatprep.mubr.f32.mxu0 %v7311_v33  ;;  %v27841_v33 = vld [vmem:[#allocation32_spill] sm:$0xff] }
 0x3ae   :  { %19359 = vmatprep.subr.bf16.mxu0 %v27832_v8  ;;  %19401 = vmatpush3.bf16.msra.mxu1 %v27833_v27  ;;  %v27842_v27 = vld [vmem:[#allocation78_spill] sm:$0xff] }
 0x3af   :  { %19403 = vmatprep.subr.bf16.mxu1 %v27835_v55  ;;  %vm7187_vm5 = vcmp.eq.f32.partialorder %v24647_v24, %v27842_v27  ;;  %v27844_v55 = vld [vmem:[#allocation34_spill] sm:$0xff] }
 0x3b1   :  { %19361 = vmatpush3.bf16.msra.mxu0 %v27834_v28 }
 0x3b2   :  { %19363 = vmatprep.subr.bf16.mxu0 %v27836_v5  ;;  %19405 = vmatpush3.bf16.msra.mxu1 %v27837_v23  ;;  %v27846_v23 = vld [vmem:[#allocation36_spill] sm:$0xff] }
 0x3b3   :  { %19407 = vmatprep.subr.bf16.mxu1 %v27839_v52  ;;  %v14387_v52 = vsel %vm7187_vm5, 1.0, %v27490_v10 }
 0x3b4   :  { %v15715_v14 = vpop.f32.mrb[34].mxu1 }
 0x3b5   :  { %19365 = vmatpush3.bf16.msra.mxu0 %v27838_v44  ;;  %v15716_v58 = vpop.f32.mrb[35].mxu1 }
 0x3b6   :  { %19367 = vmatprep.subr.bf16.mxu0 %v27840_v30  ;;  %v15717_v17 = vadd.f32 %v15716_v58, %v15715_v14  ;;  %19409 = vmatpush3.bf16.msra.mxu1 %v27841_v33  ;;  %v27848_v14 = vld [vmem:[#allocation40_spill] sm:$0xff]  ;;  %v27849_v58 = vld [vmem:[#allocation25_spill] sm:$0xff]  ;;  %v24718_v33 = vsub.f32 %v14387_v52, %v14387_v52  ;;  %v27853_v52 = vld [vmem:[#allocation31_spill] sm:$0xff] }
 0x3b7   :  { %19411 = vmatprep.subr.bf16.mxu1 %v27844_v55  ;;  %v27850_v55 = vld [vmem:[#allocation49_spill] sm:$0xff] }
 0x3b9   :  { %19369 = vmatpush3.bf16.msra.mxu0 %v27843_v47 }
 0x3ba   :  { %19371 = vmatprep.subr.bf16.mxu0 %v27845_v63  ;;  %19413 = vmatpush3.bf16.msra.mxu1 %v27846_v23  ;;  %v7315_v23 = vand.u32 4294901760, %v24718_v33 }
 0x3bb   :  { %19415 = vmatprep.subr.bf16.mxu1 %v27848_v14  ;;  %v27856_v14 = vld [vmem:[#allocation37_spill] sm:$0xff] }
 0x3bd   :  { %19373 = vmatpush3.bf16.msra.mxu0 %v27847_v19 }
 0x3be   :  { %19375 = vmatprep.subr.bf16.mxu0 %v27849_v58  ;;  %19417 = vmatpush3.bf16.msra.mxu1 %v27850_v55  ;;  %v7316_v55 = vsub.f32 %v24718_v33, %v7315_v23 }
 0x3bf   :  { %v15680_v22 = vpop.f32.mrb[34].mxu0  ;;  %19451 = vmatprep.subr.bf16.mxu1 %v27828_v26 }
 0x3c0   :  { %v15681_v37 = vpop.f32.mrb[35].mxu0 }
 0x3c1   :  { %v15682_v13 = vadd.f32 %v15681_v37, %v15680_v22  ;;  %19377 = vmatpush3.bf16.msra.mxu0 %v27851_v43  ;;  %14396 = vmatmul.mubr.msk.f32.vlgmr.msra.gmra.mrb[48].mxu1 %vm7187_vm5, %v26812_v0  ;;  %v27854_v22 = vld [vmem:[#allocation33_spill] sm:$0xff] }
 0x3c2   :  { %19379 = vmatprep.subr.bf16.mxu0 %v27852_v54  ;;  %19453 = vmatpush3.bf16.msra.mxu1 %v27830_v61 }
 0x3c3   :  { %v5352_v36 = vadd.f32 %v15682_v13, %v5184_v18  ;;  %7792 = vmatprep.mubr.f32.mxu1 %v7309_v29  ;;  %19455 = vmatprep.subr.bf16.mxu1 %v27832_v8  ;;  %v27855_v13 = vld [vmem:[#allocation35_spill] sm:$0xff]  ;;  %v7317_v18 = vand.u32 4294901760, %v7316_v55  ;;  %v27857_v29 = vld [vmem:[#allocation38_spill] sm:$0xff] }
 0x3c4   :  { %v27860_v55 = vld [vmem:[#allocation42_spill] sm:$0xff] }
 0x3c5   :  { %19381 = vmatpush3.bf16.msra.mxu0 %v27853_v52  ;;  %v5456_v37 = vadd.f32 %v15717_v17, %v5352_v36  ;;  %v27858_v36 = vld [vmem:[#allocation39_spill] sm:$0xff]  ;;  %v27859_v17 = vld [vmem:[#allocation41_spill] sm:$0xff] }
 0x3c6   :  { %19383 = vmatprep.subr.bf16.mxu0 %v27854_v22  ;;  %19457 = vmatpush3.bf16.msra.mxu1 %v27834_v28 }
 0x3c7   :  { %19459 = vmatprep.subr.bf16.mxu1 %v27836_v5 }
 0x3c9   :  { %19385 = vmatpush3.bf16.msra.mxu0 %v27855_v13 }
 0x3ca   :  { %19419 = vmatprep.subr.bf16.mxu0 %v27856_v14  ;;  %19461 = vmatpush3.bf16.msra.mxu1 %v27838_v44 }
 0x3cb   :  { %19463 = vmatprep.subr.bf16.mxu1 %v27840_v30 }
 0x3cc   :  { %7318 = vmatmul.mubr.f32.vlgmr.msra.gmra.mrb[48].mxu0 %v7317_v18  ;;  %v27861_v18 = vld [vmem:[#allocation43_spill] sm:$0xff] }
 0x3cd   :  { %19421 = vmatpush3.bf16.msra.mxu0 %v27857_v29  ;;  %7685 = vmatprep.mubr.f32.mxu0 %v24664_v45  ;;  %v27862_v45 = vld [vmem:[#allocation44_spill] sm:$0xff] }
 0x3ce   :  { %19423 = vmatprep.subr.bf16.mxu0 %v27858_v36  ;;  %19465 = vmatpush3.bf16.msra.mxu1 %v27843_v47  ;;  %v27863_v36 = vld [vmem:[#allocation45_spill] sm:$0xff] }
 0x3cf   :  { %19467 = vmatprep.subr.bf16.mxu1 %v27845_v63 }
 0x3d1   :  { %19425 = vmatpush3.bf16.msra.mxu0 %v27859_v17  ;;  %v27864_v17 = vld [vmem:[#allocation46_spill] sm:$0xff] }
 0x3d2   :  { %19427 = vmatprep.subr.bf16.mxu0 %v27860_v55  ;;  %19469 = vmatpush3.bf16.msra.mxu1 %v27847_v19  ;;  %v27865_v55 = vld [vmem:[#allocation47_spill] sm:$0xff] }
 0x3d3   :  { %19471 = vmatprep.subr.bf16.mxu1 %v27849_v58 }
 0x3d4   :  { %v15785_v29 = vpop.f32.mrb[36].mxu1 }
 0x3d5   :  { %19429 = vmatpush3.bf16.msra.mxu0 %v27861_v18  ;;  %v15786_v14 = vpop.f32.mrb[37].mxu1  ;;  %v27866_v18 = vld [vmem:[#allocation48_spill] sm:$0xff] }
 0x3d6   :  { %19431 = vmatprep.subr.bf16.mxu0 %v27862_v45  ;;  %v15787_v11 = vadd.f32 %v15786_v14, %v15785_v29  ;;  %19473 = vmatpush3.bf16.msra.mxu1 %v27851_v43  ;;  %v27867_v29 = vld [vmem:[#allocation50_spill] sm:$0xff] }
 0x3d7   :  { %19475 = vmatprep.subr.bf16.mxu1 %v27852_v54 }
 0x3d9   :  { %19433 = vmatpush3.bf16.msra.mxu0 %v27863_v36  ;;  %v27868_v36 = vld [vmem:[#allocation57_spill] sm:$0xff] }
 0x3da   :  { %19435 = vmatprep.subr.bf16.mxu0 %v27864_v17  ;;  %19477 = vmatpush3.bf16.msra.mxu1 %v27853_v52 }
 0x3db   :  { %19479 = vmatprep.subr.bf16.mxu1 %v27854_v22 }
 0x3dd   :  { %19437 = vmatpush3.bf16.msra.mxu0 %v27865_v55  ;;  %v27893_v55 = vld [vmem:[#allocation76_spill] sm:$0xff] }
 0x3de   :  { %19439 = vmatprep.subr.bf16.mxu0 %v27866_v18  ;;  %19481 = vmatpush3.bf16.msra.mxu1 %v27855_v13  ;;  %v27869_v18 = vld [vmem:[#allocation58_spill] sm:$0xff] }
 0x3df   :  { %v15750_v50 = vpop.f32.mrb[36].mxu0  ;;  %19515 = vmatprep.subr.bf16.mxu1 %v27828_v26 }
 0x3e0   :  { %v15751_v45 = vpop.f32.mrb[37].mxu0 }
 0x3e1   :  { %v15752_v14 = vadd.f32 %v15751_v45, %v15750_v50  ;;  %19441 = vmatpush3.bf16.msra.mxu0 %v27867_v29  ;;  %7796 = vmatmul.mubr.f32.vlgmr.msra.gmra.mrb[50].mxu1 %v7315_v23  ;;  %v27870_v45 = vld [vmem:[#allocation59_spill] sm:$0xff]  ;;  %v20958_v29 = vmov 3   ;;  %v27871_v23 = vld [vmem:[#allocation60_spill] sm:$0xff] }
 0x3e2   :  { %19443 = vmatprep.subr.bf16.mxu0 %v27868_v36  ;;  %19517 = vmatpush3.bf16.msra.mxu1 %v27830_v61 }
 0x3e3   :  { %v5568_v17 = vadd.f32 %v15752_v14, %v5456_v37  ;;  %14399 = vmatprep.mubr.msk.f32.mxu1 %vm7188_vm4, %v26812_v0  ;;  %19519 = vmatprep.subr.bf16.mxu1 %v27832_v8  ;;  %v27872_v37 = vld [vmem:[#allocation61_spill] sm:$0xff]  ;;  %v27873_v14 = vmov 1  }
 0x3e4   :  { %20915 = vset.pattern.permute.xlu1 %v20958_v29  ;;  %20920 = vset.pattern.permute.xlu0 %v20958_v29 }
 0x3e5   :  { %19445 = vmatpush3.bf16.msra.mxu0 %v27869_v18  ;;  %v5800_v50 = vadd.f32 %v15787_v11, %v5568_v17  ;;  %10660 = vperm.xlu1 %20915, %v27695_v25   ;;  %v27874_v11 = vld [vmem:[#allocation62_spill] sm:$0xff]  ;;  %v27875_v25 = vld [vmem:[#allocation63_spill] sm:$0xff]  ;;  %v27876_v17 = vld [vmem:[#allocation64_spill] sm:$0xff] }
 0x3e6   :  { %19447 = vmatprep.subr.bf16.mxu0 %v27870_v45  ;;  %19521 = vmatpush3.bf16.msra.mxu1 %v27834_v28  ;;  %v27881_v45 = vld [vmem:[#allocation68_spill] sm:$0xff]  ;;  %v27887_v18 = vld [vmem:[#allocation73_spill] sm:$0xff] }
 0x3e7   :  { %19523 = vmatprep.subr.bf16.mxu1 %v27836_v5 }
 0x3e9   :  { %19449 = vmatpush3.bf16.msra.mxu0 %v27871_v23  ;;  %20916 = vset.pattern.permute.xlu1 %v27873_v14  ;;  %v27878_v14 = vld [vmem:[#allocation66_spill] sm:$0xff] }
 0x3ea   :  { %19483 = vmatprep.subr.bf16.mxu0 %v27872_v37  ;;  %19525 = vmatpush3.bf16.msra.mxu1 %v27838_v44  ;;  %v27918_v44 = vld [vmem:[#allocation136_spill] sm:$0xff] }
 0x3eb   :  { %19527 = vmatprep.subr.bf16.mxu1 %v27840_v30  ;;  %14167 = vperm.xlu1 %20916, %v27696_v2   ;;  %v27917_v30 = vld [vmem:[#allocation135_spill] sm:$0xff] }
 0x3ec   :  { %7688 = vmatmul.mubr.f32.vlgmr.msra.gmra.mrb[50].mxu0 %v24718_v33  ;;  %v27877_v33 = vld [vmem:[#allocation65_spill] sm:$0xff] }
 0x3ed   :  { %19485 = vmatpush3.bf16.msra.mxu0 %v27874_v11  ;;  %14397 = vmatprep.mubr.msk.f32.mxu0 %vm7188_vm4, %v26812_v0  ;;  %v27879_v11 = vld [vmem:[#allocation67_spill] sm:$0xff]  ;;  %vm14147_vm4 = vcmask 261120  }
 0x3ee   :  { %19487 = vmatprep.subr.bf16.mxu0 %v27875_v25  ;;  %19529 = vmatpush3.bf16.msra.mxu1 %v27843_v47 }
 0x3ef   :  { %19531 = vmatprep.subr.bf16.mxu1 %v27845_v63  ;;  %20918 = vset.pattern.permute.xlu1 %v20958_v29  ;;  %v27882_v29 = vld [vmem:[#allocation69_spill] sm:$0xff] }
 0x3f0   :  { %14177 = vperm.xlu1 %20918, %v27696_v2  }
 0x3f1   :  { %19489 = vmatpush3.bf16.msra.mxu0 %v27876_v17  ;;  %v27880_v17 = vmov 0  }
 0x3f2   :  { %19491 = vmatprep.subr.bf16.mxu0 %v27877_v33  ;;  %19533 = vmatpush3.bf16.msra.mxu1 %v27847_v19  ;;  %v27886_v33 = vld [vmem:[#allocation96_spill] sm:$0xff]  ;;  %v27913_v19 = vld [vmem:[#allocation131_spill] sm:$0xff] }
 0x3f3   :  { %19535 = vmatprep.subr.bf16.mxu1 %v27849_v58  ;;  %v27911_v58 = vld [vmem:[#allocation129_spill] sm:$0xff] }
 0x3f4   :  { %v15855_v25 = vpop.f32.mrb[38].mxu1  ;;  %20919 = vset.pattern.permute.xlu1 %v27880_v17  ;;  %v27884_v17 = vld [vmem:[#allocation71_spill] sm:$0xff] }
 0x3f5   :  { %19493 = vmatpush3.bf16.msra.mxu0 %v27878_v14  ;;  %v15856_v37 = vpop.f32.mrb[39].mxu1  ;;  %14156 = vperm.xlu1 %20919, %v27696_v2  }
 0x3f6   :  { %19495 = vmatprep.subr.bf16.mxu0 %v27879_v11  ;;  %v15857_v23 = vadd.f32 %v15856_v37, %v15855_v25  ;;  %19537 = vmatpush3.bf16.msra.mxu1 %v27851_v43  ;;  %v14390_v37 = vsel %vm7190_vm6, 1.0, %v27490_v10  ;;  %v27883_v25 = vld [vmem:[#allocation70_spill] sm:$0xff]  ;;  %v27909_v43 = vld [vmem:[#allocation127_spill] sm:$0xff] }
 0x3f7   :  { %19539 = vmatprep.subr.bf16.mxu1 %v27852_v54  ;;  %v24812_v11 = vsub.f32 %v14390_v37, %v14390_v37  ;;  %v24826_v37 = vld [vmem:[%s25888_s3] ss:$0 sm:$0xff]  ;;  %v27907_v54 = vld [vmem:[#allocation126_spill] sm:$0xff] }
 0x3f9   :  { %19497 = vmatpush3.bf16.msra.mxu0 %v27881_v45 }
 0x3fa   :  { %19499 = vmatprep.subr.bf16.mxu0 %v27882_v29  ;;  %19541 = vmatpush3.bf16.msra.mxu1 %v27853_v52  ;;  %v27885_v29 = vld [vmem:[#allocation72_spill] sm:$0xff] }
 0x3fb   :  { %19543 = vmatprep.subr.bf16.mxu1 %v27854_v22 }
 0x3fd   :  { %19501 = vmatpush3.bf16.msra.mxu0 %v27883_v25 }
 0x3fe   :  { %19503 = vmatprep.subr.bf16.mxu0 %v27884_v17  ;;  %19545 = vmatpush3.bf16.msra.mxu1 %v27855_v13  ;;  %v8171_v17 = vand.u32 4294901760, %v24812_v11  ;;  %v27894_v13 = vld [vmem:[#allocation111_spill] sm:$0xff] }
 0x3ff   :  { %v15820_v45 = vpop.f32.mrb[38].mxu0  ;;  %19579 = vmatprep.subr.bf16.mxu1 %v27886_v33 }
 0x400   :  { %v15821_v14 = vpop.f32.mrb[39].mxu0  ;;  %v8172_v25 = vsub.f32 %v24812_v11, %v8171_v17 }
 0x401   :  { %v15822_v2 = vadd.f32 %v15821_v14, %v15820_v45  ;;  %19505 = vmatpush3.bf16.msra.mxu0 %v27885_v29  ;;  %14400 = vmatmul.mubr.msk.f32.vlgmr.msra.gmra.mrb[52].mxu1 %vm7187_vm5, %v26812_v0  ;;  %v14173_v45 = vpop.permute.xlu0 %14172  ;;  %v27888_v14 = vld [vmem:[#allocation97_spill] sm:$0xff]  ;;  %v27891_v29 = vld [vmem:[#allocation75_spill] sm:$0xff] }
 0x402   :  { %19507 = vmatprep.subr.bf16.mxu0 %v27887_v18  ;;  %19581 = vmatpush3.bf16.msra.mxu1 %v27888_v14  ;;  %v27890_v18 = vld [vmem:[#allocation104_spill] sm:$0xff] }
 0x403   :  { %v5938_v36 = vadd.f32 %v15822_v2, %v5800_v50  ;;  %14401 = vmatprep.mubr.msk.f32.mxu1 %vm7190_vm6, %v26812_v0  ;;  %v14175_v50 = vmul.f32 %v24826_v37, %v14173_v45  ;;  %v27889_v2 = vld [vmem:[#allocation74_spill] sm:$0xff]  ;;  %19583 = vmatprep.subr.bf16.mxu1 %v27890_v18  ;;  %v27892_v14 = vld [vmem:[#allocation108_spill] sm:$0xff]  ;;  %v8173_v45 = vand.u32 4294901760, %v8172_v25  ;;  %v27902_v25 = vld [vmem:[#allocation121_spill] sm:$0xff] }
 0x404   :  { %v27903_v18 = vld [vmem:[#allocation123_spill] sm:$0xff] }
 0x405   :  { %19509 = vmatpush3.bf16.msra.mxu0 %v27889_v2  ;;  %v6046_v33 = vadd.f32 %v15857_v23, %v5938_v36  ;;  %14186 = vrot.lane.b32.xlu1 %v14175_v50, %s20959_s14  ;;  %v27895_v36 = vld [vmem:[#allocation116_spill] sm:$0xff]  ;;  %v27896_v23 = vld [vmem:[#allocation102_spill] sm:$0xff] }
 0x406   :  { %19511 = vmatprep.subr.bf16.mxu0 %v27891_v29  ;;  %19585 = vmatpush3.bf16.msra.mxu1 %v27892_v14  ;;  %v27897_v50 = vld [vmem:[#allocation118_spill] sm:$0xff]  ;;  %v27898_v14 = vld [vmem:[#allocation103_spill] sm:$0xff]  ;;  %v27901_v29 = vld [vmem:[#allocation120_spill] sm:$0xff] }
 0x407   :  { %19587 = vmatprep.subr.bf16.mxu1 %v27894_v13  ;;  %v27900_v13 = vld [vmem:[#allocation117_spill] sm:$0xff]  ;;  %v27904_v2 = vld [vmem:[#allocation122_spill] sm:$0xff] }
 0x409   :  { %19513 = vmatpush3.bf16.msra.mxu0 %v27893_v55  ;;  %v27899_v55 = vld [vmem:[#allocation119_spill] sm:$0xff] }
 0x40a   :  { %19547 = vmatprep.subr.bf16.mxu0 %v27656_v7  ;;  %19589 = vmatpush3.bf16.msra.mxu1 %v27895_v36  ;;  %v27905_v36 = vld [vmem:[#allocation124_spill] sm:$0xff] }
 0x40b   :  { %19591 = vmatprep.subr.bf16.mxu1 %v27897_v50 }
 0x40c   :  { %14398 = vmatmul.mubr.msk.f32.vlgmr.msra.gmra.mrb[52].mxu0 %vm7187_vm5, %v26812_v0  ;;  %vm14149_vm5 = vcmask 523264  }
 0x40d   :  { %19549 = vmatpush3.bf16.msra.mxu0 %v27896_v23  ;;  %8174 = vmatprep.mubr.f32.mxu0 %v8173_v45  ;;  %v27906_v45 = vld [vmem:[#allocation125_spill] sm:$0xff] }
 0x40e   :  { %19551 = vmatprep.subr.bf16.mxu0 %v27898_v14  ;;  %19593 = vmatpush3.bf16.msra.mxu1 %v27899_v55  ;;  %v27908_v55 = vld [vmem:[#allocation52_spill] sm:$0xff] }
 0x40f   :  { %19595 = vmatprep.subr.bf16.mxu1 %v27901_v29  ;;  %vm7189_vm7 = vcmp.eq.f32.partialorder %v24647_v24, %v27908_v55  ;;  %v27910_v29 = vld [vmem:[#allocation128_spill] sm:$0xff]  ;;  %v28072_v24 = vld [vmem:[#allocation15_spill] sm:$0xff] }
 0x411   :  { %19553 = vmatpush3.bf16.msra.mxu0 %v27900_v13 }
 0x412   :  { %19555 = vmatprep.subr.bf16.mxu0 %v27902_v25  ;;  %19597 = vmatpush3.bf16.msra.mxu1 %v27903_v18  ;;  %v27912_v18 = vld [vmem:[#allocation130_spill] sm:$0xff] }
 0x413   :  { %19599 = vmatprep.subr.bf16.mxu1 %v27905_v36  ;;  %v14389_v36 = vsel %vm7189_vm7, 1.0, %v27490_v10 }
 0x414   :  { %v15925_v22 = vpop.f32.mrb[40].mxu1 }
 0x415   :  { %19557 = vmatpush3.bf16.msra.mxu0 %v27904_v2  ;;  %v15926_v50 = vpop.f32.mrb[41].mxu1 }
 0x416   :  { %19559 = vmatprep.subr.bf16.mxu0 %v27906_v45  ;;  %v15927_v52 = vadd.f32 %v15926_v50, %v15925_v22  ;;  %19601 = vmatpush3.bf16.msra.mxu1 %v27907_v54  ;;  %v27914_v22 = vld [vmem:[#allocation132_spill] sm:$0xff]  ;;  %v27915_v50 = vld [vmem:[#allocation133_spill] sm:$0xff]  ;;  %v24873_v54 = vsub.f32 %v14389_v36, %v14389_v36 }
 0x417   :  { %19603 = vmatprep.subr.bf16.mxu1 %v27910_v29  ;;  %v27916_v29 = vld [vmem:[#allocation134_spill] sm:$0xff]  ;;  %v27919_v36 = vld [vmem:[#allocation137_spill] sm:$0xff] }
 0x419   :  { %19561 = vmatpush3.bf16.msra.mxu0 %v27909_v43 }
 0x41a   :  { %19563 = vmatprep.subr.bf16.mxu0 %v27911_v58  ;;  %19605 = vmatpush3.bf16.msra.mxu1 %v27912_v18  ;;  %v8177_v18 = vand.u32 4294901760, %v24873_v54 }
 0x41b   :  { %19607 = vmatprep.subr.bf16.mxu1 %v27914_v22  ;;  %v27922_v22 = vld [vmem:[#allocation81_spill] sm:$0xff] }
 0x41d   :  { %19565 = vmatpush3.bf16.msra.mxu0 %v27913_v19 }
 0x41e   :  { %19567 = vmatprep.subr.bf16.mxu0 %v27915_v50  ;;  %19609 = vmatpush3.bf16.msra.mxu1 %v27916_v29  ;;  %v8178_v29 = vsub.f32 %v24873_v54, %v8177_v18 }
 0x41f   :  { %v15890_v63 = vpop.f32.mrb[40].mxu0  ;;  %19643 = vmatprep.subr.bf16.mxu1 %v27656_v7 }
 0x420   :  { %v15891_v47 = vpop.f32.mrb[41].mxu0 }
 0x421   :  { %v15892_v27 = vadd.f32 %v15891_v47, %v15890_v63  ;;  %19569 = vmatpush3.bf16.msra.mxu0 %v27917_v30  ;;  %14402 = vmatmul.mubr.msk.f32.vlgmr.msra.gmra.mrb[54].mxu1 %vm7189_vm7, %v26812_v0  ;;  %v27920_v47 = vld [vmem:[#allocation79_spill] sm:$0xff] }
 0x422   :  { %19571 = vmatprep.subr.bf16.mxu0 %v27918_v44  ;;  %19645 = vmatpush3.bf16.msra.mxu1 %v27896_v23 }
 0x423   :  { %v6214_v5 = vadd.f32 %v15892_v27, %v6046_v33  ;;  %8654 = vmatprep.mubr.f32.mxu1 %v8171_v17  ;;  %19647 = vmatprep.subr.bf16.mxu1 %v27898_v14  ;;  %v27921_v27 = vld [vmem:[#allocation80_spill] sm:$0xff]  ;;  %v8179_v33 = vand.u32 4294901760, %v8178_v29  ;;  %v27923_v17 = vld [vmem:[#allocation82_spill] sm:$0xff]  ;;  %v27926_v29 = vld [vmem:[#allocation85_spill] sm:$0xff] }
 0x425   :  { %19573 = vmatpush3.bf16.msra.mxu0 %v27919_v36  ;;  %v6318_v63 = vadd.f32 %v15927_v52, %v6214_v5  ;;  %v27924_v5 = vld [vmem:[#allocation83_spill] sm:$0xff]  ;;  %v27925_v52 = vld [vmem:[#allocation84_spill] sm:$0xff] }
 0x426   :  { %19575 = vmatprep.subr.bf16.mxu0 %v27920_v47  ;;  %19649 = vmatpush3.bf16.msra.mxu1 %v27900_v13 }
 0x427   :  { %19651 = vmatprep.subr.bf16.mxu1 %v27902_v25 }
 0x429   :  { %19577 = vmatpush3.bf16.msra.mxu0 %v27921_v27 }
 0x42a   :  { %19611 = vmatprep.subr.bf16.mxu0 %v27922_v22  ;;  %19653 = vmatpush3.bf16.msra.mxu1 %v27904_v2 }
 0x42b   :  { %19655 = vmatprep.subr.bf16.mxu1 %v27906_v45 }
 0x42c   :  { %8180 = vmatmul.mubr.f32.vlgmr.msra.gmra.mrb[54].mxu0 %v8179_v33  ;;  %v27927_v33 = vld [vmem:[#allocation86_spill] sm:$0xff] }
 0x42d   :  { %19613 = vmatpush3.bf16.msra.mxu0 %v27923_v17  ;;  %8547 = vmatprep.mubr.f32.mxu0 %v24812_v11  ;;  %v27928_v11 = vld [vmem:[#allocation88_spill] sm:$0xff] }
 0x42e   :  { %19615 = vmatprep.subr.bf16.mxu0 %v27924_v5  ;;  %19657 = vmatpush3.bf16.msra.mxu1 %v27909_v43  ;;  %v27929_v5 = vld [vmem:[#allocation89_spill] sm:$0xff] }
 0x42f   :  { %19659 = vmatprep.subr.bf16.mxu1 %v27911_v58 }
 0x431   :  { %19617 = vmatpush3.bf16.msra.mxu0 %v27925_v52  ;;  %v27930_v52 = vld [vmem:[#allocation91_spill] sm:$0xff] }
 0x432   :  { %19619 = vmatprep.subr.bf16.mxu0 %v27926_v29  ;;  %19661 = vmatpush3.bf16.msra.mxu1 %v27913_v19  ;;  %v27931_v29 = vld [vmem:[#allocation94_spill] sm:$0xff] }
 0x433   :  { %19663 = vmatprep.subr.bf16.mxu1 %v27915_v50 }
 0x434   :  { %v15995_v17 = vpop.f32.mrb[42].mxu1 }
 0x435   :  { %19621 = vmatpush3.bf16.msra.mxu0 %v27927_v33  ;;  %v15996_v22 = vpop.f32.mrb[43].mxu1  ;;  %v27932_v33 = vld [vmem:[#allocation100_spill] sm:$0xff] }
 0x436   :  { %19623 = vmatprep.subr.bf16.mxu0 %v27928_v11  ;;  %v15997_v28 = vadd.f32 %v15996_v22, %v15995_v17  ;;  %19665 = vmatpush3.bf16.msra.mxu1 %v27917_v30  ;;  %v27933_v17 = vld [vmem:[#allocation106_spill] sm:$0xff] }
 0x437   :  { %19667 = vmatprep.subr.bf16.mxu1 %v27918_v44 }
 0x439   :  { %19625 = vmatpush3.bf16.msra.mxu0 %v27929_v5  ;;  %v27934_v5 = vld [vmem:[#allocation107_spill] sm:$0xff] }
 0x43a   :  { %19627 = vmatprep.subr.bf16.mxu0 %v27930_v52  ;;  %19669 = vmatpush3.bf16.msra.mxu1 %v27919_v36 }
 0x43b   :  { %19671 = vmatprep.subr.bf16.mxu1 %v27920_v47 }
 0x43d   :  { %19629 = vmatpush3.bf16.msra.mxu0 %v27931_v29  ;;  %v27951_v29 = vld [vmem:[#allocation114_spill] sm:$0xff] }
 0x43e   :  { %19631 = vmatprep.subr.bf16.mxu0 %v27932_v33  ;;  %19673 = vmatpush3.bf16.msra.mxu1 %v27921_v27  ;;  %v27935_v33 = vld [vmem:[#allocation110_spill] sm:$0xff] }
 0x43f   :  { %v15960_v8 = vpop.f32.mrb[42].mxu0  ;;  %19707 = vmatprep.subr.bf16.mxu1 %v27656_v7 }
 0x440   :  { %v15961_v11 = vpop.f32.mrb[43].mxu0 }
 0x441   :  { %v15962_v22 = vadd.f32 %v15961_v11, %v15960_v8  ;;  %19633 = vmatpush3.bf16.msra.mxu0 %v27933_v17  ;;  %8658 = vmatmul.mubr.f32.vlgmr.msra.gmra.mrb[56].mxu1 %v8177_v18  ;;  %v27936_v11 = vld [vmem:[#allocation113_spill] sm:$0xff]  ;;  %v27937_v17 = vld [vmem:[#allocation140_spill] sm:$0xff] }
 0x442   :  { %19635 = vmatprep.subr.bf16.mxu0 %v27934_v5  ;;  %19709 = vmatpush3.bf16.msra.mxu1 %v27896_v23  ;;  %v27938_v18 = vld [vmem:[#allocation141_spill] sm:$0xff]  ;;  %v27950_v5 = vld [vmem:[#allocation164_spill] sm:$0xff] }
 0x443   :  { %v6430_v52 = vadd.f32 %v15962_v22, %v6318_v63  ;;  %14405 = vmatprep.mubr.msk.f32.mxu1 %vm7190_vm6, %v26812_v0  ;;  %19711 = vmatprep.subr.bf16.mxu1 %v27898_v14  ;;  %v27939_v63 = vld [vmem:[#allocation147_spill] sm:$0xff]  ;;  %v27943_v22 = vld [vmem:[#allocation156_spill] sm:$0xff] }
 0x445   :  { %19637 = vmatpush3.bf16.msra.mxu0 %v27935_v33  ;;  %v6662_v8 = vadd.f32 %v15997_v28, %v6430_v52  ;;  %v27940_v28 = vld [vmem:[#allocation148_spill] sm:$0xff]  ;;  %v27941_v52 = vld [vmem:[#allocation153_spill] sm:$0xff]  ;;  %v27949_v33 = vld [vmem:[#allocation163_spill] sm:$0xff] }
 0x446   :  { %19639 = vmatprep.subr.bf16.mxu0 %v27936_v11  ;;  %19713 = vmatpush3.bf16.msra.mxu1 %v27900_v13 }
 0x447   :  { %19715 = vmatprep.subr.bf16.mxu1 %v27902_v25 }
 0x449   :  { %19641 = vmatpush3.bf16.msra.mxu0 %v27937_v17 }
 0x44a   :  { %19675 = vmatprep.subr.bf16.mxu0 %v27938_v18  ;;  %19717 = vmatpush3.bf16.msra.mxu1 %v27904_v2  ;;  %v27944_v18 = vld [vmem:[#allocation157_spill] sm:$0xff] }
 0x44b   :  { %19719 = vmatprep.subr.bf16.mxu1 %v27906_v45 }
 0x44c   :  { %8550 = vmatmul.mubr.f32.vlgmr.msra.gmra.mrb[56].mxu0 %v24873_v54  ;;  %v27942_v54 = vld [vmem:[#allocation154_spill] sm:$0xff] }
 0x44d   :  { %19677 = vmatpush3.bf16.msra.mxu0 %v27939_v63  ;;  %14403 = vmatprep.mubr.msk.f32.mxu0 %vm7190_vm6, %v26812_v0  ;;  %vm14151_vm6 = vcmask 785408  }
 0x44e   :  { %19679 = vmatprep.subr.bf16.mxu0 %v27940_v28  ;;  %19721 = vmatpush3.bf16.msra.mxu1 %v27909_v43  ;;  %v27945_v28 = vld [vmem:[#allocation159_spill] sm:$0xff] }
 0x44f   :  { %19723 = vmatprep.subr.bf16.mxu1 %v27911_v58 }
 0x451   :  { %19681 = vmatpush3.bf16.msra.mxu0 %v27941_v52 }
 0x452   :  { %19683 = vmatprep.subr.bf16.mxu0 %v27942_v54  ;;  %19725 = vmatpush3.bf16.msra.mxu1 %v27913_v19  ;;  %v27946_v54 = vld [vmem:[#allocation160_spill] sm:$0xff] }
 0x453   :  { %19727 = vmatprep.subr.bf16.mxu1 %v27915_v50 }
 0x454   :  { %v16065_v63 = vpop.f32.mrb[44].mxu1 }
 0x455   :  { %19685 = vmatpush3.bf16.msra.mxu0 %v27943_v22  ;;  %v16066_v17 = vpop.f32.mrb[45].mxu1  ;;  %v27947_v22 = vld [vmem:[#allocation161_spill] sm:$0xff] }
 0x456   :  { %19687 = vmatprep.subr.bf16.mxu0 %v27944_v18  ;;  %v16067_v11 = vadd.f32 %v16066_v17, %v16065_v63  ;;  %19729 = vmatpush3.bf16.msra.mxu1 %v27917_v30  ;;  %v14392_v18 = vsel %vm7192_vm8, 1.0, %v27490_v10  ;;  %v27948_v17 = vld [vmem:[#allocation162_spill] sm:$0xff] }
 0x457   :  { %19731 = vmatprep.subr.bf16.mxu1 %v27918_v44 }
 0x459   :  { %19689 = vmatpush3.bf16.msra.mxu0 %v27945_v28  ;;  %v24961_v28 = vsub.f32 %v14392_v18, %v14392_v18  ;;  %v27952_v18 = vld [vmem:[#allocation167_spill] sm:$0xff] }
 0x45a   :  { %19691 = vmatprep.subr.bf16.mxu0 %v27946_v54  ;;  %19733 = vmatpush3.bf16.msra.mxu1 %v27919_v36 }
 0x45b   :  { %19735 = vmatprep.subr.bf16.mxu1 %v27920_v47 }
 0x45d   :  { %19693 = vmatpush3.bf16.msra.mxu0 %v27947_v22  ;;  %v27957_v22 = vld [vmem:[#allocation90_spill] sm:$0xff] }
 0x45e   :  { %19695 = vmatprep.subr.bf16.mxu0 %v27948_v17  ;;  %19737 = vmatpush3.bf16.msra.mxu1 %v27921_v27  ;;  %v9033_v17 = vand.u32 4294901760, %v24961_v28 }
 0x45f   :  { %v16030_v63 = vpop.f32.mrb[44].mxu0  ;;  %19771 = vmatprep.subr.bf16.mxu1 %v27950_v5  ;;  %v27956_v5 = vld [vmem:[#allocation175_spill] sm:$0xff] }
 0x460   :  { %v16031_v52 = vpop.f32.mrb[45].mxu0 }
 0x461   :  { %v16032_v54 = vadd.f32 %v16031_v52, %v16030_v63  ;;  %19697 = vmatpush3.bf16.msra.mxu0 %v27949_v33  ;;  %14406 = vmatmul.mubr.msk.f32.vlgmr.msra.gmra.mrb[58].mxu1 %vm7189_vm7, %v26812_v0  ;;  %v27953_v52 = vld [vmem:[#allocation171_spill] sm:$0xff]  ;;  %v27954_v63 = vld [vmem:[#allocation172_spill] sm:$0xff] }
 0x462   :  { %19699 = vmatprep.subr.bf16.mxu0 %v27951_v29  ;;  %19773 = vmatpush3.bf16.msra.mxu1 %v27952_v18  ;;  %v27958_v18 = vld [vmem:[#allocation177_spill] sm:$0xff] }
 0x463   :  { %v6800_v36 = vadd.f32 %v16032_v54, %v6662_v8  ;;  %14407 = vmatprep.mubr.msk.f32.mxu1 %vm7192_vm8, %v26812_v0  ;;  %19775 = vmatprep.subr.bf16.mxu1 %v27954_v63  ;;  %v27955_v8 = vld [vmem:[#allocation87_spill] sm:$0xff]  ;;  %v9034_v54 = vsub.f32 %v24961_v28, %v9033_v17 }
 0x464   :  { %v24982_v33 = vpop.permute.xlu1 %10660  ;;  %v27970_v63 = vld [vmem:[#allocation203_spill] sm:$0xff] }
 0x465   :  { %19701 = vmatpush3.bf16.msra.mxu0 %v27953_v52  ;;  %v6908_v29 = vadd.f32 %v16067_v11, %v6800_v36  ;;  %v9035_v27 = vand.u32 4294901760, %v9034_v54  ;;  %v27959_v36 = vld [vmem:[#allocation183_spill] sm:$0xff]  ;;  %v27960_v11 = vld [vmem:[#allocation185_spill] sm:$0xff]  ;;  %v27962_v54 = vld [vmem:[#allocation188_spill] sm:$0xff]  ;;  %vm10664_vm12 = vcmp.eq.f32.partialorder %v24982_v33, %v27813_v15  ;;  %vm10666_vm14 = vcmp.eq.f32.partialorder %v24982_v33, %v27642_v48 }
 0x466   :  { %19703 = vmatprep.subr.bf16.mxu0 %v27955_v8  ;;  %19777 = vmatpush3.bf16.msra.mxu1 %v27956_v5  ;;  %v27961_v5 = vld [vmem:[#allocation187_spill] sm:$0xff]  ;;  %vm10665_vm15 = vcmp.eq.f32.partialorder %v24982_v33, %v27908_v55  ;;  %vm10668_vm0 = vcmp.eq.f32.partialorder %v24982_v33, %v27710_v6  ;;  %v28182_v55 = vld [vmem:[#allocation192_spill] sm:$0xff]  ;;  %vm10667_vm1 = vcmp.eq.f32.partialorder %v24982_v33, %v27416_v31 }
 0x467   :  { %19779 = vmatprep.subr.bf16.mxu1 %v27958_v18  ;;  %vm10670_vm2 = vcmp.eq.f32.partialorder %v24982_v33, %v27546_v12  ;;  %v28239_v31 = vld [vmem:[#allocation252_spill] sm:$0xff] }
 0x469   :  { %19705 = vmatpush3.bf16.msra.mxu0 %v27957_v22 }
 0x46a   :  { %19739 = vmatprep.subr.bf16.mxu0 %v27724_v56  ;;  %19781 = vmatpush3.bf16.msra.mxu1 %v27959_v36  ;;  %v14168_v22 = vpop.permute.xlu1 %14167  ;;  %v27963_v36 = vld [vmem:[#allocation191_spill] sm:$0xff] }
 0x46b   :  { %19783 = vmatprep.subr.bf16.mxu1 %v27960_v11  ;;  %v14170_v18 = vmul.f32 %v24826_v37, %v14168_v22 }
 0x46c   :  { %14404 = vmatmul.mubr.msk.f32.vlgmr.msra.gmra.mrb[58].mxu0 %vm7189_vm7, %v26812_v0 }
 0x46d   :  { %19741 = vmatpush3.bf16.msra.mxu0 %v27726_v49  ;;  %9036 = vmatprep.mubr.f32.mxu0 %v9035_v27  ;;  %v27964_v27 = vld [vmem:[#allocation192_spill] sm:$0xff] }
 0x46e   :  { %19743 = vmatprep.subr.bf16.mxu0 %v27728_v41  ;;  %19785 = vmatpush3.bf16.msra.mxu1 %v27961_v5  ;;  %v27965_v5 = vld [vmem:[#allocation193_spill] sm:$0xff] }
 0x46f   :  { %19787 = vmatprep.subr.bf16.mxu1 %v27962_v54  ;;  %14182 = vrot.lane.b32.xlu0 %v14170_v18, %s20960_s15  ;;  %v27966_v54 = vld [vmem:[#allocation195_spill] sm:$0xff]  ;;  %v14391_v18 = vsel %vm7191_vm9, 1.0, %v27490_v10 }
 0x471   :  { %19745 = vmatpush3.bf16.msra.mxu0 %v27730_v35 }
 0x472   :  { %19747 = vmatprep.subr.bf16.mxu0 %v27732_v1  ;;  %19789 = vmatpush3.bf16.msra.mxu1 %v27963_v36 }
 0x473   :  { %19791 = vmatprep.subr.bf16.mxu1 %v27964_v27  ;;  %v27967_v27 = vld [vmem:[#allocation197_spill] sm:$0xff] }
 0x474   :  { %v16135_v11 = vpop.f32.mrb[46].mxu1 }
 0x475   :  { %19749 = vmatpush3.bf16.msra.mxu0 %v27734_v40  ;;  %v16136_v37 = vpop.f32.mrb[47].mxu1 }
 0x476   :  { %19751 = vmatprep.subr.bf16.mxu0 %v27736_v3  ;;  %v16137_v22 = vadd.f32 %v16136_v37, %v16135_v11  ;;  %19793 = vmatpush3.bf16.msra.mxu1 %v27965_v5  ;;  %v27968_v11 = vld [vmem:[#allocation199_spill] sm:$0xff]  ;;  %v25019_v37 = vsub.f32 %v14391_v18, %v14391_v18  ;;  %v27971_v18 = vld [vmem:[#allocation92_spill] sm:$0xff] }
 0x477   :  { %19795 = vmatprep.subr.bf16.mxu1 %v27966_v54  ;;  %v27969_v54 = vld [vmem:[#allocation201_spill] sm:$0xff] }
 0x479   :  { %19753 = vmatpush3.bf16.msra.mxu0 %v27738_v57 }
 0x47a   :  { %19755 = vmatprep.subr.bf16.mxu0 %v27740_v20  ;;  %19797 = vmatpush3.bf16.msra.mxu1 %v27967_v27  ;;  %v9039_v27 = vand.u32 4294901760, %v25019_v37 }
 0x47b   :  { %19799 = vmatprep.subr.bf16.mxu1 %v27968_v11 }
 0x47d   :  { %19757 = vmatpush3.bf16.msra.mxu0 %v27742_v53 }
 0x47e   :  { %19759 = vmatprep.subr.bf16.mxu0 %v27744_v9  ;;  %19801 = vmatpush3.bf16.msra.mxu1 %v27969_v54 }
 0x47f   :  { %v16100_v5 = vpop.f32.mrb[46].mxu0  ;;  %19835 = vmatprep.subr.bf16.mxu1 %v27724_v56 }
 0x480   :  { %v16101_v36 = vpop.f32.mrb[47].mxu0 }
 0x481   :  { %v16102_v8 = vadd.f32 %v16101_v36, %v16100_v5  ;;  %19761 = vmatpush3.bf16.msra.mxu0 %v27746_v62  ;;  %14408 = vmatmul.mubr.msk.f32.vlgmr.msra.gmra.mrb[60].mxu1 %vm7191_vm9, %v26812_v0  ;;  %v9040_v36 = vsub.f32 %v25019_v37, %v9039_v27 }
 0x482   :  { %19763 = vmatprep.subr.bf16.mxu0 %v27970_v63  ;;  %19837 = vmatpush3.bf16.msra.mxu1 %v27726_v49 }
 0x483   :  { %v7076_v52 = vadd.f32 %v16102_v8, %v6908_v29  ;;  %9516 = vmatprep.mubr.f32.mxu1 %v9033_v17  ;;  %19839 = vmatprep.subr.bf16.mxu1 %v27728_v41  ;;  %v9041_v29 = vand.u32 4294901760, %v9040_v36  ;;  %v27972_v8 = vld [vmem:[#allocation98_spill] sm:$0xff]  ;;  %v27973_v17 = vld [vmem:[#allocation112_spill] sm:$0xff] }
 0x484   :  { %v27977_v36 = vld [vmem:[#allocation150_spill] sm:$0xff] }
 0x485   :  { %19765 = vmatpush3.bf16.msra.mxu0 %v27971_v18  ;;  %v7180_v5 = vadd.f32 %v16137_v22, %v7076_v52  ;;  %v27974_v52 = vld [vmem:[#allocation101_spill] sm:$0xff]  ;;  %v27975_v22 = vld [vmem:[#allocation139_spill] sm:$0xff] }
 0x486   :  { %19767 = vmatprep.subr.bf16.mxu0 %v27750_v39  ;;  %19841 = vmatpush3.bf16.msra.mxu1 %v27730_v35 }
 0x487   :  { %14136 = vrot.lane.b32.xlu1 %v7180_v5, %s20960_s15  ;;  %19843 = vmatprep.subr.bf16.mxu1 %v27732_v1  ;;  %v27976_v5 = vld [vmem:[#allocation143_spill] sm:$0xff] }
 0x489   :  { %19769 = vmatpush3.bf16.msra.mxu0 %v27751_v51 }
 0x48a   :  { %19803 = vmatprep.subr.bf16.mxu0 %v27972_v8  ;;  %19845 = vmatpush3.bf16.msra.mxu1 %v27734_v40 }
 0x48b   :  { %19847 = vmatprep.subr.bf16.mxu1 %v27736_v3 }
 0x48c   :  { %9042 = vmatmul.mubr.f32.vlgmr.msra.gmra.mrb[60].mxu0 %v9041_v29 }
 0x48d   :  { %19805 = vmatpush3.bf16.msra.mxu0 %v27973_v17  ;;  %9409 = vmatprep.mubr.f32.mxu0 %v24961_v28  ;;  %v27978_v28 = vld [vmem:[#allocation151_spill] sm:$0xff] }
 0x48e   :  { %19807 = vmatprep.subr.bf16.mxu0 %v27974_v52  ;;  %19849 = vmatpush3.bf16.msra.mxu1 %v27738_v57  ;;  %v27979_v52 = vld [vmem:[#allocation155_spill] sm:$0xff] }
 0x48f   :  { %19851 = vmatprep.subr.bf16.mxu1 %v27740_v20 }
 0x491   :  { %19809 = vmatpush3.bf16.msra.mxu0 %v27975_v22  ;;  %v27980_v22 = vld [vmem:[#allocation158_spill] sm:$0xff] }
 0x492   :  { %19811 = vmatprep.subr.bf16.mxu0 %v27976_v5  ;;  %19853 = vmatpush3.bf16.msra.mxu1 %v27742_v53  ;;  %v27981_v5 = vld [vmem:[#allocation170_spill] sm:$0xff] }
 0x493   :  { %19855 = vmatprep.subr.bf16.mxu1 %v27744_v9 }
 0x494   :  { %v16205_v29 = vpop.f32.mrb[48].mxu1 }
 0x495   :  { %19813 = vmatpush3.bf16.msra.mxu0 %v27977_v36  ;;  %v16206_v17 = vpop.f32.mrb[49].mxu1  ;;  %v27982_v36 = vld [vmem:[#allocation205_spill] sm:$0xff] }
 0x496   :  { %19815 = vmatprep.subr.bf16.mxu0 %v27978_v28  ;;  %v16207_v8 = vadd.f32 %v16206_v17, %v16205_v29  ;;  %19857 = vmatpush3.bf16.msra.mxu1 %v27746_v62  ;;  %v27983_v29 = vld [vmem:[#allocation209_spill] sm:$0xff] }
 0x497   :  { %19859 = vmatprep.subr.bf16.mxu1 %v27970_v63 }
 0x499   :  { %19817 = vmatpush3.bf16.msra.mxu0 %v27979_v52  ;;  %v27984_v52 = vld [vmem:[#allocation211_spill] sm:$0xff] }
 0x49a   :  { %19819 = vmatprep.subr.bf16.mxu0 %v27980_v22  ;;  %19861 = vmatpush3.bf16.msra.mxu1 %v27971_v18 }
 0x49b   :  { %19863 = vmatprep.subr.bf16.mxu1 %v27750_v39 }
 0x49d   :  { %19821 = vmatpush3.bf16.msra.mxu0 %v27981_v5 }
 0x49e   :  { %19823 = vmatprep.subr.bf16.mxu0 %v27982_v36  ;;  %19865 = vmatpush3.bf16.msra.mxu1 %v27751_v51  ;;  %v27985_v36 = vld [vmem:[#allocation213_spill] sm:$0xff] }
 0x49f   :  { %v16170_v54 = vpop.f32.mrb[48].mxu0  ;;  %19899 = vmatprep.subr.bf16.mxu1 %v27724_v56 }
 0x4a0   :  { %v16171_v28 = vpop.f32.mrb[49].mxu0 }
 0x4a1   :  { %v16172_v17 = vadd.f32 %v16171_v28, %v16170_v54  ;;  %19825 = vmatpush3.bf16.msra.mxu0 %v27983_v29  ;;  %9520 = vmatmul.mubr.f32.vlgmr.msra.gmra.mrb[62].mxu1 %v9039_v27  ;;  %v27986_v54 = vld [vmem:[#allocation214_spill] sm:$0xff]  ;;  %v27987_v28 = vld [vmem:[#allocation219_spill] sm:$0xff]  ;;  %v27988_v27 = vld [vmem:[#allocation221_spill] sm:$0xff] }
 0x4a2   :  { %19827 = vmatprep.subr.bf16.mxu0 %v27984_v52  ;;  %19901 = vmatpush3.bf16.msra.mxu1 %v27726_v49  ;;  %v27999_v29 = vld [vmem:[#allocation239_spill] sm:$0xff] }
 0x4a3   :  { %v7552_v22 = vadd.f32 %v16207_v8, %v16172_v17  ;;  %14411 = vmatprep.mubr.msk.f32.mxu1 %vm7192_vm8, %v26812_v0  ;;  %19903 = vmatprep.subr.bf16.mxu1 %v27728_v41  ;;  %v27989_v8 = vld [vmem:[#allocation225_spill] sm:$0xff]  ;;  %v27990_v17 = vld [vmem:[#allocation226_spill] sm:$0xff] }
 0x4a5   :  { %19829 = vmatpush3.bf16.msra.mxu0 %v27985_v36 }
 0x4a6   :  { %19831 = vmatprep.subr.bf16.mxu0 %v27986_v54  ;;  %19905 = vmatpush3.bf16.msra.mxu1 %v27730_v35  ;;  %v27994_v54 = vld [vmem:[#allocation232_spill] sm:$0xff] }
 0x4a7   :  { %19907 = vmatprep.subr.bf16.mxu1 %v27732_v1 }
 0x4a9   :  { %19833 = vmatpush3.bf16.msra.mxu0 %v27987_v28  ;;  %v27991_v28 = vld [vmem:[#allocation229_spill] sm:$0xff] }
 0x4aa   :  { %19867 = vmatprep.subr.bf16.mxu0 %v27988_v27  ;;  %19909 = vmatpush3.bf16.msra.mxu1 %v27734_v40 }
 0x4ab   :  { %19911 = vmatprep.subr.bf16.mxu1 %v27736_v3 }
 0x4ac   :  { %9412 = vmatmul.mubr.f32.vlgmr.msra.gmra.mrb[62].mxu0 %v25019_v37  ;;  %v27992_v37 = vld [vmem:[#allocation230_spill] sm:$0xff] }
 0x4ad   :  { %19869 = vmatpush3.bf16.msra.mxu0 %v27989_v8  ;;  %14409 = vmatprep.mubr.msk.f32.mxu0 %vm7192_vm8, %v26812_v0  ;;  %v27993_v8 = vld [vmem:[#allocation231_spill] sm:$0xff] }
 0x4ae   :  { %19871 = vmatprep.subr.bf16.mxu0 %v27990_v17  ;;  %19913 = vmatpush3.bf16.msra.mxu1 %v27738_v57  ;;  %v27995_v17 = vld [vmem:[#allocation233_spill] sm:$0xff] }
 0x4af   :  { %19915 = vmatprep.subr.bf16.mxu1 %v27740_v20 }
 0x4b1   :  { %19873 = vmatpush3.bf16.msra.mxu0 %v27991_v28  ;;  %v27998_v28 = vld [vmem:[#allocation241_spill] sm:$0xff] }
 0x4b2   :  { %19875 = vmatprep.subr.bf16.mxu0 %v27992_v37  ;;  %19917 = vmatpush3.bf16.msra.mxu1 %v27742_v53  ;;  %v27996_v37 = vld [vmem:[#allocation174_spill] sm:$0xff] }
 0x4b3   :  { %19919 = vmatprep.subr.bf16.mxu1 %v27744_v9 }
 0x4b4   :  { %v16275_v27 = vpop.f32.mrb[50].mxu1 }
 0x4b5   :  { %19877 = vmatpush3.bf16.msra.mxu0 %v27993_v8  ;;  %v16276_v36 = vpop.f32.mrb[51].mxu1 }
 0x4b6   :  { %19879 = vmatprep.subr.bf16.mxu0 %v27994_v54  ;;  %v16277_v52 = vadd.f32 %v16276_v36, %v16275_v27  ;;  %19921 = vmatpush3.bf16.msra.mxu1 %v27746_v62  ;;  %v14394_v54 = vsel %vm7194_vm10, 1.0, %v27490_v10  ;;  %v27997_v36 = vld [vmem:[#allocation178_spill] sm:$0xff]  ;;  %v28023_v62 = vld [vmem:[#allocation115_spill] sm:$0xff] }
 0x4b7   :  { %19923 = vmatprep.subr.bf16.mxu1 %v27970_v63  ;;  %v28022_v63 = vld [vmem:[#allocation258_spill] sm:$0xff] }
 0x4b9   :  { %19881 = vmatpush3.bf16.msra.mxu0 %v27995_v17  ;;  %v25108_v17 = vsub.f32 %v14394_v54, %v14394_v54  ;;  %v28000_v54 = vld [vmem:[#allocation242_spill] sm:$0xff] }
 0x4ba   :  { %19883 = vmatprep.subr.bf16.mxu0 %v27996_v37  ;;  %19925 = vmatpush3.bf16.msra.mxu1 %v27971_v18 }
 0x4bb   :  { %19927 = vmatprep.subr.bf16.mxu1 %v27750_v39 }
 0x4bd   :  { %19885 = vmatpush3.bf16.msra.mxu0 %v27777_v16  ;;  %v28006_v16 = vld [vmem:[#allocation245_spill] sm:$0xff] }
 0x4be   :  { %19887 = vmatprep.subr.bf16.mxu0 %v27997_v36  ;;  %19929 = vmatpush3.bf16.msra.mxu1 %v27751_v51  ;;  %v9895_v36 = vand.u32 4294901760, %v25108_v17 }
 0x4bf   :  { %v16240_v27 = vpop.f32.mrb[50].mxu0  ;;  %19963 = vmatprep.subr.bf16.mxu1 %v27998_v28  ;;  %v28004_v28 = vld [vmem:[#allocation54_spill] sm:$0xff] }
 0x4c0   :  { %v16241_v8 = vpop.f32.mrb[51].mxu0 }
 0x4c1   :  { %v16242_v37 = vadd.f32 %v16241_v8, %v16240_v27  ;;  %19889 = vmatpush3.bf16.msra.mxu0 %v27779_v32  ;;  %14412 = vmatmul.mubr.msk.f32.vlgmr.msra.gmra.mrb[64].mxu1 %vm7191_vm9, %v26812_v0  ;;  %v28001_v8 = vld [vmem:[#allocation142_spill] sm:$0xff]  ;;  %v28002_v27 = vld [vmem:[#allocation244_spill] sm:$0xff] }
 0x4c2   :  { %19891 = vmatprep.subr.bf16.mxu0 %v27999_v29  ;;  %19965 = vmatpush3.bf16.msra.mxu1 %v28000_v54  ;;  %v28005_v32 = vld [vmem:[#allocation146_spill] sm:$0xff] }
 0x4c3   :  { %v7690_v5 = vadd.f32 %v16242_v37, %v7552_v22  ;;  %14413 = vmatprep.mubr.msk.f32.mxu1 %vm7194_vm10, %v26812_v0  ;;  %19967 = vmatprep.subr.bf16.mxu1 %v28002_v27  ;;  %v28003_v22 = vld [vmem:[#allocation144_spill] sm:$0xff]  ;;  %v9896_v37 = vsub.f32 %v25108_v17, %v9895_v36  ;;  %v28007_v27 = vld [vmem:[#allocation246_spill] sm:$0xff] }
 0x4c5   :  { %19893 = vmatpush3.bf16.msra.mxu0 %v28001_v8  ;;  %v7798_v29 = vadd.f32 %v16277_v52, %v7690_v5  ;;  %v9897_v54 = vand.u32 4294901760, %v9896_v37  ;;  %v28008_v52 = vld [vmem:[#allocation247_spill] sm:$0xff]  ;;  %v28009_v5 = vld [vmem:[#allocation249_spill] sm:$0xff] }
 0x4c6   :  { %19895 = vmatprep.subr.bf16.mxu0 %v28003_v22  ;;  %19969 = vmatpush3.bf16.msra.mxu1 %v28004_v28  ;;  %v28011_v37 = vld [vmem:[#allocation253_spill] sm:$0xff]  ;;  %v28013_v28 = vld [vmem:[#allocation255_spill] sm:$0xff] }
 0x4c7   :  { %19971 = vmatprep.subr.bf16.mxu1 %v28006_v16  ;;  %v28010_v16 = vld [vmem:[#allocation250_spill] sm:$0xff]  ;;  %v28016_v22 = vld [vmem:[#allocation105_spill] sm:$0xff] }
 0x4c8   :  { %v28018_v8 = vld [vmem:[#allocation145_spill] sm:$0xff] }
 0x4c9   :  { %19897 = vmatpush3.bf16.msra.mxu0 %v28005_v32 }
 0x4ca   :  { %19931 = vmatprep.subr.bf16.mxu0 %v23676_v4  ;;  %19973 = vmatpush3.bf16.msra.mxu1 %v28007_v27  ;;  %v28012_v27 = vld [vmem:[#allocation254_spill] sm:$0xff] }
 0x4cb   :  { %19975 = vmatprep.subr.bf16.mxu1 %v28008_v52 }
 0x4cc   :  { %14410 = vmatmul.mubr.msk.f32.vlgmr.msra.gmra.mrb[64].mxu0 %vm7191_vm9, %v26812_v0 }
 0x4cd   :  { %19933 = vmatpush3.bf16.msra.mxu0 %v23700_v34  ;;  %9898 = vmatprep.mubr.f32.mxu0 %v9897_v54 }
 0x4ce   :  { %19935 = vmatprep.subr.bf16.mxu0 %v23708_v21  ;;  %19977 = vmatpush3.bf16.msra.mxu1 %v28009_v5  ;;  %v28014_v5 = vld [vmem:[#allocation215_spill] sm:$0xff] }
 0x4cf   :  { %19979 = vmatprep.subr.bf16.mxu1 %v28010_v16  ;;  %v28015_v16 = vld [vmem:[#allocation216_spill] sm:$0xff] }
 0x4d1   :  { %19937 = vmatpush3.bf16.msra.mxu0 %v23717_v59 }
 0x4d2   :  { %19939 = vmatprep.subr.bf16.mxu0 %v23745_v42  ;;  %19981 = vmatpush3.bf16.msra.mxu1 %v28011_v37  ;;  %v28017_v37 = vld [vmem:[#allocation138_spill] sm:$0xff] }
 0x4d3   :  { %19983 = vmatprep.subr.bf16.mxu1 %v28012_v27  ;;  %v14393_v27 = vsel %vm7193_vm11, 1.0, %v27490_v10 }
 0x4d4   :  { %v16345_v32 = vpop.f32.mrb[52].mxu1 }
 0x4d5   :  { %19941 = vmatpush3.bf16.msra.mxu0 %v23753_v60  ;;  %v16346_v54 = vpop.f32.mrb[53].mxu1 }
 0x4d6   :  { %19943 = vmatprep.subr.bf16.mxu0 %v23778_v46  ;;  %v16347_v52 = vadd.f32 %v16346_v54, %v16345_v32  ;;  %19985 = vmatpush3.bf16.msra.mxu1 %v28013_v28  ;;  %v28019_v32 = vld [vmem:[#allocation149_spill] sm:$0xff]  ;;  %v28020_v54 = vld [vmem:[#allocation256_spill] sm:$0xff]  ;;  %v25162_v28 = vsub.f32 %v14393_v27, %v14393_v27 }
 0x4d7   :  { %19987 = vmatprep.subr.bf16.mxu1 %v28015_v16  ;;  %v28021_v16 = vld [vmem:[#allocation257_spill] sm:$0xff] }
 0x4d8   :  { %v28024_v27 = vld [vmem:[#allocation165_spill] sm:$0xff] }
 0x4d9   :  { %19945 = vmatpush3.bf16.msra.mxu0 %v28014_v5 }
 0x4da   :  { %19947 = vmatprep.subr.bf16.mxu0 %v28016_v22  ;;  %19989 = vmatpush3.bf16.msra.mxu1 %v28017_v37  ;;  %v9901_v37 = vand.u32 4294901760, %v25162_v28 }
 0x4db   :  { %19991 = vmatprep.subr.bf16.mxu1 %v28019_v32  ;;  %v28027_v32 = vld [vmem:[#allocation173_spill] sm:$0xff] }
 0x4dd   :  { %19949 = vmatpush3.bf16.msra.mxu0 %v28018_v8 }
 0x4de   :  { %19951 = vmatprep.subr.bf16.mxu0 %v28020_v54  ;;  %19993 = vmatpush3.bf16.msra.mxu1 %v28021_v16  ;;  %v9902_v16 = vsub.f32 %v25162_v28, %v9901_v37 }
 0x4df   :  { %v16310_v51 = vpop.f32.mrb[52].mxu0  ;;  %20027 = vmatprep.subr.bf16.mxu1 %v23676_v4 }
 0x4e0   :  { %v16311_v39 = vpop.f32.mrb[53].mxu0 }
 0x4e1   :  { %v16312_v18 = vadd.f32 %v16311_v39, %v16310_v51  ;;  %19953 = vmatpush3.bf16.msra.mxu0 %v28022_v63  ;;  %14414 = vmatmul.mubr.msk.f32.vlgmr.msra.gmra.mrb[66].mxu1 %vm7193_vm11, %v26812_v0  ;;  %v28025_v51 = vld [vmem:[#allocation168_spill] sm:$0xff] }
 0x4e2   :  { %19955 = vmatprep.subr.bf16.mxu0 %v28023_v62  ;;  %20029 = vmatpush3.bf16.msra.mxu1 %v23700_v34 }
 0x4e3   :  { %v7966_v9 = vadd.f32 %v16312_v18, %v7798_v29  ;;  %10378 = vmatprep.mubr.f32.mxu1 %v9895_v36  ;;  %20031 = vmatprep.subr.bf16.mxu1 %v23708_v21  ;;  %v28026_v18 = vld [vmem:[#allocation169_spill] sm:$0xff]  ;;  %v9903_v29 = vand.u32 4294901760, %v9902_v16  ;;  %v28028_v36 = vld [vmem:[#allocation204_spill] sm:$0xff]  ;;  %v28031_v16 = vld [vmem:[#allocation222_spill] sm:$0xff] }
 0x4e5   :  { %19957 = vmatpush3.bf16.msra.mxu0 %v28024_v27  ;;  %v8070_v39 = vadd.f32 %v16347_v52, %v7966_v9  ;;  %v28029_v9 = vld [vmem:[#allocation207_spill] sm:$0xff]  ;;  %v28030_v52 = vld [vmem:[#allocation208_spill] sm:$0xff] }
 0x4e6   :  { %19959 = vmatprep.subr.bf16.mxu0 %v28025_v51  ;;  %20033 = vmatpush3.bf16.msra.mxu1 %v23717_v59 }
 0x4e7   :  { %20035 = vmatprep.subr.bf16.mxu1 %v23745_v42 }
 0x4e9   :  { %19961 = vmatpush3.bf16.msra.mxu0 %v28026_v18 }
 0x4ea   :  { %19995 = vmatprep.subr.bf16.mxu0 %v28027_v32  ;;  %20037 = vmatpush3.bf16.msra.mxu1 %v23753_v60 }
 0x4eb   :  { %20039 = vmatprep.subr.bf16.mxu1 %v23778_v46 }
 0x4ec   :  { %9904 = vmatmul.mubr.f32.vlgmr.msra.gmra.mrb[66].mxu0 %v9903_v29  ;;  %v28032_v29 = vld [vmem:[#allocation223_spill] sm:$0xff] }
 0x4ed   :  { %19997 = vmatpush3.bf16.msra.mxu0 %v28028_v36  ;;  %10271 = vmatprep.mubr.f32.mxu0 %v25108_v17  ;;  %v28033_v17 = vld [vmem:[#allocation227_spill] sm:$0xff] }
 0x4ee   :  { %19999 = vmatprep.subr.bf16.mxu0 %v28029_v9  ;;  %20041 = vmatpush3.bf16.msra.mxu1 %v28014_v5  ;;  %v28034_v9 = vld [vmem:[#allocation228_spill] sm:$0xff] }
 0x4ef   :  { %20043 = vmatprep.subr.bf16.mxu1 %v28016_v22 }
 0x4f1   :  { %20001 = vmatpush3.bf16.msra.mxu0 %v28030_v52  ;;  %v28035_v52 = vld [vmem:[#allocation234_spill] sm:$0xff] }
 0x4f2   :  { %20003 = vmatprep.subr.bf16.mxu0 %v28031_v16  ;;  %20045 = vmatpush3.bf16.msra.mxu1 %v28018_v8  ;;  %v28036_v16 = vld [vmem:[#allocation235_spill] sm:$0xff] }
 0x4f3   :  { %20047 = vmatprep.subr.bf16.mxu1 %v28020_v54 }
 0x4f4   :  { %v16415_v36 = vpop.f32.mrb[54].mxu1 }
 0x4f5   :  { %20005 = vmatpush3.bf16.msra.mxu0 %v28032_v29  ;;  %v16416_v32 = vpop.f32.mrb[55].mxu1  ;;  %v28037_v29 = vld [vmem:[#allocation236_spill] sm:$0xff] }
 0x4f6   :  { %20007 = vmatprep.subr.bf16.mxu0 %v28033_v17  ;;  %v16417_v11 = vadd.f32 %v16416_v32, %v16415_v36  ;;  %20049 = vmatpush3.bf16.msra.mxu1 %v28022_v63  ;;  %v28038_v36 = vld [vmem:[#allocation180_spill] sm:$0xff] }
 0x4f7   :  { %20051 = vmatprep.subr.bf16.mxu1 %v28023_v62 }
 0x4f9   :  { %20009 = vmatpush3.bf16.msra.mxu0 %v28034_v9  ;;  %v28039_v9 = vld [vmem:[#allocation181_spill] sm:$0xff] }
 0x4fa   :  { %20011 = vmatprep.subr.bf16.mxu0 %v28035_v52  ;;  %20053 = vmatpush3.bf16.msra.mxu1 %v28024_v27 }
 0x4fb   :  { %20055 = vmatprep.subr.bf16.mxu1 %v28025_v51 }
 0x4fd   :  { %20013 = vmatpush3.bf16.msra.mxu0 %v28036_v16  ;;  %v28056_v16 = vld [vmem:[#allocation217_spill] sm:$0xff] }
 0x4fe   :  { %20015 = vmatprep.subr.bf16.mxu0 %v28037_v29  ;;  %20057 = vmatpush3.bf16.msra.mxu1 %v28026_v18  ;;  %v28040_v29 = vld [vmem:[#allocation237_spill] sm:$0xff] }
 0x4ff   :  { %v16380_v53 = vpop.f32.mrb[54].mxu0  ;;  %20091 = vmatprep.subr.bf16.mxu1 %v23676_v4 }
 0x500   :  { %v16381_v17 = vpop.f32.mrb[55].mxu0 }
 0x501   :  { %v16382_v32 = vadd.f32 %v16381_v17, %v16380_v53  ;;  %20017 = vmatpush3.bf16.msra.mxu0 %v28038_v36  ;;  %10382 = vmatmul.mubr.f32.vlgmr.msra.gmra.mrb[68].mxu1 %v9901_v37  ;;  %v28041_v17 = vld [vmem:[#allocation238_spill] sm:$0xff]  ;;  %v28042_v36 = vld [vmem:[#allocation240_spill] sm:$0xff]  ;;  %v28043_v37 = vld [vmem:[#allocation243_spill] sm:$0xff] }
 0x502   :  { %20019 = vmatprep.subr.bf16.mxu0 %v28039_v9  ;;  %20093 = vmatpush3.bf16.msra.mxu1 %v23700_v34  ;;  %v28055_v9 = vld [vmem:[#allocation9_spill] sm:$0xff] }
 0x503   :  { %v8182_v52 = vadd.f32 %v16382_v32, %v8070_v39  ;;  %14417 = vmatprep.mubr.msk.f32.mxu1 %vm7194_vm10, %v26812_v0  ;;  %20095 = vmatprep.subr.bf16.mxu1 %v23708_v21  ;;  %v28044_v39 = vld [vmem:[#allocation152_spill] sm:$0xff]  ;;  %v28048_v32 = vld [vmem:[#allocation261_spill] sm:$0xff] }
 0x505   :  { %20021 = vmatpush3.bf16.msra.mxu0 %v28040_v29  ;;  %v8414_v53 = vadd.f32 %v16417_v11, %v8182_v52  ;;  %v28045_v11 = vld [vmem:[#allocation55_spill] sm:$0xff]  ;;  %v28054_v29 = vld [vmem:[#allocation265_spill] sm:$0xff] }
 0x506   :  { %20023 = vmatprep.subr.bf16.mxu0 %v28041_v17  ;;  %20097 = vmatpush3.bf16.msra.mxu1 %v23717_v59  ;;  %v28046_v52 = vld [vmem:[#allocation259_spill] sm:$0xff] }
 0x507   :  { %20099 = vmatprep.subr.bf16.mxu1 %v23745_v42 }
 0x509   :  { %20025 = vmatpush3.bf16.msra.mxu0 %v28042_v36 }
 0x50a   :  { %20059 = vmatprep.subr.bf16.mxu0 %v28043_v37  ;;  %20101 = vmatpush3.bf16.msra.mxu1 %v23753_v60  ;;  %v28049_v37 = vld [vmem:[#allocation262_spill] sm:$0xff] }
 0x50b   :  { %20103 = vmatprep.subr.bf16.mxu1 %v23778_v46  ;;  %v28086_v46 = vld [vmem:[#allocation29_spill] sm:$0xff] }
 0x50c   :  { %10274 = vmatmul.mubr.f32.vlgmr.msra.gmra.mrb[68].mxu0 %v25162_v28  ;;  %v28047_v28 = vld [vmem:[#allocation260_spill] sm:$0xff] }
 0x50d   :  { %20061 = vmatpush3.bf16.msra.mxu0 %v28044_v39  ;;  %14415 = vmatprep.mubr.msk.f32.mxu0 %vm7194_vm10, %v26812_v0 }
 0x50e   :  { %20063 = vmatprep.subr.bf16.mxu0 %v28045_v11  ;;  %20105 = vmatpush3.bf16.msra.mxu1 %v28014_v5 }
 0x50f   :  { %20107 = vmatprep.subr.bf16.mxu1 %v28016_v22 }
 0x511   :  { %20065 = vmatpush3.bf16.msra.mxu0 %v28046_v52  ;;  %v28050_v52 = vld [vmem:[#allocation263_spill] sm:$0xff] }
 0x512   :  { %20067 = vmatprep.subr.bf16.mxu0 %v28047_v28  ;;  %20109 = vmatpush3.bf16.msra.mxu1 %v28018_v8  ;;  %v28051_v28 = vld [vmem:[#allocation206_spill] sm:$0xff] }
 0x513   :  { %20111 = vmatprep.subr.bf16.mxu1 %v28020_v54  ;;  %v28081_v54 = vld [vmem:[#allocation23_spill] sm:$0xff] }
 0x514   :  { %v16485_v39 = vpop.f32.mrb[56].mxu1 }
 0x515   :  { %20069 = vmatpush3.bf16.msra.mxu0 %v28048_v32  ;;  %v16486_v36 = vpop.f32.mrb[57].mxu1  ;;  %v14420_v32 = vsel %vm10664_vm12, 1.0, %v27490_v10 }
 0x516   :  { %20071 = vmatprep.subr.bf16.mxu0 %v28049_v37  ;;  %v16487_v17 = vadd.f32 %v16486_v36, %v16485_v39  ;;  %20113 = vmatpush3.bf16.msra.mxu1 %v28022_v63  ;;  %v28052_v37 = vld [vmem:[#allocation210_spill] sm:$0xff]  ;;  %v28053_v36 = vld [vmem:[#allocation264_spill] sm:$0xff]  ;;  %v25250_v39 = vsub.f32 %v14420_v32, %v14420_v32  ;;  %v28079_v63 = vld [vmem:[#allocation21_spill] sm:$0xff] }
 0x517   :  { %20115 = vmatprep.subr.bf16.mxu1 %v28023_v62  ;;  %v28057_v32 = vld [vmem:[#allocation10_spill] sm:$0xff] }
 0x518   :  { %v28077_v62 = vld [vmem:[#allocation18_spill] sm:$0xff] }
 0x519   :  { %20073 = vmatpush3.bf16.msra.mxu0 %v28050_v52 }
 0x51a   :  { %20075 = vmatprep.subr.bf16.mxu0 %v28051_v28  ;;  %20117 = vmatpush3.bf16.msra.mxu1 %v28024_v27  ;;  %v10785_v27 = vand.u32 4294901760, %v25250_v39 }
 0x51b   :  { %20119 = vmatprep.subr.bf16.mxu1 %v28025_v51 }
 0x51d   :  { %20077 = vmatpush3.bf16.msra.mxu0 %v28052_v37 }
 0x51e   :  { %20079 = vmatprep.subr.bf16.mxu0 %v28053_v36  ;;  %20121 = vmatpush3.bf16.msra.mxu1 %v28026_v18  ;;  %v28063_v36 = vld [vmem:[#allocation17_spill] sm:$0xff]  ;;  %v28074_v18 = vld [vmem:[#allocation16_spill] sm:$0xff] }
 0x51f   :  { %v16450_v52 = vpop.f32.mrb[56].mxu0  ;;  %20155 = vmatprep.subr.bf16.mxu1 %v28055_v9  ;;  %v28059_v9 = vld [vmem:[#allocation11_spill] sm:$0xff] }
 0x520   :  { %v16451_v11 = vpop.f32.mrb[57].mxu0 }
 0x521   :  { %v16452_v28 = vadd.f32 %v16451_v11, %v16450_v52  ;;  %20081 = vmatpush3.bf16.msra.mxu0 %v28054_v29  ;;  %14418 = vmatmul.mubr.msk.f32.vlgmr.msra.gmra.mrb[70].mxu1 %vm7193_vm11, %v26812_v0  ;;  %v28058_v11 = vld [vmem:[#allocation218_spill] sm:$0xff]  ;;  %v28062_v29 = vld [vmem:[#allocation224_spill] sm:$0xff] }
 0x522   :  { %20083 = vmatprep.subr.bf16.mxu0 %v28056_v16  ;;  %20157 = vmatpush3.bf16.msra.mxu1 %v28057_v32  ;;  %v28060_v16 = vld [vmem:[#allocation220_spill] sm:$0xff] }
 0x523   :  { %v8552_v37 = vadd.f32 %v16452_v28, %v8414_v53  ;;  %14427 = vmatprep.mubr.msk.f32.mxu1 %vm10664_vm12, %v26812_v0  ;;  %20159 = vmatprep.subr.bf16.mxu1 %v28059_v9  ;;  %v10786_v53 = vsub.f32 %v25250_v39, %v10785_v27  ;;  %v28061_v28 = vld [vmem:[#allocation14_spill] sm:$0xff]  ;;  %v28064_v9 = vld [vmem:[#allocation20_spill] sm:$0xff] }
 0x525   :  { %20085 = vmatpush3.bf16.msra.mxu0 %v28058_v11  ;;  %v8660_v52 = vadd.f32 %v16487_v17, %v8552_v37  ;;  %v10787_v32 = vand.u32 4294901760, %v10786_v53  ;;  %v28065_v17 = vld [vmem:[#allocation22_spill] sm:$0xff]  ;;  %v28066_v37 = vld [vmem:[#allocation7_spill] sm:$0xff]  ;;  %v28070_v53 = vld [vmem:[#allocation12_spill] sm:$0xff] }
 0x526   :  { %20087 = vmatprep.subr.bf16.mxu0 %v28060_v16  ;;  %20161 = vmatpush3.bf16.msra.mxu1 %v28061_v28  ;;  %v28067_v28 = vld [vmem:[#allocation24_spill] sm:$0xff] }
 0x527   :  { %20163 = vmatprep.subr.bf16.mxu1 %v28063_v36  ;;  %v28068_v36 = vld [vmem:[#allocation8_spill] sm:$0xff] }
 0x528   :  { %v28071_v16 = vld [vmem:[#allocation28_spill] sm:$0xff] }
 0x529   :  { %20089 = vmatpush3.bf16.msra.mxu0 %v28062_v29  ;;  %v28069_v29 = vld [vmem:[#allocation26_spill] sm:$0xff] }
 0x52a   :  { %20123 = vmatprep.subr.bf16.mxu0 %v27828_v26  ;;  %20165 = vmatpush3.bf16.msra.mxu1 %v28064_v9  ;;  %v28073_v9 = vld [vmem:[#allocation30_spill] sm:$0xff] }
 0x52b   :  { %20167 = vmatprep.subr.bf16.mxu1 %v28065_v17 }
 0x52c   :  { %14416 = vmatmul.mubr.msk.f32.vlgmr.msra.gmra.mrb[70].mxu0 %vm7193_vm11, %v26812_v0 }
 0x52d   :  { %20125 = vmatpush3.bf16.msra.mxu0 %v27830_v61  ;;  %10788 = vmatprep.mubr.f32.mxu0 %v10787_v32  ;;  %v28075_v32 = vld [vmem:[#allocation32_spill] sm:$0xff] }
 0x52e   :  { %20127 = vmatprep.subr.bf16.mxu0 %v28066_v37  ;;  %20169 = vmatpush3.bf16.msra.mxu1 %v28067_v28  ;;  %v28076_v28 = vld [vmem:[#allocation78_spill] sm:$0xff] }
 0x52f   :  { %20171 = vmatprep.subr.bf16.mxu1 %v28069_v29  ;;  %vm10663_vm13 = vcmp.eq.f32.partialorder %v24982_v33, %v28076_v28  ;;  %v28078_v29 = vld [vmem:[#allocation34_spill] sm:$0xff]  ;;  %v28132_v28 = vld [vmem:[#allocation124_spill] sm:$0xff] }
 0x531   :  { %20129 = vmatpush3.bf16.msra.mxu0 %v28068_v36 }
 0x532   :  { %20131 = vmatprep.subr.bf16.mxu0 %v28070_v53  ;;  %20173 = vmatpush3.bf16.msra.mxu1 %v28071_v16  ;;  %v14419_v16 = vsel %vm10663_vm13, 1.0, %v27490_v10 }
 0x533   :  { %20175 = vmatprep.subr.bf16.mxu1 %v28073_v9  ;;  %v28080_v9 = vld [vmem:[#allocation36_spill] sm:$0xff] }
 0x534   :  { %v16555_v11 = vpop.f32.mrb[58].mxu1 }
 0x535   :  { %20133 = vmatpush3.bf16.msra.mxu0 %v28072_v24  ;;  %v16556_v17 = vpop.f32.mrb[59].mxu1 }
 0x536   :  { %20135 = vmatprep.subr.bf16.mxu0 %v28074_v18  ;;  %v16557_v51 = vadd.f32 %v16556_v17, %v16555_v11  ;;  %20177 = vmatpush3.bf16.msra.mxu1 %v28075_v32  ;;  %v28082_v11 = vld [vmem:[#allocation40_spill] sm:$0xff]  ;;  %v28083_v17 = vld [vmem:[#allocation25_spill] sm:$0xff]  ;;  %v25304_v32 = vsub.f32 %v14419_v16, %v14419_v16  ;;  %v28087_v16 = vld [vmem:[#allocation31_spill] sm:$0xff] }
 0x537   :  { %20179 = vmatprep.subr.bf16.mxu1 %v28078_v29  ;;  %v28084_v29 = vld [vmem:[#allocation49_spill] sm:$0xff] }
 0x539   :  { %20137 = vmatpush3.bf16.msra.mxu0 %v28077_v62 }
 0x53a   :  { %20139 = vmatprep.subr.bf16.mxu0 %v28079_v63  ;;  %20181 = vmatpush3.bf16.msra.mxu1 %v28080_v9  ;;  %v10791_v9 = vand.u32 4294901760, %v25304_v32 }
 0x53b   :  { %20183 = vmatprep.subr.bf16.mxu1 %v28082_v11 }
 0x53c   :  { %v10792_v11 = vsub.f32 %v25304_v32, %v10791_v9 }
 0x53d   :  { %20141 = vmatpush3.bf16.msra.mxu0 %v28081_v54 }
 0x53e   :  { %20143 = vmatprep.subr.bf16.mxu0 %v28083_v17  ;;  %20185 = vmatpush3.bf16.msra.mxu1 %v28084_v29  ;;  %v28090_v29 = vld [vmem:[#allocation37_spill] sm:$0xff] }
 0x53f   :  { %v16520_v8 = vpop.f32.mrb[58].mxu0  ;;  %20219 = vmatprep.subr.bf16.mxu1 %v27828_v26 }
 0x540   :  { %v16521_v22 = vpop.f32.mrb[59].mxu0 }
 0x541   :  { %v16522_v5 = vadd.f32 %v16521_v22, %v16520_v8  ;;  %20145 = vmatpush3.bf16.msra.mxu0 %v28085_v38  ;;  %14428 = vmatmul.mubr.msk.f32.vlgmr.msra.gmra.mrb[72].mxu1 %vm10663_vm13, %v26812_v0  ;;  %v28088_v22 = vld [vmem:[#allocation33_spill] sm:$0xff] }
 0x542   :  { %20147 = vmatprep.subr.bf16.mxu0 %v28086_v46  ;;  %20221 = vmatpush3.bf16.msra.mxu1 %v27830_v61 }
 0x543   :  { %v8828_v60 = vadd.f32 %v16522_v5, %v8660_v52  ;;  %11268 = vmatprep.mubr.f32.mxu1 %v10785_v27  ;;  %20223 = vmatprep.subr.bf16.mxu1 %v28066_v37  ;;  %v28089_v5 = vld [vmem:[#allocation35_spill] sm:$0xff]  ;;  %v10793_v52 = vand.u32 4294901760, %v10792_v11  ;;  %v28091_v27 = vld [vmem:[#allocation38_spill] sm:$0xff] }
 0x544   :  { %v28094_v11 = vld [vmem:[#allocation42_spill] sm:$0xff] }
 0x545   :  { %20149 = vmatpush3.bf16.msra.mxu0 %v28087_v16  ;;  %v8932_v8 = vadd.f32 %v16557_v51, %v8828_v60  ;;  %v28092_v60 = vld [vmem:[#allocation39_spill] sm:$0xff]  ;;  %v28093_v51 = vld [vmem:[#allocation41_spill] sm:$0xff] }
 0x546   :  { %20151 = vmatprep.subr.bf16.mxu0 %v28088_v22  ;;  %20225 = vmatpush3.bf16.msra.mxu1 %v28068_v36 }
 0x547   :  { %20227 = vmatprep.subr.bf16.mxu1 %v28070_v53 }
 0x549   :  { %20153 = vmatpush3.bf16.msra.mxu0 %v28089_v5 }
 0x54a   :  { %20187 = vmatprep.subr.bf16.mxu0 %v28090_v29  ;;  %20229 = vmatpush3.bf16.msra.mxu1 %v28072_v24 }
 0x54b   :  { %20231 = vmatprep.subr.bf16.mxu1 %v28074_v18 }
 0x54c   :  { %10794 = vmatmul.mubr.f32.vlgmr.msra.gmra.mrb[72].mxu0 %v10793_v52  ;;  %v28095_v52 = vld [vmem:[#allocation43_spill] sm:$0xff] }
 0x54d   :  { %20189 = vmatpush3.bf16.msra.mxu0 %v28091_v27  ;;  %11161 = vmatprep.mubr.f32.mxu0 %v25250_v39  ;;  %v28096_v39 = vld [vmem:[#allocation44_spill] sm:$0xff] }
 0x54e   :  { %20191 = vmatprep.subr.bf16.mxu0 %v28092_v60  ;;  %20233 = vmatpush3.bf16.msra.mxu1 %v28077_v62  ;;  %v28097_v60 = vld [vmem:[#allocation45_spill] sm:$0xff] }
 0x54f   :  { %20235 = vmatprep.subr.bf16.mxu1 %v28079_v63 }
 0x551   :  { %20193 = vmatpush3.bf16.msra.mxu0 %v28093_v51  ;;  %v28098_v51 = vld [vmem:[#allocation46_spill] sm:$0xff] }
 0x552   :  { %20195 = vmatprep.subr.bf16.mxu0 %v28094_v11  ;;  %20237 = vmatpush3.bf16.msra.mxu1 %v28081_v54  ;;  %v28099_v11 = vld [vmem:[#allocation47_spill] sm:$0xff] }
 0x553   :  { %20239 = vmatprep.subr.bf16.mxu1 %v28083_v17 }
 0x554   :  { %v16625_v29 = vpop.f32.mrb[60].mxu1 }
 0x555   :  { %20197 = vmatpush3.bf16.msra.mxu0 %v28095_v52  ;;  %v16626_v27 = vpop.f32.mrb[61].mxu1  ;;  %v28100_v52 = vld [vmem:[#allocation48_spill] sm:$0xff] }
 0x556   :  { %20199 = vmatprep.subr.bf16.mxu0 %v28096_v39  ;;  %v16627_v42 = vadd.f32 %v16626_v27, %v16625_v29  ;;  %20241 = vmatpush3.bf16.msra.mxu1 %v28085_v38  ;;  %v28101_v27 = vld [vmem:[#allocation50_spill] sm:$0xff] }
 0x557   :  { %20243 = vmatprep.subr.bf16.mxu1 %v28086_v46 }
 0x559   :  { %20201 = vmatpush3.bf16.msra.mxu0 %v28097_v60  ;;  %v28102_v60 = vld [vmem:[#allocation57_spill] sm:$0xff] }
 0x55a   :  { %20203 = vmatprep.subr.bf16.mxu0 %v28098_v51  ;;  %20245 = vmatpush3.bf16.msra.mxu1 %v28087_v16 }
 0x55b   :  { %20247 = vmatprep.subr.bf16.mxu1 %v28088_v22 }
 0x55d   :  { %20205 = vmatpush3.bf16.msra.mxu0 %v28099_v11  ;;  %v28103_v11 = vld [vmem:[#allocation58_spill] sm:$0xff] }
 0x55e   :  { %20207 = vmatprep.subr.bf16.mxu0 %v28100_v52  ;;  %20249 = vmatpush3.bf16.msra.mxu1 %v28089_v5  ;;  %v28104_v52 = vld [vmem:[#allocation59_spill] sm:$0xff] }
 0x55f   :  { %v16590_v59 = vpop.f32.mrb[60].mxu0  ;;  %20283 = vmatprep.subr.bf16.mxu1 %v27828_v26  ;;  %v28105_v26 = vld [vmem:[#allocation60_spill] sm:$0xff] }
 0x560   :  { %v16591_v39 = vpop.f32.mrb[61].mxu0 }
 0x561   :  { %v16592_v29 = vadd.f32 %v16591_v39, %v16590_v59  ;;  %20209 = vmatpush3.bf16.msra.mxu0 %v28101_v27  ;;  %11272 = vmatmul.mubr.f32.vlgmr.msra.gmra.mrb[74].mxu1 %v10791_v9  ;;  %v28106_v9 = vld [vmem:[#allocation61_spill] sm:$0xff] }
 0x562   :  { %20211 = vmatprep.subr.bf16.mxu0 %v28102_v60  ;;  %20285 = vmatpush3.bf16.msra.mxu1 %v27830_v61  ;;  %v28107_v61 = vld [vmem:[#allocation62_spill] sm:$0xff]  ;;  %v28118_v60 = vld [vmem:[#allocation96_spill] sm:$0xff] }
 0x563   :  { %v9044_v51 = vadd.f32 %v16592_v29, %v8932_v8  ;;  %14431 = vmatprep.mubr.msk.f32.mxu1 %vm10664_vm12, %v26812_v0  ;;  %20287 = vmatprep.subr.bf16.mxu1 %v28066_v37  ;;  %v28109_v37 = vld [vmem:[#allocation64_spill] sm:$0xff]  ;;  %v14178_v29 = vpop.permute.xlu1 %14177 }
 0x565   :  { %20213 = vmatpush3.bf16.msra.mxu0 %v28103_v11  ;;  %v9276_v59 = vadd.f32 %v16627_v42, %v9044_v51  ;;  %v28108_v42 = vld [vmem:[#allocation63_spill] sm:$0xff]  ;;  %v25400_v51 = vld [vmem:[%s25888_s3] ss:$0 sm:$0xff]  ;;  %v28119_v11 = vld [vmem:[#allocation73_spill] sm:$0xff]  ;;  %s20961_s3 = smov 96  }
 0x566   :  { %20215 = vmatprep.subr.bf16.mxu0 %v28104_v52  ;;  %20289 = vmatpush3.bf16.msra.mxu1 %v28068_v36  ;;  %v28110_v36 = vld [vmem:[#allocation65_spill] sm:$0xff] }
 0x567   :  { %20291 = vmatprep.subr.bf16.mxu1 %v28070_v53  ;;  %v28111_v53 = vld [vmem:[#allocation66_spill] sm:$0xff] }
 0x569   :  { %20217 = vmatpush3.bf16.msra.mxu0 %v28105_v26  ;;  %v28120_v26 = vld [vmem:[#allocation97_spill] sm:$0xff] }
 0x56a   :  { %20251 = vmatprep.subr.bf16.mxu0 %v28106_v9  ;;  %20293 = vmatpush3.bf16.msra.mxu1 %v28072_v24  ;;  %v28112_v24 = vld [vmem:[#allocation67_spill] sm:$0xff]  ;;  %v28121_v9 = vld [vmem:[#allocation74_spill] sm:$0xff] }
 0x56b   :  { %20295 = vmatprep.subr.bf16.mxu1 %v28074_v18 }
 0x56c   :  { %11164 = vmatmul.mubr.f32.vlgmr.msra.gmra.mrb[74].mxu0 %v25304_v32 }
 0x56d   :  { %20253 = vmatpush3.bf16.msra.mxu0 %v28107_v61  ;;  %14429 = vmatprep.mubr.msk.f32.mxu0 %vm10664_vm12, %v26812_v0  ;;  %v28122_v61 = vld [vmem:[#allocation104_spill] sm:$0xff] }
 0x56e   :  { %20255 = vmatprep.subr.bf16.mxu0 %v28108_v42  ;;  %20297 = vmatpush3.bf16.msra.mxu1 %v28077_v62  ;;  %v28113_v62 = vld [vmem:[#allocation68_spill] sm:$0xff] }
 0x56f   :  { %20299 = vmatprep.subr.bf16.mxu1 %v28079_v63  ;;  %v28114_v63 = vld [vmem:[#allocation69_spill] sm:$0xff] }
 0x571   :  { %20257 = vmatpush3.bf16.msra.mxu0 %v28109_v37 }
 0x572   :  { %20259 = vmatprep.subr.bf16.mxu0 %v28110_v36  ;;  %20301 = vmatpush3.bf16.msra.mxu1 %v28081_v54  ;;  %v14422_v54 = vsel %vm10666_vm14, 1.0, %v27490_v10  ;;  %v28124_v36 = vld [vmem:[#allocation108_spill] sm:$0xff] }
 0x573   :  { %20303 = vmatprep.subr.bf16.mxu1 %v28083_v17  ;;  %v28115_v17 = vld [vmem:[#allocation70_spill] sm:$0xff] }
 0x574   :  { %v16695_v15 = vpop.f32.mrb[62].mxu1 }
 0x575   :  { %20261 = vmatpush3.bf16.msra.mxu0 %v28111_v53  ;;  %v16696_v18 = vpop.f32.mrb[63].mxu1  ;;  %v28125_v53 = vld [vmem:[#allocation76_spill] sm:$0xff] }
 0x576   :  { %20263 = vmatprep.subr.bf16.mxu0 %v28112_v24  ;;  %v16697_v32 = vadd.f32 %v16696_v18, %v16695_v15  ;;  %20305 = vmatpush3.bf16.msra.mxu1 %v28085_v38  ;;  %v28116_v38 = vld [vmem:[#allocation71_spill] sm:$0xff]  ;;  %v28127_v18 = vld [vmem:[#allocation116_spill] sm:$0xff] }
 0x577   :  { %20307 = vmatprep.subr.bf16.mxu1 %v28086_v46  ;;  %v25392_v46 = vsub.f32 %v14422_v54, %v14422_v54  ;;  %v28126_v15 = vld [vmem:[#allocation111_spill] sm:$0xff] }
 0x578   :  { %v28131_v54 = vld [vmem:[#allocation123_spill] sm:$0xff] }
 0x579   :  { %20265 = vmatpush3.bf16.msra.mxu0 %v28113_v62  ;;  %v28129_v62 = vld [vmem:[#allocation119_spill] sm:$0xff] }
 0x57a   :  { %20267 = vmatprep.subr.bf16.mxu0 %v28114_v63  ;;  %20309 = vmatpush3.bf16.msra.mxu1 %v28087_v16  ;;  %v28117_v16 = vld [vmem:[#allocation72_spill] sm:$0xff] }
 0x57b   :  { %20311 = vmatprep.subr.bf16.mxu1 %v28088_v22  ;;  %v14180_v22 = vmul.f32 %v25400_v51, %v14178_v29  ;;  %v28130_v63 = vld [vmem:[#allocation120_spill] sm:$0xff] }
 0x57c   :  { %v28134_v29 = vld [vmem:[#allocation128_spill] sm:$0xff] }
 0x57d   :  { %20269 = vmatpush3.bf16.msra.mxu0 %v28115_v17  ;;  %14190 = vrot.lane.b32.xlu0 %v14180_v22, %s20961_s3 }
 0x57e   :  { %20271 = vmatprep.subr.bf16.mxu0 %v28116_v38  ;;  %20313 = vmatpush3.bf16.msra.mxu1 %v28089_v5  ;;  %v11647_v5 = vand.u32 4294901760, %v25392_v46 }
 0x57f   :  { %v16660_v8 = vpop.f32.mrb[62].mxu0  ;;  %20347 = vmatprep.subr.bf16.mxu1 %v28118_v60  ;;  %v28136_v60 = vld [vmem:[#allocation132_spill] sm:$0xff] }
 0x580   :  { %v16661_v39 = vpop.f32.mrb[63].mxu0  ;;  %v11648_v37 = vsub.f32 %v25392_v46, %v11647_v5 }
 0x581   :  { %v16662_v27 = vadd.f32 %v16661_v39, %v16660_v8  ;;  %20273 = vmatpush3.bf16.msra.mxu0 %v28117_v16  ;;  %14432 = vmatmul.mubr.msk.f32.vlgmr.msra.gmra.mrb[76].mxu1 %vm10663_vm13, %v26812_v0  ;;  %v28133_v39 = vld [vmem:[#allocation126_spill] sm:$0xff] }
 0x582   :  { %20275 = vmatprep.subr.bf16.mxu0 %v28119_v11  ;;  %20349 = vmatpush3.bf16.msra.mxu1 %v28120_v26  ;;  %v11649_v24 = vand.u32 4294901760, %v11648_v37  ;;  %v28135_v16 = vld [vmem:[#allocation130_spill] sm:$0xff]  ;;  %v28138_v37 = vld [vmem:[#allocation137_spill] sm:$0xff] }
 0x583   :  { %v9414_v52 = vadd.f32 %v16662_v27, %v9276_v59  ;;  %14433 = vmatprep.mubr.msk.f32.mxu1 %vm10666_vm14, %v26812_v0  ;;  %20351 = vmatprep.subr.bf16.mxu1 %v28122_v61  ;;  %v28123_v59 = vld [vmem:[#allocation75_spill] sm:$0xff]  ;;  %v14421_v27 = vsel %vm10665_vm15, 1.0, %v27490_v10  ;;  %v28137_v26 = vld [vmem:[#allocation134_spill] sm:$0xff] }
 0x584   :  { %v25453_v22 = vsub.f32 %v14421_v27, %v14421_v27 }
 0x585   :  { %20277 = vmatpush3.bf16.msra.mxu0 %v28121_v9  ;;  %v9522_v42 = vadd.f32 %v16697_v32, %v9414_v52  ;;  %v28128_v32 = vld [vmem:[#allocation118_spill] sm:$0xff] }
 0x586   :  { %20279 = vmatprep.subr.bf16.mxu0 %v28123_v59  ;;  %20353 = vmatpush3.bf16.msra.mxu1 %v28124_v36  ;;  %v11653_v61 = vand.u32 4294901760, %v25453_v22 }
 0x587   :  { %20355 = vmatprep.subr.bf16.mxu1 %v28126_v15 }
 0x589   :  { %20281 = vmatpush3.bf16.msra.mxu0 %v28125_v53  ;;  %v11654_v53 = vsub.f32 %v25453_v22, %v11653_v61 }
 0x58a   :  { %20315 = vmatprep.subr.bf16.mxu0 %v27656_v7  ;;  %20357 = vmatpush3.bf16.msra.mxu1 %v28127_v18  ;;  %v28142_v18 = vld [vmem:[#allocation83_spill] sm:$0xff] }
 0x58b   :  { %20359 = vmatprep.subr.bf16.mxu1 %v28128_v32  ;;  %v11655_v15 = vand.u32 4294901760, %v11654_v53  ;;  %v28143_v32 = vld [vmem:[#allocation84_spill] sm:$0xff]  ;;  %v28154_v53 = vld [vmem:[#allocation113_spill] sm:$0xff] }
 0x58c   :  { %14430 = vmatmul.mubr.msk.f32.vlgmr.msra.gmra.mrb[76].mxu0 %vm10663_vm13, %v26812_v0 }
 0x58d   :  { %20317 = vmatpush3.bf16.msra.mxu0 %v27896_v23  ;;  %11650 = vmatprep.mubr.f32.mxu0 %v11649_v24  ;;  %v28140_v24 = vld [vmem:[#allocation81_spill] sm:$0xff] }
 0x58e   :  { %20319 = vmatprep.subr.bf16.mxu0 %v27898_v14  ;;  %20361 = vmatpush3.bf16.msra.mxu1 %v28129_v62  ;;  %v28144_v62 = vld [vmem:[#allocation85_spill] sm:$0xff] }
 0x58f   :  { %20363 = vmatprep.subr.bf16.mxu1 %v28130_v63  ;;  %v28145_v63 = vld [vmem:[#allocation86_spill] sm:$0xff] }
 0x591   :  { %20321 = vmatpush3.bf16.msra.mxu0 %v27900_v13 }
 0x592   :  { %20323 = vmatprep.subr.bf16.mxu0 %v27902_v25  ;;  %20365 = vmatpush3.bf16.msra.mxu1 %v28131_v54 }
 0x593   :  { %20367 = vmatprep.subr.bf16.mxu1 %v28132_v28 }
 0x594   :  { %v16765_v17 = vpop.f32.mrb[64].mxu1 }
 0x595   :  { %20325 = vmatpush3.bf16.msra.mxu0 %v27904_v2  ;;  %v16766_v38 = vpop.f32.mrb[65].mxu1 }
 0x596   :  { %20327 = vmatprep.subr.bf16.mxu0 %v27906_v45  ;;  %v16767_v8 = vadd.f32 %v16766_v38, %v16765_v17  ;;  %20369 = vmatpush3.bf16.msra.mxu1 %v28133_v39  ;;  %v28147_v38 = vld [vmem:[#allocation89_spill] sm:$0xff]  ;;  %v28149_v39 = vld [vmem:[#allocation94_spill] sm:$0xff] }
 0x597   :  { %20371 = vmatprep.subr.bf16.mxu1 %v28134_v29  ;;  %v28150_v29 = vld [vmem:[#allocation100_spill] sm:$0xff] }
 0x599   :  { %20329 = vmatpush3.bf16.msra.mxu0 %v27909_v43 }
 0x59a   :  { %20331 = vmatprep.subr.bf16.mxu0 %v27911_v58  ;;  %20373 = vmatpush3.bf16.msra.mxu1 %v28135_v16 }
 0x59b   :  { %20375 = vmatprep.subr.bf16.mxu1 %v28136_v60 }
 0x59d   :  { %20333 = vmatpush3.bf16.msra.mxu0 %v27913_v19 }
 0x59e   :  { %20335 = vmatprep.subr.bf16.mxu0 %v27915_v50  ;;  %20377 = vmatpush3.bf16.msra.mxu1 %v28137_v26 }
 0x59f   :  { %v16730_v11 = vpop.f32.mrb[64].mxu0  ;;  %20411 = vmatprep.subr.bf16.mxu1 %v27656_v7 }
 0x5a0   :  { %v16731_v52 = vpop.f32.mrb[65].mxu0 }
 0x5a1   :  { %v16732_v9 = vadd.f32 %v16731_v52, %v16730_v11  ;;  %20337 = vmatpush3.bf16.msra.mxu0 %v27917_v30  ;;  %14434 = vmatmul.mubr.msk.f32.vlgmr.msra.gmra.mrb[78].mxu1 %vm10665_vm15, %v26812_v0  ;;  %v28151_v11 = vld [vmem:[#allocation106_spill] sm:$0xff]  ;;  %v28152_v52 = vld [vmem:[#allocation107_spill] sm:$0xff] }
 0x5a2   :  { %20339 = vmatprep.subr.bf16.mxu0 %v27918_v44  ;;  %20413 = vmatpush3.bf16.msra.mxu1 %v27896_v23 }
 0x5a3   :  { %v9690_v59 = vadd.f32 %v16732_v9, %v9522_v42  ;;  %12130 = vmatprep.mubr.f32.mxu1 %v11647_v5  ;;  %20415 = vmatprep.subr.bf16.mxu1 %v27898_v14  ;;  %v28139_v42 = vld [vmem:[#allocation80_spill] sm:$0xff]  ;;  %v28141_v5 = vld [vmem:[#allocation82_spill] sm:$0xff] }
 0x5a4   :  { %v28153_v9 = vld [vmem:[#allocation110_spill] sm:$0xff] }
 0x5a5   :  { %20341 = vmatpush3.bf16.msra.mxu0 %v28138_v37  ;;  %v9794_v36 = vadd.f32 %v16767_v8, %v9690_v59  ;;  %v28148_v8 = vld [vmem:[#allocation91_spill] sm:$0xff] }
 0x5a6   :  { %20343 = vmatprep.subr.bf16.mxu0 %v27920_v47  ;;  %20417 = vmatpush3.bf16.msra.mxu1 %v27900_v13 }
 0x5a7   :  { %20419 = vmatprep.subr.bf16.mxu1 %v27902_v25 }
 0x5a9   :  { %20345 = vmatpush3.bf16.msra.mxu0 %v28139_v42 }
 0x5aa   :  { %20379 = vmatprep.subr.bf16.mxu0 %v28140_v24  ;;  %20421 = vmatpush3.bf16.msra.mxu1 %v27904_v2 }
 0x5ab   :  { %20423 = vmatprep.subr.bf16.mxu1 %v27906_v45 }
 0x5ac   :  { %11656 = vmatmul.mubr.f32.vlgmr.msra.gmra.mrb[78].mxu0 %v11655_v15 }
 0x5ad   :  { %20381 = vmatpush3.bf16.msra.mxu0 %v28141_v5  ;;  %12023 = vmatprep.mubr.f32.mxu0 %v25392_v46  ;;  %v28146_v46 = vld [vmem:[#allocation88_spill] sm:$0xff] }
 0x5ae   :  { %20383 = vmatprep.subr.bf16.mxu0 %v28142_v18  ;;  %20425 = vmatpush3.bf16.msra.mxu1 %v27909_v43  ;;  %v28167_v18 = vld [vmem:[#allocation163_spill] sm:$0xff] }
 0x5af   :  { %20427 = vmatprep.subr.bf16.mxu1 %v27911_v58 }
 0x5b1   :  { %20385 = vmatpush3.bf16.msra.mxu0 %v28143_v32  ;;  %v28169_v32 = vld [vmem:[#allocation114_spill] sm:$0xff] }
 0x5b2   :  { %20387 = vmatprep.subr.bf16.mxu0 %v28144_v62  ;;  %20429 = vmatpush3.bf16.msra.mxu1 %v27913_v19 }
 0x5b3   :  { %20431 = vmatprep.subr.bf16.mxu1 %v27915_v50 }
 0x5b4   :  { %v16835_v54 = vpop.f32.mrb[66].mxu1 }
 0x5b5   :  { %20389 = vmatpush3.bf16.msra.mxu0 %v28145_v63  ;;  %v16836_v28 = vpop.f32.mrb[67].mxu1  ;;  %v28170_v63 = vld [vmem:[#allocation167_spill] sm:$0xff] }
 0x5b6   :  { %20391 = vmatprep.subr.bf16.mxu0 %v28146_v46  ;;  %v16837_v17 = vadd.f32 %v16836_v28, %v16835_v54  ;;  %20433 = vmatpush3.bf16.msra.mxu1 %v27917_v30  ;;  %v28172_v54 = vld [vmem:[#allocation172_spill] sm:$0xff]  ;;  %v28173_v28 = vld [vmem:[#allocation87_spill] sm:$0xff] }
 0x5b7   :  { %20435 = vmatprep.subr.bf16.mxu1 %v27918_v44 }
 0x5b9   :  { %20393 = vmatpush3.bf16.msra.mxu0 %v28147_v38  ;;  %v28174_v38 = vld [vmem:[#allocation175_spill] sm:$0xff] }
 0x5ba   :  { %20395 = vmatprep.subr.bf16.mxu0 %v28148_v8  ;;  %20437 = vmatpush3.bf16.msra.mxu1 %v28138_v37  ;;  %v28175_v8 = vld [vmem:[#allocation90_spill] sm:$0xff] }
 0x5bb   :  { %20439 = vmatprep.subr.bf16.mxu1 %v27920_v47 }
 0x5bd   :  { %20397 = vmatpush3.bf16.msra.mxu0 %v28149_v39  ;;  %v28176_v39 = vld [vmem:[#allocation177_spill] sm:$0xff] }
 0x5be   :  { %20399 = vmatprep.subr.bf16.mxu0 %v28150_v29  ;;  %20441 = vmatpush3.bf16.msra.mxu1 %v28139_v42 }
 0x5bf   :  { %v16800_v27 = vpop.f32.mrb[66].mxu0  ;;  %20475 = vmatprep.subr.bf16.mxu1 %v27656_v7  ;;  %v28155_v7 = vld [vmem:[#allocation140_spill] sm:$0xff] }
 0x5c0   :  { %v16801_v16 = vpop.f32.mrb[67].mxu0 }
 0x5c1   :  { %v16802_v60 = vadd.f32 %v16801_v16, %v16800_v27  ;;  %20401 = vmatpush3.bf16.msra.mxu0 %v28151_v11  ;;  %12134 = vmatmul.mubr.f32.vlgmr.msra.gmra.mrb[80].mxu1 %v11653_v61  ;;  %v28156_v61 = vld [vmem:[#allocation141_spill] sm:$0xff]  ;;  %v28177_v27 = vld [vmem:[#allocation183_spill] sm:$0xff]  ;;  %v28180_v11 = vld [vmem:[#allocation188_spill] sm:$0xff] }
 0x5c2   :  { %20403 = vmatprep.subr.bf16.mxu0 %v28152_v52  ;;  %20477 = vmatpush3.bf16.msra.mxu1 %v27896_v23  ;;  %v28157_v23 = vld [vmem:[#allocation147_spill] sm:$0xff]  ;;  %v28178_v16 = vld [vmem:[#allocation185_spill] sm:$0xff] }
 0x5c3   :  { %v9906_v26 = vadd.f32 %v16802_v60, %v9794_v36  ;;  %14437 = vmatprep.mubr.msk.f32.mxu1 %vm10666_vm14, %v26812_v0  ;;  %20479 = vmatprep.subr.bf16.mxu1 %v27898_v14  ;;  %v28159_v14 = vld [vmem:[#allocation153_spill] sm:$0xff]  ;;  %v28179_v60 = vld [vmem:[#allocation187_spill] sm:$0xff] }
 0x5c4   :  { %v28181_v52 = vld [vmem:[#allocation191_spill] sm:$0xff] }
 0x5c5   :  { %20405 = vmatpush3.bf16.msra.mxu0 %v28153_v9  ;;  %v10138_v59 = vadd.f32 %v16837_v17, %v9906_v26 }
 0x5c6   :  { %20407 = vmatprep.subr.bf16.mxu0 %v28154_v53  ;;  %20481 = vmatpush3.bf16.msra.mxu1 %v27900_v13  ;;  %v28158_v13 = vld [vmem:[#allocation148_spill] sm:$0xff]  ;;  %v28183_v53 = vld [vmem:[#allocation193_spill] sm:$0xff] }
 0x5c7   :  { %20483 = vmatprep.subr.bf16.mxu1 %v27902_v25  ;;  %v28160_v25 = vld [vmem:[#allocation154_spill] sm:$0xff] }
 0x5c9   :  { %20409 = vmatpush3.bf16.msra.mxu0 %v28155_v7  ;;  %v28184_v7 = vld [vmem:[#allocation195_spill] sm:$0xff] }
 0x5ca   :  { %20443 = vmatprep.subr.bf16.mxu0 %v28156_v61  ;;  %20485 = vmatpush3.bf16.msra.mxu1 %v27904_v2  ;;  %v28161_v2 = vld [vmem:[#allocation156_spill] sm:$0xff]  ;;  %v14423_v61 = vsel %vm10667_vm1, 1.0, %v27490_v10 }
 0x5cb   :  { %20487 = vmatprep.subr.bf16.mxu1 %v27906_v45 }
 0x5cc   :  { %12026 = vmatmul.mubr.f32.vlgmr.msra.gmra.mrb[80].mxu0 %v25453_v22  ;;  %v28162_v22 = vld [vmem:[#allocation157_spill] sm:$0xff] }
 0x5cd   :  { %20445 = vmatpush3.bf16.msra.mxu0 %v28157_v23  ;;  %14435 = vmatprep.mubr.msk.f32.mxu0 %vm10666_vm14, %v26812_v0  ;;  %v28185_v23 = vld [vmem:[#allocation197_spill] sm:$0xff] }
 0x5ce   :  { %20447 = vmatprep.subr.bf16.mxu0 %v28158_v13  ;;  %20489 = vmatpush3.bf16.msra.mxu1 %v27909_v43  ;;  %v28163_v43 = vld [vmem:[#allocation159_spill] sm:$0xff]  ;;  %v28186_v13 = vld [vmem:[#allocation198_spill] sm:$0xff] }
 0x5cf   :  { %20491 = vmatprep.subr.bf16.mxu1 %v27911_v58  ;;  %v28164_v58 = vld [vmem:[#allocation160_spill] sm:$0xff] }
 0x5d1   :  { %20449 = vmatpush3.bf16.msra.mxu0 %v28159_v14  ;;  %v28187_v14 = vld [vmem:[#allocation199_spill] sm:$0xff] }
 0x5d2   :  { %20451 = vmatprep.subr.bf16.mxu0 %v28160_v25  ;;  %20493 = vmatpush3.bf16.msra.mxu1 %v27913_v19  ;;  %v14424_v19 = vsel %vm10668_vm0, 1.0, %v27490_v10  ;;  %v28188_v25 = vld [vmem:[#allocation200_spill] sm:$0xff] }
 0x5d3   :  { %20495 = vmatprep.subr.bf16.mxu1 %v27915_v50  ;;  %v28165_v50 = vld [vmem:[#allocation161_spill] sm:$0xff] }
 0x5d4   :  { %v16905_v48 = vpop.f32.mrb[68].mxu1 }
 0x5d5   :  { %20453 = vmatpush3.bf16.msra.mxu0 %v28161_v2  ;;  %v16906_v45 = vpop.f32.mrb[69].mxu1  ;;  %v25595_v2 = vsub.f32 %v14423_v61, %v14423_v61  ;;  %v14426_v61 = vsel %vm10670_vm2, 1.0, %v27490_v10 }
 0x5d6   :  { %20455 = vmatprep.subr.bf16.mxu0 %v28162_v22  ;;  %v16907_v36 = vadd.f32 %v16906_v45, %v16905_v48  ;;  %20497 = vmatpush3.bf16.msra.mxu1 %v27917_v30  ;;  %v28166_v30 = vld [vmem:[#allocation162_spill] sm:$0xff]  ;;  %v28189_v45 = vld [vmem:[#allocation201_spill] sm:$0xff] }
 0x5d7   :  { %20499 = vmatprep.subr.bf16.mxu1 %v27918_v44  ;;  %v25541_v44 = vsub.f32 %v14424_v19, %v14424_v19  ;;  %v12515_v19 = vand.u32 4294901760, %v25595_v2 }
 0x5d9   :  { %20457 = vmatpush3.bf16.msra.mxu0 %v28163_v43  ;;  %v28190_v43 = vld [vmem:[#allocation202_spill] sm:$0xff] }
 0x5da   :  { %20459 = vmatprep.subr.bf16.mxu0 %v28164_v58  ;;  %20501 = vmatpush3.bf16.msra.mxu1 %v28138_v37  ;;  %v28168_v37 = vld [vmem:[#allocation164_spill] sm:$0xff]  ;;  %v28191_v58 = vld [vmem:[#allocation203_spill] sm:$0xff] }
 0x5db   :  { %20503 = vmatprep.subr.bf16.mxu1 %v27920_v47  ;;  %v12509_v47 = vand.u32 4294901760, %v25541_v44 }
 0x5dd   :  { %20461 = vmatpush3.bf16.msra.mxu0 %v28165_v50  ;;  %v12510_v17 = vsub.f32 %v25541_v44, %v12509_v47 }
 0x5de   :  { %20463 = vmatprep.subr.bf16.mxu0 %v28166_v30  ;;  %20505 = vmatpush3.bf16.msra.mxu1 %v28139_v42  ;;  %v28171_v42 = vld [vmem:[#allocation171_spill] sm:$0xff]  ;;  %v28192_v30 = vld [vmem:[#allocation92_spill] sm:$0xff] }
 0x5df   :  { %v16870_v15 = vpop.f32.mrb[68].mxu0  ;;  %20539 = vmatprep.subr.bf16.mxu1 %v28168_v37  ;;  %v12511_v29 = vand.u32 4294901760, %v12510_v17 }
 0x5e0   :  { %v16871_v24 = vpop.f32.mrb[69].mxu0 }
 0x5e1   :  { %v16872_v5 = vadd.f32 %v16871_v24, %v16870_v15  ;;  %20465 = vmatpush3.bf16.msra.mxu0 %v28167_v18  ;;  %14438 = vmatmul.mubr.msk.f32.vlgmr.msra.gmra.mrb[82].mxu1 %vm10665_vm15, %v26812_v0  ;;  %v28193_v24 = vld [vmem:[#allocation93_spill] sm:$0xff]  ;;  %v28194_v18 = vld [vmem:[#allocation95_spill] sm:$0xff] }
 0x5e2   :  { %20467 = vmatprep.subr.bf16.mxu0 %v28169_v32  ;;  %20541 = vmatpush3.bf16.msra.mxu1 %v28170_v63  ;;  %v28195_v32 = vld [vmem:[#allocation98_spill] sm:$0xff]  ;;  %v28198_v63 = vld [vmem:[#allocation139_spill] sm:$0xff] }
 0x5e3   :  { %v10276_v62 = vadd.f32 %v16872_v5, %v10138_v59  ;;  %14439 = vmatprep.mubr.msk.f32.mxu1 %vm10668_vm0, %v26812_v0  ;;  %20543 = vmatprep.subr.bf16.mxu1 %v28172_v54  ;;  %v12516_v5 = vsub.f32 %v25595_v2, %v12515_v19  ;;  %v28200_v54 = vld [vmem:[#allocation150_spill] sm:$0xff] }
 0x5e5   :  { %20469 = vmatpush3.bf16.msra.mxu0 %v28171_v42  ;;  %v10384_v46 = vadd.f32 %v16907_v36, %v10276_v62  ;;  %v12517_v37 = vand.u32 4294901760, %v12516_v5  ;;  %v28196_v62 = vld [vmem:[#allocation112_spill] sm:$0xff]  ;;  %v28199_v42 = vld [vmem:[#allocation143_spill] sm:$0xff] }
 0x5e6   :  { %20471 = vmatprep.subr.bf16.mxu0 %v28173_v28  ;;  %20545 = vmatpush3.bf16.msra.mxu1 %v28174_v38  ;;  %v28202_v38 = vld [vmem:[#allocation155_spill] sm:$0xff] }
 0x5e7   :  { %20547 = vmatprep.subr.bf16.mxu1 %v28176_v39  ;;  %v28204_v39 = vld [vmem:[#allocation170_spill] sm:$0xff] }
 0x5e9   :  { %20473 = vmatpush3.bf16.msra.mxu0 %v28175_v8  ;;  %v28203_v8 = vld [vmem:[#allocation158_spill] sm:$0xff] }
 0x5ea   :  { %20507 = vmatprep.subr.bf16.mxu0 %v27724_v56  ;;  %20549 = vmatpush3.bf16.msra.mxu1 %v28177_v27 }
 0x5eb   :  { %20551 = vmatprep.subr.bf16.mxu1 %v28178_v16 }
 0x5ec   :  { %14436 = vmatmul.mubr.msk.f32.vlgmr.msra.gmra.mrb[82].mxu0 %vm10665_vm15, %v26812_v0 }
 0x5ed   :  { %20509 = vmatpush3.bf16.msra.mxu0 %v27726_v49  ;;  %12512 = vmatprep.mubr.f32.mxu0 %v12511_v29  ;;  %v28205_v29 = vld [vmem:[#allocation205_spill] sm:$0xff] }
 0x5ee   :  { %20511 = vmatprep.subr.bf16.mxu0 %v27728_v41  ;;  %20553 = vmatpush3.bf16.msra.mxu1 %v28179_v60 }
 0x5ef   :  { %20555 = vmatprep.subr.bf16.mxu1 %v28180_v11  ;;  %v28206_v11 = vld [vmem:[#allocation209_spill] sm:$0xff] }
 0x5f1   :  { %20513 = vmatpush3.bf16.msra.mxu0 %v27730_v35 }
 0x5f2   :  { %20515 = vmatprep.subr.bf16.mxu0 %v27732_v1  ;;  %20557 = vmatpush3.bf16.msra.mxu1 %v28181_v52  ;;  %v28207_v52 = vld [vmem:[#allocation211_spill] sm:$0xff] }
 0x5f3   :  { %20559 = vmatprep.subr.bf16.mxu1 %v28182_v55 }
 0x5f4   :  { %v16975_v26 = vpop.f32.mrb[70].mxu1 }
 0x5f5   :  { %20517 = vmatpush3.bf16.msra.mxu0 %v27734_v40  ;;  %v16976_v9 = vpop.f32.mrb[71].mxu1 }
 0x5f6   :  { %20519 = vmatprep.subr.bf16.mxu0 %v27736_v3  ;;  %v16977_v59 = vadd.f32 %v16976_v9, %v16975_v26  ;;  %20561 = vmatpush3.bf16.msra.mxu1 %v28183_v53  ;;  %v28208_v26 = vld [vmem:[#allocation213_spill] sm:$0xff]  ;;  %v28209_v9 = vld [vmem:[#allocation214_spill] sm:$0xff]  ;;  %v28217_v53 = vld [vmem:[#allocation232_spill] sm:$0xff] }
 0x5f7   :  { %20563 = vmatprep.subr.bf16.mxu1 %v28184_v7 }
 0x5f9   :  { %20521 = vmatpush3.bf16.msra.mxu0 %v27738_v57 }
 0x5fa   :  { %20523 = vmatprep.subr.bf16.mxu0 %v27740_v20  ;;  %20565 = vmatpush3.bf16.msra.mxu1 %v28185_v23  ;;  %v28220_v23 = vld [vmem:[#allocation176_spill] sm:$0xff] }
 0x5fb   :  { %20567 = vmatprep.subr.bf16.mxu1 %v28187_v14 }
 0x5fd   :  { %20525 = vmatpush3.bf16.msra.mxu0 %v28186_v13 }
 0x5fe   :  { %20527 = vmatprep.subr.bf16.mxu0 %v28188_v25  ;;  %20569 = vmatpush3.bf16.msra.mxu1 %v28189_v45  ;;  %v28223_v45 = vld [vmem:[#allocation241_spill] sm:$0xff] }
 0x5ff   :  { %v16940_v48 = vpop.f32.mrb[70].mxu0  ;;  %20603 = vmatprep.subr.bf16.mxu1 %v27724_v56 }
 0x600   :  { %v16941_v22 = vpop.f32.mrb[71].mxu0 }
 0x601   :  { %v16942_v36 = vadd.f32 %v16941_v22, %v16940_v48  ;;  %20529 = vmatpush3.bf16.msra.mxu0 %v28190_v43  ;;  %14440 = vmatmul.mubr.msk.f32.vlgmr.msra.gmra.mrb[84].mxu1 %vm10667_vm1, %v26812_v0  ;;  %v28222_v22 = vld [vmem:[#allocation179_spill] sm:$0xff] }
 0x602   :  { %20531 = vmatprep.subr.bf16.mxu0 %v28191_v58  ;;  %20605 = vmatpush3.bf16.msra.mxu1 %v27726_v49 }
 0x603   :  { %v10552_v50 = vadd.f32 %v16942_v36, %v10384_v46  ;;  %12992 = vmatprep.mubr.f32.mxu1 %v12509_v47  ;;  %20607 = vmatprep.subr.bf16.mxu1 %v27728_v41  ;;  %v28197_v47 = vld [vmem:[#allocation101_spill] sm:$0xff]  ;;  %v28224_v36 = vld [vmem:[#allocation239_spill] sm:$0xff] }
 0x605   :  { %20533 = vmatpush3.bf16.msra.mxu0 %v28192_v30  ;;  %v10656_v15 = vadd.f32 %v16977_v59, %v10552_v50  ;;  %v28211_v59 = vld [vmem:[#allocation221_spill] sm:$0xff]  ;;  %v28226_v50 = vld [vmem:[#allocation142_spill] sm:$0xff] }
 0x606   :  { %20535 = vmatprep.subr.bf16.mxu0 %v28193_v24  ;;  %20609 = vmatpush3.bf16.msra.mxu1 %v27730_v35 }
 0x607   :  { %14140 = vrot.lane.b32.xlu0 %v10656_v15, %s20959_s14  ;;  %20611 = vmatprep.subr.bf16.mxu1 %v27732_v1 }
 0x609   :  { %20537 = vmatpush3.bf16.msra.mxu0 %v28194_v18 }
 0x60a   :  { %20571 = vmatprep.subr.bf16.mxu0 %v28195_v32  ;;  %20613 = vmatpush3.bf16.msra.mxu1 %v27734_v40  ;;  %v28231_v32 = vld [vmem:[#allocation245_spill] sm:$0xff] }
 0x60b   :  { %20615 = vmatprep.subr.bf16.mxu1 %v27736_v3 }
 0x60c   :  { %12518 = vmatmul.mubr.f32.vlgmr.msra.gmra.mrb[84].mxu0 %v12517_v37  ;;  %v28230_v37 = vld [vmem:[#allocation146_spill] sm:$0xff] }
 0x60d   :  { %20573 = vmatpush3.bf16.msra.mxu0 %v28196_v62  ;;  %12885 = vmatprep.mubr.f32.mxu0 %v25541_v44  ;;  %v28201_v44 = vld [vmem:[#allocation151_spill] sm:$0xff] }
 0x60e   :  { %20575 = vmatprep.subr.bf16.mxu0 %v28197_v47  ;;  %20617 = vmatpush3.bf16.msra.mxu1 %v27738_v57  ;;  %v28232_v47 = vld [vmem:[#allocation246_spill] sm:$0xff] }
 0x60f   :  { %20619 = vmatprep.subr.bf16.mxu1 %v27740_v20 }
 0x611   :  { %20577 = vmatpush3.bf16.msra.mxu0 %v28198_v63  ;;  %v28233_v63 = vld [vmem:[#allocation247_spill] sm:$0xff] }
 0x612   :  { %20579 = vmatprep.subr.bf16.mxu0 %v28199_v42  ;;  %20621 = vmatpush3.bf16.msra.mxu1 %v28186_v13  ;;  %v28234_v42 = vld [vmem:[#allocation249_spill] sm:$0xff] }
 0x613   :  { %20623 = vmatprep.subr.bf16.mxu1 %v28188_v25 }
 0x614   :  { %v17045_v46 = vpop.f32.mrb[72].mxu1 }
 0x615   :  { %20581 = vmatpush3.bf16.msra.mxu0 %v28200_v54  ;;  %v17046_v28 = vpop.f32.mrb[73].mxu1  ;;  %v28235_v54 = vld [vmem:[#allocation248_spill] sm:$0xff] }
 0x616   :  { %20583 = vmatprep.subr.bf16.mxu0 %v28201_v44  ;;  %v17047_v17 = vadd.f32 %v17046_v28, %v17045_v46  ;;  %20625 = vmatpush3.bf16.msra.mxu1 %v28190_v43  ;;  %v28236_v46 = vld [vmem:[#allocation250_spill] sm:$0xff]  ;;  %v28237_v44 = vld [vmem:[#allocation251_spill] sm:$0xff]  ;;  %v28238_v28 = vld [vmem:[#allocation253_spill] sm:$0xff] }
 0x617   :  { %20627 = vmatprep.subr.bf16.mxu1 %v28191_v58 }
 0x619   :  { %20585 = vmatpush3.bf16.msra.mxu0 %v28202_v38 }
 0x61a   :  { %20587 = vmatprep.subr.bf16.mxu0 %v28203_v8  ;;  %20629 = vmatpush3.bf16.msra.mxu1 %v28192_v30  ;;  %v28241_v8 = vld [vmem:[#allocation212_spill] sm:$0xff] }
 0x61b   :  { %20631 = vmatprep.subr.bf16.mxu1 %v28193_v24 }
 0x61d   :  { %20589 = vmatpush3.bf16.msra.mxu0 %v28204_v39 }
 0x61e   :  { %20591 = vmatprep.subr.bf16.mxu0 %v28205_v29  ;;  %20633 = vmatpush3.bf16.msra.mxu1 %v28194_v18 }
 0x61f   :  { %v17010_v27 = vpop.f32.mrb[72].mxu0  ;;  %20667 = vmatprep.subr.bf16.mxu1 %v27724_v56  ;;  %v28210_v56 = vld [vmem:[#allocation219_spill] sm:$0xff] }
 0x620   :  { %v17011_v16 = vpop.f32.mrb[73].mxu0 }
 0x621   :  { %v17012_v60 = vadd.f32 %v17011_v16, %v17010_v27  ;;  %20593 = vmatpush3.bf16.msra.mxu0 %v28206_v11  ;;  %12996 = vmatmul.mubr.f32.vlgmr.msra.gmra.mrb[86].mxu1 %v12515_v19  ;;  %v28225_v19 = vld [vmem:[#allocation242_spill] sm:$0xff]  ;;  %v28242_v27 = vld [vmem:[#allocation255_spill] sm:$0xff]  ;;  %v28243_v16 = vld [vmem:[#allocation56_spill] sm:$0xff] }
 0x622   :  { %20595 = vmatprep.subr.bf16.mxu0 %v28207_v52  ;;  %20669 = vmatpush3.bf16.msra.mxu1 %v27726_v49  ;;  %v28212_v49 = vld [vmem:[#allocation225_spill] sm:$0xff]  ;;  %vm10669_vm3 = vcmp.eq.f32.partialorder %v24982_v33, %v28243_v16  ;;  %v28245_v11 = vld [vmem:[#allocation216_spill] sm:$0xff] }
 0x623   :  { %v11028_v55 = vadd.f32 %v17047_v17, %v17012_v60  ;;  %14443 = vmatprep.mubr.msk.f32.mxu1 %vm10668_vm0, %v26812_v0  ;;  %20671 = vmatprep.subr.bf16.mxu1 %v27728_v41  ;;  %v28213_v41 = vld [vmem:[#allocation226_spill] sm:$0xff]  ;;  %v28244_v60 = vld [vmem:[#allocation215_spill] sm:$0xff]  ;;  %v28246_v52 = vld [vmem:[#allocation105_spill] sm:$0xff] }
 0x624   :  { %v28240_v17 = vld [vmem:[#allocation254_spill] sm:$0xff] }
 0x625   :  { %20597 = vmatpush3.bf16.msra.mxu0 %v28208_v26  ;;  %v28247_v26 = vld [vmem:[#allocation138_spill] sm:$0xff] }
 0x626   :  { %20599 = vmatprep.subr.bf16.mxu0 %v28209_v9  ;;  %20673 = vmatpush3.bf16.msra.mxu1 %v27730_v35  ;;  %v28214_v35 = vld [vmem:[#allocation229_spill] sm:$0xff] }
 0x627   :  { %20675 = vmatprep.subr.bf16.mxu1 %v27732_v1  ;;  %v28215_v1 = vld [vmem:[#allocation230_spill] sm:$0xff]  ;;  %v28248_v9 = vld [vmem:[#allocation145_spill] sm:$0xff] }
 0x629   :  { %20601 = vmatpush3.bf16.msra.mxu0 %v28210_v56  ;;  %v28249_v56 = vld [vmem:[#allocation149_spill] sm:$0xff] }
 0x62a   :  { %20635 = vmatprep.subr.bf16.mxu0 %v28211_v59  ;;  %20677 = vmatpush3.bf16.msra.mxu1 %v27734_v40  ;;  %v28216_v40 = vld [vmem:[#allocation231_spill] sm:$0xff]  ;;  %v28250_v59 = vld [vmem:[#allocation256_spill] sm:$0xff] }
 0x62b   :  { %20679 = vmatprep.subr.bf16.mxu1 %v27736_v3 }
 0x62c   :  { %12888 = vmatmul.mubr.f32.vlgmr.msra.gmra.mrb[86].mxu0 %v25595_v2 }
 0x62d   :  { %20637 = vmatpush3.bf16.msra.mxu0 %v28212_v49  ;;  %14441 = vmatprep.mubr.msk.f32.mxu0 %vm10668_vm0, %v26812_v0 }
 0x62e   :  { %20639 = vmatprep.subr.bf16.mxu0 %v28213_v41  ;;  %20681 = vmatpush3.bf16.msra.mxu1 %v27738_v57  ;;  %v28218_v57 = vld [vmem:[#allocation233_spill] sm:$0xff] }
 0x62f   :  { %20683 = vmatprep.subr.bf16.mxu1 %v27740_v20  ;;  %v28219_v20 = vld [vmem:[#allocation174_spill] sm:$0xff] }
 0x631   :  { %20641 = vmatpush3.bf16.msra.mxu0 %v28214_v35 }
 0x632   :  { %20643 = vmatprep.subr.bf16.mxu0 %v28215_v1  ;;  %20685 = vmatpush3.bf16.msra.mxu1 %v28186_v13  ;;  %v28221_v13 = vld [vmem:[#allocation178_spill] sm:$0xff]  ;;  %v28251_v1 = vld [vmem:[#allocation257_spill] sm:$0xff] }
 0x633   :  { %20687 = vmatprep.subr.bf16.mxu1 %v28188_v25  ;;  %v25684_v25 = vsub.f32 %v14426_v61, %v14426_v61 }
 0x634   :  { %v17115_v6 = vpop.f32.mrb[74].mxu1 }
 0x635   :  { %20645 = vmatpush3.bf16.msra.mxu0 %v28216_v40  ;;  %v17116_v3 = vpop.f32.mrb[75].mxu1 }
 0x636   :  { %20647 = vmatprep.subr.bf16.mxu0 %v28217_v53  ;;  %v17117_v7 = vadd.f32 %v17116_v3, %v17115_v6  ;;  %20689 = vmatpush3.bf16.msra.mxu1 %v28190_v43  ;;  %v28252_v6 = vld [vmem:[#allocation258_spill] sm:$0xff] }
 0x637   :  { %20691 = vmatprep.subr.bf16.mxu1 %v28191_v58  ;;  %v13371_v58 = vand.u32 4294901760, %v25684_v25 }
 0x639   :  { %20649 = vmatpush3.bf16.msra.mxu0 %v28218_v57  ;;  %v13372_v5 = vsub.f32 %v25684_v25, %v13371_v58 }
 0x63a   :  { %20651 = vmatprep.subr.bf16.mxu0 %v28219_v20  ;;  %20693 = vmatpush3.bf16.msra.mxu1 %v28192_v30  ;;  %v28227_v30 = vld [vmem:[#allocation244_spill] sm:$0xff] }
 0x63b   :  { %20695 = vmatprep.subr.bf16.mxu1 %v28193_v24  ;;  %v28228_v24 = vld [vmem:[#allocation144_spill] sm:$0xff]  ;;  %v13373_v62 = vand.u32 4294901760, %v13372_v5 }
 0x63c   :  { %v28255_v20 = vld [vmem:[#allocation168_spill] sm:$0xff] }
 0x63d   :  { %20653 = vmatpush3.bf16.msra.mxu0 %v28220_v23  ;;  %v28256_v23 = vld [vmem:[#allocation169_spill] sm:$0xff] }
 0x63e   :  { %20655 = vmatprep.subr.bf16.mxu0 %v28221_v13  ;;  %20697 = vmatpush3.bf16.msra.mxu1 %v28194_v18  ;;  %v28229_v18 = vld [vmem:[#allocation54_spill] sm:$0xff] }
 0x63f   :  { %v17080_v14 = vpop.f32.mrb[74].mxu0  ;;  %20731 = vmatprep.subr.bf16.mxu1 %v28223_v45  ;;  %v28261_v45 = vld [vmem:[#allocation222_spill] sm:$0xff] }
 0x640   :  { %v17081_v2 = vpop.f32.mrb[75].mxu0 }
 0x641   :  { %v17082_v48 = vadd.f32 %v17081_v2, %v17080_v14  ;;  %20657 = vmatpush3.bf16.msra.mxu0 %v28222_v22  ;;  %14444 = vmatmul.mubr.msk.f32.vlgmr.msra.gmra.mrb[88].mxu1 %vm10667_vm1, %v26812_v0  ;;  %v28257_v14 = vld [vmem:[#allocation173_spill] sm:$0xff]  ;;  %v28258_v2 = vld [vmem:[#allocation204_spill] sm:$0xff] }
 0x642   :  { %20659 = vmatprep.subr.bf16.mxu0 %v28224_v36  ;;  %20733 = vmatpush3.bf16.msra.mxu1 %v28225_v19  ;;  %v28260_v22 = vld [vmem:[#allocation208_spill] sm:$0xff]  ;;  %v28262_v36 = vld [vmem:[#allocation223_spill] sm:$0xff] }
 0x643   :  { %v11166_v43 = vadd.f32 %v17082_v48, %v11028_v55  ;;  %14445 = vmatprep.mubr.msk.f32.mxu1 %vm10670_vm2, %v26812_v0  ;;  %20735 = vmatprep.subr.bf16.mxu1 %v28227_v30  ;;  %v14425_v55 = vsel %vm10669_vm3, 1.0, %v27490_v10  ;;  %v28253_v10 = vld [vmem:[#allocation115_spill] sm:$0xff]  ;;  %v28265_v30 = vld [vmem:[#allocation234_spill] sm:$0xff] }
 0x644   :  { %v25738_v49 = vsub.f32 %v14425_v55, %v14425_v55  ;;  %v28259_v48 = vld [vmem:[#allocation207_spill] sm:$0xff] }
 0x645   :  { %20661 = vmatpush3.bf16.msra.mxu0 %v28226_v50  ;;  %v11274_v15 = vadd.f32 %v17117_v7, %v11166_v43  ;;  %v28254_v7 = vld [vmem:[#allocation165_spill] sm:$0xff]  ;;  %v28264_v50 = vld [vmem:[#allocation228_spill] sm:$0xff] }
 0x646   :  { %20663 = vmatprep.subr.bf16.mxu0 %v28228_v24  ;;  %20737 = vmatpush3.bf16.msra.mxu1 %v28229_v18  ;;  %v13377_v53 = vand.u32 4294901760, %v25738_v49  ;;  %v28267_v24 = vld [vmem:[#allocation236_spill] sm:$0xff] }
 0x647   :  { %20739 = vmatprep.subr.bf16.mxu1 %v28231_v32  ;;  %v28268_v32 = vld [vmem:[#allocation180_spill] sm:$0xff] }
 0x648   :  { %v13378_v61 = vsub.f32 %v25738_v49, %v13377_v53 }
 0x649   :  { %20665 = vmatpush3.bf16.msra.mxu0 %v28230_v37 }
 0x64a   :  { %20699 = vmatprep.subr.bf16.mxu0 %v23676_v4  ;;  %20741 = vmatpush3.bf16.msra.mxu1 %v28232_v47  ;;  %v13379_v13 = vand.u32 4294901760, %v13378_v61 }
 0x64b   :  { %20743 = vmatprep.subr.bf16.mxu1 %v28233_v63  ;;  %v28270_v63 = vld [vmem:[#allocation237_spill] sm:$0xff] }
 0x64c   :  { %14442 = vmatmul.mubr.msk.f32.vlgmr.msra.gmra.mrb[88].mxu0 %vm10667_vm1, %v26812_v0 }
 0x64d   :  { %20701 = vmatpush3.bf16.msra.mxu0 %v23700_v34  ;;  %13374 = vmatprep.mubr.f32.mxu0 %v13373_v62  ;;  %v28269_v62 = vld [vmem:[#allocation181_spill] sm:$0xff] }
 0x64e   :  { %20703 = vmatprep.subr.bf16.mxu0 %v23708_v21  ;;  %20745 = vmatpush3.bf16.msra.mxu1 %v28234_v42 }
 0x64f   :  { %20747 = vmatprep.subr.bf16.mxu1 %v28236_v46  ;;  %v28271_v46 = vld [vmem:[#allocation238_spill] sm:$0xff] }
 0x651   :  { %20705 = vmatpush3.bf16.msra.mxu0 %v28235_v54 }
 0x652   :  { %20707 = vmatprep.subr.bf16.mxu0 %v28237_v44  ;;  %20749 = vmatpush3.bf16.msra.mxu1 %v28238_v28  ;;  %v28273_v28 = vld [vmem:[#allocation243_spill] sm:$0xff] }
 0x653   :  { %20751 = vmatprep.subr.bf16.mxu1 %v28240_v17  ;;  %v28279_v17 = vld [vmem:[#allocation262_spill] sm:$0xff] }
 0x654   :  { %v17185_v38 = vpop.f32.mrb[76].mxu1 }
 0x655   :  { %20709 = vmatpush3.bf16.msra.mxu0 %v28239_v31  ;;  %v17186_v39 = vpop.f32.mrb[77].mxu1 }
 0x656   :  { %20711 = vmatprep.subr.bf16.mxu0 %v28241_v8  ;;  %v17187_v29 = vadd.f32 %v17186_v39, %v17185_v38  ;;  %20753 = vmatpush3.bf16.msra.mxu1 %v28242_v27  ;;  %v28280_v39 = vld [vmem:[#allocation263_spill] sm:$0xff]  ;;  %v28282_v27 = vld [vmem:[#allocation210_spill] sm:$0xff] }
 0x657   :  { %20755 = vmatprep.subr.bf16.mxu1 %v28245_v11 }
 0x659   :  { %20713 = vmatpush3.bf16.msra.mxu0 %v28244_v60 }
 0x65a   :  { %20715 = vmatprep.subr.bf16.mxu0 %v28246_v52  ;;  %20757 = vmatpush3.bf16.msra.mxu1 %v28247_v26  ;;  %v28284_v26 = vld [vmem:[#allocation265_spill] sm:$0xff] }
 0x65b   :  { %20759 = vmatprep.subr.bf16.mxu1 %v28249_v56 }
 0x65d   :  { %20717 = vmatpush3.bf16.msra.mxu0 %v28248_v9 }
 0x65e   :  { %20719 = vmatprep.subr.bf16.mxu0 %v28250_v59  ;;  %20761 = vmatpush3.bf16.msra.mxu1 %v28251_v1 }
 0x65f   :  { %v17150_v41 = vpop.f32.mrb[76].mxu0  ;;  %20795 = vmatprep.subr.bf16.mxu1 %v23676_v4 }
 0x660   :  { %v17151_v35 = vpop.f32.mrb[77].mxu0 }
 0x661   :  { %v17152_v40 = vadd.f32 %v17151_v35, %v17150_v41  ;;  %20721 = vmatpush3.bf16.msra.mxu0 %v28252_v6  ;;  %14446 = vmatmul.mubr.msk.f32.vlgmr.msra.gmra.mrb[90].mxu1 %vm10669_vm3, %v26812_v0  ;;  %v28287_v41 = vld [vmem:[#allocation220_spill] sm:$0xff] }
 0x662   :  { %20723 = vmatprep.subr.bf16.mxu0 %v28253_v10  ;;  %20797 = vmatpush3.bf16.msra.mxu1 %v23700_v34  ;;  %v28288_v35 = vld [vmem:[#allocation224_spill] sm:$0xff] }
 0x663   :  { %v11442_v3 = vadd.f32 %v17152_v40, %v11274_v15  ;;  %13854 = vmatprep.mubr.f32.mxu1 %v13371_v58  ;;  %20799 = vmatprep.subr.bf16.mxu1 %v23708_v21  ;;  %v28266_v15 = vld [vmem:[#allocation235_spill] sm:$0xff] }
 0x665   :  { %20725 = vmatpush3.bf16.msra.mxu0 %v28254_v7  ;;  %v11546_v57 = vadd.f32 %v17187_v29, %v11442_v3  ;;  %v28281_v29 = vld [vmem:[#allocation206_spill] sm:$0xff] }
 0x666   :  { %20727 = vmatprep.subr.bf16.mxu0 %v28255_v20  ;;  %20801 = vmatpush3.bf16.msra.mxu1 %v28235_v54 }
 0x667   :  { %20803 = vmatprep.subr.bf16.mxu1 %v28237_v44 }
 0x669   :  { %20729 = vmatpush3.bf16.msra.mxu0 %v28256_v23 }
 0x66a   :  { %20763 = vmatprep.subr.bf16.mxu0 %v28257_v14  ;;  %20805 = vmatpush3.bf16.msra.mxu1 %v28239_v31 }
 0x66b   :  { %20807 = vmatprep.subr.bf16.mxu1 %v28241_v8 }
 0x66c   :  { %13380 = vmatmul.mubr.f32.vlgmr.msra.gmra.mrb[90].mxu0 %v13379_v13 }
 0x66d   :  { %20765 = vmatpush3.bf16.msra.mxu0 %v28258_v2  ;;  %13747 = vmatprep.mubr.f32.mxu0 %v25684_v25  ;;  %v28263_v25 = vld [vmem:[#allocation227_spill] sm:$0xff] }
 0x66e   :  { %20767 = vmatprep.subr.bf16.mxu0 %v28259_v48  ;;  %20809 = vmatpush3.bf16.msra.mxu1 %v28244_v60 }
 0x66f   :  { %20811 = vmatprep.subr.bf16.mxu1 %v28246_v52 }
 0x671   :  { %20769 = vmatpush3.bf16.msra.mxu0 %v28260_v22 }
 0x672   :  { %20771 = vmatprep.subr.bf16.mxu0 %v28261_v45  ;;  %20813 = vmatpush3.bf16.msra.mxu1 %v28248_v9 }
 0x673   :  { %20815 = vmatprep.subr.bf16.mxu1 %v28250_v59 }
 0x674   :  { %v17255_v43 = vpop.f32.mrb[78].mxu1 }
 0x675   :  { %20773 = vmatpush3.bf16.msra.mxu0 %v28262_v36  ;;  %v17256_v58 = vpop.f32.mrb[79].mxu1 }
 0x676   :  { %20775 = vmatprep.subr.bf16.mxu0 %v28263_v25  ;;  %v17257_v19 = vadd.f32 %v17256_v58, %v17255_v43  ;;  %20817 = vmatpush3.bf16.msra.mxu1 %v28252_v6 }
 0x677   :  { %20819 = vmatprep.subr.bf16.mxu1 %v28253_v10 }
 0x679   :  { %20777 = vmatpush3.bf16.msra.mxu0 %v28264_v50 }
 0x67a   :  { %20779 = vmatprep.subr.bf16.mxu0 %v28265_v30  ;;  %20821 = vmatpush3.bf16.msra.mxu1 %v28254_v7 }
 0x67b   :  { %20823 = vmatprep.subr.bf16.mxu1 %v28255_v20 }
 0x67d   :  { %20781 = vmatpush3.bf16.msra.mxu0 %v28266_v15 }
 0x67e   :  { %20783 = vmatprep.subr.bf16.mxu0 %v28267_v24  ;;  %20825 = vmatpush3.bf16.msra.mxu1 %v28256_v23 }
 0x67f   :  { %v17220_v5 = vpop.f32.mrb[78].mxu0  ;;  %20859 = vmatprep.subr.bf16.mxu1 %v23676_v4  ;;  %v28272_v4 = vld [vmem:[#allocation240_spill] sm:$0xff] }
 0x680   :  { %v17221_v18 = vpop.f32.mrb[79].mxu0 }
 0x681   :  { %v17222_v37 = vadd.f32 %v17221_v18, %v17220_v5  ;;  %20785 = vmatpush3.bf16.msra.mxu0 %v28268_v32  ;;  %13858 = vmatmul.mubr.f32.vlgmr.msra.gmra.mrb[92].mxu1 %v13377_v53 }
 0x682   :  { %20787 = vmatprep.subr.bf16.mxu0 %v28269_v62  ;;  %20861 = vmatpush3.bf16.msra.mxu1 %v23700_v34  ;;  %v28274_v34 = vld [vmem:[#allocation152_spill] sm:$0xff] }
 0x683   :  { %v11658_v47 = vadd.f32 %v17222_v37, %v11546_v57  ;;  %14449 = vmatprep.mubr.msk.f32.mxu1 %vm10670_vm2, %v26812_v0  ;;  %20863 = vmatprep.subr.bf16.mxu1 %v23708_v21  ;;  %v28275_v21 = vld [vmem:[#allocation55_spill] sm:$0xff] }
 0x685   :  { %20789 = vmatpush3.bf16.msra.mxu0 %v28270_v63  ;;  %v11890_v42 = vadd.f32 %v17257_v19, %v11658_v47 }
 0x686   :  { %20791 = vmatprep.subr.bf16.mxu0 %v28271_v46  ;;  %20865 = vmatpush3.bf16.msra.mxu1 %v28235_v54  ;;  %v28276_v54 = vld [vmem:[#allocation259_spill] sm:$0xff] }
 0x687   :  { %20867 = vmatprep.subr.bf16.mxu1 %v28237_v44  ;;  %v28277_v44 = vld [vmem:[#allocation260_spill] sm:$0xff] }
 0x689   :  { %20793 = vmatpush3.bf16.msra.mxu0 %v28272_v4  ;;  %v14157_v4 = vpop.permute.xlu1 %14156 }
 0x68a   :  { %20827 = vmatprep.subr.bf16.mxu0 %v28273_v28  ;;  %20869 = vmatpush3.bf16.msra.mxu1 %v28239_v31  ;;  %v28278_v31 = vld [vmem:[#allocation261_spill] sm:$0xff]  ;;  %v14165_v28 = vmul.f32 %v25400_v51, %v14157_v4 }
 0x68b   :  { %20871 = vmatprep.subr.bf16.mxu1 %v28241_v8 }
 0x68c   :  { %13750 = vmatmul.mubr.f32.vlgmr.msra.gmra.mrb[92].mxu0 %v25738_v49 }
 0x68d   :  { %20829 = vmatpush3.bf16.msra.mxu0 %v28274_v34  ;;  %14447 = vmatprep.mubr.msk.f32.mxu0 %vm10670_vm2, %v26812_v0 }
 0x68e   :  { %20831 = vmatprep.subr.bf16.mxu0 %v28275_v21  ;;  %20873 = vmatpush3.bf16.msra.mxu1 %v28244_v60  ;;  %v28283_v60 = vld [vmem:[#allocation264_spill] sm:$0xff] }
 0x68f   :  { %20875 = vmatprep.subr.bf16.mxu1 %v28246_v52 }
 0x691   :  { %20833 = vmatpush3.bf16.msra.mxu0 %v28276_v54  ;;  %v14183_v54 = vpop.permute.xlu0 %14182 }
 0x692   :  { %20835 = vmatprep.subr.bf16.mxu0 %v28277_v44  ;;  %20877 = vmatpush3.bf16.msra.mxu1 %v28248_v9  ;;  %v28285_v9 = vld [vmem:[#allocation217_spill] sm:$0xff]  ;;  %v14193_v44 = vsel %vm14147_vm4, %v14165_v28, %v14183_v54 }
 0x693   :  { %20879 = vmatprep.subr.bf16.mxu1 %v28250_v59  ;;  %v28286_v59 = vld [vmem:[#allocation218_spill] sm:$0xff] }
 0x694   :  { %v17325_v12 = vpop.f32.mrb[80].mxu1 }
 0x695   :  { %20837 = vmatpush3.bf16.msra.mxu0 %v28278_v31  ;;  %v17326_v38 = vpop.f32.mrb[81].mxu1  ;;  %v14187_v31 = vpop.permute.xlu1 %14186 }
 0x696   :  { %20839 = vmatprep.subr.bf16.mxu0 %v28279_v17  ;;  %v17327_v8 = vadd.f32 %v17326_v38, %v17325_v12  ;;  %20881 = vmatpush3.bf16.msra.mxu1 %v28252_v6  ;;  %v14194_v12 = vsel %vm14149_vm5, %v14193_v44, %v14187_v31  ;;  %v14191_v17 = vpop.permute.xlu0 %14190  ;;  %v14452_v38 = vld [vmem:[%s25889_s4] ss:$0 sm:$0xff] }
 0x697   :  { %20883 = vmatprep.subr.bf16.mxu1 %v28253_v10 }
 0x699   :  { %20841 = vmatpush3.bf16.msra.mxu0 %v28280_v39 }
 0x69a   :  { %20843 = vmatprep.subr.bf16.mxu0 %v28281_v29  ;;  %20885 = vmatpush3.bf16.msra.mxu1 %v28254_v7 }
 0x69b   :  { %20887 = vmatprep.subr.bf16.mxu1 %v28255_v20 }
 0x69d   :  { %20845 = vmatpush3.bf16.msra.mxu0 %v28282_v27 }
 0x69e   :  { %20847 = vmatprep.subr.bf16.mxu0 %v28283_v60  ;;  %20889 = vmatpush3.bf16.msra.mxu1 %v28256_v23 }
 0x69f   :  { %v17290_v11 = vpop.f32.mrb[80].mxu0 }
 0x6a0   :  { %v17291_v52 = vpop.f32.mrb[81].mxu0 }
 0x6a1   :  { %v17292_v55 = vadd.f32 %v17291_v52, %v17290_v11  ;;  %20849 = vmatpush3.bf16.msra.mxu0 %v28284_v26  ;;  %14450 = vmatmul.mubr.msk.f32.vlgmr.msra.gmra.mrb[94].mxu1 %vm10669_vm3, %v26812_v0 }
 0x6a2   :  { %20851 = vmatprep.subr.bf16.mxu0 %v28285_v9 }
 0x6a3   :  { %v12028_v56 = vadd.f32 %v17292_v55, %v11890_v42 }
 0x6a5   :  { %20853 = vmatpush3.bf16.msra.mxu0 %v28286_v59  ;;  %v12136_v49 = vadd.f32 %v17327_v8, %v12028_v56  ;;  %v14195_v8 = vsel %vm14151_vm6, %v14194_v12, %v14191_v17 }
 0x6a6   :  { %20855 = vmatprep.subr.bf16.mxu0 %v28287_v41  ;;  %v25841_v39 = vadd.f32 %v14452_v38, %v14195_v8 }
 0x6a8   :  { %v14207_v51 = vand.u32 2139095040, %v25841_v39  ;;  %vm14206_vm14 = vcmp.lt.s32.totalorder %v25841_v39, 0 }
 0x6a9   :  { %20857 = vmatpush3.bf16.msra.mxu0 %v28288_v35 }
 0x6aa   :  { %v14208_v60 = vshrl.u32 %v14207_v51, 23 }
 0x6ac   :  { %14448 = vmatmul.mubr.msk.f32.vlgmr.msra.gmra.mrb[94].mxu0 %vm10669_vm3, %v26812_v0  ;;  %v14453_v52 = vadd.s32 4294967169, %v14208_v60  ;;  %vm14296_vm3 = vweird.f32 %v25841_v39 }
 0x6ae   :  { %v14214_v26 = vadd.s32 1, %v14453_v52 }
 0x6b0   :  { %vm14215_vm7 = vcmp.gt.s32.totalorder %v14214_v26, 0 }
 0x6b1   :  { %v14216_v41 = vsel %vm14215_vm7, %v14214_v26, 0 }
 0x6b2   :  { %v14218_v35 = vand.u32 31, %v14216_v41 }
 0x6b4   :  { %v17395_v1 = vpop.f32.mrb[82].mxu1 }
 0x6b5   :  { %v17396_v40 = vpop.f32.mrb[83].mxu1 }
 0x6b6   :  { %v17397_v6 = vadd.f32 %v17396_v40, %v17395_v1  ;;  %v14219_v1 = vsub.s32 32, %v14218_v35  ;;  %v20962_v40 = vmov 2102212464  }
 0x6bf   :  { %v17360_v10 = vpop.f32.mrb[82].mxu0 }
 0x6c0   :  { %v17361_v53 = vpop.f32.mrb[83].mxu0 }
 0x6c1   :  { %v17362_v3 = vadd.f32 %v17361_v53, %v17360_v10  ;;  %v20963_v10 = vmov 920167782  }
 0x6c2   :  { %v14231_v53 = vshrl.u32 %v20963_v10, %v14219_v1 }
 0x6c3   :  { %v12304_v7 = vadd.f32 %v17362_v3, %v12136_v49  ;;  %v14204_v3 = vand.u32 2147483647, %v25841_v39 }
 0x6c5   :  { %v12408_v57 = vadd.f32 %v17397_v6, %v12304_v7  ;;  %v14230_v6 = vshll.u32 %v20962_v40, %v14218_v35  ;;  %v14217_v7 = vshrl.u32 %v14216_v41, 5  ;;  %vm14205_vm15 = vcmp.le.f32.partialorder %v14204_v3, 0.7853982 }
 0x6c7   :  { %vm14239_vm8 = vcmp.lt.s32.totalorder %v14217_v7, 4  ;;  %vm14236_vm9 = vcmp.lt.s32.totalorder %v14217_v7, 1  ;;  %vm14238_vm10 = vcmp.lt.s32.totalorder %v14217_v7, 3  ;;  %vm14237_vm11 = vcmp.lt.s32.totalorder %v14217_v7, 2 }
 0x6d4   :  { %v17465_v20 = vpop.f32.mrb[84].mxu1 }
 0x6d5   :  { %v17466_v61 = vpop.f32.mrb[85].mxu1 }
 0x6d6   :  { %v17467_v23 = vadd.f32 %v17466_v61, %v17465_v20  ;;  %v20964_v20 = vmov 1326507024  }
 0x6d7   :  { %v14234_v61 = vshrl.u32 %v20964_v20, %v14219_v1 }
 0x6df   :  { %v17430_v13 = vpop.f32.mrb[84].mxu0 }
 0x6e0   :  { %v17431_v14 = vpop.f32.mrb[85].mxu0 }
 0x6e1   :  { %v17432_v2 = vadd.f32 %v17431_v14, %v17430_v13  ;;  %v20966_v14 = vmov 2475754826  }
 0x6e3   :  { %v12520_v48 = vadd.f32 %v17432_v2, %v12408_v57  ;;  %v14233_v57 = vshll.u32 %v20963_v10, %v14218_v35  ;;  %v14224_v2 = vshll.u32 %v20966_v14, %v14218_v35 }
 0x6e5   :  { %v12752_v22 = vadd.f32 %v17467_v23, %v12520_v48  ;;  %v20965_v23 = vmov 683565275   ;;  %v14222_v48 = vshrl.u32 %v20966_v14, %v14219_v1 }
 0x6e6   :  { %v14221_v13 = vshll.u32 %v20965_v23, %v14218_v35  ;;  %v14220_v31 = vshrl.u32 %v20965_v23, %v14219_v1 }
 0x6f4   :  { %v17535_v45 = vpop.f32.mrb[86].mxu1 }
 0x6f5   :  { %v17536_v36 = vpop.f32.mrb[87].mxu1 }
 0x6f6   :  { %v17537_v33 = vadd.f32 %v17536_v36, %v17535_v45 }
 0x6ff   :  { %v17500_v0 = vpop.f32.mrb[86].mxu0 }
 0x700   :  { %v17501_v16 = vpop.f32.mrb[87].mxu0 }
 0x701   :  { %v17502_v43 = vadd.f32 %v17501_v16, %v17500_v0  ;;  %v14232_v0 = vor.u32 %v14231_v53, %v14230_v6 }
 0x703   :  { %v12890_v25 = vadd.f32 %v17502_v43, %v12752_v22  ;;  %v20967_v22 = vmov 2131351028   ;;  %v14211_v43 = vand.u32 8388607, %v14204_v3 }
 0x704   :  { %v14225_v45 = vshrl.u32 %v20967_v22, %v14219_v1  ;;  %v14227_v36 = vshll.u32 %v20967_v22, %v14218_v35 }
 0x705   :  { %v12998_v58 = vadd.f32 %v17537_v33, %v12890_v25  ;;  %v14228_v33 = vshrl.u32 %v20962_v40, %v14219_v1  ;;  %v14235_v25 = vor.u32 %v14234_v61, %v14233_v57 }
 0x714   :  { %v17605_v19 = vpop.f32.mrb[88].mxu1 }
 0x715   :  { %v17606_v50 = vpop.f32.mrb[89].mxu1 }
 0x716   :  { %v17607_v30 = vadd.f32 %v17606_v50, %v17605_v19  ;;  %v14223_v50 = vor.u32 %v14222_v48, %v14221_v13 }
 0x718   :  { %v14240_v51 = vsel %vm14236_vm9, %v14220_v31, %v14223_v50 }
 0x71f   :  { %v17570_v15 = vpop.f32.mrb[88].mxu0 }
 0x720   :  { %v17571_v24 = vpop.f32.mrb[89].mxu0 }
 0x721   :  { %v17572_v5 = vadd.f32 %v17571_v24, %v17570_v15  ;;  %v14229_v15 = vor.u32 %v14228_v33, %v14227_v36  ;;  %v14245_v24 = vsel %vm14239_vm8, %v14232_v0, 920167782 }
 0x723   :  { %v13166_v18 = vadd.f32 %v17572_v5, %v12998_v58  ;;  %v14212_v5 = vor.u32 8388608, %v14211_v43  ;;  %v14241_v38 = vsel %vm14239_vm8, %v14229_v15, 2102212464 }
 0x725   :  { %v13270_v37 = vadd.f32 %v17607_v30, %v13166_v18  ;;  %v14226_v30 = vor.u32 %v14225_v45, %v14224_v2  ;;  %v14249_v18 = vsel %vm14239_vm8, %v14235_v25, 1326507024 }
 0x734   :  { %v17675_v32 = vpop.f32.mrb[90].mxu1 }
 0x735   :  { %v17676_v62 = vpop.f32.mrb[91].mxu1 }
 0x736   :  { %v17677_v47 = vadd.f32 %v17676_v62, %v17675_v32  ;;  %v14246_v32 = vsel %vm14238_vm10, %v14229_v15, %v14245_v24  ;;  %v14248_v62 = vsel %vm14236_vm9, %v14226_v30, %v14229_v15 }
 0x73f   :  { %v17640_v63 = vpop.f32.mrb[90].mxu0 }
 0x740   :  { %v17641_v42 = vpop.f32.mrb[91].mxu0 }
 0x741   :  { %v17642_v46 = vadd.f32 %v17641_v42, %v17640_v63  ;;  %v14252_v63 = vshll.u32 %v14212_v5, 8  ;;  %v14137_v5 = vpop.permute.xlu1 %14136 }
 0x743   :  { %v13382_v34 = vadd.f32 %v17642_v46, %v13270_v37  ;;  %v14244_v37 = vsel %vm14236_vm9, %v14223_v50, %v14226_v30 }
 0x744   :  { %v14247_v46 = vsel %vm14237_vm11, %v14244_v37, %v14246_v32  ;;  %v14457_v37 = vld [vmem:[%s25890_s5] ss:$0 sm:$0xff] }
 0x745   :  { %v13614_v21 = vadd.f32 %v17677_v47, %v13382_v34  ;;  %v14250_v47 = vsel %vm14238_vm10, %v14232_v0, %v14249_v18  ;;  %v14141_v18 = vpop.permute.xlu0 %14140 }
 0x746   :  { %v14251_v28 = vsel %vm14237_vm11, %v14248_v62, %v14250_v47  ;;  %v28289_v62 = vld [vmem:[#allocation51_spill] sm:$0xff] }
 0x747   :  { %v25858_v12 = vmul.u32.u64.low %v14252_v63, %v14251_v28  ;;  %v25859_v17 = vmul.u32.u64.high %v14252_v63, %v14251_v28, %v25858_v12  ;;  %v14148_v47 = vsel %vm14147_vm4, %v28289_v62, %v14137_v5 }
 0x754   :  { %v17745_v29 = vpop.f32.mrb[92].mxu1 }
 0x755   :  { %v17746_v27 = vpop.f32.mrb[93].mxu1 }
 0x756   :  { %v17747_v11 = vadd.f32 %v17746_v27, %v17745_v29  ;;  %v14242_v29 = vsel %vm14238_vm10, %v14226_v30, %v14241_v38 }
 0x757   :  { %v14243_v27 = vsel %vm14237_vm11, %v14240_v51, %v14242_v29 }
 0x75f   :  { %v17710_v55 = vpop.f32.mrb[92].mxu0 }
 0x760   :  { %v17711_v9 = vpop.f32.mrb[93].mxu0 }
 0x761   :  { %v17712_v56 = vadd.f32 %v17711_v9, %v17710_v55 }
 0x763   :  { %v13752_v59 = vadd.f32 %v17712_v56, %v13614_v21  ;;  %v25855_v21 = vmul.u32.u64.low %v14252_v63, %v14247_v46  ;;  %v25856_v54 = vmul.u32.u64.high %v14252_v63, %v14247_v46, %v25855_v21 }
 0x765   :  { %v13860_v49 = vadd.f32 %v17747_v11, %v13752_v59  ;;  %v14262_v60 = vadd.s32 1, %v25856_v54  ;;  %vm14261_vm12 = vc.u32 %v25859_v17, %v25855_v21  ;;  %v14259_v11 = vmul.u32 %v14252_v63, %v14243_v27 }
 0x766   :  { %v14260_v10 = vadd.s32 %v25855_v21, %v25859_v17  ;;  %v14150_v63 = vsel %vm14149_vm5, %v14148_v47, %v14141_v18 }
 0x767   :  { %v14263_v52 = vsel %vm14261_vm12, %v14262_v60, %v25856_v54 }
 0x768   :  { %v14264_v55 = vadd.s32 %v14263_v52, %v14259_v11 }
 0x76a   :  { %v14265_v26 = vadd.s32 536870912, %v14264_v55 }
 0x76c   :  { %v14266_v9 = vshrl.u32 %v14265_v26, 30 }
 0x76e   :  { %v14267_v56 = vshll.u32 %v14266_v9, 30  ;;  %v14290_v33 = vsub.s32 4, %v14266_v9 }
 0x770   :  { %v14268_v59 = vsub.s32 %v14264_v55, %v14267_v56  ;;  %v14291_v0 = vsel %vm14206_vm14, %v14290_v33, %v14266_v9 }
 0x774   :  { %v17815_v16 = vpop.f32.mrb[94].mxu1 }
 0x775   :  { %v17816_v58 = vpop.f32.mrb[95].mxu1 }
 0x776   :  { %v17817_v19 = vadd.f32 %v17816_v58, %v17815_v16  ;;  %v14293_v16 = vsel %vm14205_vm15, 0, %v14291_v0 }
 0x777   :  { %v14297_v43 = vadd.s32 3, %v14293_v16 }
 0x77f   :  { %v17780_v42 = vpop.f32.mrb[94].mxu0 }
 0x780   :  { %v17781_v4 = vpop.f32.mrb[95].mxu0 }
 0x781   :  { %v17782_v34 = vadd.f32 %v17781_v4, %v17780_v42 }
 0x783   :  { %v14028_v44 = vadd.f32 %v17782_v34, %v13860_v49  ;;  %v14270_v49 = vsub.s32 0, %v14268_v59 }
 0x785   :  { %v14132_v8 = vadd.f32 %v17817_v19, %v14028_v44  ;;  %v14454_v41 = vmin.u32 %v14270_v49, %v14268_v59  ;;  %v14298_v19 = vand.u32 3, %v14297_v43 }
 0x787   :  { %14144 = vrot.lane.b32.xlu1 %v14132_v8, %s20961_s3  ;;  %v14272_v35 = vclz %v14454_v41  ;;  %vm14300_vm0 = vcmp.eq.s32.totalorder %v14298_v19, 0  ;;  %vm14303_vm1 = vcmp.eq.s32.totalorder %v14298_v19, 2  ;;  %vm14299_vm2 = vcmp.lt.s32.totalorder %v14298_v19, 2 }
 0x789   :  { %v14455_v1 = vadd.s32 4294967294, %v14272_v35 }
 0x78b   :  { %vm14456_vm13 = vcmp.lt.s32.totalorder %v14455_v1, 0 }
 0x78c   :  { %v14275_v40 = vsel %vm14456_vm13, 0, %v14455_v1 }
 0x78d   :  { %v14280_v6 = vsub.s32 4294967266, %v14275_v40  ;;  %v14276_v53 = vsub.s32 32, %v14275_v40  ;;  %v14277_v57 = vshll.u32 %v14268_v59, %v14275_v40 }
 0x78f   :  { %v14281_v7 = vadd.s32 127, %v14280_v6  ;;  %v14278_v20 = vshrl.u32 %v14260_v10, %v14276_v53 }
 0x791   :  { %v14282_v61 = vshll.u32 %v14281_v7, 23  ;;  %v14279_v23 = vor.u32 %v14278_v20, %v14277_v57 }
 0x793   :  { %v14283_v13 = vor.u32 4788187, %v14282_v61  ;;  %v14286_v2 = vcvt.s32.f32 %v14279_v23 }
 0x795   :  { %v14284_v14 = vand.u32 2147483647, %v14283_v13 }
 0x797   :  { %v14287_v48 = vmul.f32 %v14286_v2, %v14284_v14 }
 0x799   :  { %v14288_v22 = vxor.u32 2147483648, %v14287_v48 }
 0x79b   :  { %v14289_v45 = vsel %vm14206_vm14, %v14288_v22, %v14287_v48 }
 0x79c   :  { %v14292_v36 = vsel %vm14205_vm15, %v25841_v39, %v14289_v45 }
 0x79d   :  { %20921 = vcosq.f32 %v14292_v36 }
 0x79e   :  { %20923 = vsinq.f32 %v14292_v36 }
 0x7a7   :  { %v20922_v25 = vpop.eup %20921 }
 0x7a8   :  { %v20924_v58 = vpop.eup %20923  ;;  %v14304_v30 = vxor.u32 2147483648, %v20922_v25 }
 0x7a9   :  { %v14301_v50 = vxor.u32 2147483648, %v20924_v58 }
 0x7aa   :  { %v14305_v24 = vsel %vm14303_vm1, %v14304_v30, %v20924_v58 }
 0x7ab   :  { %v14302_v15 = vsel %vm14300_vm0, %v20922_v25, %v14301_v50 }
 0x7ac   :  { %v14306_v3 = vsel %vm14299_vm2, %v14302_v15, %v14305_v24 }
 0x7ad   :  { %v14307_v32 = vsel %vm14296_vm3, nan, %v14306_v3 }
 0x7ae   :  { %v14315_v46 = vmul.f32 %v14457_v37, %v14307_v32 }
 0x7f9   :  { %v14145_v42 = vpop.permute.xlu1 %14144 }
 0x7fa   :  { %v14152_v4 = vsel %vm14151_vm6, %v14150_v63, %v14145_v42 }
 0x7fb   :  { %v14316_v28 = vadd.f32 %v14315_v46, %v14152_v4 }
 0x7fd   :  { %14317 = vst [vmem:[%s25891_s6] sm:$0xff] %v14316_v28 }
 0x7fe   :  { %14322 = vsyncpa [#allocation3], 1 }

// kernel: run.1
= control target key start
LH: loop header
LB: loop body
LE: loop exit
PB: predicated region body
PF: predicated region fallthrough
CT: control target
= control target key end

     0   :  { %11 = vsyncpa [#allocation3], 0  ;;  %s8687_s0 = inlined_call_operand.vmem [shape: f32[8,1], index: 0, kind: input, shape index: {}]   ;;  %s8688_s1 = inlined_call_operand.hbm [shape: f32[1024,32], index: 1, kind: input, shape index: {}]   ;;  %s8689_s2 = inlined_call_operand.vmem [shape: f32[1,1024], index: 2, kind: input, shape index: {}]   ;;  %s8690_s3 = inlined_call_operand.vmem [shape: f32[1,32], index: 3, kind: input, shape index: {}]   ;;  %s8691_s4 = inlined_call_operand.vmem [shape: f32[1,32], index: 4, kind: input, shape index: {}]   ;;  %s8692_s5 = inlined_call_operand.vmem [shape: f32[1,32], index: 5, kind: input, shape index: {}]   ;;  %s8693_s6 = inlined_call_operand.hbm [shape: f32[8,32], index: 6, kind: output, shape index: {}]  }
   0x1   :  { %12 = vsyncpa [#allocation4], 0  ;;  %s5577_s21 = smov [#allocation2]   ;;  %s5529_s25 = scalar_lea.hbm %s8688_s1, 16384 }
   0x2   :  { %s20_s22 = sshll.u32 %s5577_s21, 4  ;;  %p5530_p0 = scmp.ne.s32.totalorder %s8688_s1, %s5529_s25  ;;  %s21_s22 = int_to_ptr.vmem [resolvable:$true] %s20_s22 }
   0x3   :  { %p5533_p1 = scmp.lt.u32.totalorder %s5529_s25, %s8688_s1 }
   0x5   :  { %p5535_p2 = pnand %p5533_p1, %p5530_p0 }
   0x7   :  { %5538 = shalt.err (!%p5535_p2)
}
   0x8   :  { %s5539_s30 = scalar_lea.vmem %s21_s22, 16384  ;;  %p5544_p4 = scmp.lt.s32.totalorder %s21_s22, %s21_s22 }
   0x9   :  { %p5540_p3 = scmp.ne.s32.totalorder %s21_s22, %s5539_s30  ;;  %p5545_p5 = scmp.lt.s32.totalorder %s5539_s30, %s5539_s30 }
   0xb   :  { %p5546_p6 = por %p5545_p5, %p5544_p4 }
   0xd   :  { %p5547_p7 = pnand %p5546_p6, %p5540_p3 }
   0xf   :  { %5550 = shalt.err (!%p5547_p7)
}
  0x10   :  { %s5578_s7 = smov 128   ;;  %s5579_s8 = smov 8  }
  0x11   :  { %26 = dma.hbm_to_vmem [thread:$0]  %s8688_s1, 16384, %s21_s22, [#allocation3], %s5578_s7, %s5578_s7, %s5579_s8  }
  0x12   :  { %5573 = dma.done.wait [#allocation3], 16384  }
  0x13   :  { %5574 = vsyncadd [#allocation3], 4294950912  ;;  %v5580_v0 = vmov 0   ;;  %v5640_v1 = vld [vmem:[%s8687_s0] sm:$0xff]  ;;  %v5644_v3 = vld [vmem:[#allocation2 + $0x88] sm:$0xff] }
  0x14   :  { %5522 = vset.pattern.permute.xlu0 %v5580_v0  ;;  %v5642_v2 = vld [vmem:[#allocation2 + $0x80] sm:$0xff]  ;;  %v39_v4 = vand.u32 2147483647, %v5640_v1  ;;  %v445_v6 = vand.u32 4294901760, %v5644_v3  ;;  %v48_v8 = vand.u32 2147483648, %v5640_v1  ;;  %v5652_v9 = vld [vmem:[#allocation2 + $0x8] sm:$0xff] }
  0x15   :  { %v442_v5 = vand.u32 4294901760, %v5642_v2  ;;  %v5649_v7 = vld [vmem:[#allocation2] sm:$0xff]  ;;  %v5655_v11 = vld [vmem:[#allocation2 + $0x90] sm:$0xff]  ;;  %v5657_v12 = vld [vmem:[#allocation2 + $0x98] sm:$0xff]  ;;  %v397_v16 = vand.u32 4294901760, %v5652_v9 }
  0x16   :  { %v394_v10 = vand.u32 4294901760, %v5649_v7  ;;  %v41_v13 = vmul.f32 0.0001, %v39_v4  ;;  %v5665_v15 = vsub.f32 %v5644_v3, %v445_v6  ;;  %v5668_v17 = vld [vmem:[#allocation2 + $0x10] sm:$0xff]  ;;  %v5670_v18 = vld [vmem:[#allocation2 + $0x18] sm:$0xff]  ;;  %v448_v20 = vand.u32 4294901760, %v5655_v11 }
  0x17   :  { %v5662_v14 = vsub.f32 %v5642_v2, %v442_v5  ;;  %v451_v21 = vand.u32 4294901760, %v5657_v12  ;;  %v400_v22 = vand.u32 4294901760, %v5668_v17  ;;  %v5683_v26 = vsub.f32 %v5652_v9, %v397_v16  ;;  %v5724_v47 = vld [vmem:[#allocation2 + $0xa0] sm:$0xff]  ;;  %v5731_v51 = vld [vmem:[#allocation2 + $0xa8] sm:$0xff]  ;;  %v5742_v62 = vld [vmem:[#allocation2 + $0xb0] sm:$0xff] }
  0x18   :  { %v5675_v19 = vsub.f32 %v5649_v7, %v394_v10  ;;  %v42_v23 = vfloor.f32 %v41_v13  ;;  %v8700_v25 = vand.u32 4294901760, %v5665_v15  ;;  %v5689_v28 = vsub.f32 %v5655_v11, %v448_v20  ;;  %v5736_v56 = vld [vmem:[#allocation2 + $0x20] sm:$0xff]  ;;  %v5740_v61 = vld [vmem:[#allocation2 + $0x28] sm:$0xff] }
  0x19   :  { %v8701_v24 = vand.u32 4294901760, %v5662_v14  ;;  %v5694_v29 = vsub.f32 %v5657_v12, %v451_v21  ;;  %v403_v30 = vand.u32 4294901760, %v5670_v18  ;;  %v8698_v34 = vand.u32 4294901760, %v5683_v26 }
  0x1a   :  { %v8699_v27 = vand.u32 4294901760, %v5675_v19  ;;  %v43_v31 = vmul.f32 10000.0, %v42_v23  ;;  %v628_v33 = vsub.f32 %v5665_v15, %v8700_v25  ;;  %v8697_v36 = vand.u32 4294901760, %v5689_v28 }
  0x1b   :  { %v621_v32 = vsub.f32 %v5662_v14, %v8701_v24  ;;  %v8696_v37 = vand.u32 4294901760, %v5694_v29  ;;  %v5712_v38 = vsub.f32 %v5668_v17, %v400_v22  ;;  %v516_v42 = vsub.f32 %v5683_v26, %v8698_v34  ;;  %v5859_v34 = vld [vmem:[#allocation2 + $0x48] sm:$0xff] }
  0x1c   :  { %v509_v35 = vsub.f32 %v5675_v19, %v8699_v27  ;;  %v44_v39 = vsub.f32 %v39_v4, %v43_v31  ;;  %v629_v41 = vand.u32 4294901760, %v628_v33  ;;  %v635_v44 = vsub.f32 %v5689_v28, %v8697_v36 }
  0x1d   :  { %v622_v40 = vand.u32 4294901760, %v621_v32  ;;  %v642_v45 = vsub.f32 %v5694_v29, %v8696_v37  ;;  %v8695_v46 = vand.u32 4294901760, %v5712_v38  ;;  %v517_v49 = vand.u32 4294901760, %v516_v42 }
  0x1e   :  { %v510_v43 = vand.u32 4294901760, %v509_v35  ;;  %vm45_vm0 = vcmp.eq.f32.partialorder %v44_v39, 10000.0  ;;  %v5729_v50 = vsub.f32 %v5670_v18, %v403_v30  ;;  %v636_v53 = vand.u32 4294901760, %v635_v44 }
  0x1f   :  { %v4769_v48 = vpack.c.bf16 %v629_v41, %v622_v40  ;;  %v46_v52 = vsel %vm45_vm0, 0.0, %v44_v39  ;;  %v643_v54 = vand.u32 4294901760, %v642_v45  ;;  %v523_v55 = vsub.f32 %v5712_v38, %v8695_v46 }
  0x20   :  { %v47_v57 = vand.u32 2147483647, %v46_v52  ;;  %v4771_v58 = vpack.c.bf16 %v517_v49, %v510_v43  ;;  %v8694_v59 = vand.u32 4294901760, %v5729_v50  ;;  %v454_v60 = vand.u32 4294901760, %v5724_v47  ;;  %v5800_v49 = vld [vmem:[#allocation2 + $0x30] sm:$0xff] }
  0x21   :  { %4770 = vmatprep.subr.bf16.mxu1 %v4769_v48  ;;  %v4773_v63 = vpack.c.bf16 %v643_v54, %v636_v53  ;;  %v524_v0 = vand.u32 4294901760, %v523_v55  ;;  %v457_v1 = vand.u32 4294901760, %v5731_v51  ;;  %v5747_v3 = vpack.c.bf16 %v445_v6, %v442_v5 }
  0x22   :  { %v49_v4 = vor.u32 %v48_v8, %v47_v57  ;;  %4772 = vmatpush3.bf16.msra.mxu1 %v4771_v58  ;;  %v530_v9 = vsub.f32 %v5729_v50, %v8694_v59  ;;  %v5755_v13 = vsub.f32 %v5724_v47, %v454_v60  ;;  %v406_v23 = vand.u32 4294901760, %v5736_v56  ;;  %v5769_v8 = vld [vmem:[#allocation2 + $0xb8] sm:$0xff] }
  0x23   :  { %4774 = vmatprep.subr.bf16.mxu1 %v4773_v63  ;;  %v5761_v2 = vsub.f32 %v5731_v51, %v457_v1  ;;  %4738 = vmatprep.subr.bf16.mxu0 %v5747_v3  ;;  %v409_v5 = vand.u32 4294901760, %v5740_v61  ;;  %v5767_v6 = vpack.c.bf16 %v397_v16, %v394_v10  ;;  %v460_v31 = vand.u32 4294901760, %v5742_v62  ;;  %v5815_v57 = vld [vmem:[#allocation2 + $0x38] sm:$0xff] }
  0x24   :  { %vm50_vm1 = vcmp.ne.f32.partialorder %v49_v4, 0.0  ;;  %vm51_vm2 = vcmp.lt.f32.partialorder %v49_v4, 0.0  ;;  %v53_v32 = vadd.f32 10000.0, %v49_v4  ;;  %v531_v33 = vand.u32 4294901760, %v530_v9  ;;  %v5885_v47 = vld [vmem:[#allocation2 + $0xd8] sm:$0xff] }
  0x25   :  { %vm52_vm3 = vmand %vm51_vm2, %vm50_vm1  ;;  %v8715_v35 = vand.u32 4294901760, %v5755_v13  ;;  %v8712_v39 = vand.u32 4294901760, %v5761_v2  ;;  %v5777_v40 = vsub.f32 %v5736_v56, %v406_v23  ;;  %v5782_v7 = vsub.f32 %v5740_v61, %v409_v5  ;;  %4740 = vmatpush3.bf16.msra.mxu0 %v5767_v6 }
  0x26   :  { %v54_v10 = vsel %vm52_vm3, %v53_v32, %v49_v4  ;;  %v4775_v16 = vpack.c.bf16 %v531_v33, %v524_v0  ;;  %v463_v41 = vand.u32 4294901760, %v5769_v8  ;;  %v5789_v42 = vsub.f32 %v5742_v62, %v460_v31 }
  0x27   :  { %v5791_v43 = vmul.f32 0.0001, %v54_v10  ;;  %v649_v44 = vsub.f32 %v5755_v13, %v8715_v35  ;;  %v656_v45 = vsub.f32 %v5761_v2, %v8712_v39  ;;  %v8710_v48 = vand.u32 4294901760, %v5777_v40 }
  0x28   :  { %4776 = vmatpush3.bf16.msra.mxu1 %v4775_v16  ;;  %v8708_v52 = vand.u32 4294901760, %v5782_v7  ;;  %v8707_v53 = vand.u32 4294901760, %v5789_v42  ;;  %v5807_v54 = vsub.f32 %v5769_v8, %v463_v41  ;;  %v5813_v55 = vpack.c.bf16 %v451_v21, %v448_v20  ;;  %v5830_v21 = vld [vmem:[#allocation2 + $0xc0] sm:$0xff] }
  0x29   :  { %v57_v58 = vmul.f32 1000.0, %v5791_v43  ;;  %v650_v63 = vand.u32 4294901760, %v649_v44  ;;  %v657_v0 = vand.u32 4294901760, %v656_v45  ;;  %v537_v4 = vsub.f32 %v5777_v40, %v8710_v48  ;;  %v5833_v44 = vld [vmem:[#allocation2 + $0xc8] sm:$0xff] }
  0x2a   :  { %v544_v9 = vsub.f32 %v5782_v7, %v8708_v52  ;;  %v663_v11 = vsub.f32 %v5789_v42, %v8707_v53  ;;  %v8705_v12 = vand.u32 4294901760, %v5807_v54  ;;  %4742 = vmatprep.subr.bf16.mxu0 %v5813_v55  ;;  %v412_v20 = vand.u32 4294901760, %v5800_v49 }
  0x2b   :  { %v58_v32 = vfloor.f32 %v57_v58  ;;  %v4777_v33 = vpack.c.bf16 %v657_v0, %v650_v63  ;;  %v538_v10 = vand.u32 4294901760, %v537_v4  ;;  %v415_v16 = vand.u32 4294901760, %v5815_v57  ;;  %v5855_v4 = vld [vmem:[#allocation2 + $0x40] sm:$0xff] }
  0x2c   :  { %v545_v45 = vand.u32 4294901760, %v544_v9  ;;  %v664_v59 = vand.u32 4294901760, %v663_v11  ;;  %v670_v46 = vsub.f32 %v5807_v54, %v8705_v12  ;;  %v5841_v37 = vsub.f32 %v5800_v49, %v412_v20 }
  0x2d   :  { %v59_v36 = vmax.f32 %v58_v32, 0.0  ;;  %4778 = vmatprep.subr.bf16.mxu1 %v4777_v33  ;;  %v5846_v58 = vsub.f32 %v5815_v57, %v415_v16  ;;  %v5852_v63 = vpack.c.bf16 %v403_v30, %v400_v22  ;;  %v466_v0 = vand.u32 4294901760, %v5830_v21  ;;  %v5874_v22 = vld [vmem:[#allocation2 + $0xd0] sm:$0xff] }
  0x2e   :  { %v4779_v9 = vpack.c.bf16 %v545_v45, %v538_v10  ;;  %v671_v11 = vand.u32 4294901760, %v670_v46  ;;  %v8704_v32 = vand.u32 4294901760, %v5841_v37  ;;  %v469_v33 = vand.u32 4294901760, %v5833_v44 }
  0x2f   :  { %v60_v27 = vmin.f32 %v59_v36, 999.0  ;;  %v8703_v25 = vand.u32 4294901760, %v5846_v58  ;;  %4744 = vmatpush3.bf16.msra.mxu0 %v5852_v63  ;;  %v5866_v17 = vsub.f32 %v5830_v21, %v466_v0  ;;  %v5872_v18 = vpack.c.bf16 %v457_v1, %v454_v60 }
  0x30   :  { %4780 = vmatpush3.bf16.msra.mxu1 %v4779_v9  ;;  %v4781_v30 = vpack.c.bf16 %v671_v11, %v664_v59  ;;  %v551_v36 = vsub.f32 %v5841_v37, %v8704_v32  ;;  %v5882_v46 = vsub.f32 %v5833_v44, %v469_v33  ;;  %v418_v10 = vand.u32 4294901760, %v5855_v4  ;;  %v91_v44 = vld [vmem:[#allocation2 + $0xf0] sm:$0xff] }
  0x31   :  { %192 = vperm.xlu0 %5522, %v60_v27   ;;  %v558_v51 = vsub.f32 %v5846_v58, %v8703_v25  ;;  %v8702_v59 = vand.u32 4294901760, %v5866_v17  ;;  %4746 = vmatprep.subr.bf16.mxu0 %v5872_v18  ;;  %v421_v60 = vand.u32 4294901760, %v5859_v34  ;;  %v5897_v1 = vpack.c.bf16 %v409_v5, %v406_v23  ;;  %v5916_v5 = vld [vmem:[#allocation2 + $0x50] sm:$0xff]  ;;  %v5933_v25 = vld [vmem:[#allocation2 + $0x58] sm:$0xff] }
  0x32   :  { %4782 = vmatprep.subr.bf16.mxu1 %v4781_v30  ;;  %v552_v45 = vand.u32 4294901760, %v551_v36  ;;  %v8706_v27 = vand.u32 4294901760, %v5882_v46  ;;  %v5903_v9 = vsub.f32 %v5855_v4, %v418_v10  ;;  %v472_v11 = vand.u32 4294901760, %v5874_v22 }
  0x33   :  { %v559_v24 = vand.u32 4294901760, %v558_v51  ;;  %v677_v56 = vsub.f32 %v5866_v17, %v8702_v59  ;;  %v5912_v61 = vsub.f32 %v5859_v34, %v421_v60  ;;  %4748 = vmatpush3.bf16.msra.mxu0 %v5897_v1  ;;  %v8721_v23 = vand.u32 4294901760, %v5885_v47 }
  0x34   :  { %v684_v30 = vsub.f32 %v5882_v46, %v8706_v27  ;;  %v8709_v36 = vand.u32 4294901760, %v5903_v9  ;;  %v5925_v51 = vsub.f32 %v5874_v22, %v472_v11  ;;  %v5931_v59 = vpack.c.bf16 %v463_v41, %v460_v31 }
  0x35   :  { %263 = vperm.xlu0 %5522, %v5791_v43   ;;  %v4783_v32 = vpack.c.bf16 %v559_v24, %v552_v45  ;;  %v678_v12 = vand.u32 4294901760, %v677_v56  ;;  %v8711_v27 = vand.u32 4294901760, %v5912_v61  ;;  %v5940_v53 = vsub.f32 %v5885_v47, %v8721_v23  ;;  %v5948_v24 = vld [vmem:[#allocation2 + $0xe0] sm:$0xff] }
  0x36   :  { %8988 = vst [vmem:[#allocation8_spill] sm:$0xff] %v5931_v59  ;;  %v685_v52 = vand.u32 4294901760, %v684_v30  ;;  %v565_v62 = vsub.f32 %v5903_v9, %v8709_v36  ;;  %v8714_v8 = vand.u32 4294901760, %v5925_v51  ;;  %4750 = vmatprep.subr.bf16.mxu0 %v5931_v59  ;;  %v8717_v31 = vand.u32 4294901760, %v5916_v5  ;;  %v5961_v30 = vld [vmem:[#allocation2 + $0xe8] sm:$0xff] }
  0x37   :  { %4784 = vmatpush3.bf16.msra.mxu1 %v4783_v32  ;;  %v572_v41 = vsub.f32 %v5912_v61, %v8711_v27  ;;  %v8713_v43 = vand.u32 4294901760, %v5940_v53  ;;  %v8716_v45 = vand.u32 4294901760, %v5933_v25  ;;  %v5959_v56 = vpack.c.bf16 %v415_v16, %v412_v20  ;;  %v5983_v20 = vld [vmem:[#allocation2 + $0x68] sm:$0xff] }
  0x38   :  { %v4785_v36 = vpack.c.bf16 %v685_v52, %v678_v12  ;;  %v566_v48 = vand.u32 4294901760, %v565_v62  ;;  %v691_v32 = vsub.f32 %v5925_v51, %v8714_v8  ;;  %v5969_v27 = vsub.f32 %v5916_v5, %v8717_v31  ;;  %v5981_v12 = vld [vmem:[#allocation2 + $0x60] sm:$0xff] }
  0x39   :  { %8989 = vst [vmem:[#allocation9_spill] sm:$0xff] %v5959_v56  ;;  %v573_v39 = vand.u32 4294901760, %v572_v41  ;;  %v698_v49 = vsub.f32 %v5940_v53, %v8713_v43  ;;  %v5977_v57 = vsub.f32 %v5933_v25, %v8716_v45  ;;  %4752 = vmatpush3.bf16.msra.mxu0 %v5959_v56  ;;  %v8720_v52 = vand.u32 4294901760, %v5948_v24 }
  0x3a   :  { %4786 = vmatprep.subr.bf16.mxu1 %v4785_v36  ;;  %v692_v16 = vand.u32 4294901760, %v691_v32  ;;  %v8718_v62 = vand.u32 4294901760, %v5969_v27  ;;  %v8719_v41 = vand.u32 4294901760, %v5961_v30  ;;  %v5991_v43 = vpack.c.bf16 %v469_v33, %v466_v0  ;;  %v92_v0 = vld [vmem:[#allocation2 + $0xf8] sm:$0xff] }
  0x3b   :  { %v4787_v8 = vpack.c.bf16 %v573_v39, %v566_v48  ;;  %v699_v35 = vand.u32 4294901760, %v698_v49  ;;  %v8723_v45 = vand.u32 4294901760, %v5977_v57  ;;  %v5997_v31 = vsub.f32 %v5948_v24, %v8720_v52 }
  0x3c   :  { %8990 = vst [vmem:[#allocation10_spill] sm:$0xff] %v5991_v43  ;;  %v579_v36 = vsub.f32 %v5969_v27, %v8718_v62  ;;  %v6005_v21 = vsub.f32 %v5961_v30, %v8719_v41  ;;  %4754 = vmatprep.subr.bf16.mxu0 %v5991_v43  ;;  %v430_v39 = vand.u32 4294901760, %v5981_v12  ;;  %v433_v48 = vand.u32 4294901760, %v5983_v20 }
  0x3d   :  { %4788 = vmatpush3.bf16.msra.mxu1 %v4787_v8  ;;  %v4789_v33 = vpack.c.bf16 %v699_v35, %v692_v16  ;;  %v586_v32 = vsub.f32 %v5977_v57, %v8723_v45  ;;  %v8722_v49 = vand.u32 4294901760, %v5997_v31  ;;  %v6018_v62 = vpack.c.bf16 %v421_v60, %v418_v10  ;;  %v75_v10 = vld [vmem:[#allocation2 + $0x70] sm:$0xff] }
  0x3e   :  { %v580_v41 = vand.u32 4294901760, %v579_v36  ;;  %v8730_v52 = vand.u32 4294901760, %v6005_v21  ;;  %v6022_v23 = vsub.f32 %v5981_v12, %v430_v39  ;;  %v6025_v35 = vsub.f32 %v5983_v20, %v433_v48 }
  0x3f   :  { %8991 = vst [vmem:[#allocation11_spill] sm:$0xff] %v6018_v62  ;;  %4790 = vmatprep.subr.bf16.mxu1 %v4789_v33  ;;  %v587_v8 = vand.u32 4294901760, %v586_v32  ;;  %v705_v16 = vsub.f32 %v5997_v31, %v8722_v49  ;;  %4756 = vmatpush3.bf16.msra.mxu0 %v6018_v62  ;;  %v484_v34 = vand.u32 4294901760, %v91_v44  ;;  %v487_v4 = vand.u32 4294901760, %v92_v0  ;;  %v76_v32 = vld [vmem:[#allocation2 + $0x78] sm:$0xff] }
  0x40   :  { %v712_v60 = vsub.f32 %v6005_v21, %v8730_v52  ;;  %v8731_v12 = vand.u32 4294901760, %v6022_v23  ;;  %v8734_v20 = vand.u32 4294901760, %v6025_v35  ;;  %v8992_v36 = vand.u32 4294901760, %v5885_v47 }
  0x41   :  { %v4791_v49 = vpack.c.bf16 %v587_v8, %v580_v41  ;;  %v706_v45 = vand.u32 4294901760, %v705_v16  ;;  %v6042_v62 = vsub.f32 %v91_v44, %v484_v34  ;;  %v6044_v43 = vsub.f32 %v92_v0, %v487_v4 }
  0x42   :  { %v6040_v33 = vpack.c.bf16 %v8992_v36, %v472_v11  ;;  %v713_v56 = vand.u32 4294901760, %v712_v60  ;;  %v593_v52 = vsub.f32 %v6022_v23, %v8731_v12  ;;  %v600_v22 = vsub.f32 %v6025_v35, %v8734_v20 }
  0x43   :  { %v436_v47 = vand.u32 4294901760, %v75_v10  ;;  %4792 = vmatpush3.bf16.msra.mxu1 %v4791_v49  ;;  %v8737_v11 = vand.u32 4294901760, %v6042_v62  ;;  %v725_v41 = vand.u32 4294901760, %v6044_v43  ;;  %v439_v44 = vand.u32 4294901760, %v76_v32 }
  0x44   :  { %8993 = vst [vmem:[#allocation12_spill] sm:$0xff] %v6040_v33  ;;  %4758 = vmatprep.subr.bf16.mxu0 %v6040_v33  ;;  %v8994_v0 = vand.u32 4294901760, %v5916_v5  ;;  %v8995_v8 = vand.u32 4294901760, %v5933_v25  ;;  %v4793_v60 = vpack.c.bf16 %v713_v56, %v706_v45  ;;  %v594_v36 = vand.u32 4294901760, %v593_v52 }
  0x45   :  { %v601_v12 = vand.u32 4294901760, %v600_v22  ;;  %v6061_v59 = vsub.f32 %v75_v10, %v436_v47  ;;  %v719_v49 = vsub.f32 %v6042_v62, %v8737_v11  ;;  %v726_v20 = vsub.f32 %v6044_v43, %v725_v41 }
  0x46   :  { %v6059_v16 = vpack.c.bf16 %v8995_v8, %v8994_v0  ;;  %v6067_v33 = vsub.f32 %v76_v32, %v439_v44  ;;  %4794 = vmatprep.subr.bf16.mxu1 %v4793_v60  ;;  %v8997_v10 = vand.u32 4294901760, %v5948_v24  ;;  %v8998_v22 = vand.u32 4294901760, %v5961_v30 }
  0x47   :  { %v4795_v5 = vpack.c.bf16 %v601_v12, %v594_v36  ;;  %v606_v25 = vand.u32 4294901760, %v6061_v59  ;;  %v720_v0 = vand.u32 4294901760, %v719_v49  ;;  %v727_v45 = vand.u32 4294901760, %v726_v20 }
  0x48   :  { %8996 = vst [vmem:[#allocation13_spill] sm:$0xff] %v6059_v16  ;;  %4760 = vmatpush3.bf16.msra.mxu0 %v6059_v16  ;;  %v613_v56 = vand.u32 4294901760, %v6067_v33  ;;  %v6077_v8 = vpack.c.bf16 %v8998_v22, %v8997_v10  ;;  %v6079_v32 = vpack.c.bf16 %v433_v48, %v430_v39  ;;  %v6083_v20 = vpack.c.bf16 %v487_v4, %v484_v34 }
  0x49   :  { %4796 = vmatpush3.bf16.msra.mxu1 %v4795_v5  ;;  %v607_v52 = vsub.f32 %v6061_v59, %v606_v25  ;;  %v4797_v11 = vpack.c.bf16 %v727_v45, %v720_v0  ;;  %v6087_v24 = vpack.c.bf16 %v439_v44, %v436_v47  ;;  %v4801_v30 = vpack.c.bf16 %v5665_v15, %v5662_v14 }
  0x4a   :  { %8999 = vst [vmem:[#allocation14_spill] sm:$0xff] %v6077_v8  ;;  %9000 = vst [vmem:[#allocation15_spill] sm:$0xff] %v6079_v32  ;;  %v614_v12 = vsub.f32 %v6067_v33, %v613_v56  ;;  %4762 = vmatprep.subr.bf16.mxu0 %v6077_v8  ;;  %v4803_v48 = vpack.c.bf16 %v5683_v26, %v5675_v19  ;;  %v9006_v45 = vand.u32 4294901760, %v5782_v7  ;;  %v9007_v22 = vand.u32 4294901760, %v5789_v42 }
  0x4b   :  { %v608_v60 = vand.u32 4294901760, %v607_v52  ;;  %9001 = vst [vmem:[#allocation16_spill] sm:$0xff] %v6083_v20  ;;  %4798 = vmatprep.subr.bf16.mxu1 %v4797_v11  ;;  %9002 = vst [vmem:[#allocation17_spill] sm:$0xff] %v6087_v24  ;;  %v9005_v52 = vand.u32 4294901760, %v5777_v40  ;;  %v9008_v0 = vand.u32 4294901760, %v5807_v54  ;;  %v9011_v5 = vand.u32 4294901760, %v5846_v58 }
  0x4c   :  { %v615_v36 = vand.u32 4294901760, %v614_v12  ;;  %4764 = vmatpush3.bf16.msra.mxu0 %v6079_v32 }
  0x4d   :  { %4766 = vmatprep.subr.bf16.mxu0 %v6083_v20  ;;  %v6133_v10 = vpack.c.bf16 %v9006_v45, %v9005_v52  ;;  %v6139_v12 = vpack.c.bf16 %v9008_v0, %v9007_v22  ;;  %v9016_v45 = vand.u32 4294901760, %v5903_v9  ;;  %v9017_v52 = vand.u32 4294901760, %v5912_v61 }
  0x4e   :  { %v4799_v39 = vpack.c.bf16 %v615_v36, %v608_v60  ;;  %v9003_v36 = vand.u32 4294901760, %v5755_v13  ;;  %v9010_v60 = vand.u32 4294901760, %v5841_v37  ;;  %v9019_v0 = vand.u32 4294901760, %v5925_v51 }
  0x4f   :  { %9009 = vst [vmem:[#allocation18_spill] sm:$0xff] %v6139_v12  ;;  %v6157_v47 = vpack.c.bf16 %v9017_v52, %v9016_v45  ;;  %v9020_v22 = vand.u32 4294901760, %v5940_v53  ;;  %v9028_v45 = vand.u32 4294901760, %v6022_v23  ;;  %v9029_v52 = vand.u32 4294901760, %v6025_v35  ;;  %v6309_v12 = vld [vmem:[#allocation2 + $0x118] sm:$0xff] }
  0x50   :  { %4800 = vmatpush3.bf16.msra.mxu1 %v4799_v39  ;;  %4768 = vmatpush3.bf16.msra.mxu0 %v6087_v24  ;;  %v6145_v44 = vpack.c.bf16 %v9011_v5, %v9010_v60  ;;  %v9022_v5 = vand.u32 4294901760, %v5969_v27  ;;  %v9023_v60 = vand.u32 4294901760, %v5977_v57 }
  0x51   :  { %4834 = vmatprep.subr.bf16.mxu1 %v5747_v3  ;;  %4802 = vmatprep.subr.bf16.mxu0 %v4801_v30  ;;  %v9004_v30 = vand.u32 4294901760, %v5761_v2  ;;  %9018 = vst [vmem:[#allocation21_spill] sm:$0xff] %v6157_v47  ;;  %v6163_v4 = vpack.c.bf16 %v9020_v22, %v9019_v0  ;;  %v6181_v47 = vpack.c.bf16 %v9029_v52, %v9028_v45  ;;  %v9031_v0 = vand.u32 4294901760, %v6042_v62 }
  0x52   :  { %9012 = vst [vmem:[#allocation19_spill] sm:$0xff] %v6145_v44  ;;  %v6169_v34 = vpack.c.bf16 %v9023_v60, %v9022_v5  ;;  %v196_v5 = vlaneseq  ;;  %v6284_v44 = vld [vmem:[#allocation2 + $0x1f0] sm:$0xff] }
  0x53   :  { %v6127_v39 = vpack.c.bf16 %v9004_v30, %v9003_v36  ;;  %v9013_v36 = vand.u32 4294901760, %v5866_v17  ;;  %v9014_v30 = vand.u32 4294901760, %v5882_v46  ;;  %9021 = vst [vmem:[#allocation22_spill] sm:$0xff] %v6163_v4  ;;  %9030 = vst [vmem:[#allocation25_spill] sm:$0xff] %v6181_v47  ;;  %v6185_v22 = vpack.c.bf16 %v725_v41, %v9031_v0 }
  0x54   :  { %9024 = vst [vmem:[#allocation23_spill] sm:$0xff] %v6169_v34  ;;  %v6187_v4 = vpack.c.bf16 %v613_v56, %v606_v25  ;;  %v6189_v60 = vshrl.u32 %v196_v5, 7  ;;  %v8738_v56 = vmov 0.0   ;;  %v8740_v0 = vmov 1.0  }
  0x55   :  { %v6151_v11 = vpack.c.bf16 %v9014_v30, %v9013_v36  ;;  %v9025_v36 = vand.u32 4294901760, %v5997_v31  ;;  %v9026_v30 = vand.u32 4294901760, %v6005_v21  ;;  %9032 = vst [vmem:[#allocation26_spill] sm:$0xff] %v6185_v22 }
  0x56   :  { %9033 = vst [vmem:[#allocation27_spill] sm:$0xff] %v6187_v4  ;;  %9034 = vst [vmem:[#allocation28_spill] sm:$0xff] %v6189_v60  ;;  %v202_v34 = vsub.s32 1, %v6189_v60 }
  0x57   :  { %9015 = vst [vmem:[#allocation20_spill] sm:$0xff] %v6151_v11  ;;  %v6175_v49 = vpack.c.bf16 %v9026_v30, %v9025_v36  ;;  %v198_v36 = vsub.s32 0, %v6189_v60  ;;  %v6196_v30 = vld [vmem:[%s8689_s2] sm:$0xff]  ;;  %v6282_v11 = vld [vmem:[#allocation2 + $0x108] sm:$0xff] }
  0x58   :  { %v6199_v45 = vrot.slane %v6196_v30, %v202_v34 }
  0x59   :  { %9027 = vst [vmem:[#allocation24_spill] sm:$0xff] %v6175_v49  ;;  %v6202_v41 = vrot.slane %v6196_v30, %v198_v36  ;;  %v6261_v49 = vld [vmem:[#allocation2 + $0x180] sm:$0xff] }
  0x5b   :  { %9035 = vst [vmem:[#allocation29_spill] sm:$0xff] %v6202_v41 }
  0xb0   :  { %v6204_v25 = vpop.permute.xlu0 %192 }
  0xb1   :  { %9036 = vst [vmem:[#allocation30_spill] sm:$0xff] %v6204_v25  ;;  %vm237_vm4 = vcmp.eq.f32.partialorder %v6204_v25, %v6199_v45  ;;  %vm236_vm5 = vcmp.eq.f32.partialorder %v6204_v25, %v6202_v41  ;;  %v9039_v41 = vld [vmem:[#allocation9_spill] sm:$0xff] }
  0xb2   :  { %v3859_v52 = vsel %vm237_vm4, 1.0, %v8738_v56  ;;  %3873 = vmatprep.mubr.msk.f32.mxu1 %vm237_vm4, %v8740_v0  ;;  %v3858_v34 = vsel %vm236_vm5, 1.0, %v8738_v56 }
  0xb3   :  { %v490_v5 = vsub.f32 %v3859_v52, %v3859_v52  ;;  %v6222_v36 = vsub.f32 %v3858_v34, %v3858_v34  ;;  %3874 = vmatmul.mubr.msk.f32.vlgmr.msra.gmra.mrb[0].mxu1 %vm236_vm5, %v8740_v0  ;;  %v9037_v0 = vld [vmem:[#allocation8_spill] sm:$0xff] }
  0xb4   :  { %4836 = vmatpush3.bf16.msra.mxu1 %v5767_v6 }
  0xb5   :  { %4838 = vmatprep.subr.bf16.mxu1 %v5813_v55  ;;  %v491_v4 = vand.u32 4294901760, %v490_v5  ;;  %v8744_v22 = vand.u32 4294901760, %v6222_v36 }
  0xb7   :  { %974 = vmatprep.mubr.f32.mxu1 %v491_v4  ;;  %v492_v47 = vsub.f32 %v490_v5, %v491_v4  ;;  %v498_v52 = vsub.f32 %v6222_v36, %v8744_v22  ;;  %v9038_v4 = vpack.c.bf16 %v5694_v29, %v5689_v28  ;;  %v9040_v22 = vpack.c.bf16 %v5729_v50, %v5712_v38 }
  0xb8   :  { %4840 = vmatpush3.bf16.msra.mxu1 %v5852_v63 }
  0xb9   :  { %4842 = vmatprep.subr.bf16.mxu1 %v5872_v18  ;;  %v493_v34 = vand.u32 4294901760, %v492_v47  ;;  %v499_v56 = vand.u32 4294901760, %v498_v52  ;;  %v9041_v47 = vld [vmem:[#allocation10_spill] sm:$0xff]  ;;  %v9042_v52 = vpack.c.bf16 %v5761_v2, %v5755_v13  ;;  %v6264_v13 = vld [vmem:[#allocation2 + $0x188] sm:$0xff]  ;;  %v6266_v2 = vld [vmem:[#allocation2 + $0x160] sm:$0xff] }
  0xba   :  { %9049 = vst [vmem:[#allocation10_spill] sm:$0xff] %v6266_v2 }
  0xbb   :  { %494 = vmatprep.mubr.f32.mxu0 %v493_v34  ;;  %v9046_v34 = vpack.c.bf16 %v5807_v54, %v5789_v42  ;;  %v6274_v42 = vld [vmem:[#allocation2 + $0x100] sm:$0xff]  ;;  %v6293_v54 = vld [vmem:[#allocation2 + $0x110] sm:$0xff] }
  0xbc   :  { %4844 = vmatpush3.bf16.msra.mxu1 %v5897_v1  ;;  %500 = vmatmul.mubr.f32.vlgmr.msra.gmra.mrb[0].mxu0 %v499_v56  ;;  %v9044_v56 = vpack.c.bf16 %v5782_v7, %v5777_v40  ;;  %v6268_v40 = vld [vmem:[#allocation2 + $0x168] sm:$0xff]  ;;  %v9051_v7 = vpack.c.bf16 %v5846_v58, %v5841_v37  ;;  %v6286_v37 = vld [vmem:[#allocation2 + $0x1f8] sm:$0xff] }
  0xbd   :  { %4804 = vmatpush3.bf16.msra.mxu0 %v4803_v48  ;;  %867 = vmatprep.mubr.f32.mxu0 %v490_v5  ;;  %v9043_v48 = vld [vmem:[#allocation11_spill] sm:$0xff]  ;;  %v9045_v5 = vld [vmem:[#allocation12_spill] sm:$0xff]  ;;  %9054 = vst [vmem:[#allocation31_spill] sm:$0xff] %v6286_v37 }
  0xbe   :  { %4846 = vmatprep.subr.bf16.mxu1 %v9037_v0  ;;  %4806 = vmatprep.subr.bf16.mxu0 %v9038_v4  ;;  %v6257_v4 = vld [vmem:[#allocation2 + $0x1e0] sm:$0xff]  ;;  %9050 = vst [vmem:[#allocation11_spill] sm:$0xff] %v6268_v40  ;;  %9053 = vst [vmem:[#allocation12_spill] sm:$0xff] %v6284_v44 }
  0xbf   :  { %9047 = vst [vmem:[#allocation8_spill] sm:$0xff] %v6257_v4 }
  0xc0   :  { %4848 = vmatpush3.bf16.msra.mxu1 %v9039_v41 }
  0xc1   :  { %4808 = vmatpush3.bf16.msra.mxu0 %v9040_v22  ;;  %4850 = vmatprep.subr.bf16.mxu1 %v9041_v47  ;;  %v6259_v22 = vld [vmem:[#allocation2 + $0x1e8] sm:$0xff] }
  0xc2   :  { %4810 = vmatprep.subr.bf16.mxu0 %v9042_v52  ;;  %9048 = vst [vmem:[#allocation9_spill] sm:$0xff] %v6259_v22 }
  0xc4   :  { %4852 = vmatpush3.bf16.msra.mxu1 %v9043_v48 }
  0xc5   :  { %4812 = vmatpush3.bf16.msra.mxu0 %v9044_v56  ;;  %4854 = vmatprep.subr.bf16.mxu1 %v9045_v5  ;;  %v9052_v56 = vpack.c.bf16 %v5882_v46, %v5866_v17  ;;  %v9056_v46 = vand.u32 4294901760, %v5662_v14  ;;  %v9059_v17 = vand.u32 4294901760, %v6257_v4  ;;  %v9061_v14 = vand.u32 4294901760, %v6259_v22 }
  0xc6   :  { %4814 = vmatprep.subr.bf16.mxu0 %v9046_v34 }
  0xc7   :  { %v6314_v52 = vsub.f32 %v6257_v4, %v9059_v17 }
  0xc8   :  { %4856 = vmatpush3.bf16.msra.mxu1 %v6059_v16  ;;  %v9058_v16 = vpack.c.bf16 %v5912_v61, %v5903_v9  ;;  %v6323_v9 = vld [vmem:[#allocation2 + $0x170] sm:$0xff]  ;;  %v6325_v61 = vld [vmem:[#allocation2 + $0x178] sm:$0xff] }
  0xc9   :  { %4816 = vmatpush3.bf16.msra.mxu0 %v9051_v7  ;;  %4858 = vmatprep.subr.bf16.mxu1 %v6077_v8  ;;  %v6289_v7 = vld [vmem:[#allocation2 + $0x190] sm:$0xff]  ;;  %v6291_v8 = vld [vmem:[#allocation2 + $0x198] sm:$0xff]  ;;  %9060 = vst [vmem:[#allocation33_spill] sm:$0xff] %v6314_v52  ;;  %9063 = vst [vmem:[#allocation35_spill] sm:$0xff] %v6323_v9 }
  0xca   :  { %4818 = vmatprep.subr.bf16.mxu0 %v9052_v56  ;;  %9055 = vst [vmem:[#allocation32_spill] sm:$0xff] %v6291_v8  ;;  %v9057_v56 = vand.u32 4294901760, %v5665_v15  ;;  %v6319_v15 = vsub.f32 %v6259_v22, %v9061_v14  ;;  %9064 = vst [vmem:[#allocation36_spill] sm:$0xff] %v6325_v61  ;;  %v9068_v22 = vand.u32 4294901760, %v6264_v13  ;;  %v264_v14 = vpop.permute.xlu0 %263 }
  0xcc   :  { %4860 = vmatpush3.bf16.msra.mxu1 %v6079_v32  ;;  %v6302_v34 = vpack.c.bf16 %v9057_v56, %v9056_v46  ;;  %9062 = vst [vmem:[#allocation34_spill] sm:$0xff] %v6319_v15  ;;  %v9066_v46 = vand.u32 4294901760, %v6261_v49  ;;  %v9075_v32 = vand.u32 4294901760, %v6284_v44 }
  0xcd   :  { %4820 = vmatpush3.bf16.msra.mxu0 %v9058_v16  ;;  %4862 = vmatprep.subr.bf16.mxu1 %v6083_v20  ;;  %v9065_v16 = vpack.c.bf16 %v5940_v53, %v5925_v51  ;;  %v6342_v20 = vsub.f32 %v6264_v13, %v9068_v22  ;;  %v9070_v53 = vand.u32 4294901760, %v6266_v2  ;;  %v9072_v22 = vand.u32 4294901760, %v6274_v42 }
  0xce   :  { %v6337_v56 = vsub.f32 %v6261_v49, %v9066_v46  ;;  %v3866_v46 = vld [vmem:[%s8690_s3] ss:$0 sm:$0xff] }
  0xcf   :  { %4822 = vmatprep.subr.bf16.mxu0 %v9065_v16  ;;  %9069 = vst [vmem:[#allocation38_spill] sm:$0xff] %v6342_v20  ;;  %v6347_v51 = vsub.f32 %v6266_v2, %v9070_v53  ;;  %v9071_v16 = vand.u32 4294901760, %v6268_v40  ;;  %v6361_v58 = vsub.f32 %v6274_v42, %v9072_v22  ;;  %v6375_v22 = vsub.f32 %v6284_v44, %v9075_v32 }
  0xd0   :  { %9067 = vst [vmem:[#allocation37_spill] sm:$0xff] %v6337_v56  ;;  %4864 = vmatpush3.bf16.msra.mxu1 %v6087_v24  ;;  %v9076_v53 = vand.u32 4294901760, %v6286_v37  ;;  %v9082_v32 = vand.u32 4294901760, %v6291_v8  ;;  %v9088_v44 = vand.u32 4294901760, %v6319_v15 }
  0xd1   :  { %v6352_v4 = vsub.f32 %v6268_v40, %v9071_v16  ;;  %9073 = vst [vmem:[#allocation39_spill] sm:$0xff] %v6361_v58  ;;  %v9074_v16 = vpack.c.bf16 %v5977_v57, %v5969_v27  ;;  %4898 = vmatprep.subr.bf16.mxu1 %v5747_v3  ;;  %v9077_v27 = vpack.c.bf16 %v6005_v21, %v5997_v31  ;;  %v9078_v3 = vand.u32 4294901760, %v6282_v11  ;;  %v6405_v21 = vld [vmem:[#allocation2 + $0x1a0] sm:$0xff]  ;;  %v6409_v40 = vld [vmem:[#allocation2 + $0x1a8] sm:$0xff] }
  0xd2   :  { %v6380_v17 = vsub.f32 %v6286_v37, %v9076_v53  ;;  %v6398_v24 = vsub.f32 %v6291_v8, %v9082_v32  ;;  %v9084_v53 = vand.u32 4294901760, %v6293_v54  ;;  %v9087_v32 = vand.u32 4294901760, %v6314_v52 }
  0xd3   :  { %4824 = vmatpush3.bf16.msra.mxu0 %v9074_v16  ;;  %v6388_v57 = vsub.f32 %v6282_v11, %v9078_v3  ;;  %v9080_v16 = vand.u32 4294901760, %v6289_v7  ;;  %v9086_v3 = vand.u32 4294901760, %v6222_v36 }
  0xd4   :  { %4826 = vmatprep.subr.bf16.mxu0 %v9077_v27  ;;  %9083 = vst [vmem:[#allocation42_spill] sm:$0xff] %v6398_v24  ;;  %v6403_v31 = vsub.f32 %v6293_v54, %v9084_v53  ;;  %v272_v27 = vmul.f32 %v3866_v46, %v264_v14  ;;  %v6417_v8 = vpack.c.bf16 %v9088_v44, %v9087_v32  ;;  %v3867_v53 = vld [vmem:[%s8691_s4] ss:$0 sm:$0xff]  ;;  %v9090_v14 = vmov 1.0  }
  0xd5   :  { %9079 = vst [vmem:[#allocation40_spill] sm:$0xff] %v6388_v57  ;;  %v6393_v2 = vsub.f32 %v6289_v7, %v9080_v16  ;;  %978 = vmatmul.mubr.f32.vlgmr.msra.gmra.mrb[2].mxu1 %v9086_v3  ;;  %v9091_v3 = vand.u32 4294901760, %v6309_v12  ;;  %v9093_v44 = vand.u32 4294901760, %v6323_v9  ;;  %v9094_v16 = vand.u32 4294901760, %v6325_v61 }
  0xd6   :  { %9085 = vst [vmem:[#allocation43_spill] sm:$0xff] %v6403_v31  ;;  %9089 = vst [vmem:[#allocation44_spill] sm:$0xff] %v6417_v8  ;;  %4900 = vmatpush3.bf16.msra.mxu1 %v5767_v6  ;;  %3877 = vmatprep.mubr.msk.f32.mxu1 %vm237_vm4, %v9090_v14  ;;  %v9095_v8 = vpack.c.bf16 %v6025_v35, %v6022_v23  ;;  %v9100_v23 = vand.u32 4294901760, %v5675_v19  ;;  %v9103_v46 = vand.u32 4294901760, %v5694_v29  ;;  %v9105_v19 = vand.u32 4294901760, %v6375_v22 }
  0xd7   :  { %9081 = vst [vmem:[#allocation41_spill] sm:$0xff] %v6393_v2  ;;  %v6431_v37 = vsub.f32 %v6309_v12, %v9091_v3  ;;  %v6436_v32 = vsub.f32 %v6323_v9, %v9093_v44  ;;  %v6441_v6 = vsub.f32 %v6325_v61, %v9094_v16  ;;  %4902 = vmatprep.subr.bf16.mxu1 %v5813_v55  ;;  %v9096_v44 = vand.u32 4294901760, %v6347_v51 }
  0xd8   :  { %4828 = vmatpush3.bf16.msra.mxu0 %v9095_v8  ;;  %v9097_v9 = vand.u32 4294901760, %v6352_v4  ;;  %v9099_v16 = vpack.c.bf16 %v6044_v43, %v6042_v62  ;;  %v9101_v55 = vand.u32 4294901760, %v5683_v26  ;;  %v9102_v8 = vand.u32 4294901760, %v5689_v28  ;;  %v6473_v62 = vld [vmem:[#allocation2 + $0x120] sm:$0xff] }
  0xd9   :  { %9092 = vst [vmem:[#allocation45_spill] sm:$0xff] %v6431_v37  ;;  %v8763_v3 = vand.u32 4294901760, %v6342_v20  ;;  %v8764_v61 = vand.u32 4294901760, %v6409_v40  ;;  %v8768_v43 = vand.u32 4294901760, %v6388_v57  ;;  %v9106_v26 = vand.u32 4294901760, %v6380_v17 }
  0xda   :  { %v6454_v52 = vpack.c.bf16 %v9097_v9, %v9096_v44  ;;  %4830 = vmatprep.subr.bf16.mxu0 %v9099_v16  ;;  %v4867_v35 = vpack.c.bf16 %v9101_v55, %v9100_v23  ;;  %v4869_v15 = vpack.c.bf16 %v9103_v46, %v9102_v8  ;;  %v6469_v9 = vadd.f32 %v3867_v53, %v272_v27 }
  0xdb   :  { %v8767_v44 = vand.u32 4294901760, %v6361_v58  ;;  %v6479_v28 = vpack.c.bf16 %v9106_v26, %v9105_v19  ;;  %4904 = vmatpush3.bf16.msra.mxu1 %v5852_v63  ;;  %v8770_v29 = vand.u32 4294901760, %v6393_v2  ;;  %v8769_v46 = vand.u32 4294901760, %v6398_v24 }
  0xdc   :  { %9098 = vst [vmem:[#allocation46_spill] sm:$0xff] %v6454_v52  ;;  %9104 = vst [vmem:[#allocation47_spill] sm:$0xff] %v6469_v9  ;;  %v8766_v27 = vand.u32 4294901760, %v6436_v32  ;;  %v8765_v53 = vand.u32 4294901760, %v6441_v6  ;;  %v9108_v16 = vpack.c.bf16 %v6067_v33, %v6061_v59  ;;  %4906 = vmatprep.subr.bf16.mxu1 %v5872_v18  ;;  %v9109_v23 = vand.u32 4294901760, %v6337_v56  ;;  %v6509_v33 = vld [vmem:[#allocation2 + $0x128] sm:$0xff] }
  0xdd   :  { %9107 = vst [vmem:[#allocation48_spill] sm:$0xff] %v6479_v28  ;;  %v8771_v63 = vand.u32 4294901760, %v6403_v31  ;;  %v9110_v19 = vand.u32 4294901760, %v6405_v21  ;;  %v1490_v59 = vsub.f32 %v6342_v20, %v8763_v3  ;;  %v6507_v18 = vsub.f32 %v6409_v40, %v8764_v61  ;;  %v9170_v20 = vld [vmem:[#allocation17_spill] sm:$0xff] }
  0xde   :  { %4832 = vmatpush3.bf16.msra.mxu0 %v9108_v16  ;;  %v1483_v55 = vsub.f32 %v6337_v56, %v9109_v23  ;;  %v6516_v23 = vpack.c.bf16 %v8765_v53, %v8766_v27  ;;  %v1378_v3 = vsub.f32 %v6388_v57, %v8768_v43  ;;  %v210_v61 = vsub.s32 3, %v6189_v60  ;;  %v9161_v57 = vld [vmem:[#allocation22_spill] sm:$0xff] }
  0xdf   :  { %v6498_v26 = vsub.f32 %v6405_v21, %v9110_v19  ;;  %4866 = vmatprep.subr.bf16.mxu0 %v6302_v34  ;;  %9112 = vst [vmem:[#allocation50_spill] sm:$0xff] %v6507_v18  ;;  %v284_v34 = vand.u32 2139095040, %v6469_v9  ;;  %v1371_v19 = vsub.f32 %v6361_v58, %v8767_v44  ;;  %4908 = vmatpush3.bf16.msra.mxu1 %v5897_v1  ;;  %v9114_v16 = vand.u32 4294901760, %v5712_v38 }
  0xe0   :  { %9113 = vst [vmem:[#allocation51_spill] sm:$0xff] %v6516_v23  ;;  %v9115_v53 = vand.u32 4294901760, %v5729_v50  ;;  %v1497_v8 = vsub.f32 %v6393_v2, %v8770_v29  ;;  %v1504_v44 = vsub.f32 %v6398_v24, %v8769_v46  ;;  %v206_v43 = vsub.s32 2, %v6189_v60  ;;  %4910 = vmatprep.subr.bf16.mxu1 %v9037_v0  ;;  %v6569_v46 = vld [vmem:[#allocation2 + $0x138] sm:$0xff] }
  0xe1   :  { %9111 = vst [vmem:[#allocation49_spill] sm:$0xff] %v6498_v26  ;;  %870 = vmatmul.mubr.f32.vlgmr.msra.gmra.mrb[2].mxu0 %v6222_v36  ;;  %v1385_v38 = vsub.f32 %v6403_v31, %v8771_v63  ;;  %v9116_v50 = vand.u32 4294901760, %v6431_v37  ;;  %v1491_v45 = vand.u32 4294901760, %v1490_v59  ;;  %v9117_v29 = vand.u32 4294901760, %v6473_v62  ;;  %v6567_v59 = vld [vmem:[#allocation2 + $0x130] sm:$0xff] }
  0xe2   :  { %v4871_v27 = vpack.c.bf16 %v9115_v53, %v9114_v16  ;;  %4868 = vmatpush3.bf16.msra.mxu0 %v4867_v35  ;;  %3875 = vmatprep.mubr.msk.f32.mxu0 %vm237_vm4, %v9090_v14  ;;  %v6551_v16 = vld [vmem:[#allocation2 + $0x1b0] sm:$0xff]  ;;  %v1484_v35 = vand.u32 4294901760, %v1483_v55  ;;  %v285_v23 = vshrl.u32 %v284_v34, 23  ;;  %v1379_v28 = vand.u32 4294901760, %v1378_v3  ;;  %v6563_v53 = vld [vmem:[#allocation2 + $0x1b8] sm:$0xff]  ;;  %v6587_v55 = vld [vmem:[#allocation2 + $0x1c8] sm:$0xff] }
  0xe3   :  { %v1392_v1 = vsub.f32 %v6431_v37, %v9116_v50  ;;  %4870 = vmatprep.subr.bf16.mxu0 %v4869_v15  ;;  %v6558_v63 = vsub.f32 %v6473_v62, %v9117_v29  ;;  %v1372_v50 = vand.u32 4294901760, %v1371_v19  ;;  %v6561_v36 = vrot.slane %v6196_v30, %v210_v61  ;;  %4912 = vmatpush3.bf16.msra.mxu1 %v9039_v41  ;;  %v6571_v29 = vld [vmem:[#allocation2 + $0x1c0] sm:$0xff] }
  0xe4   :  { %v1498_v0 = vand.u32 4294901760, %v1497_v8  ;;  %v1505_v15 = vand.u32 4294901760, %v1504_v44  ;;  %v6574_v34 = vrot.slane %v6196_v30, %v206_v43  ;;  %4914 = vmatprep.subr.bf16.mxu1 %v9041_v47  ;;  %v1386_v61 = vand.u32 4294901760, %v1385_v38  ;;  %v9129_v38 = vld [vmem:[#allocation18_spill] sm:$0xff] }
  0xe5   :  { %9118 = vst [vmem:[#allocation52_spill] sm:$0xff] %v6558_v63  ;;  %9119 = vst [vmem:[#allocation53_spill] sm:$0xff] %v6561_v36  ;;  %v1393_v3 = vand.u32 4294901760, %v1392_v1  ;;  %v9121_v41 = vand.u32 4294901760, %v6498_v26  ;;  %v9122_v8 = vand.u32 4294901760, %v6509_v33  ;;  %v6590_v30 = vpack.c.bf16 %v1491_v45, %v1484_v35 }
  0xe6   :  { %9120 = vst [vmem:[#allocation54_spill] sm:$0xff] %v6574_v34  ;;  %4872 = vmatpush3.bf16.msra.mxu0 %v4871_v27  ;;  %v9124_v47 = vand.u32 4294901760, %v6507_v18  ;;  %v8772_v27 = vand.u32 4294901760, %v6558_v63  ;;  %v3868_v1 = vadd.s32 4294967169, %v285_v23  ;;  %v6603_v35 = vpack.c.bf16 %v1505_v15, %v1498_v0  ;;  %v6623_v15 = vld [vmem:[#allocation2 + $0x140] sm:$0xff] }
  0xe7   :  { %v6580_v44 = vsub.f32 %v6498_v26, %v9121_v41  ;;  %v6585_v19 = vsub.f32 %v6509_v33, %v9122_v8  ;;  %4874 = vmatprep.subr.bf16.mxu0 %v6127_v39  ;;  %v8773_v41 = vand.u32 4294901760, %v6567_v59  ;;  %v8774_v8 = vand.u32 4294901760, %v6569_v46  ;;  %4916 = vmatpush3.bf16.msra.mxu1 %v9043_v48  ;;  %v9145_v26 = vld [vmem:[#allocation20_spill] sm:$0xff] }
  0xe8   :  { %v1518_v43 = vsub.f32 %v6507_v18, %v9124_v47  ;;  %v6601_v39 = vpack.c.bf16 %v1379_v28, %v1372_v50  ;;  %v9125_v45 = vand.u32 4294901760, %v6551_v16  ;;  %4918 = vmatprep.subr.bf16.mxu1 %v9045_v5  ;;  %v6613_v23 = vpack.c.bf16 %v1393_v3, %v1386_v61 }
  0xe9   :  { %9123 = vst [vmem:[#allocation55_spill] sm:$0xff] %v6585_v19  ;;  %v1512_v52 = vand.u32 4294901760, %v6580_v44  ;;  %v9127_v48 = vand.u32 4294901760, %v6261_v49  ;;  %v9128_v28 = vand.u32 4294901760, %v6264_v13  ;;  %v6631_v5 = vsub.f32 %v6558_v63, %v8772_v27  ;;  %v9142_v63 = vld [vmem:[#allocation19_spill] sm:$0xff] }
  0xea   :  { %v6608_v47 = vsub.f32 %v6551_v16, %v9125_v45  ;;  %4876 = vmatpush3.bf16.msra.mxu0 %v6133_v10  ;;  %v6625_v45 = vld [vmem:[#allocation2 + $0x148] sm:$0xff]  ;;  %v1519_v10 = vand.u32 4294901760, %v1518_v43  ;;  %v9130_v49 = vand.u32 4294901760, %v6274_v42  ;;  %v9131_v13 = vand.u32 4294901760, %v6282_v11 }
  0xeb   :  { %v6620_v50 = vpack.c.bf16 %v9128_v28, %v9127_v48  ;;  %4878 = vmatprep.subr.bf16.mxu0 %v9129_v38  ;;  %v9132_v3 = vand.u32 4294901760, %v6563_v53  ;;  %v6644_v48 = vld [vmem:[#allocation2 + $0x1d0] sm:$0xff]  ;;  %v6646_v38 = vld [vmem:[#allocation2 + $0x1d8] sm:$0xff]  ;;  %v291_v43 = vadd.s32 1, %v3868_v1  ;;  %v6651_v28 = vsub.f32 %v6567_v59, %v8773_v41 }
  0xec   :  { %9126 = vst [vmem:[#allocation56_spill] sm:$0xff] %v6608_v47  ;;  %v6637_v61 = vpack.c.bf16 %v9131_v13, %v9130_v49  ;;  %v6656_v11 = vsub.f32 %v6569_v46, %v8774_v8  ;;  %v9136_v42 = vand.u32 4294901760, %v6571_v29  ;;  %v6663_v13 = vld [vmem:[#allocation2 + $0x150] sm:$0xff]  ;;  %v9140_v41 = vand.u32 4294901760, %v6587_v55  ;;  %v9147_v8 = vld [vmem:[#allocation32_spill] sm:$0xff] }
  0xed   :  { %v6642_v44 = vsub.f32 %v6563_v53, %v9132_v3  ;;  %9134 = vst [vmem:[#allocation57_spill] sm:$0xff] %v6651_v28  ;;  %v6665_v3 = vld [vmem:[#allocation2 + $0x158] sm:$0xff]  ;;  %v9139_v1 = vld [vmem:[#allocation13_spill] sm:$0xff]  ;;  %vm239_vm6 = vcmp.eq.f32.partialorder %v6204_v25, %v6561_v36  ;;  %vm292_vm7 = vcmp.gt.s32.totalorder %v291_v43, 0  ;;  %v9150_v60 = vmov 0.0  }
  0xee   :  { %9135 = vst [vmem:[#allocation58_spill] sm:$0xff] %v6656_v11  ;;  %v6661_v49 = vsub.f32 %v6571_v29, %v9136_v42  ;;  %9138 = vst [vmem:[#allocation60_spill] sm:$0xff] %v6665_v3  ;;  %4920 = vmatpush3.bf16.msra.mxu1 %v9139_v1  ;;  %v6672_v0 = vsub.f32 %v6587_v55, %v9140_v41  ;;  %4880 = vmatpush3.bf16.msra.mxu0 %v9142_v63  ;;  %v9143_v42 = vld [vmem:[#allocation14_spill] sm:$0xff]  ;;  %v9144_v1 = vand.u32 4294901760, %v6585_v19  ;;  %v9155_v41 = vld [vmem:[#allocation21_spill] sm:$0xff] }
  0xef   :  { %9133 = vst [vmem:[#allocation18_spill] sm:$0xff] %v6642_v44  ;;  %4922 = vmatprep.subr.bf16.mxu1 %v9143_v42  ;;  %4882 = vmatprep.subr.bf16.mxu0 %v9145_v26  ;;  %v9146_v63 = vand.u32 4294901760, %v6289_v7  ;;  %v9148_v42 = vand.u32 4294901760, %v9147_v8  ;;  %v9149_v26 = vld [vmem:[#allocation15_spill] sm:$0xff]  ;;  %v3861_v7 = vsel %vm239_vm6, 1.0, %v9150_v60  ;;  %v4969_v24 = vpack.c.bf16 %v1519_v10, %v1512_v52  ;;  %v9182_v36 = vld [vmem:[#allocation26_spill] sm:$0xff] }
  0xf0   :  { %9137 = vst [vmem:[#allocation59_spill] sm:$0xff] %v6661_v49  ;;  %9141 = vst [vmem:[#allocation13_spill] sm:$0xff] %v6672_v0  ;;  %v6683_v27 = vsub.f32 %v6585_v19, %v9144_v1  ;;  %v9153_v1 = vand.u32 4294901760, %v6625_v45  ;;  %v9157_v31 = vand.u32 4294901760, %v6644_v48  ;;  %v9159_v8 = vand.u32 4294901760, %v6646_v38 }
  0xf1   :  { %v6693_v37 = vpack.c.bf16 %v9148_v42, %v9146_v63  ;;  %v9151_v63 = vand.u32 4294901760, %v6623_v15  ;;  %v6728_v2 = vsel %vm292_vm7, %v291_v43, 0  ;;  %v9163_v52 = vand.u32 4294901760, %v6663_v13 }
  0xf2   :  { %4924 = vmatpush3.bf16.msra.mxu1 %v9149_v26  ;;  %v6714_v18 = vsub.f32 %v6625_v45, %v9153_v1  ;;  %4884 = vmatpush3.bf16.msra.mxu0 %v9155_v41  ;;  %v9156_v26 = vld [vmem:[#allocation16_spill] sm:$0xff]  ;;  %v6721_v19 = vsub.f32 %v6644_v48, %v9157_v31  ;;  %v9162_v1 = vand.u32 4294901760, %v6608_v47  ;;  %v9165_v31 = vand.u32 4294901760, %v6665_v3 }
  0xf3   :  { %v6709_v42 = vsub.f32 %v6623_v15, %v9151_v63  ;;  %4926 = vmatprep.subr.bf16.mxu1 %v9156_v26  ;;  %v6726_v63 = vsub.f32 %v6646_v38, %v9159_v8  ;;  %4886 = vmatprep.subr.bf16.mxu0 %v9161_v57  ;;  %v6737_v10 = vsub.f32 %v6663_v13, %v9163_v52  ;;  %v9167_v43 = vand.u32 4294901760, %v6642_v44 }
  0xf4   :  { %9154 = vst [vmem:[#allocation14_spill] sm:$0xff] %v6714_v18  ;;  %9158 = vst [vmem:[#allocation20_spill] sm:$0xff] %v6721_v19  ;;  %v1525_v41 = vsub.f32 %v6608_v47, %v9162_v1  ;;  %v6742_v26 = vsub.f32 %v6665_v3, %v9165_v31  ;;  %v6744_v8 = vsub.f32 %v3861_v7, %v3861_v7  ;;  %v9168_v58 = vand.u32 4294901760, %v6651_v28 }
  0xf5   :  { %9152 = vst [vmem:[#allocation19_spill] sm:$0xff] %v6709_v42  ;;  %9160 = vst [vmem:[#allocation32_spill] sm:$0xff] %v6726_v63  ;;  %v1532_v57 = vsub.f32 %v6642_v44, %v9167_v43  ;;  %v9169_v47 = vand.u32 4294901760, %v6656_v11  ;;  %v9171_v56 = vand.u32 4294901760, %v6661_v49  ;;  %v9172_v7 = vand.u32 4294901760, %v6672_v0 }
  0xf6   :  { %9164 = vst [vmem:[#allocation15_spill] sm:$0xff] %v6737_v10  ;;  %9166 = vst [vmem:[#allocation21_spill] sm:$0xff] %v6742_v26  ;;  %v1413_v1 = vsub.f32 %v6651_v28, %v9168_v58  ;;  %4928 = vmatpush3.bf16.msra.mxu1 %v9170_v20  ;;  %v6765_v58 = vand.u32 31, %v6728_v2  ;;  %v9173_v28 = vld [vmem:[#allocation23_spill] sm:$0xff]  ;;  %v1400_v20 = vand.u32 4294901760, %v6631_v5  ;;  %v1526_v43 = vand.u32 4294901760, %v1525_v41 }
  0xf7   :  { %v1420_v52 = vsub.f32 %v6656_v11, %v9169_v47  ;;  %v1539_v31 = vsub.f32 %v6661_v49, %v9171_v56  ;;  %v1546_v3 = vsub.f32 %v6672_v0, %v9172_v7  ;;  %4888 = vmatpush3.bf16.msra.mxu0 %v9173_v28  ;;  %4962 = vmatprep.subr.bf16.mxu1 %v6590_v30  ;;  %v8818_v56 = vand.u32 4294901760, %v6726_v63  ;;  %v9174_v49 = vld [vmem:[#allocation24_spill] sm:$0xff] }
  0xf8   :  { %4890 = vmatprep.subr.bf16.mxu0 %v9174_v49  ;;  %v1407_v7 = vand.u32 4294901760, %v6683_v27  ;;  %v1533_v5 = vand.u32 4294901760, %v1532_v57  ;;  %v1414_v47 = vand.u32 4294901760, %v1413_v1  ;;  %v9176_v41 = vand.u32 4294901760, %v6709_v42 }
  0xf9   :  { %3878 = vmatmul.mubr.msk.f32.vlgmr.msra.gmra.mrb[4].mxu1 %vm236_vm5, %v9090_v14  ;;  %v1421_v11 = vand.u32 4294901760, %v1420_v52  ;;  %v1540_v27 = vand.u32 4294901760, %v1539_v31  ;;  %v1547_v49 = vand.u32 4294901760, %v1546_v3  ;;  %v9177_v44 = vand.u32 4294901760, %v6714_v18 }
  0xfa   :  { %4964 = vmatpush3.bf16.msra.mxu1 %v6601_v39  ;;  %3879 = vmatprep.mubr.msk.f32.mxu1 %vm239_vm6, %v9090_v14  ;;  %v6789_v0 = vsub.f32 %v6709_v42, %v9176_v41  ;;  %v6795_v1 = vsub.s32 32, %v6765_v58  ;;  %v9178_v39 = vld [vmem:[#allocation25_spill] sm:$0xff]  ;;  %v9179_v52 = vand.u32 4294901760, %v6293_v54  ;;  %v9180_v3 = vand.u32 4294901760, %v6309_v12 }
  0xfb   :  { %v1434_v57 = vsub.f32 %v6714_v18, %v9177_v44  ;;  %4892 = vmatpush3.bf16.msra.mxu0 %v9178_v39  ;;  %4966 = vmatprep.subr.bf16.mxu1 %v6603_v35  ;;  %v9181_v41 = vand.u32 4294901760, %v6721_v19  ;;  %v6813_v44 = vsub.f32 %v6726_v63, %v8818_v56  ;;  %v4971_v39 = vpack.c.bf16 %v1407_v7, %v1400_v20 }
  0xfc   :  { %v6803_v31 = vpack.c.bf16 %v9180_v3, %v9179_v52  ;;  %4894 = vmatprep.subr.bf16.mxu0 %v9182_v36  ;;  %v9183_v35 = vand.u32 4294901760, %v6405_v21  ;;  %v9184_v54 = vand.u32 4294901760, %v6409_v40  ;;  %v9185_v52 = vand.u32 4294901760, %v6737_v10 }
  0xfd   :  { %v6808_v30 = vsub.f32 %v6721_v19, %v9181_v41  ;;  %v9186_v41 = vand.u32 4294901760, %v6742_v26  ;;  %v9187_v56 = vand.u32 4294901760, %v6744_v8  ;;  %v4973_v20 = vpack.c.bf16 %v1533_v5, %v1526_v43  ;;  %v9192_v5 = vld [vmem:[#allocation27_spill] sm:$0xff] }
  0xfe   :  { %v6820_v12 = vpack.c.bf16 %v9184_v54, %v9183_v35  ;;  %v6825_v3 = vsub.f32 %v6737_v10, %v9185_v52  ;;  %v9188_v21 = vand.u32 4294901760, %v6473_v62  ;;  %v9189_v40 = vand.u32 4294901760, %v6509_v33  ;;  %4968 = vmatpush3.bf16.msra.mxu1 %v6613_v23 }
  0xff   :  { %v6830_v19 = vsub.f32 %v6742_v26, %v9186_v41  ;;  %v1354_v36 = vsub.f32 %v6744_v8, %v9187_v56  ;;  %v9190_v35 = vand.u32 4294901760, %v6551_v16  ;;  %v9191_v54 = vand.u32 4294901760, %v6563_v53  ;;  %4896 = vmatpush3.bf16.msra.mxu0 %v9192_v5  ;;  %4970 = vmatprep.subr.bf16.mxu1 %v4969_v24  ;;  %v9193_v53 = vld [vmem:[#allocation33_spill] sm:$0xff] }
 0x100   :  { %v6839_v7 = vpack.c.bf16 %v9189_v40, %v9188_v21  ;;  %v4975_v41 = vpack.c.bf16 %v1421_v11, %v1414_v47  ;;  %v4977_v26 = vpack.c.bf16 %v1547_v49, %v1540_v27  ;;  %v1428_v10 = vand.u32 4294901760, %v6789_v0  ;;  %4930 = vmatprep.subr.bf16.mxu0 %v6620_v50  ;;  %v9195_v27 = vld [vmem:[#allocation34_spill] sm:$0xff] }
 0x101   :  { %v6845_v52 = vpack.c.bf16 %v9191_v54, %v9190_v35  ;;  %v1435_v56 = vand.u32 4294901760, %v1434_v57  ;;  %v5583_v43 = vmov 920167782   ;;  %v1554_v33 = vand.u32 4294901760, %v6808_v30 }
 0x102   :  { %v308_v62 = vshrl.u32 %v5583_v43, %v6795_v1  ;;  %v1561_v16 = vand.u32 4294901760, %v6813_v44  ;;  %v9194_v21 = vand.u32 4294901760, %v9193_v53  ;;  %v5584_v23 = vmov 1326507024   ;;  %3876 = vmatmul.mubr.msk.f32.vlgmr.msra.gmra.mrb[4].mxu0 %vm236_vm5, %v9090_v14  ;;  %4972 = vmatpush3.bf16.msra.mxu1 %v4971_v39 }
 0x103   :  { %v311_v11 = vshrl.u32 %v5584_v23, %v6795_v1  ;;  %v1442_v0 = vand.u32 4294901760, %v6825_v3  ;;  %v1449_v47 = vand.u32 4294901760, %v6830_v19  ;;  %v9196_v49 = vand.u32 4294901760, %v9195_v27  ;;  %4932 = vmatpush3.bf16.msra.mxu0 %v6637_v61  ;;  %4974 = vmatprep.subr.bf16.mxu1 %v4973_v20 }
 0x104   :  { %v1567_v40 = vsub.f32 %v9193_v53, %v9194_v21  ;;  %v5585_v57 = vmov 2102212464   ;;  %v310_v35 = vshll.u32 %v5583_v43, %v6765_v58  ;;  %v1355_v54 = vand.u32 4294901760, %v1354_v36  ;;  %4934 = vmatprep.subr.bf16.mxu0 %v6693_v37 }
 0x105   :  { %v1574_v24 = vsub.f32 %v9195_v27, %v9196_v49  ;;  %v307_v44 = vshll.u32 %v5585_v57, %v6765_v58  ;;  %v6867_v5 = vshrl.u32 %v6728_v2, 5  ;;  %v5586_v21 = vmov 2475754826  }
 0x106   :  { %v299_v3 = vshrl.u32 %v5586_v21, %v6795_v1  ;;  %v5587_v23 = vmov 2131351028   ;;  %v305_v53 = vshrl.u32 %v5585_v57, %v6795_v1  ;;  %v8827_v49 = vmov 683565275   ;;  %1356 = vmatprep.mubr.f32.mxu0 %v1355_v54  ;;  %4976 = vmatpush3.bf16.msra.mxu1 %v4975_v41 }
 0x107   :  { %v302_v19 = vshrl.u32 %v5587_v23, %v6795_v1  ;;  %v298_v36 = vshll.u32 %v8827_v49, %v6765_v58  ;;  %v309_v2 = vor.u32 %v308_v62, %v307_v44  ;;  %v1568_v43 = vand.u32 4294901760, %v1567_v40  ;;  %4936 = vmatpush3.bf16.msra.mxu0 %v6803_v31  ;;  %4978 = vmatprep.subr.bf16.mxu1 %v4977_v26 }
 0x108   :  { %v9197_v30 = vand.u32 4294901760, %v6347_v51  ;;  %v301_v57 = vshll.u32 %v5586_v21, %v6765_v58  ;;  %v304_v63 = vshll.u32 %v5587_v23, %v6765_v58  ;;  %v312_v28 = vor.u32 %v311_v11, %v310_v35  ;;  %4938 = vmatprep.subr.bf16.mxu0 %v6820_v12 }
 0x109   :  { %v1575_v39 = vand.u32 4294901760, %v1574_v24  ;;  %v9198_v49 = vand.u32 2147483647, %v6469_v9  ;;  %v4979_v44 = vpack.c.bf16 %v1435_v56, %v1428_v10  ;;  %v9199_v54 = vand.u32 4294901760, %v6567_v59  ;;  %v9263_v9 = vld [vmem:[#allocation55_spill] sm:$0xff] }
 0x10a   :  { %v1455_v27 = vsub.f32 %v6347_v51, %v9197_v30  ;;  %v9200_v40 = vand.u32 4294901760, %v6569_v46  ;;  %v9202_v30 = vand.u32 4294901760, %v6352_v4  ;;  %v6896_v58 = vor.u32 %v299_v3, %v298_v36 }
 0x10b   :  { %v288_v62 = vand.u32 8388607, %v9198_v49  ;;  %v6898_v20 = vor.u32 %v302_v19, %v301_v57  ;;  %v306_v11 = vor.u32 %v305_v53, %v304_v63  ;;  %vm316_vm8 = vcmp.lt.s32.totalorder %v6867_v5, 4  ;;  %4980 = vmatpush3.bf16.msra.mxu1 %v4979_v44  ;;  %4940 = vmatpush3.bf16.msra.mxu0 %v6839_v7 }
 0x10c   :  { %v6891_v18 = vpack.c.bf16 %v9200_v40, %v9199_v54  ;;  %v1462_v21 = vsub.f32 %v6352_v4, %v9202_v30  ;;  %v322_v10 = vsel %vm316_vm8, %v309_v2, 920167782  ;;  %v4981_v46 = vpack.c.bf16 %v1561_v16, %v1554_v33  ;;  %4942 = vmatprep.subr.bf16.mxu0 %v6845_v52 }
 0x10d   :  { %v9203_v59 = vand.u32 4294901760, %v6375_v22  ;;  %v9204_v24 = vand.u32 4294901760, %v6380_v17  ;;  %v326_v63 = vsel %vm316_vm8, %v312_v28, 1326507024  ;;  %v4983_v41 = vpack.c.bf16 %v1449_v47, %v1442_v0 }
 0x10e   :  { %9201 = vst [vmem:[#allocation16_spill] sm:$0xff] %v6891_v18  ;;  %v4985_v53 = vpack.c.bf16 %v1575_v39, %v1568_v43  ;;  %v1456_v3 = vand.u32 4294901760, %v1455_v27  ;;  %vm313_vm9 = vcmp.lt.s32.totalorder %v6867_v5, 1  ;;  %vm315_vm10 = vcmp.lt.s32.totalorder %v6867_v5, 3  ;;  %4982 = vmatprep.subr.bf16.mxu1 %v4981_v46 }
 0x10f   :  { %v1581_v56 = vsub.f32 %v6375_v22, %v9203_v59  ;;  %v1588_v35 = vsub.f32 %v6380_v17, %v9204_v24  ;;  %v1463_v26 = vand.u32 4294901760, %v1462_v21  ;;  %v9205_v33 = vand.u32 4294901760, %v6436_v32  ;;  %4984 = vmatpush3.bf16.msra.mxu1 %v4983_v41  ;;  %4944 = vmatpush3.bf16.msra.mxu0 %v6891_v18 }
 0x110   :  { %v289_v23 = vor.u32 8388608, %v288_v62  ;;  %v321_v19 = vsel %vm313_vm9, %v6896_v58, %v6898_v20  ;;  %v323_v0 = vsel %vm315_vm10, %v306_v11, %v322_v10  ;;  %v9206_v47 = vand.u32 4294901760, %v6441_v6  ;;  %4986 = vmatprep.subr.bf16.mxu1 %v4985_v53 }
 0x111   :  { %v1469_v16 = vsub.f32 %v6436_v32, %v9205_v33  ;;  %v325_v49 = vsel %vm313_vm9, %v6898_v20, %v306_v11  ;;  %v327_v36 = vsel %vm315_vm10, %v309_v2, %v326_v63  ;;  %v1582_v43 = vand.u32 4294901760, %v1581_v56 }
 0x112   :  { %v1476_v27 = vsub.f32 %v6441_v6, %v9206_v47  ;;  %v1589_v57 = vand.u32 4294901760, %v1588_v35  ;;  %vm314_vm11 = vcmp.lt.s32.totalorder %v6867_v5, 2  ;;  %v9207_v28 = vand.u32 4294901760, %v6571_v29 }
 0x113   :  { %v9208_v39 = vand.u32 4294901760, %v6587_v55  ;;  %v324_v44 = vsel %vm314_vm11, %v321_v19, %v323_v0  ;;  %v4987_v54 = vpack.c.bf16 %v1463_v26, %v1456_v3  ;;  %v1470_v2 = vand.u32 4294901760, %v1469_v16  ;;  %v9224_v0 = vld [vmem:[#allocation9_spill] sm:$0xff] }
 0x114   :  { %v328_v40 = vsel %vm314_vm11, %v325_v49, %v327_v36  ;;  %v329_v30 = vshll.u32 %v289_v23, 8  ;;  %v1477_v21 = vand.u32 4294901760, %v1476_v27  ;;  %vm238_vm12 = vcmp.eq.f32.partialorder %v6204_v25, %v6574_v34  ;;  %v9222_v23 = vld [vmem:[#allocation8_spill] sm:$0xff] }
 0x115   :  { %v6939_v62 = vpack.c.bf16 %v9208_v39, %v9207_v28  ;;  %v9210_v55 = vand.u32 4294901760, %v6623_v15  ;;  %v9211_v29 = vand.u32 4294901760, %v6625_v45  ;;  %v4989_v46 = vpack.c.bf16 %v1589_v57, %v1582_v43  ;;  %4988 = vmatpush3.bf16.msra.mxu1 %v4987_v54  ;;  %v9227_v43 = vld [vmem:[#allocation10_spill] sm:$0xff]  ;;  %v9229_v28 = vld [vmem:[#allocation11_spill] sm:$0xff]  ;;  %v9231_v54 = vld [vmem:[#allocation12_spill] sm:$0xff] }
 0x116   :  { %v6954_v59 = vmul.u32.u64.low %v329_v30, %v324_v44  ;;  %v6955_v56 = vmul.u32.u64.high %v329_v30, %v324_v44, %v6954_v59  ;;  %v9214_v24 = vand.u32 4294901760, %v6644_v48  ;;  %v9215_v35 = vand.u32 4294901760, %v6646_v38  ;;  %v9219_v48 = vld [vmem:[#allocation60_spill] sm:$0xff] }
 0x117   :  { %9209 = vst [vmem:[#allocation22_spill] sm:$0xff] %v6939_v62  ;;  %v6952_v10 = vpack.c.bf16 %v9211_v29, %v9210_v55  ;;  %4946 = vmatprep.subr.bf16.mxu0 %v6939_v62  ;;  %v6965_v41 = vmul.u32.u64.low %v329_v30, %v328_v40  ;;  %v6966_v53 = vmul.u32.u64.high %v329_v30, %v328_v40, %v6965_v41  ;;  %v3860_v15 = vsel %vm238_vm12, 1.0, %v9150_v60  ;;  %4990 = vmatprep.subr.bf16.mxu1 %v4989_v46  ;;  %v9236_v46 = vld [vmem:[#allocation35_spill] sm:$0xff] }
 0x118   :  { %9213 = vst [vmem:[#allocation23_spill] sm:$0xff] %v6954_v59  ;;  %v6963_v63 = vpack.c.bf16 %v9215_v35, %v9214_v24  ;;  %v4991_v45 = vpack.c.bf16 %v1477_v21, %v1470_v2  ;;  %v9218_v3 = vand.u32 4294901760, %v6663_v13  ;;  %v9220_v26 = vand.u32 4294901760, %v9219_v48  ;;  %v9233_v2 = vld [vmem:[#allocation31_spill] sm:$0xff]  ;;  %v9238_v35 = vld [vmem:[#allocation36_spill] sm:$0xff]  ;;  %v9241_v48 = vld [vmem:[#allocation38_spill] sm:$0xff] }
 0x119   :  { %9212 = vst [vmem:[#allocation17_spill] sm:$0xff] %v6952_v10  ;;  %9217 = vst [vmem:[#allocation29_spill] sm:$0xff] %v6966_v53  ;;  %4948 = vmatpush3.bf16.msra.mxu0 %v6952_v10  ;;  %v318_v33 = vsel %vm316_vm8, %v306_v11, 2102212464  ;;  %v6982_v16 = vsub.f32 %v3860_v15, %v3860_v15  ;;  %v9223_v19 = vand.u32 4294901760, %v9222_v23  ;;  %v9225_v47 = vand.u32 4294901760, %v9224_v0 }
 0x11a   :  { %9216 = vst [vmem:[#allocation24_spill] sm:$0xff] %v6963_v63  ;;  %v6977_v38 = vpack.c.bf16 %v9220_v26, %v9218_v3  ;;  %4950 = vmatprep.subr.bf16.mxu0 %v6963_v63  ;;  %v9226_v49 = vmov 683565275   ;;  %4992 = vmatpush3.bf16.msra.mxu1 %v4991_v45  ;;  %v319_v11 = vsel %vm315_vm10, %v6898_v20, %v318_v33  ;;  %v9228_v57 = vand.u32 4294901760, %v9227_v43  ;;  %v9240_v3 = vld [vmem:[#allocation37_spill] sm:$0xff]  ;;  %v7041_v33 = vld [vmem:[#allocation2 + $0x220] sm:$0xff] }
 0x11b   :  { %v6988_v27 = vpack.c.bf16 %v9225_v47, %v9223_v19  ;;  %v297_v13 = vshrl.u32 %v9226_v49, %v6795_v1  ;;  %5026 = vmatprep.subr.bf16.mxu1 %v6620_v50  ;;  %v9230_v39 = vand.u32 4294901760, %v9229_v28  ;;  %v339_v1 = vadd.s32 1, %v6955_v56  ;;  %9242 = vst [vmem:[#allocation26_spill] sm:$0xff] %v7041_v33  ;;  %v7043_v23 = vld [vmem:[#allocation2 + $0x228] sm:$0xff]  ;;  %v9246_v43 = vld [vmem:[#allocation41_spill] sm:$0xff] }
 0x11c   :  { %9221 = vst [vmem:[#allocation25_spill] sm:$0xff] %v6977_v38  ;;  %v9234_v40 = vand.u32 4294901760, %v9233_v2  ;;  %v8832_v20 = vand.u32 4294901760, %v6982_v16  ;;  %vm338_vm13 = vc.u32 %v6966_v53, %v6954_v59  ;;  %v9235_v29 = vand.u32 4294901760, %v6744_v8  ;;  %9243 = vst [vmem:[#allocation27_spill] sm:$0xff] %v7043_v23  ;;  %v9245_v47 = vld [vmem:[#allocation40_spill] sm:$0xff] }
 0x11d   :  { %v317_v36 = vsel %vm313_vm9, %v297_v13, %v6896_v58  ;;  %4952 = vmatpush3.bf16.msra.mxu0 %v6977_v38  ;;  %v7004_v44 = vpack.c.bf16 %v9230_v39, %v9228_v57  ;;  %v9232_v58 = vand.u32 4294901760, %v9231_v54  ;;  %3880 = vmatmul.mubr.msk.f32.vlgmr.msra.gmra.mrb[6].mxu1 %vm238_vm12, %v9090_v14  ;;  %v9237_v24 = vand.u32 4294901760, %v9236_v46  ;;  %v9247_v57 = vld [vmem:[#allocation42_spill] sm:$0xff]  ;;  %v7056_v28 = vld [vmem:[#allocation2 + $0x2b0] sm:$0xff] }
 0x11e   :  { %4954 = vmatprep.subr.bf16.mxu0 %v6988_v27  ;;  %v320_v55 = vsel %vm314_vm11, %v317_v36, %v319_v11  ;;  %5028 = vmatpush3.bf16.msra.mxu1 %v6637_v61  ;;  %v9239_v41 = vand.u32 4294901760, %v9238_v35  ;;  %v340_v45 = vsel %vm338_vm13, %v339_v1, %v6955_v56  ;;  %v1360_v5 = vsub.f32 %v6982_v16, %v8832_v20  ;;  %v9244_v56 = vld [vmem:[#allocation39_spill] sm:$0xff]  ;;  %v7058_v39 = vld [vmem:[#allocation2 + $0x2b8] sm:$0xff]  ;;  %v7060_v1 = vld [vmem:[#allocation2 + $0x230] sm:$0xff] }
 0x11f   :  { %v7012_v21 = vpack.c.bf16 %v9234_v40, %v9232_v58  ;;  %1836 = vmatprep.mubr.f32.mxu1 %v9235_v29  ;;  %5030 = vmatprep.subr.bf16.mxu1 %v6693_v37  ;;  %v4993_v26 = vpack.c.bf16 %v9241_v48, %v9240_v3  ;;  %v336_v19 = vmul.u32 %v329_v30, %v320_v55  ;;  %v8830_v13 = vand.u32 4294901760, %v7041_v33  ;;  %v7062_v54 = vld [vmem:[#allocation2 + $0x238] sm:$0xff]  ;;  %v9252_v58 = vld [vmem:[#allocation43_spill] sm:$0xff]  ;;  %v9253_v2 = vld [vmem:[#allocation45_spill] sm:$0xff] }
 0x120   :  { %v7032_v15 = vpack.c.bf16 %v9239_v41, %v9237_v24  ;;  %v4995_v49 = vpack.c.bf16 %v9245_v47, %v9244_v56  ;;  %v8831_v36 = vand.u32 4294901760, %v7043_v23  ;;  %v1361_v11 = vand.u32 4294901760, %v1360_v5  ;;  %9248 = vst [vmem:[#allocation60_spill] sm:$0xff] %v7056_v28  ;;  %9249 = vst [vmem:[#allocation8_spill] sm:$0xff] %v7058_v39  ;;  %v7067_v55 = vld [vmem:[#allocation2 + $0x2c0] sm:$0xff]  ;;  %v7069_v29 = vld [vmem:[#allocation2 + $0x2c8] sm:$0xff] }
 0x121   :  { %4956 = vmatpush3.bf16.msra.mxu0 %v7004_v44  ;;  %v7046_v0 = vadd.s32 %v340_v45, %v336_v19  ;;  %v4997_v30 = vpack.c.bf16 %v9247_v57, %v9246_v43  ;;  %9250 = vst [vmem:[#allocation9_spill] sm:$0xff] %v7060_v1  ;;  %9251 = vst [vmem:[#allocation10_spill] sm:$0xff] %v7062_v54  ;;  %v4999_v40 = vpack.c.bf16 %v9253_v2, %v9252_v58  ;;  %v7084_v45 = vld [vmem:[#allocation2 + $0x240] sm:$0xff]  ;;  %v9259_v5 = vld [vmem:[#allocation49_spill] sm:$0xff]  ;;  %vm3841_vm9 = vcmask 261120  }
 0x122   :  { %4958 = vmatprep.subr.bf16.mxu0 %v7012_v21  ;;  %5032 = vmatpush3.bf16.msra.mxu1 %v6803_v31  ;;  %9254 = vst [vmem:[#allocation11_spill] sm:$0xff] %v7067_v55  ;;  %9255 = vst [vmem:[#allocation12_spill] sm:$0xff] %v7069_v29  ;;  %v7076_v24 = vsub.f32 %v7041_v33, %v8830_v13  ;;  %v7081_v35 = vsub.f32 %v7043_v23, %v8831_v36  ;;  %v7094_v20 = vld [vmem:[#allocation2 + $0x248] sm:$0xff]  ;;  %v9265_v33 = vld [vmem:[#allocation18_spill] sm:$0xff]  ;;  %v9269_v53 = vand.u32 4294901760, %v7058_v39 }
 0x123   :  { %5034 = vmatprep.subr.bf16.mxu1 %v6820_v12  ;;  %v342_v46 = vadd.s32 536870912, %v7046_v0  ;;  %9258 = vst [vmem:[#allocation36_spill] sm:$0xff] %v7084_v45  ;;  %9261 = vst [vmem:[#allocation37_spill] sm:$0xff] %v7094_v20  ;;  %v9262_v41 = vld [vmem:[#allocation52_spill] sm:$0xff]  ;;  %v9271_v13 = vand.u32 4294901760, %v7062_v54  ;;  %v9279_v19 = vand.u32 4294901760, %v7084_v45 }
 0x124   :  { %9256 = vst [vmem:[#allocation31_spill] sm:$0xff] %v7076_v24  ;;  %9257 = vst [vmem:[#allocation35_spill] sm:$0xff] %v7081_v35  ;;  %v9264_v23 = vld [vmem:[#allocation56_spill] sm:$0xff]  ;;  %v7115_v60 = vsub.f32 %v7058_v39, %v9269_v53  ;;  %v9274_v53 = vand.u32 4294901760, %v7069_v29 }
 0x125   :  { %4960 = vmatpush3.bf16.msra.mxu0 %v7032_v15  ;;  %v5005_v34 = vpack.c.bf16 %v9265_v33, %v9264_v23  ;;  %v7102_v59 = vshrl.u32 %v342_v46, 30  ;;  %v9270_v46 = vand.u32 4294901760, %v7060_v1  ;;  %v7125_v36 = vsub.f32 %v7062_v54, %v9271_v13  ;;  %v9277_v33 = vld [vmem:[#allocation59_spill] sm:$0xff]  ;;  %v9278_v13 = vld [vmem:[#allocation13_spill] sm:$0xff] }
 0x126   :  { %4994 = vmatprep.subr.bf16.mxu0 %v4993_v26  ;;  %5036 = vmatpush3.bf16.msra.mxu1 %v6839_v7  ;;  %v9260_v26 = vld [vmem:[#allocation50_spill] sm:$0xff]  ;;  %v7136_v39 = vsub.f32 %v7069_v29, %v9274_v53  ;;  %v5009_v54 = vpack.c.bf16 %v9278_v13, %v9277_v33  ;;  %v7146_v23 = vsub.f32 %v7084_v45, %v9279_v19  ;;  %v9282_v53 = vand.u32 4294901760, %v7076_v24  ;;  %v9286_v19 = vld [vmem:[#allocation20_spill] sm:$0xff] }
 0x127   :  { %5038 = vmatprep.subr.bf16.mxu1 %v6845_v52  ;;  %9266 = vst [vmem:[#allocation38_spill] sm:$0xff] %v7102_v59  ;;  %v9283_v29 = vand.u32 4294901760, %v7081_v35  ;;  %v9285_v13 = vld [vmem:[#allocation14_spill] sm:$0xff]  ;;  %v9287_v45 = vld [vmem:[#allocation32_spill] sm:$0xff]  ;;  %v7177_v35 = vld [vmem:[#allocation2 + $0x2e0] sm:$0xff] }
 0x128   :  { %1362 = vmatmul.mubr.f32.vlgmr.msra.gmra.mrb[6].mxu0 %v1361_v11  ;;  %v9267_v11 = vand.u32 4294901760, %v7056_v28  ;;  %v5011_v33 = vpack.c.bf16 %v9285_v13, %v6709_v42  ;;  %v7167_v24 = vld [vmem:[#allocation2 + $0x258] sm:$0xff]  ;;  %9291 = vst [vmem:[#allocation50_spill] sm:$0xff] %v7177_v35  ;;  %v7189_v13 = vld [vmem:[#allocation2 + $0x2f0] sm:$0xff] }
 0x129   :  { %4996 = vmatpush3.bf16.msra.mxu0 %v4995_v49  ;;  %1729 = vmatprep.mubr.f32.mxu0 %v6744_v8  ;;  %v5001_v8 = vpack.c.bf16 %v9260_v26, %v9259_v5  ;;  %9289 = vst [vmem:[#allocation49_spill] sm:$0xff] %v7167_v24  ;;  %9295 = vst [vmem:[#allocation63_spill] sm:$0xff] %v7189_v13  ;;  %v7194_v42 = vld [vmem:[#allocation2 + $0x2f8] sm:$0xff] }
 0x12a   :  { %4998 = vmatprep.subr.bf16.mxu0 %v4997_v30  ;;  %5040 = vmatpush3.bf16.msra.mxu1 %v6891_v18  ;;  %v5003_v30 = vpack.c.bf16 %v9263_v9, %v9262_v41  ;;  %v7110_v49 = vsub.f32 %v7056_v28, %v9267_v11  ;;  %v9272_v11 = vand.u32 4294901760, %v7067_v55  ;;  %v7165_v18 = vld [vmem:[#allocation2 + $0x250] sm:$0xff]  ;;  %9296 = vst [vmem:[#allocation64_spill] sm:$0xff] %v7194_v42 }
 0x12b   :  { %5042 = vmatprep.subr.bf16.mxu1 %v6939_v62  ;;  %9288 = vst [vmem:[#allocation45_spill] sm:$0xff] %v7165_v18  ;;  %v7181_v62 = vld [vmem:[#allocation2 + $0x260] sm:$0xff] }
 0x12c   :  { %9268 = vst [vmem:[#allocation39_spill] sm:$0xff] %v7110_v49  ;;  %9293 = vst [vmem:[#allocation61_spill] sm:$0xff] %v7181_v62 }
 0x12d   :  { %5000 = vmatpush3.bf16.msra.mxu0 %v4999_v40  ;;  %v7120_v40 = vsub.f32 %v7060_v1, %v9270_v46  ;;  %v9275_v46 = vld [vmem:[#allocation57_spill] sm:$0xff]  ;;  %v9276_v1 = vld [vmem:[#allocation58_spill] sm:$0xff] }
 0x12e   :  { %5002 = vmatprep.subr.bf16.mxu0 %v5001_v8  ;;  %v7131_v8 = vsub.f32 %v7067_v55, %v9272_v11  ;;  %5044 = vmatpush3.bf16.msra.mxu1 %v6952_v10  ;;  %v5007_v28 = vpack.c.bf16 %v9276_v1, %v9275_v46  ;;  %v7148_v11 = vld [vmem:[#allocation2 + $0x2d0] sm:$0xff]  ;;  %v7150_v55 = vld [vmem:[#allocation2 + $0x2d8] sm:$0xff]  ;;  %v7156_v10 = vpack.c.bf16 %v9283_v29, %v9282_v53  ;;  %v344_v1 = vshll.u32 %v7102_v59, 30 }
 0x12f   :  { %9280 = vst [vmem:[#allocation41_spill] sm:$0xff] %v7148_v11  ;;  %9281 = vst [vmem:[#allocation42_spill] sm:$0xff] %v7150_v55  ;;  %5046 = vmatprep.subr.bf16.mxu1 %v6963_v63  ;;  %v5013_v46 = vpack.c.bf16 %v9287_v45, %v9286_v19  ;;  %v7179_v45 = vld [vmem:[#allocation2 + $0x2e8] sm:$0xff]  ;;  %v9297_v19 = vand.u32 4294901760, %v7110_v49  ;;  %v9300_v53 = vand.u32 4294901760, %v7120_v40  ;;  %v9301_v29 = vand.u32 4294901760, %v7125_v36 }
 0x130   :  { %9273 = vst [vmem:[#allocation40_spill] sm:$0xff] %v7131_v8  ;;  %9284 = vst [vmem:[#allocation43_spill] sm:$0xff] %v7156_v10  ;;  %v9290_v10 = vand.u32 4294901760, %v7094_v20  ;;  %v9303_v49 = vand.u32 4294901760, %v7131_v8 }
 0x131   :  { %5004 = vmatpush3.bf16.msra.mxu0 %v5003_v30  ;;  %9292 = vst [vmem:[#allocation52_spill] sm:$0xff] %v7179_v45  ;;  %v7187_v30 = vld [vmem:[#allocation2 + $0x268] sm:$0xff]  ;;  %v7206_v9 = vpack.c.bf16 %v9301_v29, %v9300_v53  ;;  %v9311_v53 = vand.u32 4294901760, %v7146_v23 }
 0x132   :  { %5006 = vmatprep.subr.bf16.mxu0 %v5005_v34  ;;  %v7175_v59 = vsub.f32 %v7094_v20, %v9290_v10  ;;  %9294 = vst [vmem:[#allocation62_spill] sm:$0xff] %v7187_v30  ;;  %5048 = vmatpush3.bf16.msra.mxu1 %v6977_v38  ;;  %v9298_v34 = vand.u32 4294901760, %v7115_v60  ;;  %v7223_v10 = vsub.s32 %v7046_v0, %v344_v1  ;;  %v9306_v20 = vld [vmem:[#allocation15_spill] sm:$0xff]  ;;  %v9307_v38 = vld [vmem:[#allocation21_spill] sm:$0xff]  ;;  %v9310_v0 = vand.u32 4294901760, %v7165_v18 }
 0x133   :  { %9302 = vst [vmem:[#allocation66_spill] sm:$0xff] %v7206_v9  ;;  %5050 = vmatprep.subr.bf16.mxu1 %v6988_v27  ;;  %v5015_v9 = vpack.c.bf16 %v9307_v38, %v9306_v20 }
 0x134   :  { %v7200_v63 = vpack.c.bf16 %v9298_v34, %v9297_v19  ;;  %v9304_v19 = vand.u32 4294901760, %v7136_v39  ;;  %v7242_v1 = vsub.f32 %v7165_v18, %v9310_v0  ;;  %v9315_v0 = vand.u32 4294901760, %v7179_v45 }
 0x135   :  { %5008 = vmatpush3.bf16.msra.mxu0 %v5007_v28 }
 0x136   :  { %9299 = vst [vmem:[#allocation65_spill] sm:$0xff] %v7200_v63  ;;  %v7216_v34 = vpack.c.bf16 %v9304_v19, %v9303_v49  ;;  %5010 = vmatprep.subr.bf16.mxu0 %v5009_v54  ;;  %v8867_v63 = vand.u32 4294901760, %v7175_v59  ;;  %5052 = vmatpush3.bf16.msra.mxu1 %v7004_v44  ;;  %v9308_v54 = vand.u32 4294901760, %v7148_v11  ;;  %v9309_v19 = vand.u32 4294901760, %v7150_v55 }
 0x137   :  { %5054 = vmatprep.subr.bf16.mxu1 %v7012_v21  ;;  %v7264_v18 = vsub.f32 %v7179_v45, %v9315_v0  ;;  %v9390_v45 = vld [vmem:[#allocation59_spill] sm:$0xff] }
 0x138   :  { %9305 = vst [vmem:[#allocation67_spill] sm:$0xff] %v7216_v34  ;;  %v7232_v49 = vsub.f32 %v7148_v11, %v9308_v54  ;;  %v7237_v28 = vsub.f32 %v7150_v55, %v9309_v19  ;;  %v7248_v8 = vpack.c.bf16 %v8867_v63, %v9311_v53  ;;  %v9313_v54 = vand.u32 4294901760, %v7167_v24  ;;  %v9316_v53 = vld [vmem:[#allocation33_spill] sm:$0xff] }
 0x139   :  { %5012 = vmatpush3.bf16.msra.mxu0 %v5011_v33  ;;  %v9314_v19 = vand.u32 4294901760, %v7177_v35  ;;  %v9317_v33 = vld [vmem:[#allocation34_spill] sm:$0xff]  ;;  %v9391_v11 = vand.u32 4294901760, %v9390_v45 }
 0x13a   :  { %9312 = vst [vmem:[#allocation15_spill] sm:$0xff] %v7248_v8  ;;  %v7254_v29 = vsub.f32 %v7167_v24, %v9313_v54  ;;  %5014 = vmatprep.subr.bf16.mxu0 %v5013_v46  ;;  %v5017_v63 = vpack.c.bf16 %v9317_v33, %v9316_v53  ;;  %v9318_v8 = vand.u32 4294901760, %v7181_v62  ;;  %v9319_v54 = vand.u32 4294901760, %v7187_v30  ;;  %5056 = vmatpush3.bf16.msra.mxu1 %v7032_v15 }
 0x13b   :  { %v7259_v34 = vsub.f32 %v7177_v35, %v9314_v19  ;;  %v9320_v19 = vand.u32 4294901760, %v7189_v13  ;;  %v9322_v46 = vand.u32 4294901760, %v7194_v42  ;;  %v347_v53 = vsub.s32 0, %v7223_v10  ;;  %5090 = vmatprep.subr.bf16.mxu1 %v6620_v50 }
 0x13c   :  { %v7271_v55 = vsub.f32 %v7181_v62, %v9318_v8  ;;  %v7276_v24 = vsub.f32 %v7187_v30, %v9319_v54  ;;  %v5019_v8 = vpack.c.bf16 %v6352_v4, %v6347_v51  ;;  %v8876_v33 = vand.u32 4294901760, %v7232_v49  ;;  %v7299_v30 = vld [vmem:[#allocation2 + $0x270] sm:$0xff]  ;;  %v7301_v62 = vld [vmem:[#allocation2 + $0x278] sm:$0xff] }
 0x13d   :  { %v7281_v35 = vsub.f32 %v7189_v13, %v9320_v19  ;;  %v7286_v0 = vsub.f32 %v7194_v42, %v9322_v46  ;;  %v8875_v54 = vand.u32 4294901760, %v7237_v28  ;;  %5016 = vmatpush3.bf16.msra.mxu0 %v5015_v9  ;;  %v8877_v19 = vand.u32 4294901760, %v7242_v1  ;;  %9324 = vst [vmem:[#allocation34_spill] sm:$0xff] %v7299_v30  ;;  %9325 = vst [vmem:[#allocation68_spill] sm:$0xff] %v7301_v62 }
 0x13e   :  { %5018 = vmatprep.subr.bf16.mxu0 %v5017_v63  ;;  %v5021_v4 = vpack.c.bf16 %v6380_v17, %v6375_v22  ;;  %v8878_v51 = vand.u32 4294901760, %v7271_v55  ;;  %v9326_v13 = vand.u32 4294901760, %v6982_v16  ;;  %v9328_v17 = vand.u32 4294901760, %v7254_v29 }
 0x13f   :  { %9321 = vst [vmem:[#allocation21_spill] sm:$0xff] %v7281_v35  ;;  %9323 = vst [vmem:[#allocation33_spill] sm:$0xff] %v7286_v0  ;;  %v8879_v46 = vand.u32 4294901760, %v7286_v0  ;;  %v7315_v42 = vpack.c.bf16 %v8875_v54, %v8876_v33  ;;  %v9330_v63 = vand.u32 4294901760, %v7259_v34  ;;  %v9331_v50 = vand.u32 4294901760, %v7264_v18 }
 0x140   :  { %1840 = vmatmul.mubr.f32.vlgmr.msra.gmra.mrb[8].mxu1 %v9326_v13  ;;  %v7321_v22 = vpack.c.bf16 %v9328_v17, %v8877_v19  ;;  %v9334_v17 = vand.u32 4294901760, %v7276_v24  ;;  %v9336_v54 = vand.u32 4294901760, %v7281_v35  ;;  %v9354_v13 = vand.u32 4294901760, %v9259_v5  ;;  %v9360_v5 = vld [vmem:[#allocation55_spill] sm:$0xff] }
 0x141   :  { %9327 = vst [vmem:[#allocation69_spill] sm:$0xff] %v7315_v42  ;;  %v7327_v9 = vpack.c.bf16 %v9331_v50, %v9330_v63  ;;  %5092 = vmatpush3.bf16.msra.mxu1 %v6637_v61  ;;  %3883 = vmatprep.mubr.msk.f32.mxu1 %vm239_vm6, %v9090_v14  ;;  %v3869_v50 = vmin.u32 %v347_v53, %v7223_v10  ;;  %v7346_v63 = vld [vmem:[#allocation2 + $0x280] sm:$0xff] }
 0x142   :  { %9329 = vst [vmem:[#allocation70_spill] sm:$0xff] %v7321_v22  ;;  %v7340_v19 = vpack.c.bf16 %v9334_v17, %v8878_v51  ;;  %5020 = vmatpush3.bf16.msra.mxu0 %v5019_v8  ;;  %5094 = vmatprep.subr.bf16.mxu1 %v6693_v37  ;;  %v5023_v61 = vpack.c.bf16 %v6441_v6, %v6436_v32  ;;  %v9338_v17 = vand.u32 4294901760, %v9240_v3  ;;  %v9339_v51 = vand.u32 4294901760, %v9241_v48  ;;  %v7358_v8 = vld [vmem:[#allocation2 + $0x288] sm:$0xff]  ;;  %v7362_v32 = vld [vmem:[#allocation2 + $0x200] sm:$0xff]  ;;  %v7387_v22 = vld [vmem:[#allocation2 + $0x290] sm:$0xff] }
 0x143   :  { %9332 = vst [vmem:[#allocation71_spill] sm:$0xff] %v7327_v9  ;;  %v7352_v33 = vpack.c.bf16 %v8879_v46, %v9336_v54  ;;  %5022 = vmatprep.subr.bf16.mxu0 %v5021_v4  ;;  %v7364_v6 = vld [vmem:[#allocation2 + $0x208] sm:$0xff]  ;;  %v9342_v3 = vand.u32 4294901760, %v7301_v62  ;;  %v349_v4 = vclz %v3869_v50  ;;  %v8880_v46 = vand.u32 4294901760, %v7358_v8  ;;  %v7389_v50 = vld [vmem:[#allocation2 + $0x298] sm:$0xff] }
 0x144   :  { %9335 = vst [vmem:[#allocation53_spill] sm:$0xff] %v7340_v19  ;;  %v5057_v53 = vpack.c.bf16 %v9339_v51, %v9338_v17  ;;  %v9340_v19 = vand.u32 4294901760, %v7299_v30  ;;  %v9345_v51 = vand.u32 4294901760, %v9245_v47  ;;  %v9347_v37 = vand.u32 4294901760, %v9247_v57  ;;  %v9348_v9 = vld [vmem:[#allocation28_spill] sm:$0xff] }
 0x145   :  { %9337 = vst [vmem:[#allocation72_spill] sm:$0xff] %v7352_v33  ;;  %5096 = vmatpush3.bf16.msra.mxu1 %v6803_v31  ;;  %v7374_v48 = vsub.f32 %v7301_v62, %v9342_v3  ;;  %v9344_v31 = vand.u32 4294901760, %v9244_v56  ;;  %v218_v3 = vsub.s32 5, %v9348_v9  ;;  %v8883_v56 = vand.u32 4294901760, %v7364_v6 }
 0x146   :  { %v7369_v54 = vsub.f32 %v7299_v30, %v9340_v19  ;;  %5024 = vmatpush3.bf16.msra.mxu0 %v5023_v61  ;;  %5098 = vmatprep.subr.bf16.mxu1 %v6820_v12  ;;  %v9346_v19 = vand.u32 4294901760, %v9246_v43  ;;  %v8884_v12 = vand.u32 4294901760, %v7362_v32  ;;  %v9349_v47 = vand.u32 4294901760, %v9252_v58 }
 0x147   :  { %9343 = vst [vmem:[#allocation74_spill] sm:$0xff] %v7374_v48  ;;  %v5059_v17 = vpack.c.bf16 %v9345_v51, %v9344_v31  ;;  %5058 = vmatprep.subr.bf16.mxu0 %v5057_v53  ;;  %v9350_v43 = vand.u32 4294901760, %v9253_v2  ;;  %v9351_v61 = vand.u32 4294901760, %v7346_v63  ;;  %v8881_v51 = vand.u32 4294901760, %v7374_v48  ;;  %v7419_v2 = vld [vmem:[#allocation2 + $0x218] sm:$0xff] }
 0x148   :  { %9341 = vst [vmem:[#allocation73_spill] sm:$0xff] %v7369_v54  ;;  %v5061_v33 = vpack.c.bf16 %v9347_v37, %v9346_v19  ;;  %v7404_v37 = vld [vmem:[#allocation2 + $0x210] sm:$0xff]  ;;  %v8882_v31 = vand.u32 4294901760, %v7369_v54  ;;  %v3870_v19 = vadd.s32 4294967294, %v349_v4  ;;  %v7423_v4 = vld [vmem:[#allocation2 + $0x2a8] sm:$0xff]  ;;  %v9394_v54 = vmov 0.0  }
 0x149   :  { %1732 = vmatmul.mubr.f32.vlgmr.msra.gmra.mrb[8].mxu0 %v6982_v16  ;;  %5100 = vmatpush3.bf16.msra.mxu1 %v6839_v7  ;;  %v5063_v57 = vpack.c.bf16 %v9350_v43, %v9349_v47  ;;  %v7402_v53 = vsub.f32 %v7346_v63, %v9351_v61  ;;  %v7415_v7 = vsub.f32 %v7358_v8, %v8880_v46  ;;  %v7421_v47 = vld [vmem:[#allocation2 + $0x2a0] sm:$0xff]  ;;  %v9364_v16 = vld [vmem:[#allocation16_spill] sm:$0xff] }
 0x14a   :  { %5060 = vmatpush3.bf16.msra.mxu0 %v5059_v17  ;;  %3881 = vmatprep.mubr.msk.f32.mxu0 %vm239_vm6, %v9090_v14  ;;  %v9355_v17 = vand.u32 4294901760, %v9260_v26  ;;  %v7433_v61 = vld [vmem:[%s8689_s2] sm:$0xff]  ;;  %v7442_v58 = vpack.c.bf16 %v8881_v51, %v8882_v31  ;;  %vm3871_vm14 = vcmp.lt.s32.totalorder %v3870_v19, 0 }
 0x14b   :  { %9352 = vst [vmem:[#allocation75_spill] sm:$0xff] %v7402_v53  ;;  %9353 = vst [vmem:[#allocation76_spill] sm:$0xff] %v7415_v7  ;;  %5102 = vmatprep.subr.bf16.mxu1 %v6845_v52  ;;  %5062 = vmatprep.subr.bf16.mxu0 %v5061_v33  ;;  %v7436_v46 = vrot.slane %v7433_v61, %v218_v3  ;;  %v9359_v52 = vand.u32 4294901760, %v9262_v41  ;;  %v9361_v33 = vand.u32 4294901760, %v9360_v5  ;;  %v9372_v5 = vld [vmem:[#allocation18_spill] sm:$0xff] }
 0x14c   :  { %v5065_v43 = vpack.c.bf16 %v9355_v17, %v9354_v13  ;;  %9356 = vst [vmem:[#allocation77_spill] sm:$0xff] %v7433_v61  ;;  %9358 = vst [vmem:[#allocation79_spill] sm:$0xff] %v7442_v58  ;;  %v7451_v13 = vsub.f32 %v7362_v32, %v8884_v12  ;;  %v7456_v3 = vsub.f32 %v7364_v6, %v8883_v56  ;;  %v9366_v56 = vand.u32 4294901760, %v7387_v22  ;;  %v9376_v58 = vld [vmem:[#allocation58_spill] sm:$0xff] }
 0x14d   :  { %9357 = vst [vmem:[#allocation78_spill] sm:$0xff] %v7436_v46  ;;  %v5067_v26 = vpack.c.bf16 %v9361_v33, %v9359_v52  ;;  %5104 = vmatpush3.bf16.msra.mxu1 %v9364_v16  ;;  %v9365_v33 = vld [vmem:[#allocation22_spill] sm:$0xff]  ;;  %v9368_v16 = vand.u32 4294901760, %v7389_v50  ;;  %v9370_v52 = vld [vmem:[#allocation56_spill] sm:$0xff]  ;;  %v9373_v17 = vand.u32 4294901760, %v9372_v5  ;;  %vm241_vm15 = vcmp.eq.f32.partialorder %v6204_v25, %v7436_v46 }
 0x14e   :  { %9362 = vst [vmem:[#allocation55_spill] sm:$0xff] %v7451_v13  ;;  %9363 = vst [vmem:[#allocation80_spill] sm:$0xff] %v7456_v3  ;;  %5064 = vmatpush3.bf16.msra.mxu0 %v5063_v57  ;;  %5106 = vmatprep.subr.bf16.mxu1 %v9365_v33  ;;  %v7469_v12 = vsub.f32 %v7387_v22, %v9366_v56  ;;  %v9371_v41 = vand.u32 4294901760, %v9370_v52  ;;  %v9374_v33 = vld [vmem:[#allocation57_spill] sm:$0xff]  ;;  %v9377_v42 = vand.u32 4294901760, %v9376_v58  ;;  %v7493_v52 = vsel %vm3871_vm14, 0, %v3870_v19 }
 0x14f   :  { %v7474_v51 = vsub.f32 %v7389_v50, %v9368_v16  ;;  %5066 = vmatprep.subr.bf16.mxu0 %v5065_v43  ;;  %v9375_v31 = vand.u32 4294901760, %v9374_v33  ;;  %v9378_v16 = vand.u32 4294901760, %v7404_v37  ;;  %v9385_v58 = vand.u32 4294901760, %v7423_v4  ;;  %v9387_v19 = vld [vmem:[#allocation24_spill] sm:$0xff] }
 0x150   :  { %9367 = vst [vmem:[#allocation16_spill] sm:$0xff] %v7469_v12  ;;  %v5069_v57 = vpack.c.bf16 %v9373_v17, %v9371_v41  ;;  %v9380_v17 = vld [vmem:[#allocation17_spill] sm:$0xff]  ;;  %v9381_v41 = vand.u32 4294901760, %v7419_v2  ;;  %v9400_v45 = vand.u32 4294901760, %v7456_v3 }
 0x151   :  { %9369 = vst [vmem:[#allocation22_spill] sm:$0xff] %v7474_v51  ;;  %v5071_v56 = vpack.c.bf16 %v9377_v42, %v9375_v31  ;;  %v7491_v43 = vsub.f32 %v7404_v37, %v9378_v16  ;;  %5108 = vmatpush3.bf16.msra.mxu1 %v9380_v17  ;;  %v9383_v42 = vand.u32 4294901760, %v7421_v47  ;;  %v7509_v33 = vsub.f32 %v7423_v4, %v9385_v58  ;;  %v9392_v58 = vld [vmem:[#allocation13_spill] sm:$0xff] }
 0x152   :  { %v7499_v5 = vsub.f32 %v7419_v2, %v9381_v41  ;;  %5068 = vmatpush3.bf16.msra.mxu0 %v5067_v26  ;;  %5110 = vmatprep.subr.bf16.mxu1 %v9387_v19  ;;  %v9388_v16 = vand.u32 4294901760, %v7402_v53  ;;  %v9389_v41 = vand.u32 4294901760, %v7415_v7  ;;  %v9393_v48 = vand.u32 4294901760, %v9392_v58  ;;  %v9404_v58 = vld [vmem:[#allocation20_spill] sm:$0xff] }
 0x153   :  { %9379 = vst [vmem:[#allocation56_spill] sm:$0xff] %v7491_v43  ;;  %v7504_v31 = vsub.f32 %v7421_v47, %v9383_v42  ;;  %9386 = vst [vmem:[#allocation58_spill] sm:$0xff] %v7509_v33  ;;  %5070 = vmatprep.subr.bf16.mxu0 %v5069_v57  ;;  %v3863_v19 = vsel %vm241_vm15, 1.0, %v9394_v54  ;;  %v9399_v42 = vand.u32 4294901760, %v7451_v13  ;;  %v9405_v54 = vand.u32 4294901760, %v9404_v58 }
 0x154   :  { %9382 = vst [vmem:[#allocation18_spill] sm:$0xff] %v7499_v5  ;;  %v2345_v17 = vsub.f32 %v7402_v53, %v9388_v16  ;;  %v2352_v30 = vsub.f32 %v7415_v7, %v9389_v41  ;;  %v5073_v26 = vpack.c.bf16 %v9393_v48, %v9391_v11  ;;  %v357_v16 = vsub.s32 4294967266, %v7493_v52  ;;  %v9395_v53 = vld [vmem:[#allocation19_spill] sm:$0xff]  ;;  %v9397_v41 = vld [vmem:[#allocation14_spill] sm:$0xff]  ;;  %v9401_v48 = vld [vmem:[#allocation25_spill] sm:$0xff] }
 0x155   :  { %9384 = vst [vmem:[#allocation57_spill] sm:$0xff] %v7504_v31  ;;  %v9396_v61 = vand.u32 4294901760, %v9395_v53  ;;  %v9398_v7 = vand.u32 4294901760, %v9397_v41  ;;  %v2233_v57 = vsub.f32 %v7451_v13, %v9399_v42  ;;  %v2240_v11 = vsub.f32 %v7456_v3, %v9400_v45  ;;  %5112 = vmatpush3.bf16.msra.mxu1 %v9401_v48  ;;  %v9406_v3 = vld [vmem:[#allocation32_spill] sm:$0xff] }
 0x156   :  { %5072 = vmatpush3.bf16.msra.mxu0 %v5071_v56  ;;  %5114 = vmatprep.subr.bf16.mxu1 %v6988_v27  ;;  %v9402_v42 = vand.u32 4294901760, %v7469_v12  ;;  %v9403_v45 = vand.u32 4294901760, %v7474_v51  ;;  %v9407_v0 = vand.u32 4294901760, %v9406_v3  ;;  %v7555_v53 = vsub.f32 %v3863_v19, %v3863_v19 }
 0x157   :  { %v5075_v62 = vpack.c.bf16 %v9398_v7, %v9396_v61  ;;  %v2346_v7 = vand.u32 4294901760, %v2345_v17  ;;  %v2353_v61 = vand.u32 4294901760, %v2352_v30  ;;  %5074 = vmatprep.subr.bf16.mxu0 %v5073_v26  ;;  %v358_v56 = vadd.s32 127, %v357_v16 }
 0x158   :  { %v2359_v41 = vsub.f32 %v7469_v12, %v9402_v42  ;;  %v2366_v48 = vsub.f32 %v7474_v51, %v9403_v45  ;;  %v5077_v13 = vpack.c.bf16 %v9407_v0, %v9405_v54  ;;  %v9408_v27 = vand.u32 4294901760, %v9306_v20 }
 0x159   :  { %v9409_v30 = vand.u32 4294901760, %v9307_v38  ;;  %v2234_v35 = vand.u32 4294901760, %v2233_v57  ;;  %v2241_v42 = vand.u32 4294901760, %v2240_v11  ;;  %5116 = vmatpush3.bf16.msra.mxu1 %v7004_v44  ;;  %v9410_v45 = vand.u32 4294901760, %v7491_v43  ;;  %v9414_v11 = vld [vmem:[#allocation31_spill] sm:$0xff] }
 0x15a   :  { %v9411_v58 = vand.u32 4294901760, %v7499_v5  ;;  %v9412_v54 = vand.u32 4294901760, %v7504_v31  ;;  %v9413_v20 = vand.u32 4294901760, %v7509_v33  ;;  %v353_v19 = vsub.s32 32, %v7493_v52  ;;  %5076 = vmatpush3.bf16.msra.mxu0 %v5075_v62  ;;  %5118 = vmatprep.subr.bf16.mxu1 %v7012_v21 }
 0x15b   :  { %v5079_v17 = vpack.c.bf16 %v9409_v30, %v9408_v27  ;;  %v2247_v26 = vsub.f32 %v7491_v43, %v9410_v45  ;;  %v5153_v44 = vpack.c.bf16 %v2353_v61, %v2346_v7  ;;  %v2360_v16 = vand.u32 4294901760, %v2359_v41  ;;  %5078 = vmatprep.subr.bf16.mxu0 %v5077_v13  ;;  %v9416_v45 = vld [vmem:[#allocation35_spill] sm:$0xff] }
 0x15c   :  { %v2254_v0 = vsub.f32 %v7499_v5, %v9411_v58  ;;  %v2373_v3 = vsub.f32 %v7504_v31, %v9412_v54  ;;  %v2380_v38 = vsub.f32 %v7509_v33, %v9413_v20  ;;  %v2367_v57 = vand.u32 4294901760, %v2366_v48  ;;  %v9418_v31 = vld [vmem:[#allocation29_spill] sm:$0xff]  ;;  %v9419_v5 = vld [vmem:[#allocation23_spill] sm:$0xff] }
 0x15d   :  { %v9415_v27 = vand.u32 4294901760, %v9414_v11  ;;  %v9417_v58 = vand.u32 4294901760, %v9416_v45  ;;  %v337_v20 = vadd.s32 %v9419_v5, %v9418_v31  ;;  %v359_v33 = vshll.u32 %v358_v56, 23  ;;  %5120 = vmatpush3.bf16.msra.mxu1 %v7032_v15 }
 0x15e   :  { %v5155_v43 = vpack.c.bf16 %v2241_v42, %v2234_v35  ;;  %v2248_v62 = vand.u32 4294901760, %v2247_v26  ;;  %v2255_v21 = vand.u32 4294901760, %v2254_v0  ;;  %v2374_v7 = vand.u32 4294901760, %v2373_v3  ;;  %5080 = vmatpush3.bf16.msra.mxu0 %v5079_v17  ;;  %5154 = vmatprep.subr.bf16.mxu1 %v5153_v44  ;;  %v9428_v44 = vld [vmem:[#allocation40_spill] sm:$0xff] }
 0x15f   :  { %v2261_v30 = vsub.f32 %v9414_v11, %v9415_v27  ;;  %v2268_v54 = vsub.f32 %v9416_v45, %v9417_v58  ;;  %v2381_v61 = vand.u32 4294901760, %v2380_v38  ;;  %v355_v13 = vshrl.u32 %v337_v20, %v353_v19  ;;  %v9420_v27 = vld [vmem:[#allocation44_spill] sm:$0xff]  ;;  %v9421_v11 = vld [vmem:[#allocation39_spill] sm:$0xff]  ;;  %v9427_v19 = vld [vmem:[#allocation46_spill] sm:$0xff] }
 0x160   :  { %v5157_v41 = vpack.c.bf16 %v2367_v57, %v2360_v16  ;;  %v2215_v48 = vand.u32 4294901760, %v7555_v53  ;;  %5082 = vmatprep.subr.bf16.mxu0 %v9420_v27  ;;  %v9422_v5 = vand.u32 4294901760, %v9421_v11  ;;  %v9423_v15 = vand.u32 4294901760, %v7115_v60  ;;  %3884 = vmatmul.mubr.msk.f32.vlgmr.msra.gmra.mrb[10].mxu1 %vm238_vm12, %v9090_v14 }
 0x161   :  { %v2262_v58 = vand.u32 4294901760, %v2261_v30  ;;  %v2269_v45 = vand.u32 4294901760, %v2268_v54  ;;  %v354_v56 = vshll.u32 %v7223_v10, %v7493_v52  ;;  %v360_v17 = vor.u32 4788187, %v359_v33  ;;  %5156 = vmatpush3.bf16.msra.mxu1 %v5155_v43  ;;  %3885 = vmatprep.mubr.msk.f32.mxu1 %vm241_vm15, %v9090_v14  ;;  %v9431_v43 = vld [vmem:[#allocation48_spill] sm:$0xff] }
 0x162   :  { %v2387_v35 = vsub.f32 %v9421_v11, %v9422_v5  ;;  %v2394_v31 = vsub.f32 %v7115_v60, %v9423_v15  ;;  %v9425_v26 = vand.u32 4294901760, %v7120_v40  ;;  %v9426_v3 = vand.u32 4294901760, %v7125_v36  ;;  %5084 = vmatpush3.bf16.msra.mxu0 %v9427_v19  ;;  %5158 = vmatprep.subr.bf16.mxu1 %v5157_v41 }
 0x163   :  { %v5159_v10 = vpack.c.bf16 %v2255_v21, %v2248_v62  ;;  %v5161_v52 = vpack.c.bf16 %v2381_v61, %v2374_v7  ;;  %v356_v33 = vor.u32 %v355_v13, %v354_v56  ;;  %v9429_v16 = vand.u32 4294901760, %v9428_v44  ;;  %5086 = vmatprep.subr.bf16.mxu0 %v9431_v43 }
 0x164   :  { %v2275_v0 = vsub.f32 %v7120_v40, %v9425_v26  ;;  %v2282_v38 = vsub.f32 %v7125_v36, %v9426_v3  ;;  %v9430_v30 = vand.u32 4294901760, %v7136_v39  ;;  %v9432_v20 = vand.u32 4294901760, %v7346_v63 }
 0x165   :  { %v2401_v57 = vsub.f32 %v9428_v44, %v9429_v16  ;;  %v9433_v27 = vand.u32 4294901760, %v7358_v8  ;;  %v2216_v21 = vsub.f32 %v7555_v53, %v2215_v48  ;;  %v2388_v7 = vand.u32 4294901760, %v2387_v35  ;;  %5160 = vmatpush3.bf16.msra.mxu1 %v5159_v10 }
 0x166   :  { %v2408_v54 = vsub.f32 %v7136_v39, %v9430_v30  ;;  %v2395_v61 = vand.u32 4294901760, %v2394_v31  ;;  %v361_v13 = vand.u32 2147483647, %v360_v17  ;;  %v5163_v41 = vpack.c.bf16 %v2269_v45, %v2262_v58  ;;  %v9438_v58 = vld [vmem:[#allocation51_spill] sm:$0xff]  ;;  %5162 = vmatprep.subr.bf16.mxu1 %v5161_v52 }
 0x167   :  { %v7621_v62 = vpack.c.bf16 %v9433_v27, %v9432_v20  ;;  %v2276_v5 = vand.u32 4294901760, %v2275_v0  ;;  %v2283_v15 = vand.u32 4294901760, %v2282_v38  ;;  %v9434_v56 = vand.u32 4294901760, %v7146_v23  ;;  %5088 = vmatpush3.bf16.msra.mxu0 %v9438_v58 }
 0x168   :  { %v9435_v63 = vand.u32 4294901760, %v7175_v59  ;;  %v9436_v3 = vand.u32 4294901760, %v7232_v49  ;;  %v9437_v35 = vand.u32 4294901760, %v7237_v28  ;;  %v363_v45 = vcvt.s32.f32 %v356_v33 }
 0x169   :  { %v2289_v26 = vsub.f32 %v7146_v23, %v9434_v56  ;;  %v9439_v17 = vand.u32 4294901760, %v7362_v32  ;;  %v9440_v0 = vand.u32 4294901760, %v7364_v6  ;;  %v2402_v10 = vand.u32 4294901760, %v2401_v57  ;;  %5122 = vmatprep.subr.bf16.mxu0 %v7621_v62  ;;  %5164 = vmatpush3.bf16.msra.mxu1 %v5163_v41 }
 0x16a   :  { %v2296_v8 = vsub.f32 %v7175_v59, %v9435_v63  ;;  %v2415_v19 = vsub.f32 %v7232_v49, %v9436_v3  ;;  %v2422_v31 = vsub.f32 %v7237_v28, %v9437_v35  ;;  %v2409_v16 = vand.u32 4294901760, %v2408_v54  ;;  %3882 = vmatmul.mubr.msk.f32.vlgmr.msra.gmra.mrb[10].mxu0 %vm238_vm12, %v9090_v14  ;;  %v9454_v35 = vld [vmem:[#allocation26_spill] sm:$0xff] }
 0x16b   :  { %v7643_v38 = vpack.c.bf16 %v9440_v0, %v9439_v17  ;;  %v2217_v30 = vand.u32 4294901760, %v2216_v21  ;;  %v5165_v43 = vpack.c.bf16 %v2395_v61, %v2388_v7  ;;  %v9441_v20 = vand.u32 4294901760, %v7387_v22 }
 0x16c   :  { %v9442_v27 = vand.u32 4294901760, %v7389_v50  ;;  %v9444_v52 = vand.u32 4294901760, %v7404_v37  ;;  %v9445_v32 = vand.u32 4294901760, %v7419_v2  ;;  %v364_v6 = vmul.f32 %v363_v45, %v361_v13  ;;  %v9456_v45 = vld [vmem:[#allocation27_spill] sm:$0xff] }
 0x16d   :  { %v5167_v63 = vpack.c.bf16 %v2283_v15, %v2276_v5  ;;  %v9447_v57 = vand.u32 4294901760, %v7242_v1  ;;  %v9448_v21 = vand.u32 4294901760, %v7254_v29  ;;  %v2290_v50 = vand.u32 4294901760, %v2289_v26  ;;  %5124 = vmatpush3.bf16.msra.mxu0 %v7643_v38  ;;  %2218 = vmatprep.mubr.f32.mxu0 %v2217_v30 }
 0x16e   :  { %v7650_v33 = vpack.c.bf16 %v9442_v27, %v9441_v20  ;;  %v7656_v56 = vpack.c.bf16 %v9445_v32, %v9444_v52  ;;  %v2297_v37 = vand.u32 4294901760, %v2296_v8  ;;  %v2416_v2 = vand.u32 4294901760, %v2415_v19  ;;  %5166 = vmatprep.subr.bf16.mxu1 %v5165_v43  ;;  %v9460_v32 = vld [vmem:[#allocation21_spill] sm:$0xff] }
 0x16f   :  { %v2303_v54 = vsub.f32 %v7242_v1, %v9447_v57  ;;  %v2310_v22 = vsub.f32 %v7254_v29, %v9448_v21  ;;  %v2423_v7 = vand.u32 4294901760, %v2422_v31  ;;  %v5169_v61 = vpack.c.bf16 %v2409_v16, %v2402_v10  ;;  %5168 = vmatpush3.bf16.msra.mxu1 %v5167_v63  ;;  %v9462_v63 = vld [vmem:[#allocation33_spill] sm:$0xff] }
 0x170   :  { %9443 = vst [vmem:[#allocation17_spill] sm:$0xff] %v7650_v33  ;;  %9446 = vst [vmem:[#allocation24_spill] sm:$0xff] %v7656_v56  ;;  %v9449_v13 = vand.u32 4294901760, %v7259_v34  ;;  %v9450_v15 = vand.u32 4294901760, %v7264_v18  ;;  %5126 = vmatprep.subr.bf16.mxu0 %v7650_v33  ;;  %v9451_v42 = vand.u32 4294901760, %v7421_v47  ;;  %v9452_v41 = vand.u32 4294901760, %v7423_v4 }
 0x171   :  { %v214_v8 = vsub.s32 4, %v9348_v9  ;;  %v365_v19 = vxor.u32 2147483648, %v364_v6  ;;  %v9455_v31 = vand.u32 4294901760, %v9454_v35  ;;  %v9457_v58 = vand.u32 4294901760, %v9456_v45  ;;  %5128 = vmatpush3.bf16.msra.mxu0 %v7656_v56  ;;  %5170 = vmatprep.subr.bf16.mxu1 %v5169_v61  ;;  %v9469_v61 = vld [vmem:[#allocation77_spill] sm:$0xff]  ;;  %v7842_v9 = vld [vmem:[#allocation2 + $0x3b8] sm:$0xff] }
 0x172   :  { %v2429_v5 = vsub.f32 %v7259_v34, %v9449_v13  ;;  %v2436_v3 = vsub.f32 %v7264_v18, %v9450_v15  ;;  %v7680_v26 = vpack.c.bf16 %v9452_v41, %v9451_v42  ;;  %v2304_v0 = vand.u32 4294901760, %v2303_v54  ;;  %9523 = vst [vmem:[#allocation20_spill] sm:$0xff] %v7842_v9 }
 0x173   :  { %v7687_v17 = vpack.c.bf16 %v9457_v58, %v9455_v31  ;;  %v2311_v10 = vand.u32 4294901760, %v2310_v22  ;;  %v5171_v16 = vpack.c.bf16 %v2297_v37, %v2290_v50  ;;  %v5173_v30 = vpack.c.bf16 %v2423_v7, %v2416_v2  ;;  %v9464_v50 = vld [vmem:[#allocation47_spill] sm:$0xff]  ;;  %v9465_v37 = vld [vmem:[#allocation60_spill] sm:$0xff]  ;;  %v9471_v31 = vld [vmem:[#allocation73_spill] sm:$0xff] }
 0x174   :  { %9453 = vst [vmem:[#allocation59_spill] sm:$0xff] %v7680_v26  ;;  %v9458_v47 = vand.u32 4294901760, %v7271_v55  ;;  %v9459_v43 = vand.u32 4294901760, %v7276_v24  ;;  %v2430_v27 = vand.u32 4294901760, %v2429_v5  ;;  %v2437_v52 = vand.u32 4294901760, %v2436_v3  ;;  %5130 = vmatprep.subr.bf16.mxu0 %v7680_v26  ;;  %v9467_v7 = vld [vmem:[#allocation8_spill] sm:$0xff] }
 0x175   :  { %v9461_v57 = vand.u32 4294901760, %v9460_v32  ;;  %v9463_v21 = vand.u32 4294901760, %v9462_v63  ;;  %vm283_vm0 = vcmp.lt.s32.totalorder %v9464_v50, 0  ;;  %v9466_v2 = vand.u32 4294901760, %v9465_v37  ;;  %5172 = vmatpush3.bf16.msra.mxu1 %v5171_v16  ;;  %5132 = vmatpush3.bf16.msra.mxu0 %v7687_v17  ;;  %v9477_v37 = vld [vmem:[#allocation10_spill] sm:$0xff]  ;;  %v9479_v16 = vld [vmem:[#allocation11_spill] sm:$0xff] }
 0x176   :  { %v2317_v4 = vsub.f32 %v7271_v55, %v9458_v47  ;;  %v2324_v20 = vsub.f32 %v7276_v24, %v9459_v43  ;;  %v9468_v13 = vand.u32 4294901760, %v9467_v7  ;;  %v7711_v5 = vrot.slane %v9469_v61, %v214_v8  ;;  %v9473_v47 = vld [vmem:[#allocation74_spill] sm:$0xff]  ;;  %5174 = vmatprep.subr.bf16.mxu1 %v5173_v30  ;;  %v9475_v8 = vld [vmem:[#allocation9_spill] sm:$0xff] }
 0x177   :  { %v2443_v54 = vsub.f32 %v9460_v32, %v9461_v57  ;;  %v2450_v22 = vsub.f32 %v9462_v63, %v9463_v21  ;;  %v366_v3 = vsel %vm283_vm0, %v365_v19, %v364_v6  ;;  %v5175_v42 = vpack.c.bf16 %v2311_v10, %v2304_v0 }
 0x178   :  { %v7708_v15 = vpack.c.bf16 %v9468_v13, %v9466_v2  ;;  %9470 = vst [vmem:[#allocation13_spill] sm:$0xff] %v7711_v5  ;;  %v2318_v41 = vand.u32 4294901760, %v2317_v4  ;;  %v2325_v35 = vand.u32 4294901760, %v2324_v20  ;;  %v9472_v45 = vand.u32 4294901760, %v9471_v31  ;;  %v9481_v20 = vld [vmem:[#allocation12_spill] sm:$0xff] }
 0x179   :  { %v9474_v43 = vand.u32 4294901760, %v9473_v47  ;;  %v9476_v21 = vand.u32 4294901760, %v9475_v8  ;;  %v9478_v2 = vand.u32 4294901760, %v9477_v37  ;;  %v5177_v19 = vpack.c.bf16 %v2437_v52, %v2430_v27  ;;  %5176 = vmatpush3.bf16.msra.mxu1 %v5175_v42  ;;  %v9492_v42 = vld [vmem:[#allocation41_spill] sm:$0xff] }
 0x17a   :  { %v2331_v58 = vsub.f32 %v9471_v31, %v9472_v45  ;;  %v2444_v0 = vand.u32 4294901760, %v2443_v54  ;;  %v2451_v10 = vand.u32 4294901760, %v2450_v22  ;;  %5134 = vmatprep.subr.bf16.mxu0 %v7708_v15  ;;  %v9480_v4 = vand.u32 4294901760, %v9479_v16 }
 0x17b   :  { %v2338_v57 = vsub.f32 %v9473_v47, %v9474_v43  ;;  %v7726_v6 = vpack.c.bf16 %v9478_v2, %v9476_v21  ;;  %v9482_v7 = vand.u32 4294901760, %v9481_v20  ;;  %vm240_vm1 = vcmp.eq.f32.partialorder %v6204_v25, %v7711_v5  ;;  %v9486_v43 = vld [vmem:[#allocation38_spill] sm:$0xff]  ;;  %5178 = vmatprep.subr.bf16.mxu1 %v5177_v19  ;;  %v9487_v21 = vld [vmem:[#allocation36_spill] sm:$0xff]  ;;  %v9489_v2 = vld [vmem:[#allocation37_spill] sm:$0xff] }
 0x17c   :  { %v9483_v30 = vand.u32 2147483647, %v9464_v50  ;;  %v5179_v52 = vpack.c.bf16 %v2325_v35, %v2318_v41  ;;  %v2332_v54 = vand.u32 4294901760, %v2331_v58  ;;  %v367_v8 = vsub.s32 4, %v9486_v43  ;;  %v9494_v35 = vld [vmem:[#allocation42_spill] sm:$0xff]  ;;  %v7829_v5 = vld [vmem:[#allocation2 + $0x320] sm:$0xff] }
 0x17d   :  { %v7733_v13 = vpack.c.bf16 %v9482_v7, %v9480_v4  ;;  %v2339_v22 = vand.u32 4294901760, %v2338_v57  ;;  %5136 = vmatpush3.bf16.msra.mxu0 %v7726_v6  ;;  %v9488_v37 = vand.u32 4294901760, %v9487_v21  ;;  %v9490_v16 = vand.u32 4294901760, %v9489_v2  ;;  %v9527_v47 = vld [vmem:[#allocation58_spill] sm:$0xff] }
 0x17e   :  { %vm7739_vm2 = vcmp.le.f32.partialorder %v9483_v30, 0.7853982  ;;  %v5181_v20 = vpack.c.bf16 %v2451_v10, %v2444_v0  ;;  %v9491_v7 = vmov 0.0   ;;  %v9493_v41 = vand.u32 4294901760, %v9492_v42  ;;  %5180 = vmatpush3.bf16.msra.mxu1 %v5179_v52  ;;  %v9496_v10 = vld [vmem:[#allocation45_spill] sm:$0xff] }
 0x17f   :  { %v369_v27 = vsel %vm7739_vm2, %v9464_v50, %v366_v3  ;;  %v7752_v4 = vpack.c.bf16 %v9490_v16, %v9488_v37  ;;  %v3862_v3 = vsel %vm240_vm1, 1.0, %v9491_v7  ;;  %5138 = vmatprep.subr.bf16.mxu0 %v7733_v13  ;;  %v9495_v58 = vand.u32 4294901760, %v9494_v35  ;;  %v9498_v37 = vld [vmem:[#allocation49_spill] sm:$0xff]  ;;  %v7831_v7 = vld [vmem:[#allocation2 + $0x328] sm:$0xff] }
 0x180   :  { %5523 = vcosq.f32 %v369_v27  ;;  %v5183_v19 = vpack.c.bf16 %v2339_v22, %v2332_v54  ;;  %v7765_v30 = vsub.f32 %v3862_v3, %v3862_v3  ;;  %v368_v0 = vsel %vm283_vm0, %v367_v8, %v9486_v43  ;;  %5182 = vmatprep.subr.bf16.mxu1 %v5181_v20  ;;  %v9502_v54 = vld [vmem:[#allocation52_spill] sm:$0xff]  ;;  %v9504_v20 = vld [vmem:[#allocation61_spill] sm:$0xff] }
 0x181   :  { %v7763_v57 = vpack.c.bf16 %v9495_v58, %v9493_v41  ;;  %5525 = vsinq.f32 %v369_v27  ;;  %5140 = vmatpush3.bf16.msra.mxu0 %v7752_v4  ;;  %v9497_v21 = vand.u32 4294901760, %v9496_v10  ;;  %v9499_v2 = vand.u32 4294901760, %v9498_v37  ;;  %v9500_v27 = vld [vmem:[#allocation50_spill] sm:$0xff]  ;;  %v9508_v10 = vld [vmem:[#allocation63_spill] sm:$0xff]  ;;  %v9510_v37 = vld [vmem:[#allocation64_spill] sm:$0xff] }
 0x182   :  { %v9501_v52 = vand.u32 4294901760, %v9500_v27  ;;  %v9503_v22 = vand.u32 4294901760, %v9502_v54  ;;  %v370_v43 = vsel %vm7739_vm2, 0, %v368_v0  ;;  %5184 = vmatpush3.bf16.msra.mxu1 %v5183_v19  ;;  %v8917_v8 = vand.u32 4294901760, %v7765_v30  ;;  %v9506_v41 = vld [vmem:[#allocation62_spill] sm:$0xff]  ;;  %v7812_v27 = vld [vmem:[#allocation2 + $0x3a0] sm:$0xff] }
 0x183   :  { %v7775_v16 = vpack.c.bf16 %v9499_v2, %v9497_v21  ;;  %5142 = vmatprep.subr.bf16.mxu0 %v7763_v57  ;;  %5218 = vmatprep.subr.bf16.mxu1 %v7621_v62  ;;  %v9505_v42 = vand.u32 4294901760, %v9504_v20  ;;  %v9507_v35 = vand.u32 4294901760, %v9506_v41  ;;  %v9509_v21 = vand.u32 4294901760, %v9508_v10  ;;  %9512 = vst [vmem:[#allocation19_spill] sm:$0xff] %v7812_v27  ;;  %v9516_v20 = vld [vmem:[#allocation68_spill] sm:$0xff] }
 0x184   :  { %v7782_v3 = vpack.c.bf16 %v9503_v22, %v9501_v52  ;;  %v9511_v45 = vand.u32 4294901760, %v9510_v37  ;;  %v374_v19 = vadd.s32 3, %v370_v43  ;;  %v2222_v2 = vsub.f32 %v7765_v30, %v8917_v8  ;;  %v7814_v52 = vld [vmem:[#allocation2 + $0x3a8] sm:$0xff]  ;;  %v9514_v22 = vld [vmem:[#allocation34_spill] sm:$0xff]  ;;  %v7840_v8 = vld [vmem:[#allocation2 + $0x3b0] sm:$0xff] }
 0x185   :  { %5144 = vmatpush3.bf16.msra.mxu0 %v7775_v16  ;;  %v7793_v58 = vpack.c.bf16 %v9507_v35, %v9505_v42  ;;  %3886 = vmatmul.mubr.msk.f32.vlgmr.msra.gmra.mrb[12].mxu1 %vm240_vm1, %v9090_v14  ;;  %9513 = vst [vmem:[#allocation14_spill] sm:$0xff] %v7814_v52  ;;  %v9515_v43 = vand.u32 4294901760, %v9514_v22  ;;  %v9517_v42 = vand.u32 4294901760, %v9516_v20  ;;  %v9518_v35 = vld [vmem:[#allocation75_spill] sm:$0xff]  ;;  %v9519_v10 = vld [vmem:[#allocation76_spill] sm:$0xff]  ;;  %9522 = vst [vmem:[#allocation25_spill] sm:$0xff] %v7840_v8  ;;  %vm373_vm6 = vweird.f32 %v9464_v50 }
 0x186   :  { %5146 = vmatprep.subr.bf16.mxu0 %v7782_v3  ;;  %v7800_v0 = vpack.c.bf16 %v9511_v45, %v9509_v21  ;;  %5220 = vmatpush3.bf16.msra.mxu1 %v7643_v38  ;;  %v5185_v21 = vpack.c.bf16 %v9519_v10, %v9518_v35  ;;  %v375_v37 = vand.u32 3, %v374_v19  ;;  %v2223_v22 = vand.u32 4294901760, %v2222_v2  ;;  %v9521_v20 = vld [vmem:[#allocation80_spill] sm:$0xff]  ;;  %v9526_v35 = vld [vmem:[#allocation57_spill] sm:$0xff] }
 0x187   :  { %2698 = vmatprep.mubr.f32.mxu1 %v2215_v48  ;;  %5222 = vmatprep.subr.bf16.mxu1 %v7650_v33  ;;  %v7822_v41 = vpack.c.bf16 %v9517_v42, %v9515_v43  ;;  %v9520_v43 = vld [vmem:[#allocation55_spill] sm:$0xff]  ;;  %v5189_v19 = vpack.c.bf16 %v7474_v51, %v7469_v12  ;;  %v9524_v10 = vld [vmem:[#allocation56_spill] sm:$0xff]  ;;  %v5193_v31 = vpack.c.bf16 %v9527_v47, %v9526_v35  ;;  %v7852_v51 = vld [vmem:[#allocation2 + $0x338] sm:$0xff] }
 0x188   :  { %v5187_v42 = vpack.c.bf16 %v9521_v20, %v9520_v43  ;;  %v7850_v43 = vld [vmem:[#allocation2 + $0x330] sm:$0xff]  ;;  %9529 = vst [vmem:[#allocation29_spill] sm:$0xff] %v7852_v51  ;;  %v9530_v12 = vld [vmem:[#allocation31_spill] sm:$0xff]  ;;  %vm376_vm3 = vcmp.lt.s32.totalorder %v375_v37, 2  ;;  %v7868_v20 = vld [vmem:[#allocation2 + $0x3c8] sm:$0xff]  ;;  %vm377_vm4 = vcmp.eq.s32.totalorder %v375_v37, 0 }
 0x189   :  { %5148 = vmatpush3.bf16.msra.mxu0 %v7793_v58  ;;  %9528 = vst [vmem:[#allocation32_spill] sm:$0xff] %v7850_v43  ;;  %v9531_v33 = vld [vmem:[#allocation35_spill] sm:$0xff]  ;;  %9537 = vst [vmem:[#allocation54_spill] sm:$0xff] %v7868_v20  ;;  %vm380_vm5 = vcmp.eq.s32.totalorder %v375_v37, 2  ;;  %v8934_v35 = vand.u32 4294901760, %v7850_v43  ;;  %v7988_v50 = vld [vmem:[#allocation2 + $0x368] sm:$0xff] }
 0x18a   :  { %v5524_v54 = vpop.eup %5523  ;;  %5150 = vmatprep.subr.bf16.mxu0 %v7800_v0  ;;  %5224 = vmatpush3.bf16.msra.mxu1 %v7656_v56  ;;  %v9525_v56 = vld [vmem:[#allocation18_spill] sm:$0xff]  ;;  %v5195_v46 = vpack.c.bf16 %v9531_v33, %v9530_v12  ;;  %v9540_v12 = vand.u32 4294901760, %v7829_v5  ;;  %9560 = vst [vmem:[#allocation9_spill] sm:$0xff] %v7988_v50 }
 0x18b   :  { %v5526_v48 = vpop.eup %5525  ;;  %5226 = vmatprep.subr.bf16.mxu1 %v7680_v26  ;;  %v381_v61 = vxor.u32 2147483648, %v5524_v54  ;;  %v5191_v2 = vpack.c.bf16 %v9525_v56, %v9524_v10  ;;  %v9534_v56 = vand.u32 4294901760, %v7814_v52  ;;  %v7866_v26 = vld [vmem:[#allocation2 + $0x3c0] sm:$0xff]  ;;  %v9541_v10 = vand.u32 4294901760, %v7831_v7 }
 0x18c   :  { %v378_v45 = vxor.u32 2147483648, %v5526_v48  ;;  %9536 = vst [vmem:[#allocation39_spill] sm:$0xff] %v7866_v26  ;;  %v7884_v33 = vsub.f32 %v7829_v5, %v9540_v12  ;;  %v5197_v12 = vpack.c.bf16 %v7115_v60, %v9421_v11  ;;  %v9544_v60 = vand.u32 4294901760, %v7852_v51 }
 0x18d   :  { %5152 = vmatpush3.bf16.msra.mxu0 %v7822_v41  ;;  %v7864_v47 = vsub.f32 %v7814_v52, %v9534_v56  ;;  %v382_v52 = vsel %vm380_vm5, %v381_v61, %v5526_v48  ;;  %v9543_v61 = vand.u32 4294901760, %v7842_v9 }
 0x18e   :  { %5186 = vmatprep.subr.bf16.mxu0 %v5185_v21  ;;  %v9532_v21 = vand.u32 4294901760, %v7812_v27  ;;  %5228 = vmatpush3.bf16.msra.mxu1 %v7687_v17  ;;  %v379_v56 = vsel %vm377_vm4, %v5524_v54, %v378_v45  ;;  %v7920_v11 = vsub.f32 %v7852_v51, %v9544_v60 }
 0x18f   :  { %9535 = vst [vmem:[#allocation44_spill] sm:$0xff] %v7864_v47  ;;  %5230 = vmatprep.subr.bf16.mxu1 %v7708_v15  ;;  %v7909_v48 = vsub.f32 %v7842_v9, %v9543_v61  ;;  %v8019_v9 = vld [vmem:[#allocation2 + $0x370] sm:$0xff] }
 0x190   :  { %v7859_v25 = vsub.f32 %v7812_v27, %v9532_v21  ;;  %2224 = vmatmul.mubr.f32.vlgmr.msra.gmra.mrb[12].mxu0 %v2223_v22  ;;  %v7873_v21 = vld [vmem:[#allocation2 + $0x340] sm:$0xff]  ;;  %v7875_v27 = vld [vmem:[#allocation2 + $0x348] sm:$0xff]  ;;  %v9542_v22 = vand.u32 4294901760, %v7840_v8  ;;  %v9567_v51 = vand.u32 4294901760, %v7920_v11  ;;  %9569 = vst [vmem:[#allocation36_spill] sm:$0xff] %v8019_v9 }
 0x191   :  { %9538 = vst [vmem:[#allocation46_spill] sm:$0xff] %v7873_v21  ;;  %9539 = vst [vmem:[#allocation40_spill] sm:$0xff] %v7875_v27  ;;  %5188 = vmatpush3.bf16.msra.mxu0 %v5187_v42  ;;  %2591 = vmatprep.mubr.f32.mxu0 %v7555_v53  ;;  %v7889_v42 = vsub.f32 %v7831_v7, %v9541_v10  ;;  %v8936_v45 = vand.u32 4294901760, %v7873_v21  ;;  %v383_v10 = vsel %vm376_vm3, %v379_v56, %v382_v52  ;;  %v7951_v56 = vld [vmem:[#allocation2 + $0x3d0] sm:$0xff] }
 0x192   :  { %9533 = vst [vmem:[#allocation23_spill] sm:$0xff] %v7859_v25  ;;  %5190 = vmatprep.subr.bf16.mxu0 %v5189_v19  ;;  %v8935_v54 = vand.u32 4294901760, %v7859_v25  ;;  %5232 = vmatpush3.bf16.msra.mxu1 %v7726_v6  ;;  %v7904_v53 = vsub.f32 %v7840_v8, %v9542_v22  ;;  %v7915_v19 = vsub.f32 %v7850_v43, %v8934_v35  ;;  %v9545_v52 = vand.u32 4294901760, %v7864_v47  ;;  %v8021_v8 = vld [vmem:[#allocation2 + $0x378] sm:$0xff] }
 0x193   :  { %5234 = vmatprep.subr.bf16.mxu1 %v7733_v13  ;;  %v9547_v22 = vand.u32 4294901760, %v7866_v26  ;;  %v9548_v35 = vand.u32 4294901760, %v7868_v20  ;;  %9550 = vst [vmem:[#allocation51_spill] sm:$0xff] %v7951_v56  ;;  %9570 = vst [vmem:[#allocation37_spill] sm:$0xff] %v8021_v8 }
 0x194   :  { %v7926_v37 = vpack.c.bf16 %v9545_v52, %v8935_v54  ;;  %v9549_v52 = vand.u32 4294901760, %v7875_v27  ;;  %v9563_v43 = vand.u32 4294901760, %v7904_v53 }
 0x195   :  { %5192 = vmatpush3.bf16.msra.mxu0 %v5191_v2  ;;  %v7933_v61 = vsub.f32 %v7866_v26, %v9547_v22  ;;  %v7938_v60 = vsub.f32 %v7868_v20, %v9548_v35  ;;  %v5199_v35 = vpack.c.bf16 %v7125_v36, %v7120_v40  ;;  %v7956_v22 = vsel %vm373_vm6, nan, %v383_v10  ;;  %v7959_v2 = vld [vmem:[#allocation2 + $0x3d8] sm:$0xff]  ;;  %v7977_v20 = vld [vmem:[#allocation2 + $0x3e0] sm:$0xff]  ;;  %v7979_v26 = vld [vmem:[#allocation2 + $0x3e8] sm:$0xff] }
 0x196   :  { %9546 = vst [vmem:[#allocation48_spill] sm:$0xff] %v7926_v37  ;;  %5194 = vmatprep.subr.bf16.mxu0 %v5193_v31  ;;  %v7944_v31 = vsub.f32 %v7873_v21, %v8936_v45  ;;  %v7949_v54 = vsub.f32 %v7875_v27, %v9549_v52  ;;  %5236 = vmatpush3.bf16.msra.mxu1 %v7752_v4  ;;  %9551 = vst [vmem:[#allocation26_spill] sm:$0xff] %v7959_v2  ;;  %v7961_v45 = vld [vmem:[#allocation2 + $0x350] sm:$0xff]  ;;  %v9553_v37 = vand.u32 4294901760, %v7884_v33  ;;  %v7975_v21 = vld [vmem:[#allocation2 + $0x358] sm:$0xff] }
 0x197   :  { %9552 = vst [vmem:[#allocation27_spill] sm:$0xff] %v7961_v45  ;;  %v9554_v52 = vand.u32 4294901760, %v7889_v42  ;;  %5238 = vmatprep.subr.bf16.mxu1 %v7763_v57  ;;  %v5201_v36 = vpack.c.bf16 %v7136_v39, %v9428_v44  ;;  %9556 = vst [vmem:[#allocation33_spill] sm:$0xff] %v7975_v21  ;;  %v7986_v10 = vld [vmem:[#allocation2 + $0x360] sm:$0xff]  ;;  %v5207_v44 = vpack.c.bf16 %v7254_v29, %v7242_v1  ;;  %v9576_v29 = vand.u32 4294901760, %v7961_v45 }
 0x198   :  { %9557 = vst [vmem:[#allocation47_spill] sm:$0xff] %v7977_v20  ;;  %9558 = vst [vmem:[#allocation60_spill] sm:$0xff] %v7979_v26  ;;  %v9582_v1 = vand.u32 4294901760, %v7979_v26 }
 0x199   :  { %v7967_v27 = vpack.c.bf16 %v9554_v52, %v9553_v37  ;;  %5196 = vmatpush3.bf16.msra.mxu0 %v5195_v46  ;;  %v3964_v37 = vpop.f32.mrb[0].mxu1  ;;  %v5203_v46 = vpack.c.bf16 %v7175_v59, %v7146_v23  ;;  %9559 = vst [vmem:[#allocation8_spill] sm:$0xff] %v7986_v10  ;;  %v7995_v23 = vld [vmem:[#allocation2 + $0x3f0] sm:$0xff]  ;;  %v7997_v52 = vld [vmem:[#allocation2 + $0x3f8] sm:$0xff] }
 0x19a   :  { %5198 = vmatprep.subr.bf16.mxu0 %v5197_v12  ;;  %v3965_v40 = vpop.f32.mrb[1].mxu1  ;;  %9561 = vst [vmem:[#allocation10_spill] sm:$0xff] %v7995_v23  ;;  %9562 = vst [vmem:[#allocation11_spill] sm:$0xff] %v7997_v52  ;;  %5240 = vmatpush3.bf16.msra.mxu1 %v7775_v16  ;;  %v9566_v12 = vand.u32 4294901760, %v7915_v19 }
 0x19b   :  { %9555 = vst [vmem:[#allocation21_spill] sm:$0xff] %v7967_v27  ;;  %v5205_v27 = vpack.c.bf16 %v7237_v28, %v7232_v49  ;;  %v7999_v39 = vadd.f32 %v3965_v40, %v3964_v37  ;;  %v9564_v28 = vand.u32 4294901760, %v7909_v48  ;;  %5242 = vmatprep.subr.bf16.mxu1 %v7782_v3  ;;  %v5209_v40 = vpack.c.bf16 %v7264_v18, %v7259_v34  ;;  %v3872_v37 = vld [vmem:[%s8692_s5] ss:$0 sm:$0xff] }
 0x19c   :  { %v8013_v59 = vpack.c.bf16 %v9567_v51, %v9566_v12  ;;  %v8054_v18 = vsub.f32 %v7961_v45, %v9576_v29  ;;  %v9581_v29 = vand.u32 4294901760, %v7977_v20  ;;  %v8202_v45 = vld [vmem:[#allocation2 + $0x390] sm:$0xff] }
 0x19d   :  { %v8007_v49 = vpack.c.bf16 %v9564_v28, %v9563_v43  ;;  %5200 = vmatpush3.bf16.msra.mxu0 %v5199_v35  ;;  %v9571_v43 = vand.u32 4294901760, %v7933_v61  ;;  %v9572_v28 = vand.u32 4294901760, %v7938_v60  ;;  %v9580_v35 = vand.u32 4294901760, %v7975_v21 }
 0x19e   :  { %9568 = vst [vmem:[#allocation38_spill] sm:$0xff] %v8013_v59  ;;  %5202 = vmatprep.subr.bf16.mxu0 %v5201_v36  ;;  %v9574_v59 = vand.u32 4294901760, %v7951_v56  ;;  %v9575_v36 = vand.u32 4294901760, %v7959_v2  ;;  %5244 = vmatpush3.bf16.msra.mxu1 %v7793_v58  ;;  %v8073_v34 = vsub.f32 %v7977_v20, %v9581_v29  ;;  %v9586_v20 = vand.u32 4294901760, %v7997_v52 }
 0x19f   :  { %9565 = vst [vmem:[#allocation12_spill] sm:$0xff] %v8007_v49  ;;  %v8027_v49 = vpack.c.bf16 %v9572_v28, %v9571_v43  ;;  %5246 = vmatprep.subr.bf16.mxu1 %v7800_v0  ;;  %v8068_v51 = vsub.f32 %v7975_v21, %v9580_v35 }
 0x1a0   :  { %v8040_v43 = vsub.f32 %v7951_v56, %v9574_v59  ;;  %v8045_v28 = vsub.f32 %v7959_v2, %v9575_v36  ;;  %v9577_v59 = vand.u32 4294901760, %v7944_v31  ;;  %v9578_v36 = vand.u32 4294901760, %v7949_v54  ;;  %v9644_v2 = vld [vmem:[#allocation65_spill] sm:$0xff] }
 0x1a1   :  { %9573 = vst [vmem:[#allocation41_spill] sm:$0xff] %v8027_v49  ;;  %5204 = vmatpush3.bf16.msra.mxu0 %v5203_v46  ;;  %v8078_v49 = vsub.f32 %v7979_v26, %v9582_v1  ;;  %v9583_v46 = vand.u32 4294901760, %v7986_v10  ;;  %v8098_v1 = vsub.f32 %v7997_v52, %v9586_v20  ;;  %v392_v26 = vmul.f32 %v3872_v37, %v7956_v22 }
 0x1a2   :  { %v8062_v12 = vpack.c.bf16 %v9578_v36, %v9577_v59  ;;  %5206 = vmatprep.subr.bf16.mxu0 %v5205_v27  ;;  %v9584_v36 = vand.u32 4294901760, %v7988_v50  ;;  %v3929_v27 = vpop.f32.mrb[0].mxu0  ;;  %5248 = vmatpush3.bf16.msra.mxu1 %v7822_v41  ;;  %v9587_v20 = vand.u32 4294901760, %v8019_v9  ;;  %v9588_v22 = vand.u32 4294901760, %v8021_v8 }
 0x1a3   :  { %v8083_v59 = vsub.f32 %v7986_v10, %v9583_v46  ;;  %v5211_v46 = vpack.c.bf16 %v7276_v24, %v7271_v55  ;;  %5282 = vmatprep.subr.bf16.mxu1 %v7621_v62  ;;  %v8952_v37 = vand.u32 4294901760, %v8078_v49  ;;  %v9590_v62 = vand.u32 4294901760, %v8040_v43 }
 0x1a4   :  { %9579 = vst [vmem:[#allocation42_spill] sm:$0xff] %v8062_v12  ;;  %v8088_v35 = vsub.f32 %v7988_v50, %v9584_v36  ;;  %v9585_v12 = vand.u32 4294901760, %v7995_v23  ;;  %v5213_v36 = vpack.c.bf16 %v9462_v63, %v9460_v32  ;;  %v8112_v52 = vsub.f32 %v8019_v9, %v9587_v20 }
 0x1a5   :  { %v8117_v55 = vsub.f32 %v8021_v8, %v9588_v22  ;;  %5208 = vmatpush3.bf16.msra.mxu0 %v5207_v44  ;;  %v8951_v32 = vand.u32 4294901760, %v8068_v51  ;;  %v8953_v63 = vand.u32 4294901760, %v8073_v34  ;;  %v9589_v44 = vand.u32 4294901760, %v7765_v30 }
 0x1a6   :  { %v8093_v29 = vsub.f32 %v7995_v23, %v9585_v12  ;;  %v3930_v12 = vpop.f32.mrb[1].mxu0  ;;  %5210 = vmatprep.subr.bf16.mxu0 %v5209_v40  ;;  %v8954_v20 = vand.u32 4294901760, %v8088_v35  ;;  %v9593_v40 = vand.u32 4294901760, %v8054_v18 }
 0x1a7   :  { %v3931_v24 = vadd.f32 %v3930_v12, %v3929_v27  ;;  %2702 = vmatmul.mubr.f32.vlgmr.msra.gmra.mrb[14].mxu1 %v9589_v44  ;;  %v9591_v27 = vand.u32 4294901760, %v8045_v28  ;;  %v9629_v44 = vld [vmem:[#allocation57_spill] sm:$0xff] }
 0x1a8   :  { %v8139_v10 = vpack.c.bf16 %v8951_v32, %v9593_v40  ;;  %5284 = vmatpush3.bf16.msra.mxu1 %v7643_v38  ;;  %3889 = vmatprep.mubr.msk.f32.mxu1 %vm241_vm15, %v9090_v14  ;;  %v9598_v40 = vand.u32 4294901760, %v8083_v59  ;;  %v9602_v38 = vld [vmem:[#allocation74_spill] sm:$0xff] }
 0x1a9   :  { %v502_v50 = vadd.f32 %v3931_v24, %v392_v26  ;;  %v8133_v12 = vpack.c.bf16 %v9591_v27, %v9590_v62  ;;  %v8145_v26 = vpack.c.bf16 %v8952_v37, %v8953_v63  ;;  %v9596_v24 = vld [vmem:[#allocation30_spill] sm:$0xff]  ;;  %5212 = vmatpush3.bf16.msra.mxu0 %v5211_v46  ;;  %v9600_v37 = vld [vmem:[#allocation17_spill] sm:$0xff]  ;;  %v9604_v62 = vand.u32 4294901760, %v8098_v1 }
 0x1aa   :  { %9594 = vst [vmem:[#allocation49_spill] sm:$0xff] %v8139_v10  ;;  %v8158_v32 = vpack.c.bf16 %v8954_v20, %v9598_v40  ;;  %5286 = vmatprep.subr.bf16.mxu1 %v9600_v37  ;;  %v9601_v63 = vld [vmem:[#allocation73_spill] sm:$0xff]  ;;  %5214 = vmatprep.subr.bf16.mxu0 %v5213_v36  ;;  %v9606_v10 = vld [vmem:[#allocation75_spill] sm:$0xff]  ;;  %v9608_v40 = vld [vmem:[#allocation76_spill] sm:$0xff] }
 0x1ab   :  { %9592 = vst [vmem:[#allocation45_spill] sm:$0xff] %v8133_v12  ;;  %9595 = vst [vmem:[#allocation50_spill] sm:$0xff] %v8145_v26  ;;  %v5215_v22 = vpack.c.bf16 %v9602_v38, %v9601_v63  ;;  %v8164_v23 = vadd.f32 %v7999_v39, %v502_v50  ;;  %v9603_v26 = vand.u32 4294901760, %v8093_v29  ;;  %v9607_v12 = vand.u32 4294901760, %v9606_v10  ;;  %v8178_v37 = vld [vmem:[#allocation2 + $0x388] sm:$0xff]  ;;  %v9614_v10 = vld [vmem:[#allocation59_spill] sm:$0xff] }
 0x1ac   :  { %9599 = vst [vmem:[#allocation52_spill] sm:$0xff] %v8158_v32  ;;  %v9609_v20 = vand.u32 4294901760, %v9608_v40  ;;  %v8176_v32 = vld [vmem:[#allocation2 + $0x380] sm:$0xff]  ;;  %v9610_v63 = vand.u32 4294901760, %v8112_v52  ;;  %v9611_v50 = vand.u32 4294901760, %v8117_v55  ;;  %v9613_v38 = vld [vmem:[#allocation24_spill] sm:$0xff] }
 0x1ad   :  { %v8170_v27 = vpack.c.bf16 %v9604_v62, %v9603_v26  ;;  %5288 = vmatpush3.bf16.msra.mxu1 %v9613_v38  ;;  %v8187_v26 = vld [vmem:[#allocation2 + $0x300] sm:$0xff]  ;;  %v8189_v36 = vld [vmem:[#allocation2 + $0x308] sm:$0xff]  ;;  %5216 = vmatpush3.bf16.msra.mxu0 %v5215_v22  ;;  %v8960_v8 = vand.u32 4294901760, %v8176_v32  ;;  %v8959_v9 = vand.u32 4294901760, %v8178_v37  ;;  %v9621_v38 = vld [vmem:[#allocation22_spill] sm:$0xff] }
 0x1ae   :  { %v5249_v46 = vpack.c.bf16 %v9609_v20, %v9607_v12  ;;  %v8184_v39 = vpack.c.bf16 %v9611_v50, %v9610_v63  ;;  %5290 = vmatprep.subr.bf16.mxu1 %v9614_v10  ;;  %v9615_v20 = vld [vmem:[#allocation55_spill] sm:$0xff]  ;;  %v9617_v62 = vld [vmem:[#allocation80_spill] sm:$0xff]  ;;  %v8204_v22 = vld [vmem:[#allocation2 + $0x398] sm:$0xff]  ;;  %v8962_v10 = vand.u32 4294901760, %v8187_v26 }
 0x1af   :  { %9605 = vst [vmem:[#allocation61_spill] sm:$0xff] %v8170_v27  ;;  %v9616_v12 = vand.u32 4294901760, %v9615_v20  ;;  %v9618_v40 = vand.u32 4294901760, %v9617_v62  ;;  %v9619_v63 = vld [vmem:[#allocation16_spill] sm:$0xff]  ;;  %v8961_v20 = vand.u32 4294901760, %v8189_v36 }
 0x1b0   :  { %9612 = vst [vmem:[#allocation62_spill] sm:$0xff] %v8184_v39  ;;  %5250 = vmatprep.subr.bf16.mxu0 %v5249_v46  ;;  %v9620_v50 = vand.u32 4294901760, %v9619_v63  ;;  %v9622_v39 = vand.u32 4294901760, %v9621_v38  ;;  %2594 = vmatmul.mubr.f32.vlgmr.msra.gmra.mrb[14].mxu0 %v7765_v30  ;;  %v9625_v46 = vld [vmem:[#allocation18_spill] sm:$0xff]  ;;  %v8963_v30 = vand.u32 4294901760, %v8202_v45 }
 0x1b1   :  { %v5251_v27 = vpack.c.bf16 %v9618_v40, %v9616_v12  ;;  %5292 = vmatpush3.bf16.msra.mxu1 %v7687_v17  ;;  %v9623_v12 = vld [vmem:[#allocation56_spill] sm:$0xff]  ;;  %v9626_v40 = vand.u32 4294901760, %v9625_v46  ;;  %3887 = vmatprep.mubr.msk.f32.mxu0 %vm241_vm15, %v9090_v14  ;;  %v8226_v17 = vsub.f32 %v8178_v37, %v8959_v9  ;;  %v8232_v38 = vld [vmem:[#allocation2 + $0x318] sm:$0xff]  ;;  %v8242_v9 = vsub.f32 %v8187_v26, %v8962_v10  ;;  %v4034_v10 = vpop.f32.mrb[2].mxu1 }
 0x1b2   :  { %v5253_v21 = vpack.c.bf16 %v9622_v39, %v9620_v50  ;;  %v9624_v62 = vand.u32 4294901760, %v9623_v12  ;;  %v8221_v39 = vsub.f32 %v8176_v32, %v8960_v8  ;;  %5294 = vmatprep.subr.bf16.mxu1 %v7708_v15  ;;  %v9630_v12 = vand.u32 4294901760, %v9629_v44  ;;  %v9635_v50 = vld [vmem:[#allocation28_spill] sm:$0xff] }
 0x1b3   :  { %5252 = vmatpush3.bf16.msra.mxu0 %v5251_v27  ;;  %9628 = vst [vmem:[#allocation64_spill] sm:$0xff] %v8226_v17  ;;  %v8230_v27 = vld [vmem:[#allocation2 + $0x310] sm:$0xff]  ;;  %9633 = vst [vmem:[#allocation34_spill] sm:$0xff] %v8242_v9  ;;  %v8247_v8 = vsub.f32 %v8189_v36, %v8961_v20  ;;  %v226_v15 = vsub.s32 7, %v9635_v50  ;;  %v8966_v44 = vand.u32 4294901760, %v8232_v38 }
 0x1b4   :  { %v5255_v63 = vpack.c.bf16 %v9626_v40, %v9624_v62  ;;  %9627 = vst [vmem:[#allocation63_spill] sm:$0xff] %v8221_v39  ;;  %5254 = vmatprep.subr.bf16.mxu0 %v5253_v21  ;;  %v9631_v62 = vld [vmem:[#allocation58_spill] sm:$0xff]  ;;  %v8964_v21 = vand.u32 4294901760, %v8230_v27 }
 0x1b5   :  { %v9632_v46 = vand.u32 4294901760, %v9631_v62  ;;  %9634 = vst [vmem:[#allocation68_spill] sm:$0xff] %v8247_v8  ;;  %5296 = vmatpush3.bf16.msra.mxu1 %v7726_v6  ;;  %v8970_v62 = vand.u32 4294901760, %v8226_v17  ;;  %v9637_v6 = vand.u32 4294901760, %v8204_v22  ;;  %v9646_v56 = vand.u32 4294901760, %v8247_v8 }
 0x1b6   :  { %5298 = vmatprep.subr.bf16.mxu1 %v7733_v13  ;;  %v9639_v13 = vld [vmem:[#allocation77_spill] sm:$0xff] }
 0x1b7   :  { %v5257_v40 = vpack.c.bf16 %v9632_v46, %v9630_v12  ;;  %5256 = vmatpush3.bf16.msra.mxu0 %v5255_v63  ;;  %v8259_v46 = vsub.f32 %v8202_v45, %v8963_v30  ;;  %v8264_v20 = vsub.f32 %v8204_v22, %v9637_v6  ;;  %v8270_v12 = vrot.slane %v9639_v13, %v226_v15 }
 0x1b8   :  { %v8275_v30 = vsub.f32 %v8230_v27, %v8964_v21  ;;  %v8280_v6 = vsub.f32 %v8232_v38, %v8966_v44  ;;  %v9643_v63 = vand.u32 4294901760, %v8221_v39  ;;  %v3214_v15 = vsub.f32 %v8226_v17, %v8970_v62  ;;  %v4035_v44 = vpop.f32.mrb[3].mxu1 }
 0x1b9   :  { %9636 = vst [vmem:[#allocation31_spill] sm:$0xff] %v8259_v46  ;;  %9638 = vst [vmem:[#allocation35_spill] sm:$0xff] %v8264_v20  ;;  %5258 = vmatprep.subr.bf16.mxu0 %v5257_v40  ;;  %5300 = vmatpush3.bf16.msra.mxu1 %v7752_v4  ;;  %v9642_v40 = vld [vmem:[#allocation43_spill] sm:$0xff]  ;;  %vm243_vm7 = vcmp.eq.f32.partialorder %v9596_v24, %v8270_v12  ;;  %v9651_v17 = vmov 0.0  }
 0x1ba   :  { %9640 = vst [vmem:[#allocation30_spill] sm:$0xff] %v8275_v30  ;;  %9641 = vst [vmem:[#allocation78_spill] sm:$0xff] %v8280_v6  ;;  %5302 = vmatprep.subr.bf16.mxu1 %v7763_v57  ;;  %v3207_v4 = vsub.f32 %v8221_v39, %v9643_v63  ;;  %v3102_v63 = vsub.f32 %v8247_v8, %v9646_v56  ;;  %v4036_v39 = vadd.f32 %v4035_v44, %v4034_v10  ;;  %v9650_v44 = vld [vmem:[#allocation67_spill] sm:$0xff] }
 0x1bb   :  { %5260 = vmatpush3.bf16.msra.mxu0 %v9642_v40  ;;  %v9645_v40 = vand.u32 4294901760, %v8242_v9  ;;  %v8983_v21 = vand.u32 4294901760, %v8280_v6  ;;  %v9649_v10 = vand.u32 4294901760, %v8264_v20 }
 0x1bc   :  { %5262 = vmatprep.subr.bf16.mxu0 %v9644_v2  ;;  %v9647_v2 = vld [vmem:[#allocation66_spill] sm:$0xff]  ;;  %v3208_v13 = vand.u32 4294901760, %v3207_v4  ;;  %v3103_v62 = vand.u32 4294901760, %v3102_v63  ;;  %v9654_v63 = vand.u32 4294901760, %v7864_v47 }
 0x1bd   :  { %v3095_v57 = vsub.f32 %v8242_v9, %v9645_v40  ;;  %5304 = vmatpush3.bf16.msra.mxu1 %v7775_v16  ;;  %v3215_v40 = vand.u32 4294901760, %v3214_v15  ;;  %v9648_v9 = vand.u32 4294901760, %v8259_v46  ;;  %v3228_v16 = vsub.f32 %v8264_v20, %v9649_v10 }
 0x1be   :  { %5306 = vmatprep.subr.bf16.mxu1 %v7782_v3  ;;  %v9652_v3 = vand.u32 4294901760, %v8275_v30  ;;  %v9653_v15 = vand.u32 4294901760, %v7859_v25  ;;  %v3242_v10 = vsub.f32 %v7864_v47, %v9654_v63  ;;  %v9660_v47 = vld [vmem:[#allocation71_spill] sm:$0xff] }
 0x1bf   :  { %5264 = vmatpush3.bf16.msra.mxu0 %v9647_v2  ;;  %v3221_v56 = vsub.f32 %v8259_v46, %v9648_v9  ;;  %v3096_v8 = vand.u32 4294901760, %v3095_v57  ;;  %v3865_v2 = vsel %vm243_vm7, 1.0, %v9651_v17  ;;  %v3116_v9 = vsub.f32 %v8280_v6, %v8983_v21 }
 0x1c0   :  { %5266 = vmatprep.subr.bf16.mxu0 %v9650_v44  ;;  %v3109_v4 = vsub.f32 %v8275_v30, %v9652_v3  ;;  %v3235_v57 = vsub.f32 %v7859_v25, %v9653_v15  ;;  %v9655_v44 = vld [vmem:[#allocation15_spill] sm:$0xff]  ;;  %v3229_v46 = vand.u32 4294901760, %v3228_v16  ;;  %v9656_v3 = vld [vmem:[#allocation69_spill] sm:$0xff]  ;;  %v8333_v30 = vsub.f32 %v3865_v2, %v3865_v2  ;;  %v3999_v15 = vpop.f32.mrb[2].mxu0  ;;  %v9659_v2 = vld [vmem:[#allocation70_spill] sm:$0xff] }
 0x1c1   :  { %5308 = vmatpush3.bf16.msra.mxu1 %v7793_v58  ;;  %v5345_v58 = vpack.c.bf16 %v3215_v40, %v3208_v13  ;;  %v3222_v20 = vand.u32 4294901760, %v3221_v56  ;;  %v9657_v21 = vand.u32 4294901760, %v7884_v33  ;;  %v5347_v25 = vpack.c.bf16 %v3103_v62, %v3096_v8 }
 0x1c2   :  { %5310 = vmatprep.subr.bf16.mxu1 %v7800_v0  ;;  %v9658_v17 = vand.u32 4294901760, %v7889_v42  ;;  %v3110_v0 = vand.u32 4294901760, %v3109_v4  ;;  %v3117_v13 = vand.u32 4294901760, %v3116_v9  ;;  %v3236_v40 = vand.u32 4294901760, %v3235_v57  ;;  %v9687_v57 = vld [vmem:[#allocation19_spill] sm:$0xff] }
 0x1c3   :  { %5268 = vmatpush3.bf16.msra.mxu0 %v9655_v44  ;;  %v3123_v6 = vsub.f32 %v7884_v33, %v9657_v21  ;;  %v4000_v44 = vpop.f32.mrb[3].mxu0  ;;  %v3243_v56 = vand.u32 4294901760, %v3242_v10  ;;  %v3077_v8 = vand.u32 4294901760, %v8333_v30  ;;  %v9661_v62 = vand.u32 4294901760, %v7904_v53 }
 0x1c4   :  { %5270 = vmatprep.subr.bf16.mxu0 %v9656_v3  ;;  %v3130_v63 = vsub.f32 %v7889_v42, %v9658_v17  ;;  %v4001_v16 = vadd.f32 %v4000_v44, %v3999_v15  ;;  %v5349_v3 = vpack.c.bf16 %v3229_v46, %v3222_v20  ;;  %v9666_v15 = vld [vmem:[#allocation53_spill] sm:$0xff] }
 0x1c5   :  { %5312 = vmatpush3.bf16.msra.mxu1 %v7822_v41  ;;  %v3124_v21 = vand.u32 4294901760, %v3123_v6  ;;  %v3249_v17 = vsub.f32 %v7904_v53, %v9661_v62  ;;  %v9662_v41 = vand.u32 4294901760, %v7909_v48  ;;  %v9665_v6 = vand.u32 4294901760, %v7920_v11 }
 0x1c6   :  { %5346 = vmatprep.subr.bf16.mxu1 %v5345_v58  ;;  %v872_v9 = vadd.f32 %v4001_v16, %v8164_v23  ;;  %v3131_v20 = vand.u32 4294901760, %v3130_v63  ;;  %v5351_v23 = vpack.c.bf16 %v3117_v13, %v3110_v0  ;;  %v5353_v58 = vpack.c.bf16 %v3243_v56, %v3236_v40 }
 0x1c7   :  { %5272 = vmatpush3.bf16.msra.mxu0 %v9659_v2  ;;  %v3256_v4 = vsub.f32 %v7909_v48, %v9662_v41  ;;  %v3144_v10 = vsub.f32 %v7920_v11, %v9665_v6  ;;  %v9667_v63 = vand.u32 4294901760, %v7933_v61  ;;  %v9668_v16 = vand.u32 4294901760, %v7938_v60 }
 0x1c8   :  { %5274 = vmatprep.subr.bf16.mxu0 %v9660_v47  ;;  %3890 = vmatmul.mubr.msk.f32.vlgmr.msra.gmra.mrb[16].mxu1 %vm240_vm1, %v9090_v14  ;;  %v9664_v47 = vand.u32 4294901760, %v7915_v19  ;;  %v8373_v62 = vadd.f32 %v4036_v39, %v872_v9  ;;  %v9670_v41 = vand.u32 4294901760, %v8176_v32  ;;  %v9671_v0 = vand.u32 4294901760, %v8178_v37 }
 0x1c9   :  { %5348 = vmatpush3.bf16.msra.mxu1 %v5347_v25  ;;  %3891 = vmatprep.mubr.msk.f32.mxu1 %vm243_vm7, %v9090_v14  ;;  %v3263_v44 = vsub.f32 %v7933_v61, %v9667_v63  ;;  %v3270_v2 = vsub.f32 %v7938_v60, %v9668_v16  ;;  %v9669_v25 = vld [vmem:[#allocation72_spill] sm:$0xff]  ;;  %v3078_v40 = vsub.f32 %v8333_v30, %v3077_v8  ;;  %v3250_v56 = vand.u32 4294901760, %v3249_v17 }
 0x1ca   :  { %v3137_v46 = vsub.f32 %v7915_v19, %v9664_v47  ;;  %5350 = vmatprep.subr.bf16.mxu1 %v5349_v3  ;;  %v8380_v13 = vpack.c.bf16 %v9671_v0, %v9670_v41  ;;  %v3257_v3 = vand.u32 4294901760, %v3256_v4  ;;  %v5355_v47 = vpack.c.bf16 %v3131_v20, %v3124_v21  ;;  %v9676_v21 = vld [vmem:[#allocation79_spill] sm:$0xff] }
 0x1cb   :  { %5276 = vmatpush3.bf16.msra.mxu0 %v9666_v15  ;;  %v3145_v15 = vand.u32 4294901760, %v3144_v10  ;;  %v9672_v39 = vand.u32 4294901760, %v7944_v31  ;;  %v9673_v32 = vand.u32 4294901760, %v7949_v54  ;;  %v9674_v63 = vand.u32 4294901760, %v8040_v43 }
 0x1cc   :  { %5278 = vmatprep.subr.bf16.mxu0 %v9669_v25  ;;  %v3138_v6 = vand.u32 4294901760, %v3137_v46  ;;  %v9675_v25 = vand.u32 4294901760, %v8045_v28  ;;  %v9677_v4 = vand.u32 4294901760, %v8187_v26  ;;  %v9678_v20 = vand.u32 4294901760, %v8189_v36 }
 0x1cd   :  { %5352 = vmatpush3.bf16.msra.mxu1 %v5351_v23  ;;  %v3151_v9 = vsub.f32 %v7944_v31, %v9672_v39  ;;  %v3158_v37 = vsub.f32 %v7949_v54, %v9673_v32  ;;  %v3277_v16 = vsub.f32 %v8040_v43, %v9674_v63  ;;  %v3264_v10 = vand.u32 4294901760, %v3263_v44 }
 0x1ce   :  { %v3284_v17 = vsub.f32 %v8045_v28, %v9675_v25  ;;  %5354 = vmatprep.subr.bf16.mxu1 %v5353_v58  ;;  %v8402_v46 = vpack.c.bf16 %v9678_v20, %v9677_v4  ;;  %v3271_v23 = vand.u32 4294901760, %v3270_v2  ;;  %v3079_v41 = vand.u32 4294901760, %v3078_v40 }
 0x1cf   :  { %5280 = vmatpush3.bf16.msra.mxu0 %v9676_v21  ;;  %v5357_v0 = vpack.c.bf16 %v3257_v3, %v3250_v56  ;;  %v9679_v39 = vand.u32 4294901760, %v8202_v45  ;;  %v9680_v32 = vand.u32 4294901760, %v8204_v22  ;;  %v5359_v25 = vpack.c.bf16 %v3145_v15, %v3138_v6 }
 0x1d0   :  { %5314 = vmatprep.subr.bf16.mxu0 %v8380_v13  ;;  %v9681_v58 = vand.u32 4294901760, %v8230_v27  ;;  %v9682_v26 = vand.u32 4294901760, %v8232_v38  ;;  %v9683_v44 = vand.u32 4294901760, %v8054_v18  ;;  %v9684_v40 = vand.u32 4294901760, %v8068_v51 }
 0x1d1   :  { %v8409_v63 = vpack.c.bf16 %v9680_v32, %v9679_v39  ;;  %5356 = vmatpush3.bf16.msra.mxu1 %v5355_v47  ;;  %v3152_v45 = vand.u32 4294901760, %v3151_v9  ;;  %v3159_v22 = vand.u32 4294901760, %v3158_v37  ;;  %v3278_v27 = vand.u32 4294901760, %v3277_v16  ;;  %v9689_v9 = vld [vmem:[#allocation14_spill] sm:$0xff] }
 0x1d2   :  { %v8415_v36 = vpack.c.bf16 %v9682_v26, %v9681_v58  ;;  %v3165_v2 = vsub.f32 %v8054_v18, %v9683_v44  ;;  %v3172_v56 = vsub.f32 %v8068_v51, %v9684_v40  ;;  %3888 = vmatmul.mubr.msk.f32.vlgmr.msra.gmra.mrb[16].mxu0 %vm240_vm1, %v9090_v14  ;;  %v3285_v38 = vand.u32 4294901760, %v3284_v17  ;;  %5358 = vmatprep.subr.bf16.mxu1 %v5357_v0 }
 0x1d3   :  { %5316 = vmatpush3.bf16.msra.mxu0 %v8402_v46  ;;  %3080 = vmatprep.mubr.f32.mxu0 %v3079_v41  ;;  %v5361_v3 = vpack.c.bf16 %v3271_v23, %v3264_v10  ;;  %v9685_v6 = vand.u32 4294901760, %v8073_v34  ;;  %v9686_v21 = vand.u32 4294901760, %v8078_v49  ;;  %v9688_v47 = vand.u32 4294901760, %v9687_v57 }
 0x1d4   :  { %5318 = vmatprep.subr.bf16.mxu0 %v8409_v63  ;;  %v9690_v37 = vand.u32 4294901760, %v9689_v9  ;;  %v9691_v17 = vand.u32 4294901760, %v7829_v5  ;;  %v9692_v20 = vand.u32 4294901760, %v7831_v7  ;;  %v3166_v23 = vand.u32 4294901760, %v3165_v2 }
 0x1d5   :  { %v3291_v15 = vsub.f32 %v8073_v34, %v9685_v6  ;;  %v3298_v4 = vsub.f32 %v8078_v49, %v9686_v21  ;;  %v3173_v41 = vand.u32 4294901760, %v3172_v56  ;;  %v222_v39 = vsub.s32 6, %v9635_v50  ;;  %5360 = vmatpush3.bf16.msra.mxu1 %v5359_v25 }
 0x1d6   :  { %v8439_v16 = vpack.c.bf16 %v9690_v37, %v9688_v47  ;;  %v8445_v10 = vpack.c.bf16 %v9692_v20, %v9691_v17  ;;  %v5363_v0 = vpack.c.bf16 %v3159_v22, %v3152_v45  ;;  %v5365_v32 = vpack.c.bf16 %v3285_v38, %v3278_v27  ;;  %5362 = vmatprep.subr.bf16.mxu1 %v5361_v3  ;;  %v9697_v45 = vld [vmem:[#allocation25_spill] sm:$0xff]  ;;  %v9699_v27 = vld [vmem:[#allocation20_spill] sm:$0xff]  ;;  %v5528_v3 = vld [vmem:[%s8689_s2] sm:$0xff]  ;;  %s5589_s2 = smov [#allocation5]  }
 0x1d7   :  { %v9693_v58 = vand.u32 4294901760, %v8083_v59  ;;  %v9694_v44 = vand.u32 4294901760, %v8088_v35  ;;  %5320 = vmatpush3.bf16.msra.mxu0 %v8415_v36  ;;  %v3292_v5 = vand.u32 4294901760, %v3291_v15  ;;  %v3299_v7 = vand.u32 4294901760, %v3298_v4  ;;  %v9703_v20 = vld [vmem:[#allocation32_spill] sm:$0xff]  ;;  %s3849_s20 = sshll.u32 %s5589_s2, 4  ;;  %s3850_s20 = int_to_ptr.vmem [resolvable:$true] %s3849_s20 }
 0x1d8   :  { %v9695_v2 = vand.u32 4294901760, %v8093_v29  ;;  %v9696_v25 = vand.u32 4294901760, %v8098_v1  ;;  %5322 = vmatprep.subr.bf16.mxu0 %v8439_v16  ;;  %v9698_v22 = vand.u32 4294901760, %v9697_v45  ;;  %v9700_v38 = vand.u32 4294901760, %v9699_v27  ;;  %v9709_v45 = vld [vmem:[#allocation54_spill] sm:$0xff]  ;;  %s5551_s21 = scalar_lea.vmem %s3850_s20, 128  ;;  %p5556_p9 = scmp.lt.s32.totalorder %s3850_s20, %s3850_s20 }
 0x1d9   :  { %v3179_v26 = vsub.f32 %v8083_v59, %v9693_v58  ;;  %v3186_v40 = vsub.f32 %v8088_v35, %v9694_v44  ;;  %v5367_v21 = vpack.c.bf16 %v3173_v41, %v3166_v23  ;;  %v8471_v15 = vrot.slane %v5528_v3, %v222_v39  ;;  %5364 = vmatpush3.bf16.msra.mxu1 %v5363_v0  ;;  %v9705_v41 = vld [vmem:[#allocation29_spill] sm:$0xff]  ;;  %p5552_p8 = scmp.ne.s32.totalorder %s3850_s20, %s5551_s21  ;;  %p5557_p10 = scmp.lt.s32.totalorder %s5551_s21, %s5551_s21 }
 0x1da   :  { %v3305_v50 = vsub.f32 %v8093_v29, %v9695_v2  ;;  %v3312_v56 = vsub.f32 %v8098_v1, %v9696_v25  ;;  %v8466_v6 = vpack.c.bf16 %v9700_v38, %v9698_v22  ;;  %v9701_v47 = vand.u32 4294901760, %v8112_v52  ;;  %5366 = vmatprep.subr.bf16.mxu1 %v5365_v32  ;;  %v9707_v2 = vld [vmem:[#allocation39_spill] sm:$0xff] }
 0x1db   :  { %v3180_v4 = vand.u32 4294901760, %v3179_v26  ;;  %v3187_v57 = vand.u32 4294901760, %v3186_v40  ;;  %v9702_v37 = vand.u32 4294901760, %v8117_v55  ;;  %5324 = vmatpush3.bf16.msra.mxu0 %v8445_v10  ;;  %v9704_v23 = vand.u32 4294901760, %v9703_v20  ;;  %v4104_v40 = vpop.f32.mrb[4].mxu1  ;;  %p5558_p11 = por %p5557_p10, %p5556_p9 }
 0x1dc   :  { %v3193_v9 = vsub.f32 %v8112_v52, %v9701_v47  ;;  %v9706_v58 = vand.u32 4294901760, %v9705_v41  ;;  %v5369_v0 = vpack.c.bf16 %v3299_v7, %v3292_v5  ;;  %v3306_v26 = vand.u32 4294901760, %v3305_v50  ;;  %5326 = vmatprep.subr.bf16.mxu0 %v8466_v6  ;;  %v4105_v38 = vpop.f32.mrb[5].mxu1  ;;  %v9711_v7 = vld [vmem:[#allocation46_spill] sm:$0xff]  ;;  %v9715_v41 = vld [vmem:[#allocation51_spill] sm:$0xff] }
 0x1dd   :  { %v3200_v17 = vsub.f32 %v8117_v55, %v9702_v37  ;;  %v3313_v44 = vand.u32 4294901760, %v3312_v56  ;;  %v9708_v25 = vand.u32 4294901760, %v9707_v2  ;;  %v9710_v22 = vand.u32 4294901760, %v9709_v45  ;;  %5368 = vmatpush3.bf16.msra.mxu1 %v5367_v21  ;;  %v9713_v56 = vld [vmem:[#allocation40_spill] sm:$0xff]  ;;  %v9717_v2 = vld [vmem:[#allocation26_spill] sm:$0xff]  ;;  %p5559_p12 = pnand %p5558_p11, %p5552_p8 }
 0x1de   :  { %v8484_v39 = vpack.c.bf16 %v9706_v58, %v9704_v23  ;;  %vm242_vm8 = vcmp.eq.f32.partialorder %v9596_v24, %v8471_v15  ;;  %v4106_v32 = vadd.f32 %v4105_v38, %v4104_v40  ;;  %v5371_v3 = vpack.c.bf16 %v3187_v57, %v3180_v4  ;;  %5370 = vmatprep.subr.bf16.mxu1 %v5369_v0 }
 0x1df   :  { %v8491_v27 = vpack.c.bf16 %v9710_v22, %v9708_v25  ;;  %v3194_v47 = vand.u32 4294901760, %v3193_v9  ;;  %v3201_v5 = vand.u32 4294901760, %v3200_v17  ;;  %v9712_v50 = vand.u32 4294901760, %v9711_v7  ;;  %v9720_v17 = vld [vmem:[#allocation27_spill] sm:$0xff]  ;;  %v9726_v7 = vld [vmem:[#allocation60_spill] sm:$0xff] }
 0x1e0   :  { %5328 = vmatpush3.bf16.msra.mxu0 %v8484_v39  ;;  %v9714_v37 = vand.u32 4294901760, %v9713_v56  ;;  %v5373_v23 = vpack.c.bf16 %v3313_v44, %v3306_v26  ;;  %v9716_v58 = vand.u32 4294901760, %v9715_v41  ;;  %v9718_v40 = vand.u32 4294901760, %v9717_v2  ;;  %v9722_v26 = vld [vmem:[#allocation33_spill] sm:$0xff]  ;;  %v9724_v22 = vld [vmem:[#allocation47_spill] sm:$0xff] }
 0x1e1   :  { %5330 = vmatprep.subr.bf16.mxu0 %v8491_v27  ;;  %v9719_v4 = vmov 0.0   ;;  %5372 = vmatpush3.bf16.msra.mxu1 %v5371_v3  ;;  %v5375_v9 = vpack.c.bf16 %v3201_v5, %v3194_v47  ;;  %v9721_v0 = vand.u32 4294901760, %v9720_v17  ;;  %v9723_v44 = vand.u32 4294901760, %v9722_v26  ;;  %v4069_v3 = vpop.f32.mrb[4].mxu0  ;;  %v9730_v41 = vld [vmem:[#allocation9_spill] sm:$0xff] }
 0x1e2   :  { %v8500_v20 = vpack.c.bf16 %v9714_v37, %v9712_v50  ;;  %v8507_v21 = vpack.c.bf16 %v9718_v40, %v9716_v58  ;;  %v3864_v57 = vsel %vm242_vm8, 1.0, %v9719_v4  ;;  %5374 = vmatprep.subr.bf16.mxu1 %v5373_v23  ;;  %v9725_v38 = vand.u32 4294901760, %v9724_v22  ;;  %v4070_v47 = vpop.f32.mrb[5].mxu0  ;;  %v9728_v37 = vld [vmem:[#allocation8_spill] sm:$0xff]  ;;  %v9732_v40 = vld [vmem:[#allocation10_spill] sm:$0xff] }
 0x1e3   :  { %v8518_v25 = vpack.c.bf16 %v9723_v44, %v9721_v0  ;;  %v8521_v45 = vsub.f32 %v3864_v57, %v3864_v57  ;;  %v9727_v50 = vand.u32 4294901760, %v9726_v7  ;;  %v4071_v5 = vadd.f32 %v4070_v47, %v4069_v3  ;;  %v9734_v57 = vld [vmem:[#allocation11_spill] sm:$0xff]  ;;  %v9736_v44 = vld [vmem:[#allocation36_spill] sm:$0xff] }
 0x1e4   :  { %5332 = vmatpush3.bf16.msra.mxu0 %v8500_v20  ;;  %v9729_v23 = vand.u32 4294901760, %v9728_v37  ;;  %v9731_v58 = vand.u32 4294901760, %v9730_v41  ;;  %v9733_v4 = vand.u32 4294901760, %v9732_v40  ;;  %v9735_v17 = vand.u32 4294901760, %v9734_v57  ;;  %v9740_v47 = vld [vmem:[#allocation63_spill] sm:$0xff]  ;;  %v9742_v37 = vld [vmem:[#allocation34_spill] sm:$0xff] }
 0x1e5   :  { %5334 = vmatprep.subr.bf16.mxu0 %v8507_v21  ;;  %v8527_v56 = vpack.c.bf16 %v9727_v50, %v9725_v38  ;;  %5376 = vmatpush3.bf16.msra.mxu1 %v5375_v9  ;;  %v3083_v9 = vand.u32 4294901760, %v8521_v45  ;;  %v1148_v26 = vadd.f32 %v4071_v5, %v8373_v62  ;;  %v9737_v22 = vand.u32 4294901760, %v9736_v44  ;;  %v9738_v38 = vld [vmem:[#allocation37_spill] sm:$0xff]  ;;  %v9741_v5 = vld [vmem:[#allocation64_spill] sm:$0xff]  ;;  %v9745_v40 = vld [vmem:[#allocation35_spill] sm:$0xff] }
 0x1e6   :  { %5410 = vmatprep.subr.bf16.mxu1 %v8380_v13  ;;  %v8535_v2 = vpack.c.bf16 %v9731_v58, %v9729_v23  ;;  %v8542_v0 = vpack.c.bf16 %v9735_v17, %v9733_v4  ;;  %v9739_v7 = vand.u32 4294901760, %v9738_v38  ;;  %v9743_v23 = vld [vmem:[#allocation68_spill] sm:$0xff]  ;;  %v9746_v57 = vld [vmem:[#allocation30_spill] sm:$0xff]  ;;  %v9748_v44 = vld [vmem:[#allocation23_spill] sm:$0xff] }
 0x1e7   :  { %v1252_v62 = vadd.f32 %v4106_v32, %v1148_v26  ;;  %v3084_v3 = vsub.f32 %v8521_v45, %v3083_v9  ;;  %v5379_v41 = vpack.c.bf16 %v9743_v23, %v9742_v37  ;;  %v9744_v32 = vld [vmem:[#allocation31_spill] sm:$0xff]  ;;  %v9747_v17 = vld [vmem:[#allocation78_spill] sm:$0xff] }
 0x1e8   :  { %5336 = vmatpush3.bf16.msra.mxu0 %v8518_v25  ;;  %3892 = vmatmul.mubr.msk.f32.vlgmr.msra.gmra.mrb[18].mxu1 %vm242_vm8, %v9090_v14  ;;  %v8559_v50 = vpack.c.bf16 %v9739_v7, %v9737_v22  ;;  %v5381_v4 = vpack.c.bf16 %v9745_v40, %v9744_v32  ;;  %v5383_v26 = vpack.c.bf16 %v9747_v17, %v9746_v57  ;;  %v9749_v22 = vld [vmem:[#allocation44_spill] sm:$0xff] }
 0x1e9   :  { %5338 = vmatprep.subr.bf16.mxu0 %v8527_v56  ;;  %5412 = vmatpush3.bf16.msra.mxu1 %v8402_v46  ;;  %v3085_v58 = vand.u32 4294901760, %v3084_v3  ;;  %v5385_v38 = vpack.c.bf16 %v9749_v22, %v9748_v44  ;;  %v5387_v7 = vpack.c.bf16 %v7889_v42, %v7884_v33  ;;  %v5391_v3 = vpack.c.bf16 %v7920_v11, %v7915_v19 }
 0x1ea   :  { %3560 = vmatprep.mubr.f32.mxu1 %v3077_v8  ;;  %5414 = vmatprep.subr.bf16.mxu1 %v8409_v63  ;;  %v5377_v8 = vpack.c.bf16 %v9741_v5, %v9740_v47  ;;  %v5395_v33 = vpack.c.bf16 %v7949_v54, %v7944_v31  ;;  %v5397_v42 = vpack.c.bf16 %v8045_v28, %v8040_v43  ;;  %v9750_v43 = vand.u32 4294901760, %v9740_v47  ;;  %v9766_v47 = vld [vmem:[#allocation50_spill] sm:$0xff] }
 0x1eb   :  { %v9751_v28 = vand.u32 4294901760, %v9741_v5  ;;  %v9768_v5 = vld [vmem:[#allocation61_spill] sm:$0xff] }
 0x1ec   :  { %5340 = vmatpush3.bf16.msra.mxu0 %v8535_v2 }
 0x1ed   :  { %5342 = vmatprep.subr.bf16.mxu0 %v8542_v0  ;;  %5416 = vmatpush3.bf16.msra.mxu1 %v8415_v36 }
 0x1ee   :  { %5418 = vmatprep.subr.bf16.mxu1 %v8439_v16 }
 0x1f0   :  { %5344 = vmatpush3.bf16.msra.mxu0 %v8559_v50 }
 0x1f1   :  { %5378 = vmatprep.subr.bf16.mxu0 %v5377_v8  ;;  %5420 = vmatpush3.bf16.msra.mxu1 %v8445_v10  ;;  %v4174_v8 = vpop.f32.mrb[6].mxu1 }
 0x1f2   :  { %5422 = vmatprep.subr.bf16.mxu1 %v8466_v6 }
 0x1f3   :  { %3086 = vmatmul.mubr.f32.vlgmr.msra.gmra.mrb[18].mxu0 %v3085_v58  ;;  %v4175_v58 = vpop.f32.mrb[7].mxu1 }
 0x1f4   :  { %5380 = vmatpush3.bf16.msra.mxu0 %v5379_v41  ;;  %3453 = vmatprep.mubr.f32.mxu0 %v8333_v30  ;;  %v5389_v30 = vpack.c.bf16 %v7909_v48, %v7904_v53  ;;  %v5393_v41 = vpack.c.bf16 %v7938_v60, %v7933_v61  ;;  %v5399_v53 = vpack.c.bf16 %v8068_v51, %v8054_v18 }
 0x1f5   :  { %5382 = vmatprep.subr.bf16.mxu0 %v5381_v4  ;;  %5424 = vmatpush3.bf16.msra.mxu1 %v8484_v39  ;;  %v4176_v4 = vadd.f32 %v4175_v58, %v4174_v8  ;;  %v5401_v48 = vpack.c.bf16 %v8078_v49, %v8073_v34  ;;  %v5403_v61 = vpack.c.bf16 %v8088_v35, %v8083_v59  ;;  %v9752_v34 = vand.u32 4294901760, %v9742_v37  ;;  %v9769_v37 = vld [vmem:[#allocation62_spill] sm:$0xff] }
 0x1f6   :  { %5426 = vmatprep.subr.bf16.mxu1 %v8491_v27  ;;  %v5405_v60 = vpack.c.bf16 %v8098_v1, %v8093_v29  ;;  %v5407_v49 = vpack.c.bf16 %v8117_v55, %v8112_v52  ;;  %v5441_v18 = vpack.c.bf16 %v9751_v28, %v9750_v43  ;;  %v9753_v59 = vand.u32 4294901760, %v9743_v23 }
 0x1f7   :  { %v9754_v52 = vand.u32 4294901760, %v9744_v32  ;;  %v9755_v29 = vand.u32 4294901760, %v9745_v40  ;;  %v9756_v55 = vand.u32 4294901760, %v9746_v57 }
 0x1f8   :  { %5384 = vmatpush3.bf16.msra.mxu0 %v5383_v26  ;;  %v5443_v35 = vpack.c.bf16 %v9753_v59, %v9752_v34 }
 0x1f9   :  { %5386 = vmatprep.subr.bf16.mxu0 %v5385_v38  ;;  %5428 = vmatpush3.bf16.msra.mxu1 %v8500_v20  ;;  %v5445_v1 = vpack.c.bf16 %v9755_v29, %v9754_v52 }
 0x1fa   :  { %5430 = vmatprep.subr.bf16.mxu1 %v8507_v21 }
 0x1fb   :  { %v4139_v19 = vpop.f32.mrb[6].mxu0 }
 0x1fc   :  { %5388 = vmatpush3.bf16.msra.mxu0 %v5387_v7  ;;  %v4140_v11 = vpop.f32.mrb[7].mxu0 }
 0x1fd   :  { %5390 = vmatprep.subr.bf16.mxu0 %v5389_v30  ;;  %5432 = vmatpush3.bf16.msra.mxu1 %v8518_v25  ;;  %v4141_v54 = vadd.f32 %v4140_v11, %v4139_v19 }
 0x1fe   :  { %5434 = vmatprep.subr.bf16.mxu1 %v8527_v56 }
 0x1ff   :  { %v1364_v31 = vadd.f32 %v4141_v54, %v1252_v62 }
 0x200   :  { %5392 = vmatpush3.bf16.msra.mxu0 %v5391_v3 }
 0x201   :  { %5394 = vmatprep.subr.bf16.mxu0 %v5393_v41  ;;  %5436 = vmatpush3.bf16.msra.mxu1 %v8535_v2  ;;  %v1596_v51 = vadd.f32 %v4176_v4, %v1364_v31 }
 0x202   :  { %5438 = vmatprep.subr.bf16.mxu1 %v8542_v0 }
 0x204   :  { %5396 = vmatpush3.bf16.msra.mxu0 %v5395_v33 }
 0x205   :  { %5398 = vmatprep.subr.bf16.mxu0 %v5397_v42  ;;  %5440 = vmatpush3.bf16.msra.mxu1 %v8559_v50 }
 0x206   :  { %5474 = vmatprep.subr.bf16.mxu1 %v8380_v13  ;;  %v9757_v13 = vand.u32 4294901760, %v9747_v17 }
 0x208   :  { %5400 = vmatpush3.bf16.msra.mxu0 %v5399_v53  ;;  %3564 = vmatmul.mubr.f32.vlgmr.msra.gmra.mrb[20].mxu1 %v3083_v9 }
 0x209   :  { %5402 = vmatprep.subr.bf16.mxu0 %v5401_v48  ;;  %5476 = vmatpush3.bf16.msra.mxu1 %v8402_v46  ;;  %v5447_v46 = vpack.c.bf16 %v9757_v13, %v9756_v55 }
 0x20a   :  { %3895 = vmatprep.mubr.msk.f32.mxu1 %vm243_vm7, %v9090_v14  ;;  %5478 = vmatprep.subr.bf16.mxu1 %v8409_v63  ;;  %v9758_v63 = vld [vmem:[#allocation48_spill] sm:$0xff] }
 0x20c   :  { %5404 = vmatpush3.bf16.msra.mxu0 %v5403_v61 }
 0x20d   :  { %5406 = vmatprep.subr.bf16.mxu0 %v5405_v60  ;;  %5480 = vmatpush3.bf16.msra.mxu1 %v8415_v36  ;;  %v9759_v36 = vld [vmem:[#allocation21_spill] sm:$0xff] }
 0x20e   :  { %5482 = vmatprep.subr.bf16.mxu1 %v8439_v16  ;;  %v9760_v16 = vld [vmem:[#allocation12_spill] sm:$0xff] }
 0x210   :  { %5408 = vmatpush3.bf16.msra.mxu0 %v5407_v49 }
 0x211   :  { %5442 = vmatprep.subr.bf16.mxu0 %v5441_v18  ;;  %5484 = vmatpush3.bf16.msra.mxu1 %v8445_v10 }
 0x212   :  { %5486 = vmatprep.subr.bf16.mxu1 %v8466_v6  ;;  %v9761_v6 = vld [vmem:[#allocation38_spill] sm:$0xff] }
 0x213   :  { %3456 = vmatmul.mubr.f32.vlgmr.msra.gmra.mrb[20].mxu0 %v8521_v45  ;;  %v4244_v12 = vpop.f32.mrb[8].mxu1 }
 0x214   :  { %5444 = vmatpush3.bf16.msra.mxu0 %v5443_v35  ;;  %3893 = vmatprep.mubr.msk.f32.mxu0 %vm243_vm7, %v9090_v14  ;;  %v4245_v10 = vpop.f32.mrb[9].mxu1 }
 0x215   :  { %5446 = vmatprep.subr.bf16.mxu0 %v5445_v1  ;;  %5488 = vmatpush3.bf16.msra.mxu1 %v8484_v39  ;;  %v4246_v45 = vadd.f32 %v4245_v10, %v4244_v12  ;;  %v9762_v39 = vld [vmem:[#allocation41_spill] sm:$0xff] }
 0x216   :  { %5490 = vmatprep.subr.bf16.mxu1 %v8491_v27  ;;  %v9763_v27 = vld [vmem:[#allocation42_spill] sm:$0xff] }
 0x218   :  { %5448 = vmatpush3.bf16.msra.mxu0 %v5447_v46 }
 0x219   :  { %5450 = vmatprep.subr.bf16.mxu0 %v9758_v63  ;;  %5492 = vmatpush3.bf16.msra.mxu1 %v8500_v20  ;;  %v9764_v20 = vld [vmem:[#allocation45_spill] sm:$0xff] }
 0x21a   :  { %5494 = vmatprep.subr.bf16.mxu1 %v8507_v21 }
 0x21c   :  { %5452 = vmatpush3.bf16.msra.mxu0 %v9759_v36  ;;  %v4209_v21 = vpop.f32.mrb[8].mxu0 }
 0x21d   :  { %5454 = vmatprep.subr.bf16.mxu0 %v9760_v16  ;;  %5496 = vmatpush3.bf16.msra.mxu1 %v8518_v25  ;;  %v4210_v9 = vpop.f32.mrb[9].mxu0  ;;  %v9765_v25 = vld [vmem:[#allocation49_spill] sm:$0xff] }
 0x21e   :  { %5498 = vmatprep.subr.bf16.mxu1 %v8527_v56  ;;  %v4211_v62 = vadd.f32 %v4210_v9, %v4209_v21 }
 0x220   :  { %5456 = vmatpush3.bf16.msra.mxu0 %v9761_v6  ;;  %v1734_v56 = vadd.f32 %v4211_v62, %v1596_v51 }
 0x221   :  { %5458 = vmatprep.subr.bf16.mxu0 %v9762_v39  ;;  %5500 = vmatpush3.bf16.msra.mxu1 %v8535_v2  ;;  %v9767_v2 = vld [vmem:[#allocation52_spill] sm:$0xff] }
 0x222   :  { %5502 = vmatprep.subr.bf16.mxu1 %v8542_v0  ;;  %v1842_v0 = vadd.f32 %v4246_v45, %v1734_v56 }
 0x224   :  { %5460 = vmatpush3.bf16.msra.mxu0 %v9763_v27 }
 0x225   :  { %5462 = vmatprep.subr.bf16.mxu0 %v9764_v20  ;;  %5504 = vmatpush3.bf16.msra.mxu1 %v8559_v50 }
 0x228   :  { %5464 = vmatpush3.bf16.msra.mxu0 %v9765_v25  ;;  %3896 = vmatmul.mubr.msk.f32.vlgmr.msra.gmra.mrb[22].mxu1 %vm242_vm8, %v9090_v14 }
 0x229   :  { %5466 = vmatprep.subr.bf16.mxu0 %v9766_v47 }
 0x22c   :  { %5468 = vmatpush3.bf16.msra.mxu0 %v9767_v2 }
 0x22d   :  { %5470 = vmatprep.subr.bf16.mxu0 %v9768_v5 }
 0x230   :  { %5472 = vmatpush3.bf16.msra.mxu0 %v9769_v37 }
 0x233   :  { %3894 = vmatmul.mubr.msk.f32.vlgmr.msra.gmra.mrb[22].mxu0 %vm242_vm8, %v9090_v14  ;;  %v4314_v50 = vpop.f32.mrb[10].mxu1 }
 0x234   :  { %v4315_v23 = vpop.f32.mrb[11].mxu1 }
 0x235   :  { %v4316_v32 = vadd.f32 %v4315_v23, %v4314_v50 }
 0x23d   :  { %v4279_v40 = vpop.f32.mrb[10].mxu0 }
 0x23e   :  { %v4280_v57 = vpop.f32.mrb[11].mxu0 }
 0x23f   :  { %v4281_v17 = vadd.f32 %v4280_v57, %v4279_v40 }
 0x241   :  { %v2010_v26 = vadd.f32 %v4281_v17, %v1842_v0 }
 0x243   :  { %v2114_v44 = vadd.f32 %v4316_v32, %v2010_v26 }
 0x258   :  { %v4384_v22 = vpop.f32.mrb[12].mxu1 }
 0x259   :  { %v4385_v38 = vpop.f32.mrb[13].mxu1 }
 0x25a   :  { %v4386_v7 = vadd.f32 %v4385_v38, %v4384_v22 }
 0x263   :  { %v4349_v30 = vpop.f32.mrb[12].mxu0 }
 0x264   :  { %v4350_v3 = vpop.f32.mrb[13].mxu0 }
 0x265   :  { %v4351_v8 = vadd.f32 %v4350_v3, %v4349_v30 }
 0x267   :  { %v2226_v41 = vadd.f32 %v4351_v8, %v2114_v44 }
 0x269   :  { %v2458_v58 = vadd.f32 %v4386_v7, %v2226_v41 }
 0x27a   :  { %v4454_v4 = vpop.f32.mrb[14].mxu1 }
 0x27b   :  { %v4455_v33 = vpop.f32.mrb[15].mxu1 }
 0x27c   :  { %v4456_v24 = vadd.f32 %v4455_v33, %v4454_v4 }
 0x283   :  { %v4419_v14 = vpop.f32.mrb[14].mxu0 }
 0x284   :  { %v4420_v15 = vpop.f32.mrb[15].mxu0 }
 0x285   :  { %v4421_v42 = vadd.f32 %v4420_v15, %v4419_v14 }
 0x287   :  { %v2596_v53 = vadd.f32 %v4421_v42, %v2458_v58 }
 0x289   :  { %v2704_v48 = vadd.f32 %v4456_v24, %v2596_v53 }
 0x29b   :  { %v4524_v19 = vpop.f32.mrb[16].mxu1 }
 0x29c   :  { %v4525_v11 = vpop.f32.mrb[17].mxu1 }
 0x29d   :  { %v4526_v54 = vadd.f32 %v4525_v11, %v4524_v19 }
 0x2a5   :  { %v4489_v61 = vpop.f32.mrb[16].mxu0 }
 0x2a6   :  { %v4490_v60 = vpop.f32.mrb[17].mxu0 }
 0x2a7   :  { %v4491_v31 = vadd.f32 %v4490_v60, %v4489_v61 }
 0x2a9   :  { %v2872_v49 = vadd.f32 %v4491_v31, %v2704_v48 }
 0x2ab   :  { %v2976_v51 = vadd.f32 %v4526_v54, %v2872_v49 }
 0x2bb   :  { %v4594_v43 = vpop.f32.mrb[18].mxu1 }
 0x2bc   :  { %v4595_v28 = vpop.f32.mrb[19].mxu1 }
 0x2bd   :  { %v4596_v18 = vadd.f32 %v4595_v28, %v4594_v43 }
 0x2c6   :  { %v4559_v34 = vpop.f32.mrb[18].mxu0 }
 0x2c7   :  { %v4560_v59 = vpop.f32.mrb[19].mxu0 }
 0x2c8   :  { %v4561_v35 = vadd.f32 %v4560_v59, %v4559_v34 }
 0x2ca   :  { %v3088_v52 = vadd.f32 %v4561_v35, %v2976_v51 }
 0x2cc   :  { %v3320_v29 = vadd.f32 %v4596_v18, %v3088_v52 }
 0x2db   :  { %v4664_v1 = vpop.f32.mrb[20].mxu1 }
 0x2dc   :  { %v4665_v55 = vpop.f32.mrb[21].mxu1 }
 0x2dd   :  { %v4666_v13 = vadd.f32 %v4665_v55, %v4664_v1 }
 0x2e6   :  { %v4629_v46 = vpop.f32.mrb[20].mxu0 }
 0x2e7   :  { %v4630_v63 = vpop.f32.mrb[21].mxu0 }
 0x2e8   :  { %v4631_v36 = vadd.f32 %v4630_v63, %v4629_v46 }
 0x2ea   :  { %v3458_v12 = vadd.f32 %v4631_v36, %v3320_v29 }
 0x2ec   :  { %v3566_v16 = vadd.f32 %v4666_v13, %v3458_v12 }
 0x2fb   :  { %v4734_v10 = vpop.f32.mrb[22].mxu1 }
 0x2fc   :  { %v4735_v45 = vpop.f32.mrb[23].mxu1 }
 0x2fd   :  { %v4736_v6 = vadd.f32 %v4735_v45, %v4734_v10 }
 0x306   :  { %v4699_v39 = vpop.f32.mrb[22].mxu0 }
 0x307   :  { %v4700_v27 = vpop.f32.mrb[23].mxu0 }
 0x308   :  { %v4701_v20 = vadd.f32 %v4700_v27, %v4699_v39 }
 0x30a   :  { %v3734_v21 = vadd.f32 %v4701_v20, %v3566_v16 }
 0x30c   :  { %v3838_v9 = vadd.f32 %v4736_v6, %v3734_v21 }
 0x30e   :  { %3842 = vst.msk [vmem:[#allocation5] sm:$0xff] %vm3841_vm9, %v3838_v9 }
 0x30f   :  { %5562 = shalt.err (!%p5559_p12)
}
 0x310   :  { %s5563_s24 = scalar_lea.hbm %s8693_s6, 128 }
 0x311   :  { %p5564_p13 = scmp.ne.s32.totalorder %s8693_s6, %s5563_s24  ;;  %p5567_p0 = scmp.lt.u32.totalorder %s5563_s24, %s8693_s6 }
 0x313   :  { %p5569_p1 = pnand %p5567_p0, %p5564_p13 }
 0x315   :  { %5572 = shalt.err (!%p5569_p1)
}
 0x316   :  { %3852 = dma.vmem_to_hbm [thread:$0]  %s3850_s20, 128, %s8693_s6, [#allocation4]  }
 0x317   :  { %5575 = dma.done.wait [#allocation4], 128  }
 0x318   :  { %5576 = vsyncadd [#allocation4], 4294967168 }
 0x319   :  { %3856 = vsyncpa [#allocation3], 1 }
 0x31a   :  { %3857 = vsyncpa [#allocation4], 1 }

</bundles_post_ra>
